<compile_context>
chip_gen: v5e
topology: v5e:2x2
jax: 0.10.0
libtpu: 0.0.40
codegen_flags: <defaults>
</compile_context>

<pallas_src>
import functools

import jax
import jax.numpy as jnp
from jax.experimental import pallas as pl
from jax.experimental.pallas import tpu as pltpu

C = 32     # channels per stream (inp = oup = 32)
HID = 64   # hidden_dim = inp * expand_ratio = 32 * 2


def _relu6(x):
    return jnp.minimum(jnp.maximum(x, 0.0), 6.0)


def _dwconv3x3_reflect(x, k):
    """Depthwise 3x3 conv with ReflectionPad2d(1).

    x: (H, W, CH) float32, k: (3, 3, CH) float32.
    out[i, j] = sum_{r,c} k[r, c] * x[reflect(i + r - 1), reflect(j + c - 1)]
    """
    H, W, _ = x.shape
    col = jax.lax.broadcasted_iota(jnp.int32, (1, W, 1), 1)
    # Column (sublane) neighbours via XLU rotate + boundary masks (reflection).
    up1 = pltpu.roll(x, 1, axis=1)        # [:, j] = x[:, (j - 1) % W]
    dn1 = pltpu.roll(x, W - 1, axis=1)    # [:, j] = x[:, (j + 1) % W]
    left = jnp.where(col == 0, dn1, up1)       # x[:, reflect(j - 1)]
    right = jnp.where(col == W - 1, up1, dn1)  # x[:, reflect(j + 1)]
    # Per-kernel-row combinations (9 muls, 6 adds), then row shifts along the
    # leading (tile-aligned) H axis with reflection at the first/last row.
    g = [k[r, 0] * left + k[r, 1] * x + k[r, 2] * right for r in range(3)]
    up = jnp.concatenate([g[0][1:2], g[0][:H - 1]], axis=0)       # g0[reflect(i-1)]
    dn = jnp.concatenate([g[2][1:], g[2][H - 2:H - 1]], axis=0)   # g2[reflect(i+1)]
    return up + g[1] + dn


def detailnode_kernel(x_ref, wsh_ref, bsh_ref,
                      w1p_ref, kp_ref, w2p_ref,
                      w1re_ref, kre_ref, w2r_ref, w2e_ref,
                      o_ref, *, H, W):
    HW = H * W
    bf16 = jnp.bfloat16
    x = x_ref[0]                                              # (HW, P*2C) = [z1|z2|...]

    # shffleconv: 1x1 conv + bias on the packed pair(s) -> [s1|s2|...].
    s = jnp.dot(x.astype(bf16), wsh_ref[...],
                preferred_element_type=jnp.float32) + bsh_ref[...]

    # theta_phi IRB on s1 (zero-padded weights select the s1 half per image and
    # land phi in the z2 half -> [0|phi|0|phi|...]).
    h1 = _relu6(jnp.dot(s.astype(bf16), w1p_ref[...],
                        preferred_element_type=jnp.float32))   # (HW, P*HID)
    hid1 = h1.shape[-1]
    d1 = _relu6(_dwconv3x3_reflect(h1.reshape(H, W, hid1), kp_ref[...]))
    phi = jnp.dot(d1.reshape(HW, hid1).astype(bf16), w2p_ref[...],
                  preferred_element_type=jnp.float32)
    z = s + phi                                                # [s1|z2_new|...]

    # Fused theta_rho + theta_eta IRB on z2_new (P*128-channel hidden).
    h2 = _relu6(jnp.dot(z.astype(bf16), w1re_ref[...],
                        preferred_element_type=jnp.float32))   # (HW, P*2*HID)
    hid2 = h2.shape[-1]
    d2 = _relu6(_dwconv3x3_reflect(h2.reshape(H, W, hid2), kre_ref[...]))
    d2 = d2.reshape(HW, hid2).astype(bf16)
    rho = jnp.dot(d2, w2r_ref[...], preferred_element_type=jnp.float32)   # [rho|0|...]
    eta = jnp.dot(d2, w2e_ref[...], preferred_element_type=jnp.float32)   # [eta|0|...]

    # [z1_new|z2_new|...] = [s1|z2_new|...] * [exp(rho)|1|...] + [eta|0|...]
    o_ref[0] = z * jnp.exp(rho) + eta


# ----------------------------- parameters ----------------------------------
def init_raw_params(key, scale=0.05):
    """Synthetic weights in matmul orientation (x @ w).

    PyTorch shapes -> raw shapes:
      shffleconv.weight (64,64,1,1) -> wsh_t (64, 64); bias (64,) -> bsh (64,)
      IRB conv1 (64,32,1,1)         -> w1_t (32, 64)
      IRB dwconv (64,1,3,3)         -> k (3, 3, 64)  [k[dy,dx,c] = w[c,0,dy,dx]]
      IRB conv2 (32,64,1,1)         -> w2_t (64, 32)
    """
    ks = jax.random.split(key, 11)
    raw = {
        "wsh_t": scale * jax.random.normal(ks[0], (2 * C, 2 * C), jnp.float32),
        "bsh": scale * jax.random.normal(ks[1], (2 * C,), jnp.float32),
    }
    for i, name in enumerate(("phi", "rho", "eta")):
        raw[name] = dict(
            w1_t=scale * jax.random.normal(ks[2 + 3 * i], (C, HID), jnp.float32),
            k=scale * jax.random.normal(ks[3 + 3 * i], (3, 3, HID), jnp.float32),
            w2_t=scale * jax.random.normal(ks[4 + 3 * i], (HID, C), jnp.float32),
        )
    return raw


def pack_params(raw, pack=1):
    """Zero-pad / fuse weights so the kernel's dataflow stays packed, then
    block-diagonalize so `pack` images ride the lane axis together."""
    bf16 = jnp.bfloat16
    z = lambda *s: jnp.zeros(s, jnp.float32)
    phi, rho, eta = raw["phi"], raw["rho"], raw["eta"]

    wsh = raw["wsh_t"]                                                       # (2C, 2C)
    bsh = raw["bsh"].reshape(1, 2 * C)                                       # (1, 2C) f32
    # phi expand: pick the s1 half of the packed activation.
    w1p = jnp.concatenate([phi["w1_t"], z(C, HID)], axis=0)                  # (2C, HID)
    kp = phi["k"]                                                            # (3,3,HID) f32
    # phi project: land phi in the z2 half -> [0 | phi].
    w2p = jnp.concatenate([z(HID, C), phi["w2_t"]], axis=1)                  # (HID, 2C)
    # fused rho/eta expand: pick the z2_new half -> [h_rho | h_eta].
    w1re = jnp.concatenate(
        [z(C, 2 * HID),
         jnp.concatenate([rho["w1_t"], eta["w1_t"]], axis=1)], axis=0)       # (2C, 2HID)
    kre = jnp.concatenate([rho["k"], eta["k"]], axis=-1)                     # (3,3,2HID) f32
    # rho project -> [rho | 0]; eta project -> [eta | 0].
    w2rho = jnp.concatenate(
        [jnp.concatenate([rho["w2_t"], z(HID, C)], axis=1), z(HID, 2 * C)],
        axis=0)                                                              # (2HID, 2C)
    w2eta = jnp.concatenate(
        [z(HID, 2 * C), jnp.concatenate([eta["w2_t"], z(HID, C)], axis=1)],
        axis=0)                                                              # (2HID, 2C)

    if pack > 1:
        eye = jnp.eye(pack, dtype=jnp.float32)
        bd = lambda w: jnp.kron(eye, w)          # block-diag: one block per image
        wsh, w1p, w2p, w1re, w2rho, w2eta = map(
            bd, (wsh, w1p, w2p, w1re, w2rho, w2eta))
        bsh = jnp.tile(bsh, (1, pack))
        kp = jnp.tile(kp, (1, 1, pack))
        kre = jnp.tile(kre, (1, 1, pack))

    return (wsh.astype(bf16), bsh, w1p.astype(bf16), kp, w2p.astype(bf16),
            w1re.astype(bf16), kre, w2rho.astype(bf16), w2eta.astype(bf16))


# ------------------------------- wrapper ------------------------------------
def detail_node(z1, z2, raw):
    """z1, z2: (B, H, W, 32) float32 NHWC.  Returns (z1_new, z2_new)."""
    B, H, W, _ = z1.shape
    if H < 2 or W < 2:
        raise ValueError("ReflectionPad2d(1) requires H >= 2 and W >= 2")
    HW = H * W

    # Lane-pack factor: fit P image pairs (2C=64 lanes each) into 128 lanes.
    P = 2 if B % 2 == 0 else 1
    params = pack_params(raw, pack=P)
    width = P * 2 * C

    # Pack the pair channel-wise (mirrors torch.cat((z1, z2), dim=1)), flatten
    # spatial dims, and interleave P images along lanes (layout plumbing only).
    x = jnp.concatenate([z1, z2], axis=-1).reshape(B // P, P, HW, 2 * C)
    x = x.transpose(0, 2, 1, 3).reshape(B // P, HW, width)

    def full(shape):
        n = len(shape)
        return pl.BlockSpec(shape, lambda b, _n=n: (0,) * _n)

    act_spec = pl.BlockSpec((1, HW, width), lambda b: (b, 0, 0))
    in_specs = [act_spec] + [full(p.shape) for p in params]

    # TODO(synk): for large H*W, add an H-tile grid axis (reflection halo via
    # the same roll/mask taps) instead of one full image per grid step, and set
    # vmem_limit_bytes explicitly for the 64 MiB v7x VMEM.
    out = pl.pallas_call(
        functools.partial(detailnode_kernel, H=H, W=W),
        out_shape=jax.ShapeDtypeStruct((B // P, HW, width), jnp.float32),
        grid_spec=pltpu.PrefetchScalarGridSpec(
            num_scalar_prefetch=0,
            grid=(B // P,),
            in_specs=in_specs,
            out_specs=act_spec,
        ),
        compiler_params=pltpu.CompilerParams(
            dimension_semantics=("parallel",)),
    )(x, *params)

    out = out.reshape(B // P, HW, P, 2 * C).transpose(0, 2, 1, 3)
    out = out.reshape(B, H, W, 2 * C)
    return out[..., :C], out[..., C:]


# ------------------------- pure-JAX reference -------------------------------
def _bf16_matmul(x, w):
    # Same matmul precision policy as the kernel: bf16 operands, f32 accumulate.
    return jnp.dot(x.astype(jnp.bfloat16), w.astype(jnp.bfloat16),
                   preferred_element_type=jnp.float32)


def _irb_ref(x, w1_t, k, w2_t):
    B, H, W, Cin = x.shape
    h = _bf16_matmul(x.reshape(B * H * W, Cin), w1_t).reshape(B, H, W, HID)
    h = jnp.clip(h, 0.0, 6.0)
    hp = jnp.pad(h, ((0, 0), (1, 1), (1, 1), (0, 0)), mode="reflect")
    acc = jnp.zeros_like(h)
    for dy in range(3):
        for dx in range(3):
            acc = acc + hp[:, dy:dy + H, dx:dx + W, :] * k[dy, dx]
    acc = jnp.clip(acc, 0.0, 6.0)
    return _bf16_matmul(acc.reshape(B * H * W, HID), w2_t).reshape(B, H, W, -1)


def detail_node_ref(z1, z2, raw):
    B, H, W, _ = z1.shape
    x = jnp.concatenate([z1, z2], axis=-1)
    y = _bf16_matmul(x.reshape(B * H * W, 2 * C), raw["wsh_t"]).reshape(B, H, W, 2 * C)
    y = y + raw["bsh"]
    s1, s2 = y[..., :C], y[..., C:]
    z2n = s2 + _irb_ref(s1, raw["phi"]["w1_t"], raw["phi"]["k"], raw["phi"]["w2_t"])
    rho = _irb_ref(z2n, raw["rho"]["w1_t"], raw["rho"]["k"], raw["rho"]["w2_t"])
    eta = _irb_ref(z2n, raw["eta"]["w1_t"], raw["eta"]["k"], raw["eta"]["w2_t"])
    z1n = s1 * jnp.exp(rho) + eta
    return z1n, z2n


# --------------------------------- main --------------------------------------
if __name__ == "__main__":
    key = jax.random.PRNGKey(0)
    k1, k2, kw = jax.random.split(key, 3)

    B, H, W = 2, 16, 16
    # NHWC layout; the equivalent PyTorch inputs would be (B, 32, H, W) NCHW.
    z1 = jax.random.normal(k1, (B, H, W, C), jnp.float32)
    z2 = jax.random.normal(k2, (B, H, W, C), jnp.float32)

    raw = init_raw_params(kw)

    out1, out2 = detail_node(z1, z2, raw)
    out1, out2 = jax.block_until_ready(out1), jax.block_until_ready(out2)

    ref1, ref2 = detail_node_ref(z1, z2, raw)
    # Tolerance covers bf16-operand matmuls (used identically by kernel and
    # reference) plus f32 tap-accumulation-order differences in the dwconv.
    assert jnp.allclose(out1, ref1, rtol=2e-3, atol=2e-3), "z1 mismatch"
    assert jnp.allclose(out2, ref2, rtol=2e-3, atol=2e-3), "z2 mismatch"

    print("KERNEL_OK")
</pallas_src>

<mosaic_0001>
module attributes {stable_mosaic.version = 11 : i64} {
  func.func @detailnode_kernel(%arg0: i32, %arg1: memref<1x256x128xf32, #tpu.memory_space<vmem>>, %arg2: memref<128x128xbf16, #tpu.memory_space<vmem>>, %arg3: memref<1x128xf32, #tpu.memory_space<vmem>>, %arg4: memref<128x128xbf16, #tpu.memory_space<vmem>>, %arg5: memref<3x3x128xf32, #tpu.memory_space<vmem>>, %arg6: memref<128x128xbf16, #tpu.memory_space<vmem>>, %arg7: memref<128x256xbf16, #tpu.memory_space<vmem>>, %arg8: memref<3x3x256xf32, #tpu.memory_space<vmem>>, %arg9: memref<256x128xbf16, #tpu.memory_space<vmem>>, %arg10: memref<256x128xbf16, #tpu.memory_space<vmem>>, %arg11: memref<1x256x128xf32, #tpu.memory_space<vmem>>) attributes {dimension_semantics = [#tpu.dimension_semantics<parallel>], iteration_bounds = array<i64: 1>, scalar_prefetch = 0 : i64, scratch_operands = 0 : i64, tpu.core_type = #tpu.core_type<tc>, window_params = [{transform_indices = @transform_0, window_bounds = array<i64: 1, 256, 128>}, {pipeline_mode = #tpu.pipeline_mode<synchronous>, transform_indices = @transform_1, window_bounds = array<i64: 128, 128>}, {pipeline_mode = #tpu.pipeline_mode<synchronous>, transform_indices = @transform_2, window_bounds = array<i64: 1, 128>}, {pipeline_mode = #tpu.pipeline_mode<synchronous>, transform_indices = @transform_3, window_bounds = array<i64: 128, 128>}, {pipeline_mode = #tpu.pipeline_mode<synchronous>, transform_indices = @transform_4, window_bounds = array<i64: 3, 3, 128>}, {pipeline_mode = #tpu.pipeline_mode<synchronous>, transform_indices = @transform_5, window_bounds = array<i64: 128, 128>}, {pipeline_mode = #tpu.pipeline_mode<synchronous>, transform_indices = @transform_6, window_bounds = array<i64: 128, 256>}, {pipeline_mode = #tpu.pipeline_mode<synchronous>, transform_indices = @transform_7, window_bounds = array<i64: 3, 3, 256>}, {pipeline_mode = #tpu.pipeline_mode<synchronous>, transform_indices = @transform_8, window_bounds = array<i64: 256, 128>}, {pipeline_mode = #tpu.pipeline_mode<synchronous>, transform_indices = @transform_9, window_bounds = array<i64: 256, 128>}, {transform_indices = @transform_10, window_bounds = array<i64: 1, 256, 128>}]} {
    %c0 = arith.constant 0 : index
    %c0_0 = arith.constant 0 : index
    %c0_1 = arith.constant 0 : index
    %0 = vector.load %arg1[%c0, %c0_0, %c0_1] : memref<1x256x128xf32, #tpu.memory_space<vmem>>, vector<1x256x128xf32>
    %1 = vector.shape_cast %0 : vector<1x256x128xf32> to vector<256x128xf32>
    %2 = arith.truncf %1 : vector<256x128xf32> to vector<256x128xbf16>
    %c0_2 = arith.constant 0 : index
    %c0_3 = arith.constant 0 : index
    %3 = vector.load %arg2[%c0_2, %c0_3] : memref<128x128xbf16, #tpu.memory_space<vmem>>, vector<128x128xbf16>
    %cst = arith.constant dense<0.000000e+00> : vector<256x128xf32>
    %4 = tpu.matmul %2, %3, %cst {dimension_numbers = #tpu.dot_dimension_numbers<[1], [0], [0], [1], [0, 0, 1, 1], [], []>} : vector<256x128xbf16>, vector<128x128xbf16>, vector<256x128xf32> -> vector<256x128xf32>
    %c0_4 = arith.constant 0 : index
    %c0_5 = arith.constant 0 : index
    %5 = vector.load %arg3[%c0_4, %c0_5] : memref<1x128xf32, #tpu.memory_space<vmem>>, vector<1x128xf32>
    %6 = vector.broadcast %5 : vector<1x128xf32> to vector<256x128xf32>
    %7 = arith.addf %4, %6 : vector<256x128xf32>
    %8 = arith.truncf %7 : vector<256x128xf32> to vector<256x128xbf16>
    %c0_6 = arith.constant 0 : index
    %c0_7 = arith.constant 0 : index
    %9 = vector.load %arg4[%c0_6, %c0_7] : memref<128x128xbf16, #tpu.memory_space<vmem>>, vector<128x128xbf16>
    %cst_8 = arith.constant dense<0.000000e+00> : vector<256x128xf32>
    %10 = tpu.matmul %8, %9, %cst_8 {dimension_numbers = #tpu.dot_dimension_numbers<[1], [0], [0], [1], [0, 0, 1, 1], [], []>} : vector<256x128xbf16>, vector<128x128xbf16>, vector<256x128xf32> -> vector<256x128xf32>
    %cst_9 = arith.constant 0.000000e+00 : f32
    %11 = vector.broadcast %cst_9 : f32 to vector<256x128xf32>
    %12 = arith.maximumf %10, %11 : vector<256x128xf32>
    %cst_10 = arith.constant 6.000000e+00 : f32
    %13 = vector.broadcast %cst_10 : f32 to vector<256x128xf32>
    %14 = arith.minimumf %12, %13 : vector<256x128xf32>
    %15 = vector.shape_cast %14 : vector<256x128xf32> to vector<16x16x128xf32>
    %c0_11 = arith.constant 0 : index
    %c0_12 = arith.constant 0 : index
    %c0_13 = arith.constant 0 : index
    %16 = vector.load %arg5[%c0_11, %c0_12, %c0_13] : memref<3x3x128xf32, #tpu.memory_space<vmem>>, vector<3x3x128xf32>
    %17 = tpu.iota {dimensions = array<i32: 1>} : vector<1x16x1xi32>
    %c1_i32 = arith.constant 1 : i32
    %18 = tpu.dynamic_rotate %15 by %c1_i32 dim 1 : vector<16x16x128xf32>, i32 -> vector<16x16x128xf32>
    %c15_i32 = arith.constant 15 : i32
    %19 = tpu.dynamic_rotate %15 by %c15_i32 dim 1 : vector<16x16x128xf32>, i32 -> vector<16x16x128xf32>
    %c0_i32 = arith.constant 0 : i32
    %20 = vector.broadcast %c0_i32 : i32 to vector<1x16x1xi32>
    %21 = arith.cmpi eq, %17, %20 : vector<1x16x1xi32>
    %22 = vector.shape_cast %21 : vector<1x16x1xi1> to vector<1x16x1xi1>
    %23 = vector.broadcast %22 : vector<1x16x1xi1> to vector<16x16x128xi1>
    %24 = arith.select %23, %19, %18 : vector<16x16x128xi1>, vector<16x16x128xf32>
    %c15_i32_14 = arith.constant 15 : i32
    %25 = vector.broadcast %c15_i32_14 : i32 to vector<1x16x1xi32>
    %26 = arith.cmpi eq, %17, %25 : vector<1x16x1xi32>
    %27 = vector.shape_cast %26 : vector<1x16x1xi1> to vector<1x16x1xi1>
    %28 = vector.broadcast %27 : vector<1x16x1xi1> to vector<16x16x128xi1>
    %29 = arith.select %28, %18, %19 : vector<16x16x128xi1>, vector<16x16x128xf32>
    %30 = vector.extract_strided_slice %16 {offsets = [0, 0, 0], sizes = [1, 1, 128], strides = [1, 1, 1]} : vector<3x3x128xf32> to vector<1x1x128xf32>
    %31 = vector.shape_cast %30 : vector<1x1x128xf32> to vector<128xf32>
    %32 = vector.shape_cast %31 : vector<128xf32> to vector<1x1x128xf32>
    %33 = vector.broadcast %32 : vector<1x1x128xf32> to vector<16x16x128xf32>
    %34 = arith.mulf %33, %24 : vector<16x16x128xf32>
    %35 = vector.extract_strided_slice %16 {offsets = [0, 1, 0], sizes = [1, 1, 128], strides = [1, 1, 1]} : vector<3x3x128xf32> to vector<1x1x128xf32>
    %36 = vector.shape_cast %35 : vector<1x1x128xf32> to vector<128xf32>
    %37 = vector.shape_cast %36 : vector<128xf32> to vector<1x1x128xf32>
    %38 = vector.broadcast %37 : vector<1x1x128xf32> to vector<16x16x128xf32>
    %39 = arith.mulf %38, %15 : vector<16x16x128xf32>
    %40 = arith.addf %34, %39 : vector<16x16x128xf32>
    %41 = vector.extract_strided_slice %16 {offsets = [0, 2, 0], sizes = [1, 1, 128], strides = [1, 1, 1]} : vector<3x3x128xf32> to vector<1x1x128xf32>
    %42 = vector.shape_cast %41 : vector<1x1x128xf32> to vector<128xf32>
    %43 = vector.shape_cast %42 : vector<128xf32> to vector<1x1x128xf32>
    %44 = vector.broadcast %43 : vector<1x1x128xf32> to vector<16x16x128xf32>
    %45 = arith.mulf %44, %29 : vector<16x16x128xf32>
    %46 = arith.addf %40, %45 : vector<16x16x128xf32>
    %47 = vector.extract_strided_slice %16 {offsets = [1, 0, 0], sizes = [1, 1, 128], strides = [1, 1, 1]} : vector<3x3x128xf32> to vector<1x1x128xf32>
    %48 = vector.shape_cast %47 : vector<1x1x128xf32> to vector<128xf32>
    %49 = vector.shape_cast %48 : vector<128xf32> to vector<1x1x128xf32>
    %50 = vector.broadcast %49 : vector<1x1x128xf32> to vector<16x16x128xf32>
    %51 = arith.mulf %50, %24 : vector<16x16x128xf32>
    %52 = vector.extract_strided_slice %16 {offsets = [1, 1, 0], sizes = [1, 1, 128], strides = [1, 1, 1]} : vector<3x3x128xf32> to vector<1x1x128xf32>
    %53 = vector.shape_cast %52 : vector<1x1x128xf32> to vector<128xf32>
    %54 = vector.shape_cast %53 : vector<128xf32> to vector<1x1x128xf32>
    %55 = vector.broadcast %54 : vector<1x1x128xf32> to vector<16x16x128xf32>
    %56 = arith.mulf %55, %15 : vector<16x16x128xf32>
    %57 = arith.addf %51, %56 : vector<16x16x128xf32>
    %58 = vector.extract_strided_slice %16 {offsets = [1, 2, 0], sizes = [1, 1, 128], strides = [1, 1, 1]} : vector<3x3x128xf32> to vector<1x1x128xf32>
    %59 = vector.shape_cast %58 : vector<1x1x128xf32> to vector<128xf32>
    %60 = vector.shape_cast %59 : vector<128xf32> to vector<1x1x128xf32>
    %61 = vector.broadcast %60 : vector<1x1x128xf32> to vector<16x16x128xf32>
    %62 = arith.mulf %61, %29 : vector<16x16x128xf32>
    %63 = arith.addf %57, %62 : vector<16x16x128xf32>
    %64 = vector.extract_strided_slice %16 {offsets = [2, 0, 0], sizes = [1, 1, 128], strides = [1, 1, 1]} : vector<3x3x128xf32> to vector<1x1x128xf32>
    %65 = vector.shape_cast %64 : vector<1x1x128xf32> to vector<128xf32>
    %66 = vector.shape_cast %65 : vector<128xf32> to vector<1x1x128xf32>
    %67 = vector.broadcast %66 : vector<1x1x128xf32> to vector<16x16x128xf32>
    %68 = arith.mulf %67, %24 : vector<16x16x128xf32>
    %69 = vector.extract_strided_slice %16 {offsets = [2, 1, 0], sizes = [1, 1, 128], strides = [1, 1, 1]} : vector<3x3x128xf32> to vector<1x1x128xf32>
    %70 = vector.shape_cast %69 : vector<1x1x128xf32> to vector<128xf32>
    %71 = vector.shape_cast %70 : vector<128xf32> to vector<1x1x128xf32>
    %72 = vector.broadcast %71 : vector<1x1x128xf32> to vector<16x16x128xf32>
    %73 = arith.mulf %72, %15 : vector<16x16x128xf32>
    %74 = arith.addf %68, %73 : vector<16x16x128xf32>
    %75 = vector.extract_strided_slice %16 {offsets = [2, 2, 0], sizes = [1, 1, 128], strides = [1, 1, 1]} : vector<3x3x128xf32> to vector<1x1x128xf32>
    %76 = vector.shape_cast %75 : vector<1x1x128xf32> to vector<128xf32>
    %77 = vector.shape_cast %76 : vector<128xf32> to vector<1x1x128xf32>
    %78 = vector.broadcast %77 : vector<1x1x128xf32> to vector<16x16x128xf32>
    %79 = arith.mulf %78, %29 : vector<16x16x128xf32>
    %80 = arith.addf %74, %79 : vector<16x16x128xf32>
    %81 = vector.extract_strided_slice %46 {offsets = [1, 0, 0], sizes = [1, 16, 128], strides = [1, 1, 1]} : vector<16x16x128xf32> to vector<1x16x128xf32>
    %82 = vector.extract_strided_slice %46 {offsets = [0, 0, 0], sizes = [15, 16, 128], strides = [1, 1, 1]} : vector<16x16x128xf32> to vector<15x16x128xf32>
    %83 = tpu.concatenate %81, %82 in 0 : vector<1x16x128xf32>, vector<15x16x128xf32> -> vector<16x16x128xf32>
    %84 = vector.extract_strided_slice %80 {offsets = [1, 0, 0], sizes = [15, 16, 128], strides = [1, 1, 1]} : vector<16x16x128xf32> to vector<15x16x128xf32>
    %85 = vector.extract_strided_slice %80 {offsets = [14, 0, 0], sizes = [1, 16, 128], strides = [1, 1, 1]} : vector<16x16x128xf32> to vector<1x16x128xf32>
    %86 = tpu.concatenate %84, %85 in 0 : vector<15x16x128xf32>, vector<1x16x128xf32> -> vector<16x16x128xf32>
    %87 = arith.addf %83, %63 : vector<16x16x128xf32>
    %88 = arith.addf %87, %86 : vector<16x16x128xf32>
    %cst_15 = arith.constant 0.000000e+00 : f32
    %89 = vector.broadcast %cst_15 : f32 to vector<16x16x128xf32>
    %90 = arith.maximumf %88, %89 : vector<16x16x128xf32>
    %cst_16 = arith.constant 6.000000e+00 : f32
    %91 = vector.broadcast %cst_16 : f32 to vector<16x16x128xf32>
    %92 = arith.minimumf %90, %91 : vector<16x16x128xf32>
    %93 = vector.shape_cast %92 : vector<16x16x128xf32> to vector<256x128xf32>
    %94 = arith.truncf %93 : vector<256x128xf32> to vector<256x128xbf16>
    %c0_17 = arith.constant 0 : index
    %c0_18 = arith.constant 0 : index
    %95 = vector.load %arg6[%c0_17, %c0_18] : memref<128x128xbf16, #tpu.memory_space<vmem>>, vector<128x128xbf16>
    %cst_19 = arith.constant dense<0.000000e+00> : vector<256x128xf32>
    %96 = tpu.matmul %94, %95, %cst_19 {dimension_numbers = #tpu.dot_dimension_numbers<[1], [0], [0], [1], [0, 0, 1, 1], [], []>} : vector<256x128xbf16>, vector<128x128xbf16>, vector<256x128xf32> -> vector<256x128xf32>
    %97 = arith.addf %7, %96 : vector<256x128xf32>
    %98 = arith.truncf %97 : vector<256x128xf32> to vector<256x128xbf16>
    %c0_20 = arith.constant 0 : index
    %c0_21 = arith.constant 0 : index
    %99 = vector.load %arg7[%c0_20, %c0_21] : memref<128x256xbf16, #tpu.memory_space<vmem>>, vector<128x256xbf16>
    %cst_22 = arith.constant dense<0.000000e+00> : vector<256x256xf32>
    %100 = tpu.matmul %98, %99, %cst_22 {dimension_numbers = #tpu.dot_dimension_numbers<[1], [0], [0], [1], [0, 0, 1, 1], [], []>} : vector<256x128xbf16>, vector<128x256xbf16>, vector<256x256xf32> -> vector<256x256xf32>
    %cst_23 = arith.constant 0.000000e+00 : f32
    %101 = vector.broadcast %cst_23 : f32 to vector<256x256xf32>
    %102 = arith.maximumf %100, %101 : vector<256x256xf32>
    %cst_24 = arith.constant 6.000000e+00 : f32
    %103 = vector.broadcast %cst_24 : f32 to vector<256x256xf32>
    %104 = arith.minimumf %102, %103 : vector<256x256xf32>
    %105 = vector.shape_cast %104 : vector<256x256xf32> to vector<16x16x256xf32>
    %c0_25 = arith.constant 0 : index
    %c0_26 = arith.constant 0 : index
    %c0_27 = arith.constant 0 : index
    %106 = vector.load %arg8[%c0_25, %c0_26, %c0_27] : memref<3x3x256xf32, #tpu.memory_space<vmem>>, vector<3x3x256xf32>
    %107 = tpu.iota {dimensions = array<i32: 1>} : vector<1x16x1xi32>
    %c1_i32_28 = arith.constant 1 : i32
    %108 = tpu.dynamic_rotate %105 by %c1_i32_28 dim 1 : vector<16x16x256xf32>, i32 -> vector<16x16x256xf32>
    %c15_i32_29 = arith.constant 15 : i32
    %109 = tpu.dynamic_rotate %105 by %c15_i32_29 dim 1 : vector<16x16x256xf32>, i32 -> vector<16x16x256xf32>
    %c0_i32_30 = arith.constant 0 : i32
    %110 = vector.broadcast %c0_i32_30 : i32 to vector<1x16x1xi32>
    %111 = arith.cmpi eq, %107, %110 : vector<1x16x1xi32>
    %112 = vector.shape_cast %111 : vector<1x16x1xi1> to vector<1x16x1xi1>
    %113 = vector.broadcast %112 : vector<1x16x1xi1> to vector<16x16x256xi1>
    %114 = arith.select %113, %109, %108 : vector<16x16x256xi1>, vector<16x16x256xf32>
    %c15_i32_31 = arith.constant 15 : i32
    %115 = vector.broadcast %c15_i32_31 : i32 to vector<1x16x1xi32>
    %116 = arith.cmpi eq, %107, %115 : vector<1x16x1xi32>
    %117 = vector.shape_cast %116 : vector<1x16x1xi1> to vector<1x16x1xi1>
    %118 = vector.broadcast %117 : vector<1x16x1xi1> to vector<16x16x256xi1>
    %119 = arith.select %118, %108, %109 : vector<16x16x256xi1>, vector<16x16x256xf32>
    %120 = vector.extract_strided_slice %106 {offsets = [0, 0, 0], sizes = [1, 1, 256], strides = [1, 1, 1]} : vector<3x3x256xf32> to vector<1x1x256xf32>
    %121 = vector.shape_cast %120 : vector<1x1x256xf32> to vector<256xf32>
    %122 = vector.shape_cast %121 : vector<256xf32> to vector<1x1x256xf32>
    %123 = vector.broadcast %122 : vector<1x1x256xf32> to vector<16x16x256xf32>
    %124 = arith.mulf %123, %114 : vector<16x16x256xf32>
    %125 = vector.extract_strided_slice %106 {offsets = [0, 1, 0], sizes = [1, 1, 256], strides = [1, 1, 1]} : vector<3x3x256xf32> to vector<1x1x256xf32>
    %126 = vector.shape_cast %125 : vector<1x1x256xf32> to vector<256xf32>
    %127 = vector.shape_cast %126 : vector<256xf32> to vector<1x1x256xf32>
    %128 = vector.broadcast %127 : vector<1x1x256xf32> to vector<16x16x256xf32>
    %129 = arith.mulf %128, %105 : vector<16x16x256xf32>
    %130 = arith.addf %124, %129 : vector<16x16x256xf32>
    %131 = vector.extract_strided_slice %106 {offsets = [0, 2, 0], sizes = [1, 1, 256], strides = [1, 1, 1]} : vector<3x3x256xf32> to vector<1x1x256xf32>
    %132 = vector.shape_cast %131 : vector<1x1x256xf32> to vector<256xf32>
    %133 = vector.shape_cast %132 : vector<256xf32> to vector<1x1x256xf32>
    %134 = vector.broadcast %133 : vector<1x1x256xf32> to vector<16x16x256xf32>
    %135 = arith.mulf %134, %119 : vector<16x16x256xf32>
    %136 = arith.addf %130, %135 : vector<16x16x256xf32>
    %137 = vector.extract_strided_slice %106 {offsets = [1, 0, 0], sizes = [1, 1, 256], strides = [1, 1, 1]} : vector<3x3x256xf32> to vector<1x1x256xf32>
    %138 = vector.shape_cast %137 : vector<1x1x256xf32> to vector<256xf32>
    %139 = vector.shape_cast %138 : vector<256xf32> to vector<1x1x256xf32>
    %140 = vector.broadcast %139 : vector<1x1x256xf32> to vector<16x16x256xf32>
    %141 = arith.mulf %140, %114 : vector<16x16x256xf32>
    %142 = vector.extract_strided_slice %106 {offsets = [1, 1, 0], sizes = [1, 1, 256], strides = [1, 1, 1]} : vector<3x3x256xf32> to vector<1x1x256xf32>
    %143 = vector.shape_cast %142 : vector<1x1x256xf32> to vector<256xf32>
    %144 = vector.shape_cast %143 : vector<256xf32> to vector<1x1x256xf32>
    %145 = vector.broadcast %144 : vector<1x1x256xf32> to vector<16x16x256xf32>
    %146 = arith.mulf %145, %105 : vector<16x16x256xf32>
    %147 = arith.addf %141, %146 : vector<16x16x256xf32>
    %148 = vector.extract_strided_slice %106 {offsets = [1, 2, 0], sizes = [1, 1, 256], strides = [1, 1, 1]} : vector<3x3x256xf32> to vector<1x1x256xf32>
    %149 = vector.shape_cast %148 : vector<1x1x256xf32> to vector<256xf32>
    %150 = vector.shape_cast %149 : vector<256xf32> to vector<1x1x256xf32>
    %151 = vector.broadcast %150 : vector<1x1x256xf32> to vector<16x16x256xf32>
    %152 = arith.mulf %151, %119 : vector<16x16x256xf32>
    %153 = arith.addf %147, %152 : vector<16x16x256xf32>
    %154 = vector.extract_strided_slice %106 {offsets = [2, 0, 0], sizes = [1, 1, 256], strides = [1, 1, 1]} : vector<3x3x256xf32> to vector<1x1x256xf32>
    %155 = vector.shape_cast %154 : vector<1x1x256xf32> to vector<256xf32>
    %156 = vector.shape_cast %155 : vector<256xf32> to vector<1x1x256xf32>
    %157 = vector.broadcast %156 : vector<1x1x256xf32> to vector<16x16x256xf32>
    %158 = arith.mulf %157, %114 : vector<16x16x256xf32>
    %159 = vector.extract_strided_slice %106 {offsets = [2, 1, 0], sizes = [1, 1, 256], strides = [1, 1, 1]} : vector<3x3x256xf32> to vector<1x1x256xf32>
    %160 = vector.shape_cast %159 : vector<1x1x256xf32> to vector<256xf32>
    %161 = vector.shape_cast %160 : vector<256xf32> to vector<1x1x256xf32>
    %162 = vector.broadcast %161 : vector<1x1x256xf32> to vector<16x16x256xf32>
    %163 = arith.mulf %162, %105 : vector<16x16x256xf32>
    %164 = arith.addf %158, %163 : vector<16x16x256xf32>
    %165 = vector.extract_strided_slice %106 {offsets = [2, 2, 0], sizes = [1, 1, 256], strides = [1, 1, 1]} : vector<3x3x256xf32> to vector<1x1x256xf32>
    %166 = vector.shape_cast %165 : vector<1x1x256xf32> to vector<256xf32>
    %167 = vector.shape_cast %166 : vector<256xf32> to vector<1x1x256xf32>
    %168 = vector.broadcast %167 : vector<1x1x256xf32> to vector<16x16x256xf32>
    %169 = arith.mulf %168, %119 : vector<16x16x256xf32>
    %170 = arith.addf %164, %169 : vector<16x16x256xf32>
    %171 = vector.extract_strided_slice %136 {offsets = [1, 0, 0], sizes = [1, 16, 256], strides = [1, 1, 1]} : vector<16x16x256xf32> to vector<1x16x256xf32>
    %172 = vector.extract_strided_slice %136 {offsets = [0, 0, 0], sizes = [15, 16, 256], strides = [1, 1, 1]} : vector<16x16x256xf32> to vector<15x16x256xf32>
    %173 = tpu.concatenate %171, %172 in 0 : vector<1x16x256xf32>, vector<15x16x256xf32> -> vector<16x16x256xf32>
    %174 = vector.extract_strided_slice %170 {offsets = [1, 0, 0], sizes = [15, 16, 256], strides = [1, 1, 1]} : vector<16x16x256xf32> to vector<15x16x256xf32>
    %175 = vector.extract_strided_slice %170 {offsets = [14, 0, 0], sizes = [1, 16, 256], strides = [1, 1, 1]} : vector<16x16x256xf32> to vector<1x16x256xf32>
    %176 = tpu.concatenate %174, %175 in 0 : vector<15x16x256xf32>, vector<1x16x256xf32> -> vector<16x16x256xf32>
    %177 = arith.addf %173, %153 : vector<16x16x256xf32>
    %178 = arith.addf %177, %176 : vector<16x16x256xf32>
    %cst_32 = arith.constant 0.000000e+00 : f32
    %179 = vector.broadcast %cst_32 : f32 to vector<16x16x256xf32>
    %180 = arith.maximumf %178, %179 : vector<16x16x256xf32>
    %cst_33 = arith.constant 6.000000e+00 : f32
    %181 = vector.broadcast %cst_33 : f32 to vector<16x16x256xf32>
    %182 = arith.minimumf %180, %181 : vector<16x16x256xf32>
    %183 = vector.shape_cast %182 : vector<16x16x256xf32> to vector<256x256xf32>
    %184 = arith.truncf %183 : vector<256x256xf32> to vector<256x256xbf16>
    %c0_34 = arith.constant 0 : index
    %c0_35 = arith.constant 0 : index
    %185 = vector.load %arg9[%c0_34, %c0_35] : memref<256x128xbf16, #tpu.memory_space<vmem>>, vector<256x128xbf16>
    %cst_36 = arith.constant dense<0.000000e+00> : vector<256x128xf32>
    %186 = tpu.matmul %184, %185, %cst_36 {dimension_numbers = #tpu.dot_dimension_numbers<[1], [0], [0], [1], [0, 0, 1, 1], [], []>} : vector<256x256xbf16>, vector<256x128xbf16>, vector<256x128xf32> -> vector<256x128xf32>
    %c0_37 = arith.constant 0 : index
    %c0_38 = arith.constant 0 : index
    %187 = vector.load %arg10[%c0_37, %c0_38] : memref<256x128xbf16, #tpu.memory_space<vmem>>, vector<256x128xbf16>
    %cst_39 = arith.constant dense<0.000000e+00> : vector<256x128xf32>
    %188 = tpu.matmul %184, %187, %cst_39 {dimension_numbers = #tpu.dot_dimension_numbers<[1], [0], [0], [1], [0, 0, 1, 1], [], []>} : vector<256x256xbf16>, vector<256x128xbf16>, vector<256x128xf32> -> vector<256x128xf32>
    %189 = math.exp %186 : vector<256x128xf32>
    %190 = arith.mulf %97, %189 : vector<256x128xf32>
    %191 = arith.addf %190, %188 : vector<256x128xf32>
    %c0_40 = arith.constant 0 : index
    %c0_41 = arith.constant 0 : index
    %c0_42 = arith.constant 0 : index
    %192 = vector.load %arg11[%c0_40, %c0_41, %c0_42] : memref<1x256x128xf32, #tpu.memory_space<vmem>>, vector<1x256x128xf32>
    %193 = vector.shape_cast %192 : vector<1x256x128xf32> to vector<256x128xf32>
    %194 = vector.shape_cast %191 : vector<256x128xf32> to vector<1x256x128xf32>
    tpu.vector_store %arg11[%c0_40, %c0_41, %c0_42], %194 {strides = array<i32>} : memref<1x256x128xf32, #tpu.memory_space<vmem>>, vector<1x256x128xf32>,
    return
  }
  func.func @transform_0(%arg0: i32) -> (i32, i32, i32) {
    %c0_i32 = arith.constant 0 : i32
    %c0_i32_0 = arith.constant 0 : i32
    %c0_i32_1 = arith.constant 0 : i32
    return %arg0, %c0_i32, %c0_i32_0 : i32, i32, i32
  }
  func.func @transform_1(%arg0: i32) -> (i32, i32) {
    %c0_i32 = arith.constant 0 : i32
    %c0_i32_0 = arith.constant 0 : i32
    %c0_i32_1 = arith.constant 0 : i32
    return %c0_i32, %c0_i32_0 : i32, i32
  }
  func.func @transform_2(%arg0: i32) -> (i32, i32) {
    %c0_i32 = arith.constant 0 : i32
    %c0_i32_0 = arith.constant 0 : i32
    %c0_i32_1 = arith.constant 0 : i32
    return %c0_i32, %c0_i32_0 : i32, i32
  }
  func.func @transform_3(%arg0: i32) -> (i32, i32) {
    %c0_i32 = arith.constant 0 : i32
    %c0_i32_0 = arith.constant 0 : i32
    %c0_i32_1 = arith.constant 0 : i32
    return %c0_i32, %c0_i32_0 : i32, i32
  }
  func.func @transform_4(%arg0: i32) -> (i32, i32, i32) {
    %c0_i32 = arith.constant 0 : i32
    %c0_i32_0 = arith.constant 0 : i32
    %c0_i32_1 = arith.constant 0 : i32
    %c0_i32_2 = arith.constant 0 : i32
    return %c0_i32, %c0_i32_0, %c0_i32_1 : i32, i32, i32
  }
  func.func @transform_5(%arg0: i32) -> (i32, i32) {
    %c0_i32 = arith.constant 0 : i32
    %c0_i32_0 = arith.constant 0 : i32
    %c0_i32_1 = arith.constant 0 : i32
    return %c0_i32, %c0_i32_0 : i32, i32
  }
  func.func @transform_6(%arg0: i32) -> (i32, i32) {
    %c0_i32 = arith.constant 0 : i32
    %c0_i32_0 = arith.constant 0 : i32
    %c0_i32_1 = arith.constant 0 : i32
    return %c0_i32, %c0_i32_0 : i32, i32
  }
  func.func @transform_7(%arg0: i32) -> (i32, i32, i32) {
    %c0_i32 = arith.constant 0 : i32
    %c0_i32_0 = arith.constant 0 : i32
    %c0_i32_1 = arith.constant 0 : i32
    %c0_i32_2 = arith.constant 0 : i32
    return %c0_i32, %c0_i32_0, %c0_i32_1 : i32, i32, i32
  }
  func.func @transform_8(%arg0: i32) -> (i32, i32) {
    %c0_i32 = arith.constant 0 : i32
    %c0_i32_0 = arith.constant 0 : i32
    %c0_i32_1 = arith.constant 0 : i32
    return %c0_i32, %c0_i32_0 : i32, i32
  }
  func.func @transform_9(%arg0: i32) -> (i32, i32) {
    %c0_i32 = arith.constant 0 : i32
    %c0_i32_0 = arith.constant 0 : i32
    %c0_i32_1 = arith.constant 0 : i32
    return %c0_i32, %c0_i32_0 : i32, i32
  }
  func.func @transform_10(%arg0: i32) -> (i32, i32, i32) {
    %c0_i32 = arith.constant 0 : i32
    %c0_i32_0 = arith.constant 0 : i32
    %c0_i32_1 = arith.constant 0 : i32
    return %arg0, %c0_i32, %c0_i32_0 : i32, i32, i32
  }
}

</mosaic_0001>

<bundles_post_ra>
// kernel: tpu_custom_call.1
= control target key start
LH: loop header
LB: loop body
LE: loop exit
PB: predicated region body
PF: predicated region fallthrough
CT: control target
= control target key end

     0   :  { %15 = vsyncpa [#allocation3], 0  ;;  %s9706_s0 = inlined_call_operand.hbm [shape: f32[1,256,128], index: 0, kind: input, shape index: {}]   ;;  %s9707_s1 = inlined_call_operand.hbm [shape: bf16[128,128], index: 1, kind: input, shape index: {}]   ;;  %s9708_s2 = inlined_call_operand.vmem [shape: f32[1,128], index: 2, kind: input, shape index: {}]   ;;  %s9709_s3 = inlined_call_operand.hbm [shape: bf16[128,128], index: 3, kind: input, shape index: {}]   ;;  %s9710_s4 = inlined_call_operand.hbm [shape: f32[3,3,128], index: 4, kind: input, shape index: {}]   ;;  %s9711_s5 = inlined_call_operand.hbm [shape: bf16[128,128], index: 5, kind: input, shape index: {}]   ;;  %s9712_s6 = inlined_call_operand.hbm [shape: bf16[128,256], index: 6, kind: input, shape index: {}]   ;;  %s9713_s7 = inlined_call_operand.hbm [shape: f32[3,3,256], index: 7, kind: input, shape index: {}]   ;;  %s9714_s8 = inlined_call_operand.hbm [shape: bf16[256,128], index: 8, kind: input, shape index: {}]   ;;  %s9715_s9 = inlined_call_operand.hbm [shape: bf16[256,128], index: 9, kind: input, shape index: {}]   ;;  %s9716_s10 = inlined_call_operand.hbm [shape: f32[1,256,128], index: 10, kind: output, shape index: {}]  }
   0x1   :  { %16 = vsyncpa [#allocation6], 0 }
   0x2   :  { %17 = vsyncpa [#allocation9], 0 }
   0x3   :  { %18 = vsyncpa [#allocation12], 0 }
   0x4   :  { %19 = vsyncpa [#allocation15], 0  ;;  %s38_s15 = sshll.u32 %s9707_s1, 4  ;;  %s39_s15 = int_to_ptr.hbm [resolvable:$true] %s38_s15 }
   0x5   :  { %20 = vsyncpa [#allocation4], 0  ;;  %s5204_s16 = smov [#allocation5]   ;;  %s66_s20 = sshll.u32 %s9710_s4, 4  ;;  %s67_s20 = int_to_ptr.hbm [resolvable:$true] %s66_s20 }
   0x6   :  { %s40_s17 = sshll.u32 %s5204_s16, 4  ;;  %s5205_s21 = smov 64   ;;  %s41_s17 = int_to_ptr.vmem [resolvable:$true] %s40_s17 }
   0x7   :  { %s5206_s22 = smov 4   ;;  %s5207_s23 = smov [#allocation8]  }
   0x8   :  { %46 = dma.hbm_to_vmem [thread:$0]  %s39_s15, 1024, %s41_s17, [#allocation6], %s5205_s21, %s5205_s21, %s5206_s22  }
   0x9   :  { %s68_s24 = sshll.u32 %s5207_s23, 4  ;;  %s92_s26 = sshll.u32 %s9712_s6, 4  ;;  %s69_s24 = int_to_ptr.vmem [resolvable:$true] %s68_s24  ;;  %s93_s26 = int_to_ptr.hbm [resolvable:$true] %s92_s26 }
   0xa   :  { %74 = dma.hbm_to_vmem [thread:$0]  %s67_s20, 192, %s69_s24, [#allocation9], %s5205_s21, %s5205_s21, %s5206_s22  }
   0xb   :  { %s5208_s4 = smov [#allocation11]   ;;  %s118_s30 = sshll.u32 %s9714_s8, 4  ;;  %s119_s30 = int_to_ptr.hbm [resolvable:$true] %s118_s30 }
   0xc   :  { %s94_s27 = sshll.u32 %s5208_s4, 4  ;;  %s5209_s11 = smov 128   ;;  %s95_s27 = int_to_ptr.vmem [resolvable:$true] %s94_s27 }
   0xd   :  { %s5210_s12 = smov 8   ;;  %s5211_s13 = smov [#allocation14]  }
   0xe   :  { %100 = dma.hbm_to_vmem [thread:$0]  %s93_s26, 2048, %s95_s27, [#allocation12], %s5209_s11, %s5209_s11, %s5210_s12  }
   0xf   :  { %s120_s14 = sshll.u32 %s5211_s13, 4  ;;  %s25_s6 = sshll.u32 %s9706_s0, 4  ;;  %s121_s14 = int_to_ptr.vmem [resolvable:$true] %s120_s14  ;;  %s26_s6 = int_to_ptr.hbm [resolvable:$true] %s25_s6 }
  0x10   :  { %126 = dma.hbm_to_vmem [thread:$0]  %s119_s30, 2048, %s121_s14, [#allocation15], %s5205_s21, %s5205_s21, %s5206_s22  }
  0x11   :  { %s53_s18 = sshll.u32 %s9709_s3, 4  ;;  %s5212_s19 = smov [#allocation2]   ;;  %s54_s18 = int_to_ptr.hbm [resolvable:$true] %s53_s18 }
  0x12   :  { %s27_s20 = sshll.u32 %s5212_s19, 4  ;;  %s5213_s23 = smov [#allocation7]   ;;  %s28_s20 = int_to_ptr.vmem [resolvable:$true] %s27_s20 }
  0x13   :  { %33 = dma.hbm_to_vmem [thread:$0]  %s26_s6, 4096, %s28_s20, [#allocation3], %s5209_s11, %s5209_s11, %s5210_s12  }
  0x14   :  { %s55_s0 = sshll.u32 %s5213_s23, 4  ;;  %s79_s25 = sshll.u32 %s9711_s5, 4  ;;  %s56_s0 = int_to_ptr.vmem [resolvable:$true] %s55_s0  ;;  %s80_s25 = int_to_ptr.hbm [resolvable:$true] %s79_s25 }
  0x15   :  { %61 = dma.hbm_to_vmem [thread:$0]  %s54_s18, 1024, %s56_s0, [#allocation6], %s5205_s21, %s5205_s21, %s5206_s22  }
  0x16   :  { %s105_s4 = sshll.u32 %s9713_s7, 4  ;;  %s5214_s27 = smov [#allocation10]   ;;  %s106_s4 = int_to_ptr.hbm [resolvable:$true] %s105_s4 }
  0x17   :  { %s81_s28 = sshll.u32 %s5214_s27, 4  ;;  %s5215_s29 = smov [#allocation13]   ;;  %s82_s28 = int_to_ptr.vmem [resolvable:$true] %s81_s28 }
  0x18   :  { %87 = dma.hbm_to_vmem [thread:$0]  %s80_s25, 1024, %s82_s28, [#allocation9], %s5205_s21, %s5205_s21, %s5206_s22  }
  0x19   :  { %s107_s5 = sshll.u32 %s5215_s29, 4  ;;  %s131_s14 = sshll.u32 %s9715_s9, 4  ;;  %s108_s5 = int_to_ptr.vmem [resolvable:$true] %s107_s5  ;;  %s132_s14 = int_to_ptr.hbm [resolvable:$true] %s131_s14 }
  0x1a   :  { %113 = dma.hbm_to_vmem [thread:$0]  %s106_s4, 384, %s108_s5, [#allocation12], %s5209_s11, %s5209_s11, %s5210_s12  }
  0x1b   :  { %s5216_s7 = smov [#allocation16]  }
  0x1c   :  { %s133_s15 = sshll.u32 %s5216_s7, 4  ;;  %s134_s15 = int_to_ptr.vmem [resolvable:$true] %s133_s15 }
  0x1d   :  { %139 = dma.hbm_to_vmem [thread:$0]  %s132_s14, 2048, %s134_s15, [#allocation15], %s5205_s21, %s5205_s21, %s5206_s22  }
  0x1e   :  { %5192 = dma.done.wait [#allocation3], 4096  }
  0x1f   :  { %5193 = vsyncadd [#allocation3], 4294963200 }
  0x20   :  { %5194 = dma.done.wait [#allocation6], 2048  }
  0x21   :  { %5195 = vsyncadd [#allocation6], 4294965248 }
  0x22   :  { %5196 = dma.done.wait [#allocation9], 1216  }
  0x23   :  { %5197 = vsyncadd [#allocation9], 4294966080 }
  0x24   :  { %5198 = dma.done.wait [#allocation12], 2432  }
  0x25   :  { %5199 = vsyncadd [#allocation12], 4294964864 }
  0x26   :  { %5200 = dma.done.wait [#allocation15], 4096  }
  0x27   :  { %5201 = vsyncadd [#allocation15], 4294963200  ;;  %v4784_v0 = vld [vmem:[#allocation5 + $0x38] sm:$0xff]  ;;  %v4783_v1 = vld [vmem:[#allocation5 + $0x30] sm:$0xff]  ;;  %s4472_s8 = sshll.u32 %s9716_s10, 4  ;;  %s4473_s8 = int_to_ptr.hbm [resolvable:$true] %s4472_s8 }
  0x28   :  { %292 = vmatpush.bf16.msra.mxu0 %v4784_v0  ;;  %4849 = vmatpush.bf16.msra.mxu1 %v4784_v0  ;;  %v4782_v2 = vld [vmem:[#allocation5 + $0x28] sm:$0xff]  ;;  %v4781_v3 = vld [vmem:[#allocation5 + $0x20] sm:$0xff]  ;;  %v4780_v4 = vld [vmem:[#allocation5 + $0x18] sm:$0xff] }
  0x29   :  { %4850 = vmatpush.bf16.msra.mxu2 %v4784_v0  ;;  %4851 = vmatpush.bf16.msra.mxu3 %v4784_v0  ;;  %v4779_v5 = vld [vmem:[#allocation5 + $0x10] sm:$0xff]  ;;  %v4778_v6 = vld [vmem:[#allocation5 + $0x8] sm:$0xff]  ;;  %v4777_v7 = vld [vmem:[#allocation5] sm:$0xff] }
  0x2a   :  { %v176_v8 = vld [vmem:[#allocation2] sm:$0xff]  ;;  %v177_v9 = vld [vmem:[#allocation2 + $0x8] sm:$0xff]  ;;  %v178_v11 = vld [vmem:[#allocation2 + $0x10] sm:$0xff] }
  0x2b   :  { %v208_v10 = vpack.c.bf16 %v177_v9, %v176_v8  ;;  %v179_v12 = vld [vmem:[#allocation2 + $0x18] sm:$0xff]  ;;  %v184_v14 = vld [vmem:[#allocation2 + $0x40] sm:$0xff]  ;;  %v185_v15 = vld [vmem:[#allocation2 + $0x48] sm:$0xff] }
  0x2c   :  { %293 = vmatpush.bf16.msra.mxu0 %v4783_v1  ;;  %4852 = vmatpush.bf16.msra.mxu1 %v4783_v1  ;;  %v209_v13 = vpack.c.bf16 %v179_v12, %v178_v11  ;;  %v212_v16 = vpack.c.bf16 %v185_v15, %v184_v14  ;;  %v4792_v17 = vld [vmem:[#allocation7 + $0x38] sm:$0xff]  ;;  %v4791_v18 = vld [vmem:[#allocation7 + $0x30] sm:$0xff]  ;;  %v4790_v19 = vld [vmem:[#allocation7 + $0x28] sm:$0xff] }
  0x2d   :  { %4853 = vmatpush.bf16.msra.mxu2 %v4783_v1  ;;  %4854 = vmatpush.bf16.msra.mxu3 %v4783_v1  ;;  %v180_v20 = vld [vmem:[#allocation2 + $0x20] sm:$0xff]  ;;  %v181_v21 = vld [vmem:[#allocation2 + $0x28] sm:$0xff]  ;;  %v186_v23 = vld [vmem:[#allocation2 + $0x50] sm:$0xff] }
  0x2e   :  { %v210_v22 = vpack.c.bf16 %v181_v21, %v180_v20  ;;  %v187_v24 = vld [vmem:[#allocation2 + $0x58] sm:$0xff]  ;;  %v4789_v25 = vld [vmem:[#allocation7 + $0x20] sm:$0xff]  ;;  %v193_v29 = vld [vmem:[#allocation2 + $0x88] sm:$0xff] }
  0x2f   :  { %v213_v26 = vpack.c.bf16 %v187_v24, %v186_v23  ;;  %v4788_v27 = vld [vmem:[#allocation7 + $0x18] sm:$0xff]  ;;  %v192_v28 = vld [vmem:[#allocation2 + $0x80] sm:$0xff]  ;;  %v4787_v30 = vld [vmem:[#allocation7 + $0x10] sm:$0xff] }
  0x30   :  { %294 = vmatpush.bf16.msra.mxu0 %v4782_v2  ;;  %4855 = vmatpush.bf16.msra.mxu1 %v4782_v2  ;;  %v216_v31 = vpack.c.bf16 %v193_v29, %v192_v28  ;;  %v182_v32 = vld [vmem:[#allocation2 + $0x30] sm:$0xff]  ;;  %v183_v33 = vld [vmem:[#allocation2 + $0x38] sm:$0xff]  ;;  %v4786_v34 = vld [vmem:[#allocation7 + $0x8] sm:$0xff] }
  0x31   :  { %4856 = vmatpush.bf16.msra.mxu2 %v4782_v2  ;;  %4857 = vmatpush.bf16.msra.mxu3 %v4782_v2  ;;  %v211_v35 = vpack.c.bf16 %v183_v33, %v182_v32  ;;  %v188_v36 = vld [vmem:[#allocation2 + $0x60] sm:$0xff]  ;;  %v189_v37 = vld [vmem:[#allocation2 + $0x68] sm:$0xff]  ;;  %v190_v39 = vld [vmem:[#allocation2 + $0x70] sm:$0xff] }
  0x32   :  { %v214_v38 = vpack.c.bf16 %v189_v37, %v188_v36  ;;  %v191_v40 = vld [vmem:[#allocation2 + $0x78] sm:$0xff]  ;;  %v4785_v42 = vld [vmem:[#allocation7] sm:$0xff]  ;;  %v194_v43 = vld [vmem:[#allocation2 + $0x90] sm:$0xff] }
  0x33   :  { %v215_v41 = vpack.c.bf16 %v191_v40, %v190_v39  ;;  %v195_v44 = vld [vmem:[#allocation2 + $0x98] sm:$0xff]  ;;  %v196_v46 = vld [vmem:[#allocation2 + $0xa0] sm:$0xff]  ;;  %v197_v47 = vld [vmem:[#allocation2 + $0xa8] sm:$0xff] }
  0x34   :  { %295 = vmatpush.bf16.msra.mxu0 %v4781_v3  ;;  %4858 = vmatpush.bf16.msra.mxu1 %v4781_v3  ;;  %v217_v45 = vpack.c.bf16 %v195_v44, %v194_v43  ;;  %v218_v48 = vpack.c.bf16 %v197_v47, %v196_v46  ;;  %v198_v50 = vld [vmem:[#allocation2 + $0xb0] sm:$0xff]  ;;  %v199_v51 = vld [vmem:[#allocation2 + $0xb8] sm:$0xff]  ;;  %v5330_v53 = vld [vmem:[%s9708_s2] ss:$0 sm:$0xff]  ;;  %s5217_s2 = smov [#allocation17]  }
  0x35   :  { %4859 = vmatpush.bf16.msra.mxu2 %v4781_v3  ;;  %4860 = vmatpush.bf16.msra.mxu3 %v4781_v3  ;;  %v219_v52 = vpack.c.bf16 %v199_v51, %v198_v50  ;;  %v200_v59 = vld [vmem:[#allocation2 + $0xc0] sm:$0xff]  ;;  %v201_v60 = vld [vmem:[#allocation2 + $0xc8] sm:$0xff]  ;;  %v202_v2 = vld [vmem:[#allocation2 + $0xd0] sm:$0xff]  ;;  %s4470_s22 = sshll.u32 %s5217_s2, 4  ;;  %s4471_s22 = int_to_ptr.vmem [resolvable:$true] %s4470_s22 }
  0x36   :  { %v220_v61 = vpack.c.bf16 %v201_v60, %v200_v59  ;;  %v203_v3 = vld [vmem:[#allocation2 + $0xd8] sm:$0xff]  ;;  %v205_v11 = vld [vmem:[#allocation2 + $0xe8] sm:$0xff]  ;;  %v206_v20 = vld [vmem:[#allocation2 + $0xf0] sm:$0xff] }
  0x37   :  { %v207_v21 = vld [vmem:[#allocation2 + $0xf8] sm:$0xff]  ;;  %v4800_v28 = vld [vmem:[#allocation10 + $0x38] sm:$0xff] }
  0x38   :  { %296 = vmatpush.bf16.msra.mxu0 %v4780_v4  ;;  %4861 = vmatpush.bf16.msra.mxu1 %v4780_v4  ;;  %v4794_v60 = vld [vmem:[#allocation10 + $0x8] sm:$0xff] }
  0x39   :  { %4862 = vmatpush.bf16.msra.mxu2 %v4780_v4  ;;  %4863 = vmatpush.bf16.msra.mxu3 %v4780_v4 }
  0x3c   :  { %297 = vmatpush.bf16.msra.mxu0 %v4779_v5  ;;  %4864 = vmatpush.bf16.msra.mxu1 %v4779_v5 }
  0x3d   :  { %4865 = vmatpush.bf16.msra.mxu2 %v4779_v5  ;;  %4866 = vmatpush.bf16.msra.mxu3 %v4779_v5  ;;  %v221_v5 = vpack.c.bf16 %v203_v3, %v202_v2 }
  0x40   :  { %298 = vmatpush.bf16.msra.mxu0 %v4778_v6  ;;  %4867 = vmatpush.bf16.msra.mxu1 %v4778_v6 }
  0x41   :  { %4868 = vmatpush.bf16.msra.mxu2 %v4778_v6  ;;  %4869 = vmatpush.bf16.msra.mxu3 %v4778_v6 }
  0x44   :  { %299 = vmatpush.bf16.msra.mxu0 %v4777_v7  ;;  %4870 = vmatpush.bf16.msra.mxu1 %v4777_v7 }
  0x45   :  { %4871 = vmatpush.bf16.msra.mxu2 %v4777_v7  ;;  %4872 = vmatpush.bf16.msra.mxu3 %v4777_v7 }
  0x47   :  { %300 = vmatmul.bf16.vlgmr.msra.gmra.mxu0 %v208_v10  ;;  %320 = vmatmul.bf16.vlgmr.msra.gmra.mxu1 %v212_v16  ;;  %v204_v10 = vld [vmem:[#allocation2 + $0xe0] sm:$0xff] }
  0x48   :  { %461 = vmatpush.bf16.msrb.mxu1 %v4792_v17  ;;  %340 = vmatmul.bf16.vlgmr.msra.gmra.mxu2 %v216_v31  ;;  %v222_v14 = vpack.c.bf16 %v205_v11, %v204_v10 }
  0x49   :  { %360 = vmatmul.bf16.vlgmr.msra.gmra.mxu3 %v220_v61  ;;  %1503 = vmatpush.bf16.msrb.mxu2 %v4800_v28 }
  0x4c   :  { %462 = vmatpush.bf16.msrb.mxu1 %v4791_v18 }
  0x50   :  { %463 = vmatpush.bf16.msrb.mxu1 %v4790_v19 }
  0x54   :  { %464 = vmatpush.bf16.msrb.mxu1 %v4789_v25 }
  0x57   :  { %305 = vmatmul.bf16.gmra.mxu0 %v209_v13  ;;  %325 = vmatmul.bf16.gmra.mxu1 %v213_v26 }
  0x58   :  { %465 = vmatpush.bf16.msrb.mxu1 %v4788_v27  ;;  %345 = vmatmul.bf16.gmra.mxu2 %v217_v45 }
  0x59   :  { %365 = vmatmul.bf16.gmra.mxu3 %v221_v5 }
  0x5c   :  { %466 = vmatpush.bf16.msrb.mxu1 %v4787_v30 }
  0x60   :  { %467 = vmatpush.bf16.msrb.mxu1 %v4786_v34  ;;  %v4799_v34 = vld [vmem:[#allocation10 + $0x30] sm:$0xff] }
  0x61   :  { %1504 = vmatpush.bf16.msrb.mxu2 %v4799_v34 }
  0x64   :  { %468 = vmatpush.bf16.msrb.mxu1 %v4785_v42 }
  0x67   :  { %310 = vmatmul.bf16.gmra.mxu0 %v210_v22  ;;  %330 = vmatmul.bf16.gmra.mxu1 %v214_v38  ;;  %v223_v22 = vpack.c.bf16 %v207_v21, %v206_v20  ;;  %v614_v20 = vld [vmem:[#allocation8] sm:$0x7] }
  0x68   :  { %350 = vmatmul.bf16.gmra.mxu2 %v218_v48  ;;  %v4797_v48 = vld [vmem:[#allocation10 + $0x20] sm:$0xff] }
  0x69   :  { %370 = vmatmul.bf16.gmra.mxu3 %v222_v14 }
  0x77   :  { %315 = vmatmul.bf16.gmra.mxu0 %v211_v35  ;;  %335 = vmatmul.bf16.gmra.mxu1 %v215_v41  ;;  %v4798_v41 = vld [vmem:[#allocation10 + $0x28] sm:$0xff] }
  0x78   :  { %355 = vmatmul.bf16.gmra.mxu2 %v219_v52 }
  0x79   :  { %375 = vmatmul.bf16.gmra.mxu3 %v223_v22  ;;  %1505 = vmatpush.bf16.msrb.mxu2 %v4798_v41 }
  0x7d   :  { %1506 = vmatpush.bf16.msrb.mxu2 %v4797_v48  ;;  %v5462_v48 = vperm.slane %v614_v20, 2 }
  0xc4   :  { %v301_v49 = vpop.f32.mrf.mxu0  ;;  %v321_v12 = vpop.f32.mrf.mxu1 }
  0xc5   :  { %v5333_v55 = vadd.f32 %v5330_v53, %v301_v49  ;;  %v5365_v24 = vadd.f32 %v5330_v53, %v321_v12  ;;  %v4796_v49 = vld [vmem:[#allocation10 + $0x18] sm:$0xff] }
  0xc6   :  { %1507 = vmatpush.bf16.msrb.mxu2 %v4796_v49 }
  0xcb   :  { %v341_v33 = vpop.f32.mrf.mxu2 }
  0xcc   :  { %v303_v54 = vpop.f32.mrf.mxu0  ;;  %v323_v16 = vpop.f32.mrf.mxu1  ;;  %v5397_v51 = vadd.f32 %v5330_v53, %v341_v33  ;;  %v5442_v33 = vperm.slane %v614_v20, 1 }
  0xcd   :  { %v5336_v56 = vadd.f32 %v5330_v53, %v303_v54  ;;  %v5368_v25 = vadd.f32 %v5330_v53, %v323_v16  ;;  %v4795_v54 = vld [vmem:[#allocation10 + $0x10] sm:$0xff] }
  0xce   :  { %9897 = vst [vmem:[#allocation29_spill] sm:$0xff] %v5397_v51  ;;  %1508 = vmatpush.bf16.msrb.mxu2 %v4795_v54 }
  0xcf   :  { %v381_v57 = vpack.c.bf16 %v5336_v56, %v5333_v55  ;;  %v385_v26 = vpack.c.bf16 %v5368_v25, %v5365_v24 }
  0xd1   :  { %469 = vmatmul.bf16.vlgmr.msrb.gmra.mxu1 %v381_v57 }
  0xd2   :  { %1509 = vmatpush.bf16.msrb.mxu2 %v4794_v60 }
  0xd3   :  { %v343_v38 = vpop.f32.mrf.mxu2 }
  0xd4   :  { %v306_v58 = vpop.f32.mrf.mxu0  ;;  %v326_v23 = vpop.f32.mrf.mxu1  ;;  %v5400_v52 = vadd.f32 %v5330_v53, %v343_v38 }
  0xd5   :  { %v5341_v63 = vadd.f32 %v5330_v53, %v306_v58  ;;  %v5373_v30 = vadd.f32 %v5330_v53, %v326_v23 }
  0xd6   :  { %9898 = vst [vmem:[#allocation30_spill] sm:$0xff] %v5400_v52  ;;  %v389_v58 = vpack.c.bf16 %v5400_v52, %v5397_v51 }
  0xdb   :  { %v346_v42 = vpop.f32.mrf.mxu2 }
  0xdc   :  { %v308_v62 = vpop.f32.mrf.mxu0  ;;  %v328_v27 = vpop.f32.mrf.mxu1  ;;  %v5407_v5 = vadd.f32 %v5330_v53, %v346_v42 }
  0xdd   :  { %v5344_v0 = vadd.f32 %v5330_v53, %v308_v62  ;;  %v5376_v31 = vadd.f32 %v5330_v53, %v328_v27 }
  0xde   :  { %9899 = vst [vmem:[#allocation31_spill] sm:$0xff] %v5407_v5 }
  0xdf   :  { %v382_v1 = vpack.c.bf16 %v5344_v0, %v5341_v63  ;;  %9892 = vst [vmem:[#allocation24_spill] sm:$0xff] %v5376_v31  ;;  %v386_v32 = vpack.c.bf16 %v5376_v31, %v5373_v30 }
  0xe1   :  { %474 = vmatmul.bf16.gmra.mxu1 %v382_v1  ;;  %v617_v1 = vlaneseq }
  0xe3   :  { %v348_v47 = vpop.f32.mrf.mxu2 }
  0xe4   :  { %v311_v4 = vpop.f32.mrf.mxu0  ;;  %v331_v29 = vpop.f32.mrf.mxu1 }
  0xe5   :  { %v5349_v7 = vadd.f32 %v5330_v53, %v311_v4  ;;  %v5381_v36 = vadd.f32 %v5330_v53, %v331_v29  ;;  %v4793_v4 = vld [vmem:[#allocation10] sm:$0xff] }
  0xe6   :  { %1510 = vmatpush.bf16.msrb.mxu2 %v4793_v4 }
  0xe7   :  { %9893 = vst [vmem:[#allocation25_spill] sm:$0xff] %v5381_v36 }
  0xeb   :  { %v351_v50 = vpop.f32.mrf.mxu2 }
  0xec   :  { %v313_v6 = vpop.f32.mrf.mxu0  ;;  %v333_v35 = vpop.f32.mrf.mxu1  ;;  %v5437_v29 = vadd.f32 %v5330_v53, %v351_v50 }
  0xed   :  { %v5352_v8 = vadd.f32 %v5330_v53, %v313_v6  ;;  %v5384_v37 = vadd.f32 %v5330_v53, %v333_v35  ;;  %v5410_v6 = vadd.f32 %v5330_v53, %v348_v47  ;;  %v616_v35 = vld [vmem:[#allocation8 + $0x8] sm:$0x7] }
  0xee   :  { %9901 = vst [vmem:[#allocation33_spill] sm:$0xff] %v5437_v29 }
  0xef   :  { %v383_v9 = vpack.c.bf16 %v5352_v8, %v5349_v7  ;;  %9894 = vst [vmem:[#allocation26_spill] sm:$0xff] %v5384_v37  ;;  %v387_v40 = vpack.c.bf16 %v5384_v37, %v5381_v36 }
  0xf0   :  { %9900 = vst [vmem:[#allocation32_spill] sm:$0xff] %v5410_v6 }
  0xf1   :  { %479 = vmatmul.bf16.gmra.mxu1 %v383_v9  ;;  %v5412_v9 = vshrl.u32 %v617_v1, 7  ;;  %v5483_v1 = vperm.slane %v616_v35, 2 }
  0xf3   :  { %v353_v59 = vpop.f32.mrf.mxu2  ;;  %vm652_vm0 = vcmp.lt.s32.totalorder %v5412_v9, 1  ;;  %vm717_vm1 = vcmp.lt.s32.totalorder %v5412_v9, 7  ;;  %v5431_v23 = vadd.s32 8, %v5412_v9  ;;  %vm750_vm2 = vcmp.eq.s32.totalorder %v5412_v9, 0 }
  0xf4   :  { %v316_v13 = vpop.f32.mrf.mxu0  ;;  %v336_v39 = vpop.f32.mrf.mxu1 }
  0xf5   :  { %v5357_v17 = vadd.f32 %v5330_v53, %v316_v13  ;;  %v5389_v44 = vadd.f32 %v5330_v53, %v336_v39  ;;  %v5453_v39 = vperm.slane %v614_v20, 0  ;;  %vm789_vm3 = vcmp.eq.s32.totalorder %v5431_v23, 15 }
  0xf7   :  { %9895 = vst [vmem:[#allocation27_spill] sm:$0xff] %v5389_v44 }
  0xfb   :  { %v356_v11 = vpop.f32.mrf.mxu2 }
  0xfc   :  { %v318_v15 = vpop.f32.mrf.mxu0  ;;  %v338_v43 = vpop.f32.mrf.mxu1 }
  0xfd   :  { %v5360_v18 = vadd.f32 %v5330_v53, %v318_v15  ;;  %v5392_v45 = vadd.f32 %v5330_v53, %v338_v43  ;;  %v390_v15 = vpack.c.bf16 %v5410_v6, %v5407_v5 }
  0xff   :  { %v384_v19 = vpack.c.bf16 %v5360_v18, %v5357_v17  ;;  %9896 = vst [vmem:[#allocation28_spill] sm:$0xff] %v5392_v45  ;;  %v388_v46 = vpack.c.bf16 %v5392_v45, %v5389_v44 }
 0x101   :  { %484 = vmatmul.bf16.gmra.mxu1 %v384_v19 }
 0x103   :  { %v358_v47 = vpop.f32.mrf.mxu2 }
 0x111   :  { %489 = vmatmul.bf16.gmra.mxu1 %v385_v26  ;;  %v615_v26 = vld [vmem:[#allocation8 + $0x4] sm:$0x7] }
 0x112   :  { %v5434_v28 = vperm.slane %v615_v26, 0  ;;  %v5464_v49 = vperm.slane %v615_v26, 2 }
 0x121   :  { %494 = vmatmul.bf16.gmra.mxu1 %v386_v32  ;;  %v5440_v32 = vadd.f32 %v5330_v53, %v353_v59  ;;  %v5474_v59 = vperm.slane %v616_v35, 1 }
 0x123   :  { %9902 = vst [vmem:[#allocation34_spill] sm:$0xff] %v5440_v32  ;;  %v391_v54 = vpack.c.bf16 %v5440_v32, %v5437_v29 }
 0x131   :  { %499 = vmatmul.bf16.gmra.mxu1 %v387_v40  ;;  %v5455_v40 = vperm.slane %v615_v26, 1 }
 0x141   :  { %504 = vmatmul.bf16.gmra.mxu1 %v388_v46 }
 0x14e   :  { %v470_v57 = vpop.f32.mrf.mxu1 }
 0x14f   :  { %v550_v2 = vmax.f32 %v470_v57, 0.0  ;;  %v5470_v57 = vpop.f32.mrf.mxu3 }
 0x151   :  { %509 = vmatmul.bf16.gmra.mxu1 %v389_v58  ;;  %v5414_v10 = vmin.f32 %v550_v2, 6.0 }
 0x153   :  { %v620_v16 = vrot.slane %v5414_v10, 7  ;;  %v685_v19 = vrot.slane %v5414_v10, 1  ;;  %v1013_v2 = vmul.f32 %v5455_v40, %v5414_v10 }
 0x156   :  { %v472_v61 = vpop.f32.mrf.mxu1 }
 0x157   :  { %v551_v62 = vmax.f32 %v472_v61, 0.0 }
 0x159   :  { %v5404_v3 = vmin.f32 %v551_v62, 6.0  ;;  %v5481_v62 = vperm.slane %v616_v35, 0 }
 0x15b   :  { %v636_v12 = vrot.slane %v5404_v3, 7  ;;  %v701_v13 = vrot.slane %v5404_v3, 1  ;;  %v1014_v4 = vmul.f32 %v5455_v40, %v5404_v3 }
 0x15d   :  { %v669_v21 = vsel %vm652_vm0, %v636_v12, %v620_v16  ;;  %v5428_v22 = vsel %vm717_vm1, %v685_v19, %v701_v13  ;;  %v5446_v34 = vsel %vm652_vm0, %v620_v16, %v636_v12  ;;  %v734_v41 = vsel %vm717_vm1, %v701_v13, %v685_v19 }
 0x15e   :  { %v475_v14 = vpop.f32.mrf.mxu1  ;;  %v5451_v38 = vsel %vm750_vm2, %v5428_v22, %v669_v21  ;;  %v981_v50 = vmul.f32 %v5434_v28, %v5446_v34  ;;  %v5479_v61 = vsel %vm789_vm3, %v5446_v34, %v734_v41  ;;  %v5490_v12 = vadd.f32 %v5330_v53, %v356_v11 }
 0x15f   :  { %v552_v27 = vmax.f32 %v475_v14, 0.0  ;;  %v980_v58 = vmul.f32 %v5434_v28, %v5451_v38  ;;  %v5493_v13 = vadd.f32 %v5330_v53, %v358_v47  ;;  %v1078_v6 = vmul.f32 %v5464_v49, %v5428_v22 }
 0x160   :  { %9903 = vst [vmem:[#allocation35_spill] sm:$0xff] %v5490_v12  ;;  %v1046_v20 = vadd.f32 %v1014_v4, %v981_v50 }
 0x161   :  { %514 = vmatmul.bf16.gmra.mxu1 %v390_v15  ;;  %v5460_v43 = vmin.f32 %v552_v27, 6.0  ;;  %9904 = vst [vmem:[#allocation36_spill] sm:$0xff] %v5493_v13  ;;  %v1045_v26 = vadd.f32 %v1013_v2, %v980_v58  ;;  %v1079_v27 = vmul.f32 %v5464_v49, %v5479_v61 }
 0x163   :  { %v621_v14 = vrot.slane %v5460_v43, 7  ;;  %v686_v15 = vrot.slane %v5460_v43, 1  ;;  %v860_v21 = vmul.f32 %v5442_v33, %v5460_v43  ;;  %v1111_v44 = vadd.f32 %v1079_v27, %v1046_v20 }
 0x164   :  { %v1110_v36 = vadd.f32 %v1078_v6, %v1045_v26  ;;  %v392_v20 = vpack.c.bf16 %v5493_v13, %v5490_v12  ;;  %v4816_v13 = vld [vmem:[#allocation11 + $0x74] sm:$0xf0] }
 0x166   :  { %v477_v42 = vpop.f32.mrf.mxu1 }
 0x167   :  { %v553_v46 = vmax.f32 %v477_v42, 0.0 }
 0x169   :  { %v585_v60 = vmin.f32 %v553_v46, 6.0 }
 0x16b   :  { %v637_v16 = vrot.slane %v585_v60, 7  ;;  %v702_v19 = vrot.slane %v585_v60, 1  ;;  %v861_v46 = vmul.f32 %v5442_v33, %v585_v60  ;;  %v1175_v29 = vmul.f32 %v5474_v59, %v585_v60 }
 0x16d   :  { %v654_v11 = vsel %vm652_vm0, %v621_v14, %v637_v16  ;;  %v670_v35 = vsel %vm652_vm0, %v637_v16, %v621_v14  ;;  %v5507_v41 = vsel %vm717_vm1, %v686_v15, %v702_v19  ;;  %v735_v42 = vsel %vm717_vm1, %v702_v19, %v686_v15 }
 0x16e   :  { %v480_v47 = vpop.f32.mrf.mxu1  ;;  %v758_v50 = vsel %vm750_vm2, %v5507_v41, %v670_v35  ;;  %v797_v58 = vsel %vm789_vm3, %v654_v11, %v735_v42  ;;  %v830_v2 = vmul.f32 %v5453_v39, %v654_v11  ;;  %v1174_v15 = vmul.f32 %v5474_v59, %v5460_v43 }
 0x16f   :  { %v829_v4 = vmul.f32 %v5453_v39, %v758_v50  ;;  %v922_v14 = vmul.f32 %v5462_v48, %v797_v58  ;;  %v1143_v16 = vmul.f32 %v5481_v62, %v758_v50  ;;  %v1144_v32 = vmul.f32 %v5481_v62, %v654_v11 }
 0x170   :  { %v891_v19 = vadd.f32 %v861_v46, %v830_v2  ;;  %v1236_v35 = vmul.f32 %v5483_v1, %v797_v58  ;;  %v921_v5 = vmul.f32 %v5462_v48, %v5507_v41  ;;  %v554_v51 = vmax.f32 %v480_v47, 0.0  ;;  %v5532_v2 = vpop.f32.mrf.mxu3 }
 0x171   :  { %519 = vmatmul.bf16.gmra.mxu1 %v391_v54  ;;  %v890_v42 = vadd.f32 %v860_v21, %v829_v4  ;;  %v1204_v52 = vadd.f32 %v1174_v15, %v1143_v16  ;;  %v1205_v46 = vadd.f32 %v1175_v29, %v1144_v32  ;;  %v1235_v54 = vmul.f32 %v5483_v1, %v5507_v41 }
 0x172   :  { %v5530_v45 = vadd.f32 %v922_v14, %v891_v19  ;;  %v983_v31 = vmul.f32 %v5434_v28, %v654_v11  ;;  %v858_v47 = vmul.f32 %v5442_v33, %v5414_v10  ;;  %v5547_v6 = vmin.f32 %v554_v51, 6.0 }
 0x173   :  { %v5534_v37 = vadd.f32 %v921_v5, %v890_v42  ;;  %v1266_v21 = vadd.f32 %v1236_v35, %v1205_v46  ;;  %v1265_v29 = vadd.f32 %v1235_v54, %v1204_v52  ;;  %v859_v5 = vmul.f32 %v5442_v33, %v5404_v3 }
 0x174   :  { %v1296_v4 = vadd.f32 %v1111_v44, %v5530_v45  ;;  %v1016_v44 = vmul.f32 %v5455_v40, %v585_v60  ;;  %v827_v10 = vmul.f32 %v5453_v39, %v5451_v38  ;;  %v982_v16 = vmul.f32 %v5434_v28, %v758_v50 }
 0x175   :  { %v1295_v32 = vadd.f32 %v1110_v36, %v5534_v37  ;;  %v828_v36 = vmul.f32 %v5453_v39, %v5446_v34  ;;  %v1081_v3 = vmul.f32 %v5464_v49, %v797_v58  ;;  %v919_v60 = vmul.f32 %v5462_v48, %v5428_v22 }
 0x176   :  { %v482_v26 = vpop.f32.mrf.mxu1  ;;  %v1328_v27 = vadd.f32 %v1296_v4, %v1266_v21  ;;  %v1048_v52 = vadd.f32 %v1016_v44, %v983_v31  ;;  %v1015_v35 = vmul.f32 %v5455_v40, %v5460_v43  ;;  %v622_v38 = vrot.slane %v5547_v6, 7 }
 0x177   :  { %v555_v14 = vmax.f32 %v482_v26, 0.0  ;;  %v1327_v11 = vadd.f32 %v1295_v32, %v1265_v29  ;;  %v687_v50 = vrot.slane %v5547_v6, 1  ;;  %v920_v34 = vmul.f32 %v5462_v48, %v5479_v61 }
 0x178   :  { %v1360_v15 = vmax.f32 %v1328_v27, 0.0  ;;  %v1047_v54 = vadd.f32 %v1015_v35, %v982_v16  ;;  %v5568_v21 = vpop.f32.mrf.mxu3  ;;  %v888_v22 = vadd.f32 %v858_v47, %v827_v10  ;;  %v889_v4 = vadd.f32 %v859_v5, %v828_v36 }
 0x179   :  { %v5556_v51 = vmin.f32 %v555_v14, 6.0  ;;  %v1359_v19 = vmax.f32 %v1327_v11, 0.0  ;;  %v1080_v43 = vmul.f32 %v5464_v49, %v5507_v41  ;;  %v1113_v29 = vadd.f32 %v1081_v3, %v1048_v52 }
 0x17a   :  { %v1392_v42 = vmin.f32 %v1360_v15, 6.0  ;;  %v1176_v15 = vmul.f32 %v5474_v59, %v5547_v6  ;;  %v950_v36 = vadd.f32 %v920_v34, %v889_v4  ;;  %v5610_v4 = vadd.f32 %v5330_v53, %v5470_v57 }
 0x17b   :  { %v638_v31 = vrot.slane %v5556_v51, 7  ;;  %v703_v58 = vrot.slane %v5556_v51, 1  ;;  %v1391_v46 = vmin.f32 %v1359_v19, 6.0  ;;  %v1177_v14 = vmul.f32 %v5474_v59, %v5556_v51 }
 0x17c   :  { %v1112_v10 = vadd.f32 %v1080_v43, %v1047_v54  ;;  %v949_v19 = vadd.f32 %v919_v60, %v888_v22  ;;  %9905 = vst [vmem:[#allocation37_spill] sm:$0xff] %v5610_v4  ;;  %v1017_v57 = vmul.f32 %v5455_v40, %v5547_v6 }
 0x17d   :  { %v1423_v32 = vpack.c.bf16 %v1392_v42, %v1391_v46  ;;  %v5574_v26 = vsel %vm652_vm0, %v622_v38, %v638_v31  ;;  %v671_v61 = vsel %vm652_vm0, %v638_v31, %v622_v38  ;;  %v5580_v27 = vsel %vm717_vm1, %v687_v50, %v703_v58 }
 0x17e   :  { %v485_v44 = vpop.f32.mrf.mxu1  ;;  %v736_v47 = vsel %vm717_vm1, %v703_v58, %v687_v50  ;;  %v5587_v41 = vsel %vm750_vm2, %v5580_v27, %v671_v61  ;;  %v1146_v5 = vmul.f32 %v5481_v62, %v5574_v26  ;;  %v1237_v38 = vmul.f32 %v5483_v1, %v5580_v27 }
 0x17f   :  { %1511 = vmatmul.bf16.vlgmr.msrb.gmra.mxu2 %v1423_v32  ;;  %v5596_v11 = vsel %vm789_vm3, %v5574_v26, %v736_v47  ;;  %v1145_v16 = vmul.f32 %v5481_v62, %v5587_v41  ;;  %v1298_v42 = vadd.f32 %v1113_v29, %v950_v36  ;;  %v556_v31 = vmax.f32 %v485_v44, 0.0 }
 0x180   :  { %v1207_v52 = vadd.f32 %v1177_v14, %v1146_v5  ;;  %v1238_v3 = vmul.f32 %v5483_v1, %v5596_v11  ;;  %v1297_v46 = vadd.f32 %v1112_v10, %v949_v19  ;;  %v985_v43 = vmul.f32 %v5434_v28, %v5574_v26  ;;  %v368_v22 = vpop.f32.mrf.mxu3 }
 0x181   :  { %524 = vmatmul.bf16.gmra.mxu1 %v392_v20  ;;  %v1206_v35 = vadd.f32 %v1176_v15, %v1145_v16  ;;  %v984_v32 = vmul.f32 %v5434_v28, %v5587_v41  ;;  %v1018_v29 = vmul.f32 %v5455_v40, %v5556_v51  ;;  %v5616_v61 = vmin.f32 %v556_v31, 6.0 }
 0x182   :  { %v1268_v50 = vadd.f32 %v1238_v3, %v1207_v52  ;;  %v5620_v44 = vadd.f32 %v5330_v53, %v5532_v2  ;;  %v1083_v16 = vmul.f32 %v5464_v49, %v5596_v11 }
 0x183   :  { %v1267_v58 = vadd.f32 %v1237_v38, %v1206_v35  ;;  %v1050_v10 = vadd.f32 %v1018_v29, %v985_v43  ;;  %v1049_v52 = vadd.f32 %v1017_v57, %v984_v32  ;;  %v623_v3 = vrot.slane %v5616_v61, 7 }
 0x184   :  { %v1330_v54 = vadd.f32 %v1298_v42, %v1268_v50  ;;  %9906 = vst [vmem:[#allocation38_spill] sm:$0xff] %v5620_v44  ;;  %v688_v19 = vrot.slane %v5616_v61, 1  ;;  %v393_v38 = vpack.c.bf16 %v5620_v44, %v5610_v4  ;;  %v1082_v42 = vmul.f32 %v5464_v49, %v5580_v27 }
 0x185   :  { %v1329_v34 = vadd.f32 %v1297_v46, %v1267_v58  ;;  %v1115_v31 = vadd.f32 %v1083_v16, %v1050_v10 }
 0x186   :  { %v487_v20 = vpop.f32.mrf.mxu1  ;;  %v1362_v60 = vmax.f32 %v1330_v54, 0.0 }
 0x187   :  { %v557_v47 = vmax.f32 %v487_v20, 0.0  ;;  %v1361_v5 = vmax.f32 %v1329_v34, 0.0 }
 0x188   :  { %v1394_v14 = vmin.f32 %v1362_v60, 6.0  ;;  %v5668_v10 = vpop.f32.mrf.mxu3 }
 0x189   :  { %v5626_v15 = vmin.f32 %v557_v47, 6.0  ;;  %v1393_v36 = vmin.f32 %v1361_v5, 6.0  ;;  %v1114_v47 = vadd.f32 %v1082_v42, %v1049_v52  ;;  %v1300_v52 = vadd.f32 %v1115_v31, %v5530_v45 }
 0x18a   :  { %v5676_v42 = vadd.f32 %v5330_v53, %v5568_v21  ;;  %v862_v45 = vmul.f32 %v5442_v33, %v5547_v6  ;;  %v832_v21 = vmul.f32 %v5453_v39, %v5574_v26  ;;  %v1019_v6 = vmul.f32 %v5455_v40, %v5616_v61 }
 0x18b   :  { %v639_v2 = vrot.slane %v5626_v15, 7  ;;  %v704_v35 = vrot.slane %v5626_v15, 1  ;;  %v1424_v50 = vpack.c.bf16 %v1394_v14, %v1393_v36  ;;  %v1179_v29 = vmul.f32 %v5474_v59, %v5626_v15 }
 0x18c   :  { %v1178_v14 = vmul.f32 %v5474_v59, %v5616_v61  ;;  %9907 = vst [vmem:[#allocation39_spill] sm:$0xff] %v5676_v42  ;;  %v5751_v44 = vadd.f32 %v5330_v53, %v5668_v10 }
 0x18d   :  { %v5638_v58 = vsel %vm652_vm0, %v623_v3, %v639_v2  ;;  %v672_v46 = vsel %vm652_vm0, %v639_v2, %v623_v3  ;;  %v5644_v54 = vsel %vm717_vm1, %v688_v19, %v704_v35  ;;  %v737_v43 = vsel %vm717_vm1, %v704_v35, %v688_v19 }
 0x18e   :  { %v490_v34 = vpop.f32.mrf.mxu1  ;;  %v5651_v20 = vsel %vm750_vm2, %v5644_v54, %v672_v46  ;;  %v5656_v60 = vsel %vm789_vm3, %v5638_v58, %v737_v43  ;;  %v1148_v32 = vmul.f32 %v5481_v62, %v5638_v58  ;;  %v1239_v3 = vmul.f32 %v5483_v1, %v5644_v54  ;;  %9909 = vst [vmem:[#allocation41_spill] sm:$0xff] %v5751_v44 }
 0x18f   :  { %1516 = vmatmul.bf16.gmra.mxu2 %v1424_v50  ;;  %v1147_v5 = vmul.f32 %v5481_v62, %v5651_v20  ;;  %v1240_v57 = vmul.f32 %v5483_v1, %v5656_v60  ;;  %v558_v2 = vmax.f32 %v490_v34, 0.0  ;;  %v1299_v50 = vadd.f32 %v1114_v47, %v5534_v37 }
 0x190   :  { %v1209_v16 = vadd.f32 %v1179_v29, %v1148_v32  ;;  %v987_v43 = vmul.f32 %v5434_v28, %v5638_v58  ;;  %v831_v29 = vmul.f32 %v5453_v39, %v5587_v41  ;;  %v986_v34 = vmul.f32 %v5434_v28, %v5651_v20 }
 0x191   :  { %529 = vmatmul.bf16.gmra.mxu1 %v393_v38  ;;  %v1208_v36 = vadd.f32 %v1178_v14, %v1147_v5  ;;  %v5681_v38 = vadd.f32 %v5330_v53, %v368_v22  ;;  %v1020_v47 = vmul.f32 %v5455_v40, %v5626_v15  ;;  %v5693_v22 = vmin.f32 %v558_v2, 6.0 }
 0x192   :  { %v1270_v19 = vadd.f32 %v1240_v57, %v1209_v16  ;;  %v863_v41 = vmul.f32 %v5442_v33, %v5556_v51  ;;  %v1085_v26 = vmul.f32 %v5464_v49, %v5656_v60  ;;  %v892_v2 = vadd.f32 %v862_v45, %v831_v29 }
 0x193   :  { %v1269_v35 = vadd.f32 %v1239_v3, %v1208_v36  ;;  %9908 = vst [vmem:[#allocation40_spill] sm:$0xff] %v5681_v38  ;;  %v1052_v16 = vadd.f32 %v1020_v47, %v987_v43  ;;  %v394_v36 = vpack.c.bf16 %v5681_v38, %v5676_v42  ;;  %v923_v51 = vmul.f32 %v5462_v48, %v5580_v27 }
 0x194   :  { %v1332_v46 = vadd.f32 %v1300_v52, %v1270_v19  ;;  %v373_v52 = vpop.f32.mrf.mxu3  ;;  %v689_v43 = vrot.slane %v5693_v22, 1  ;;  %v924_v47 = vmul.f32 %v5462_v48, %v5596_v11  ;;  %v1084_v29 = vmul.f32 %v5464_v49, %v5644_v54 }
 0x195   :  { %v1331_v32 = vadd.f32 %v1299_v50, %v1269_v35  ;;  %v893_v35 = vadd.f32 %v863_v41, %v832_v21  ;;  %v1051_v50 = vadd.f32 %v1019_v6, %v986_v34  ;;  %v1117_v45 = vadd.f32 %v1085_v26, %v1052_v16 }
 0x196   :  { %v492_v31 = vpop.f32.mrf.mxu1  ;;  %v1364_v37 = vmax.f32 %v1332_v46, 0.0  ;;  %v624_v46 = vrot.slane %v5693_v22, 7  ;;  %v834_v10 = vmul.f32 %v5453_v39, %v5638_v58 }
 0x197   :  { %v559_v5 = vmax.f32 %v492_v31, 0.0  ;;  %v1363_v14 = vmax.f32 %v1331_v32, 0.0  ;;  %v1116_v16 = vadd.f32 %v1084_v29, %v1051_v50 }
 0x198   :  { %v1396_v57 = vmin.f32 %v1364_v37, 6.0 }
 0x199   :  { %v5703_v3 = vmin.f32 %v559_v5, 6.0  ;;  %v1395_v19 = vmin.f32 %v1363_v14, 6.0 }
 0x19b   :  { %v640_v32 = vrot.slane %v5703_v3, 7  ;;  %v705_v31 = vrot.slane %v5703_v3, 1  ;;  %v1425_v37 = vpack.c.bf16 %v1396_v57, %v1395_v19  ;;  %v1181_v6 = vmul.f32 %v5474_v59, %v5703_v3 }
 0x19c   :  { %v1180_v19 = vmul.f32 %v5474_v59, %v5693_v22  ;;  %v376_v4 = vpop.f32.mrf.mxu3 }
 0x19d   :  { %v5717_v27 = vsel %vm652_vm0, %v624_v46, %v640_v32  ;;  %v673_v21 = vsel %vm652_vm0, %v640_v32, %v624_v46  ;;  %v5723_v34 = vsel %vm717_vm1, %v689_v43, %v705_v31  ;;  %v738_v5 = vsel %vm717_vm1, %v705_v31, %v689_v43 }
 0x19e   :  { %v495_v14 = vpop.f32.mrf.mxu1  ;;  %v5730_v11 = vsel %vm750_vm2, %v5723_v34, %v673_v21  ;;  %v5735_v41 = vsel %vm789_vm3, %v5717_v27, %v738_v5  ;;  %v1150_v57 = vmul.f32 %v5481_v62, %v5717_v27  ;;  %v954_v43 = vadd.f32 %v924_v47, %v893_v35 }
 0x19f   :  { %1521 = vmatmul.bf16.gmra.mxu2 %v1425_v37  ;;  %v1149_v26 = vmul.f32 %v5481_v62, %v5730_v11  ;;  %v1242_v46 = vmul.f32 %v5483_v1, %v5735_v41  ;;  %v953_v31 = vadd.f32 %v923_v51, %v892_v2  ;;  %v1241_v5 = vmul.f32 %v5483_v1, %v5723_v34 }
 0x1a0   :  { %v1211_v32 = vadd.f32 %v1181_v6, %v1150_v57  ;;  %v1302_v37 = vadd.f32 %v1117_v45, %v954_v43  ;;  %v560_v50 = vmax.f32 %v495_v14, 0.0  ;;  %v989_v35 = vmul.f32 %v5434_v28, %v5717_v27 }
 0x1a1   :  { %534 = vmatmul.bf16.gmra.mxu1 %v394_v36  ;;  %v1210_v21 = vadd.f32 %v1180_v19, %v1149_v26  ;;  %v1301_v42 = vadd.f32 %v1116_v16, %v953_v31  ;;  %v5756_v36 = vadd.f32 %v5330_v53, %v373_v52  ;;  %v833_v51 = vmul.f32 %v5453_v39, %v5651_v20 }
 0x1a2   :  { %v1272_v38 = vadd.f32 %v1242_v46, %v1211_v32  ;;  %v864_v47 = vmul.f32 %v5442_v33, %v5616_v61  ;;  %v1022_v57 = vmul.f32 %v5455_v40, %v5703_v3  ;;  %v5768_v52 = vmin.f32 %v560_v50, 6.0 }
 0x1a3   :  { %v1271_v29 = vadd.f32 %v1241_v5, %v1210_v21  ;;  %9910 = vst [vmem:[#allocation42_spill] sm:$0xff] %v5756_v36  ;;  %v865_v20 = vmul.f32 %v5442_v33, %v5626_v15  ;;  %v1087_v58 = vmul.f32 %v5464_v49, %v5735_v41  ;;  %v395_v26 = vpack.c.bf16 %v5756_v36, %v5751_v44  ;;  %v4643_v44 = vld [vmem:[#allocation11 + $0x70] sm:$0xf] }
 0x1a4   :  { %v1334_v12 = vadd.f32 %v1302_v37, %v1272_v38  ;;  %v988_v38 = vmul.f32 %v5434_v28, %v5730_v11  ;;  %v1054_v61 = vadd.f32 %v1022_v57, %v989_v35  ;;  %v894_v43 = vadd.f32 %v864_v47, %v833_v51 }
 0x1a5   :  { %v1333_v2 = vadd.f32 %v1301_v42, %v1271_v29  ;;  %v895_v32 = vadd.f32 %v865_v20, %v834_v10  ;;  %v925_v31 = vmul.f32 %v5462_v48, %v5644_v54  ;;  %v625_v21 = vrot.slane %v5768_v52, 7 }
 0x1a6   :  { %v497_v45 = vpop.f32.mrf.mxu1  ;;  %v1366_v14 = vmax.f32 %v1334_v12, 0.0  ;;  %v1021_v12 = vmul.f32 %v5455_v40, %v5693_v22  ;;  %v690_v5 = vrot.slane %v5768_v52, 1  ;;  %v926_v35 = vmul.f32 %v5462_v48, %v5656_v60  ;;  %v378_v60 = vpop.f32.mrf.mxu3 }
 0x1a7   :  { %v561_v42 = vmax.f32 %v497_v45, 0.0  ;;  %v1365_v6 = vmax.f32 %v1333_v2, 0.0  ;;  %v1086_v2 = vmul.f32 %v5464_v49, %v5723_v34  ;;  %v1119_v51 = vadd.f32 %v1087_v58, %v1054_v61 }
 0x1a8   :  { %v1398_v16 = vmin.f32 %v1366_v14, 6.0  ;;  %v1053_v15 = vadd.f32 %v1021_v12, %v988_v38  ;;  %v1182_v12 = vmul.f32 %v5474_v59, %v5768_v52  ;;  %v5823_v58 = vadd.f32 %v5330_v53, %v376_v4 }
 0x1a9   :  { %v5778_v19 = vmin.f32 %v561_v42, 6.0  ;;  %v1397_v46 = vmin.f32 %v1365_v6, 6.0 }
 0x1aa   :  { %v1118_v20 = vadd.f32 %v1086_v2, %v1053_v15  ;;  %9911 = vst [vmem:[#allocation43_spill] sm:$0xff] %v5823_v58 }
 0x1ab   :  { %v641_v37 = vrot.slane %v5778_v19, 7  ;;  %v706_v50 = vrot.slane %v5778_v19, 1  ;;  %v1426_v29 = vpack.c.bf16 %v1398_v16, %v1397_v46  ;;  %v1183_v6 = vmul.f32 %v5474_v59, %v5778_v19 }
 0x1ac   :  { %v956_v46 = vadd.f32 %v926_v35, %v895_v32 }
 0x1ad   :  { %v5792_v54 = vsel %vm652_vm0, %v625_v21, %v641_v37  ;;  %v674_v47 = vsel %vm652_vm0, %v641_v37, %v625_v21  ;;  %v5798_v45 = vsel %vm717_vm1, %v690_v5, %v706_v50  ;;  %v739_v14 = vsel %vm717_vm1, %v706_v50, %v690_v5 }
 0x1ae   :  { %v500_v10 = vpop.f32.mrf.mxu1  ;;  %v5805_v38 = vsel %vm750_vm2, %v5798_v45, %v674_v47  ;;  %v5810_v57 = vsel %vm789_vm3, %v5792_v54, %v739_v14  ;;  %v1152_v42 = vmul.f32 %v5481_v62, %v5792_v54  ;;  %v5826_v5 = vadd.f32 %v5330_v53, %v378_v60 }
 0x1af   :  { %1526 = vmatmul.bf16.gmra.mxu2 %v1426_v29  ;;  %v1151_v16 = vmul.f32 %v5481_v62, %v5805_v38  ;;  %v1244_v61 = vmul.f32 %v5483_v1, %v5810_v57  ;;  %v955_v37 = vadd.f32 %v925_v31, %v894_v43  ;;  %v1243_v50 = vmul.f32 %v5483_v1, %v5798_v45  ;;  %v4815_v43 = vld [vmem:[#allocation11 + $0x74] sm:$0xf]  ;;  %v4645_v31 = vld [vmem:[#allocation11 + $0x78] sm:$0xf0] }
 0x1b0   :  { %v1213_v21 = vadd.f32 %v1183_v6, %v1152_v42  ;;  %9912 = vst [vmem:[#allocation44_spill] sm:$0xff] %v5826_v5  ;;  %v562_v29 = vmax.f32 %v500_v10, 0.0  ;;  %v1304_v47 = vadd.f32 %v1119_v51, %v956_v46  ;;  %v990_v32 = vmul.f32 %v5434_v28, %v5805_v38 }
 0x1b1   :  { %539 = vmatmul.bf16.gmra.mxu1 %v395_v26  ;;  %v1212_v15 = vadd.f32 %v1182_v12, %v1151_v16  ;;  %v1303_v36 = vadd.f32 %v1118_v20, %v955_v37  ;;  %v991_v53 = vmul.f32 %v5434_v28, %v5792_v54  ;;  %v4644_v26 = vor.u32 %v4816_v13, %v4643_v44 }
 0x1b2   :  { %v1274_v2 = vadd.f32 %v1244_v61, %v1213_v21  ;;  %v396_v35 = vpack.c.bf16 %v5826_v5, %v5823_v58  ;;  %v835_v51 = vmul.f32 %v5453_v39, %v5730_v11  ;;  %v4648_v60 = vor.u32 %v4815_v43, %v4645_v31  ;;  %v4814_v43 = vld [vmem:[#allocation11 + $0x64] sm:$0xf0] }
 0x1b3   :  { %v1273_v14 = vadd.f32 %v1243_v50, %v1212_v15  ;;  %v5838_v42 = vmin.f32 %v562_v29, 6.0  ;;  %v1023_v16 = vmul.f32 %v5455_v40, %v5768_v52  ;;  %v1024_v13 = vmul.f32 %v5455_v40, %v5778_v19  ;;  %1736 = vmatpush.bf16.msrb.mxu3 %v4644_v26 }
 0x1b4   :  { %v1336_v4 = vadd.f32 %v1304_v47, %v1274_v2  ;;  %v866_v11 = vmul.f32 %v5442_v33, %v5693_v22  ;;  %1825 = vmatpush.bf16.msrb.mxu0 %v4648_v60  ;;  %v1089_v37 = vmul.f32 %v5464_v49, %v5810_v57  ;;  %v867_v29 = vmul.f32 %v5442_v33, %v5703_v3  ;;  %v4635_v3 = vld [vmem:[#allocation11 + $0x60] sm:$0xf] }
 0x1b5   :  { %v1335_v10 = vadd.f32 %v1303_v36, %v1273_v14  ;;  %v836_v36 = vmul.f32 %v5453_v39, %v5717_v27  ;;  %v1055_v46 = vadd.f32 %v1023_v16, %v990_v32  ;;  %v1056_v21 = vadd.f32 %v1024_v13, %v991_v53 }
 0x1b6   :  { %v502_v6 = vpop.f32.mrf.mxu1  ;;  %v1368_v20 = vmax.f32 %v1336_v4, 0.0  ;;  %v927_v2 = vmul.f32 %v5462_v48, %v5723_v34  ;;  %v626_v27 = vrot.slane %v5838_v42, 7  ;;  %v691_v22 = vrot.slane %v5838_v42, 1 }
 0x1b7   :  { %v563_v44 = vmax.f32 %v502_v6, 0.0  ;;  %v1367_v12 = vmax.f32 %v1335_v10, 0.0  ;;  %v896_v47 = vadd.f32 %v866_v11, %v835_v51  ;;  %v1088_v14 = vmul.f32 %v5464_v49, %v5798_v45  ;;  %v4813_v6 = vld [vmem:[#allocation11 + $0x64] sm:$0xf] }
 0x1b8   :  { %v1400_v61 = vmin.f32 %v1368_v20, 6.0  ;;  %v897_v53 = vadd.f32 %v867_v29, %v836_v36  ;;  %v928_v26 = vmul.f32 %v5462_v48, %v5735_v41  ;;  %v1121_v10 = vadd.f32 %v1089_v37, %v1056_v21  ;;  %v4637_v20 = vld [vmem:[#allocation11 + $0x68] sm:$0xf0] }
 0x1b9   :  { %v5850_v15 = vmin.f32 %v563_v44, 6.0  ;;  %v1399_v50 = vmin.f32 %v1367_v12, 6.0  ;;  %v1120_v34 = vadd.f32 %v1088_v14, %v1055_v46  ;;  %v4636_v60 = vor.u32 %v4814_v43, %v4635_v3 }
 0x1ba   :  { %v1184_v21 = vmul.f32 %v5474_v59, %v5838_v42  ;;  %v958_v29 = vadd.f32 %v928_v26, %v897_v53  ;;  %v4811_v53 = vld [vmem:[#allocation11 + $0x54] sm:$0xf]  ;;  %v4629_v26 = vld [vmem:[#allocation11 + $0x58] sm:$0xf0] }
 0x1bb   :  { %v642_v4 = vrot.slane %v5850_v15, 7  ;;  %v707_v32 = vrot.slane %v5850_v15, 1  ;;  %v1427_v31 = vpack.c.bf16 %v1400_v61, %v1399_v50  ;;  %v1185_v61 = vmul.f32 %v5474_v59, %v5850_v15  ;;  %1737 = vmatpush.bf16.msrb.mxu3 %v4636_v60 }
 0x1bc   :  { %v4640_v50 = vor.u32 %v4813_v6, %v4637_v20  ;;  %v1306_v43 = vadd.f32 %v1121_v10, %v958_v29  ;;  %v4632_v20 = vor.u32 %v4811_v53, %v4629_v26 }
 0x1bd   :  { %v5866_v51 = vsel %vm652_vm0, %v626_v27, %v642_v4  ;;  %v675_v16 = vsel %vm652_vm0, %v642_v4, %v626_v27  ;;  %v5872_v13 = vsel %vm717_vm1, %v691_v22, %v707_v32  ;;  %v740_v41 = vsel %vm717_vm1, %v707_v32, %v691_v22 }
 0x1be   :  { %v505_v44 = vpop.f32.mrf.mxu1  ;;  %v5879_v12 = vsel %vm750_vm2, %v5872_v13, %v675_v16  ;;  %v5884_v36 = vsel %vm789_vm3, %v5866_v51, %v740_v41  ;;  %v1154_v11 = vmul.f32 %v5481_v62, %v5866_v51  ;;  %v957_v22 = vadd.f32 %v927_v2, %v896_v47  ;;  %1826 = vmatpush.bf16.msrb.mxu0 %v4640_v50  ;;  %v4627_v16 = vld [vmem:[#allocation11 + $0x50] sm:$0xf]  ;;  %v4812_v41 = vld [vmem:[#allocation11 + $0x54] sm:$0xf0] }
 0x1bf   :  { %1531 = vmatmul.bf16.gmra.mxu2 %v1427_v31  ;;  %v1153_v46 = vmul.f32 %v5481_v62, %v5879_v12  ;;  %v1246_v37 = vmul.f32 %v5483_v1, %v5884_v36  ;;  %v1245_v4 = vmul.f32 %v5483_v1, %v5872_v13  ;;  %v564_v32 = vmax.f32 %v505_v44, 0.0 }
 0x1c0   :  { %v1215_v27 = vadd.f32 %v1185_v61, %v1154_v11  ;;  %v1305_v60 = vadd.f32 %v1120_v34, %v957_v22  ;;  %v993_v6 = vmul.f32 %v5434_v28, %v5866_v51  ;;  %v837_v2 = vmul.f32 %v5453_v39, %v5805_v38 }
 0x1c1   :  { %544 = vmatmul.bf16.gmra.mxu1 %v396_v35  ;;  %v1214_v14 = vadd.f32 %v1184_v21, %v1153_v46  ;;  %v4628_v47 = vor.u32 %v4812_v41, %v4627_v16  ;;  %v5902_v11 = vmin.f32 %v564_v32, 6.0  ;;  %v838_v34 = vmul.f32 %v5453_v39, %v5792_v54  ;;  %v4619_v41 = vld [vmem:[#allocation11 + $0x40] sm:$0xf] }
 0x1c2   :  { %v1276_v3 = vadd.f32 %v1246_v37, %v1215_v27  ;;  %v1026_v61 = vmul.f32 %v5455_v40, %v5850_v15  ;;  %v868_v37 = vmul.f32 %v5442_v33, %v5768_v52  ;;  %v869_v38 = vmul.f32 %v5442_v33, %v5778_v19  ;;  %1827 = vmatpush.bf16.msrb.mxu0 %v4632_v20 }
 0x1c3   :  { %v1275_v31 = vadd.f32 %v1245_v4, %v1214_v14  ;;  %1738 = vmatpush.bf16.msrb.mxu3 %v4628_v47  ;;  %v1091_v54 = vmul.f32 %v5464_v49, %v5884_v36  ;;  %v929_v52 = vmul.f32 %v5462_v48, %v5798_v45  ;;  %v627_v4 = vrot.slane %v5902_v11, 7  ;;  %v4810_v45 = vld [vmem:[#allocation11 + $0x44] sm:$0xf0]  ;;  %v4621_v47 = vld [vmem:[#allocation11 + $0x48] sm:$0xf0] }
 0x1c4   :  { %v1338_v5 = vadd.f32 %v1306_v43, %v1276_v3  ;;  %v1058_v29 = vadd.f32 %v1026_v61, %v993_v6  ;;  %v898_v14 = vadd.f32 %v868_v37, %v837_v2  ;;  %v692_v19 = vrot.slane %v5902_v11, 1  ;;  %v4809_v2 = vld [vmem:[#allocation11 + $0x44] sm:$0xf] }
 0x1c5   :  { %v1337_v35 = vadd.f32 %v1305_v60, %v1275_v31  ;;  %v899_v32 = vadd.f32 %v869_v38, %v838_v34  ;;  %v1025_v3 = vmul.f32 %v5455_v40, %v5838_v42  ;;  %v930_v60 = vmul.f32 %v5462_v48, %v5810_v57 }
 0x1c6   :  { %v507_v44 = vpop.f32.mrf.mxu1  ;;  %v1370_v10 = vmax.f32 %v1338_v5, 0.0  ;;  %v992_v5 = vmul.f32 %v5434_v28, %v5879_v12  ;;  %v1090_v16 = vmul.f32 %v5464_v49, %v5872_v13  ;;  %v1123_v26 = vadd.f32 %v1091_v54, %v1058_v29 }
 0x1c7   :  { %v565_v46 = vmax.f32 %v507_v44, 0.0  ;;  %v1369_v21 = vmax.f32 %v1337_v35, 0.0  ;;  %v4620_v35 = vor.u32 %v4810_v45, %v4619_v41  ;;  %v4624_v29 = vor.u32 %v4809_v2, %v4621_v47 }
 0x1c8   :  { %v1402_v50 = vmin.f32 %v1370_v10, 6.0  ;;  %v1057_v53 = vadd.f32 %v1025_v3, %v992_v5  ;;  %v960_v54 = vadd.f32 %v930_v60, %v899_v32  ;;  %v4807_v32 = vld [vmem:[#allocation11 + $0x34] sm:$0xf]  ;;  %v4613_v60 = vld [vmem:[#allocation11 + $0x38] sm:$0xf0] }
 0x1c9   :  { %v5916_v27 = vmin.f32 %v565_v46, 6.0  ;;  %v1401_v22 = vmin.f32 %v1369_v21, 6.0  ;;  %1739 = vmatpush.bf16.msrb.mxu3 %v4620_v35  ;;  %1828 = vmatpush.bf16.msrb.mxu0 %v4624_v29  ;;  %v4808_v35 = vld [vmem:[#allocation11 + $0x34] sm:$0xf0] }
 0x1ca   :  { %v1308_v45 = vadd.f32 %v1123_v26, %v960_v54 }
 0x1cb   :  { %v643_v43 = vrot.slane %v5916_v27, 7  ;;  %v708_v31 = vrot.slane %v5916_v27, 1  ;;  %v1428_v6 = vpack.c.bf16 %v1402_v50, %v1401_v22  ;;  %v1187_v37 = vmul.f32 %v5474_v59, %v5916_v27 }
 0x1cc   :  { %v1186_v50 = vmul.f32 %v5474_v59, %v5902_v11  ;;  %v1122_v22 = vadd.f32 %v1090_v16, %v1057_v53  ;;  %v4616_v53 = vor.u32 %v4807_v32, %v4613_v60 }
 0x1cd   :  { %v5932_v20 = vsel %vm652_vm0, %v627_v4, %v643_v43  ;;  %v676_v44 = vsel %vm652_vm0, %v643_v43, %v627_v4  ;;  %v5938_v57 = vsel %vm717_vm1, %v692_v19, %v708_v31  ;;  %v741_v10 = vsel %vm717_vm1, %v708_v31, %v692_v19 }
 0x1ce   :  { %v510_v34 = vpop.f32.mrf.mxu1  ;;  %v5945_v61 = vsel %vm750_vm2, %v5938_v57, %v676_v44  ;;  %v5950_v46 = vsel %vm789_vm3, %v5932_v20, %v741_v10  ;;  %v1156_v21 = vmul.f32 %v5481_v62, %v5932_v20  ;;  %v959_v19 = vadd.f32 %v929_v52, %v898_v14  ;;  %1829 = vmatpush.bf16.msrb.mxu0 %v4616_v53 }
 0x1cf   :  { %1536 = vmatmul.bf16.gmra.mxu2 %v1428_v6  ;;  %v1155_v38 = vmul.f32 %v5481_v62, %v5945_v61  ;;  %v1248_v5 = vmul.f32 %v5483_v1, %v5950_v46  ;;  %v566_v43 = vmax.f32 %v510_v34, 0.0  ;;  %v1247_v31 = vmul.f32 %v5483_v1, %v5938_v57  ;;  %v4611_v6 = vld [vmem:[#allocation11 + $0x30] sm:$0xf] }
 0x1d0   :  { %v1217_v4 = vadd.f32 %v1187_v37, %v1156_v21  ;;  %v1307_v10 = vadd.f32 %v1122_v22, %v959_v19  ;;  %v995_v2 = vmul.f32 %v5434_v28, %v5932_v20  ;;  %v839_v14 = vmul.f32 %v5453_v39, %v5879_v12 }
 0x1d1   :  { %v1216_v3 = vadd.f32 %v1186_v50, %v1155_v38  ;;  %v840_v52 = vmul.f32 %v5453_v39, %v5866_v51  ;;  %v4612_v16 = vor.u32 %v4808_v35, %v4611_v6  ;;  %v5970_v47 = vmin.f32 %v566_v43, 6.0 }
 0x1d2   :  { %v1278_v41 = vadd.f32 %v1248_v5, %v1217_v4  ;;  %v1028_v37 = vmul.f32 %v5455_v40, %v5916_v27  ;;  %v870_v50 = vmul.f32 %v5442_v33, %v5838_v42  ;;  %v871_v12 = vmul.f32 %v5442_v33, %v5850_v15 }
 0x1d3   :  { %v1277_v44 = vadd.f32 %v1247_v31, %v1216_v3  ;;  %v994_v51 = vmul.f32 %v5434_v28, %v5945_v61  ;;  %1740 = vmatpush.bf16.msrb.mxu3 %v4612_v16  ;;  %v931_v42 = vmul.f32 %v5462_v48, %v5872_v13  ;;  %v628_v15 = vrot.slane %v5970_v47, 7  ;;  %v4806_v13 = vld [vmem:[#allocation11 + $0x24] sm:$0xf0] }
 0x1d4   :  { %v1340_v58 = vadd.f32 %v1308_v45, %v1278_v41  ;;  %v1060_v54 = vadd.f32 %v1028_v37, %v995_v2  ;;  %v900_v4 = vadd.f32 %v870_v50, %v839_v14  ;;  %v901_v19 = vadd.f32 %v871_v12, %v840_v52  ;;  %v4805_v14 = vld [vmem:[#allocation11 + $0x24] sm:$0xf]  ;;  %v4605_v52 = vld [vmem:[#allocation11 + $0x28] sm:$0xf0] }
 0x1d5   :  { %v1339_v34 = vadd.f32 %v1307_v10, %v1277_v44  ;;  %v693_v3 = vrot.slane %v5970_v47, 1  ;;  %v1027_v31 = vmul.f32 %v5455_v40, %v5902_v11  ;;  %v932_v6 = vmul.f32 %v5462_v48, %v5884_v36  ;;  %v4603_v44 = vld [vmem:[#allocation11 + $0x20] sm:$0xf] }
 0x1d6   :  { %v512_v26 = vpop.f32.mrf.mxu1  ;;  %v1372_v21 = vmax.f32 %v1340_v58, 0.0  ;;  %v1093_v58 = vmul.f32 %v5464_v49, %v5950_v46  ;;  %v1092_v35 = vmul.f32 %v5464_v49, %v5938_v57  ;;  %v4604_v60 = vor.u32 %v4806_v13, %v4603_v44  ;;  %v4595_v13 = vld [vmem:[#allocation11 + $0x10] sm:$0xf] }
 0x1d7   :  { %v567_v38 = vmax.f32 %v512_v26, 0.0  ;;  %v1371_v5 = vmax.f32 %v1339_v34, 0.0  ;;  %v1059_v2 = vadd.f32 %v1027_v31, %v994_v51  ;;  %v1188_v51 = vmul.f32 %v5474_v59, %v5970_v47 }
 0x1d8   :  { %v1404_v29 = vmin.f32 %v1372_v21, 6.0  ;;  %v1125_v32 = vadd.f32 %v1093_v58, %v1060_v54  ;;  %1741 = vmatpush.bf16.msrb.mxu3 %v4604_v60  ;;  %v962_v54 = vadd.f32 %v932_v6, %v901_v19  ;;  %v4832_v19 = vld [vmem:[#allocation14 + $0x78] sm:$0xff] }
 0x1d9   :  { %v5982_v22 = vmin.f32 %v567_v38, 6.0  ;;  %v1403_v43 = vmin.f32 %v1371_v5, 6.0  ;;  %v1124_v58 = vadd.f32 %v1092_v35, %v1059_v2  ;;  %v4803_v6 = vld [vmem:[#allocation11 + $0x14] sm:$0xf]  ;;  %v4597_v35 = vld [vmem:[#allocation11 + $0x18] sm:$0xf0]  ;;  %3911 = vmatpush.bf16.msra.mxu2 %v4832_v19 }
 0x1da   :  { %v1310_v44 = vadd.f32 %v1125_v32, %v962_v54 }
 0x1db   :  { %v644_v41 = vrot.slane %v5982_v22, 7  ;;  %v709_v45 = vrot.slane %v5982_v22, 1  ;;  %v1429_v10 = vpack.c.bf16 %v1404_v29, %v1403_v43  ;;  %v1189_v50 = vmul.f32 %v5474_v59, %v5982_v22 }
 0x1dc   :  { %v4608_v29 = vor.u32 %v4805_v14, %v4605_v52  ;;  %v4600_v52 = vor.u32 %v4803_v6, %v4597_v35  ;;  %v1030_v32 = vmul.f32 %v5455_v40, %v5982_v22 }
 0x1dd   :  { %v5998_v16 = vsel %vm652_vm0, %v628_v15, %v644_v41  ;;  %v677_v53 = vsel %vm652_vm0, %v644_v41, %v628_v15  ;;  %v6004_v36 = vsel %vm717_vm1, %v693_v3, %v709_v45  ;;  %v742_v26 = vsel %vm717_vm1, %v709_v45, %v693_v3 }
 0x1de   :  { %v515_v34 = vpop.f32.mrf.mxu1  ;;  %v6011_v21 = vsel %vm750_vm2, %v6004_v36, %v677_v53  ;;  %v6016_v37 = vsel %vm789_vm3, %v5998_v16, %v742_v26  ;;  %v1158_v38 = vmul.f32 %v5481_v62, %v5998_v16  ;;  %v961_v3 = vadd.f32 %v931_v42, %v900_v4  ;;  %1830 = vmatpush.bf16.msrb.mxu0 %v4608_v29 }
 0x1df   :  { %1541 = vmatmul.bf16.gmra.mxu2 %v1429_v10  ;;  %v1157_v12 = vmul.f32 %v5481_v62, %v6011_v21  ;;  %v1250_v5 = vmul.f32 %v5483_v1, %v6016_v37  ;;  %v568_v31 = vmax.f32 %v515_v34, 0.0  ;;  %v1249_v41 = vmul.f32 %v5483_v1, %v6004_v36  ;;  %v4804_v10 = vld [vmem:[#allocation11 + $0x14] sm:$0xf0] }
 0x1e0   :  { %v1219_v15 = vadd.f32 %v1189_v50, %v1158_v38  ;;  %v1309_v53 = vadd.f32 %v1124_v58, %v961_v3  ;;  %v997_v14 = vmul.f32 %v5434_v28, %v5998_v16  ;;  %v841_v4 = vmul.f32 %v5453_v39, %v5945_v61 }
 0x1e1   :  { %v1218_v43 = vadd.f32 %v1188_v51, %v1157_v12  ;;  %v842_v42 = vmul.f32 %v5453_v39, %v5932_v20  ;;  %v4596_v2 = vor.u32 %v4804_v10, %v4595_v13  ;;  %v6038_v34 = vmin.f32 %v568_v31, 6.0 }
 0x1e2   :  { %v1280_v45 = vadd.f32 %v1250_v5, %v1219_v15  ;;  %v872_v51 = vmul.f32 %v5442_v33, %v5902_v11  ;;  %v873_v61 = vmul.f32 %v5442_v33, %v5916_v27  ;;  %v996_v20 = vmul.f32 %v5434_v28, %v6011_v21  ;;  %1831 = vmatpush.bf16.msrb.mxu0 %v4600_v52 }
 0x1e3   :  { %v1279_v60 = vadd.f32 %v1249_v41, %v1218_v43  ;;  %1742 = vmatpush.bf16.msrb.mxu3 %v4596_v2  ;;  %v1062_v58 = vadd.f32 %v1030_v32, %v997_v14  ;;  %v1095_v15 = vmul.f32 %v5464_v49, %v6016_v37  ;;  %v1029_v3 = vmul.f32 %v5455_v40, %v5970_v47 }
 0x1e4   :  { %v1342_v26 = vadd.f32 %v1310_v44, %v1280_v45  ;;  %v902_v11 = vadd.f32 %v872_v51, %v841_v4  ;;  %v629_v27 = vrot.slane %v6038_v34, 7  ;;  %v694_v31 = vrot.slane %v6038_v34, 1  ;;  %v4824_v51 = vld [vmem:[#allocation14 + $0x38] sm:$0xff] }
 0x1e5   :  { %v1341_v50 = vadd.f32 %v1309_v53, %v1279_v60  ;;  %v903_v45 = vadd.f32 %v873_v61, %v842_v42  ;;  %v934_v10 = vmul.f32 %v5462_v48, %v5950_v46  ;;  %v1094_v60 = vmul.f32 %v5464_v49, %v6004_v36  ;;  %v4587_v53 = vld [vmem:[#allocation11] sm:$0xf]  ;;  %v4801_v61 = vld [vmem:[#allocation11 + $0x4] sm:$0xf]  ;;  %3822 = vmatpush.bf16.msra.mxu1 %v4824_v51 }
 0x1e6   :  { %v517_v38 = vpop.f32.mrf.mxu1  ;;  %v1374_v12 = vmax.f32 %v1342_v26, 0.0  ;;  %v4802_v26 = vld [vmem:[#allocation11 + $0x4] sm:$0xf0]  ;;  %v1061_v19 = vadd.f32 %v1029_v3, %v996_v20  ;;  %v1127_v6 = vadd.f32 %v1095_v15, %v1062_v58  ;;  %v933_v15 = vmul.f32 %v5462_v48, %v5938_v57 }
 0x1e7   :  { %v569_v5 = vmax.f32 %v517_v38, 0.0  ;;  %v1373_v29 = vmax.f32 %v1341_v50, 0.0  ;;  %v4588_v35 = vor.u32 %v4802_v26, %v4587_v53  ;;  %v964_v3 = vadd.f32 %v934_v10, %v903_v45  ;;  %v4848_v45 = vld [vmem:[#allocation16 + $0x78] sm:$0xff] }
 0x1e8   :  { %v1406_v54 = vmin.f32 %v1374_v12, 6.0  ;;  %v874_v10 = vmul.f32 %v5442_v33, %v5970_v47 }
 0x1e9   :  { %v6050_v43 = vmin.f32 %v569_v5, 6.0  ;;  %v1405_v41 = vmin.f32 %v1373_v29, 6.0  ;;  %1743 = vmatpush.bf16.msrb.mxu3 %v4588_v35  ;;  %v4589_v5 = vld [vmem:[#allocation11 + $0x8] sm:$0xf0]  ;;  %v1190_v29 = vmul.f32 %v5474_v59, %v6038_v34  ;;  %v1312_v26 = vadd.f32 %v1127_v6, %v964_v3  ;;  %v4840_v35 = vld [vmem:[#allocation16 + $0x38] sm:$0xff] }
 0x1ea   :  { %v4592_v58 = vor.u32 %v4801_v61, %v4589_v5 }
 0x1eb   :  { %v645_v44 = vrot.slane %v6050_v43, 7  ;;  %v710_v13 = vrot.slane %v6050_v43, 1  ;;  %v1430_v14 = vpack.c.bf16 %v1406_v54, %v1405_v41  ;;  %v1191_v12 = vmul.f32 %v5474_v59, %v6050_v43 }
 0x1ec   :  { %1832 = vmatpush.bf16.msrb.mxu0 %v4592_v58  ;;  %v1031_v58 = vmul.f32 %v5455_v40, %v6038_v34 }
 0x1ed   :  { %v6062_v4 = vsel %vm652_vm0, %v629_v27, %v645_v44  ;;  %v678_v42 = vsel %vm652_vm0, %v645_v44, %v629_v27  ;;  %v6068_v2 = vsel %vm717_vm1, %v694_v31, %v710_v13  ;;  %v743_v46 = vsel %vm717_vm1, %v710_v13, %v694_v31  ;;  %4128 = vmatpush.bf16.msra.mxu3 %v4840_v35 }
 0x1ee   :  { %v520_v52 = vpop.f32.mrf.mxu1  ;;  %v6075_v32 = vsel %vm750_vm2, %v6068_v2, %v678_v42  ;;  %v6080_v38 = vsel %vm789_vm3, %v6062_v4, %v743_v46  ;;  %v1160_v50 = vmul.f32 %v5481_v62, %v6062_v4  ;;  %v1126_v27 = vadd.f32 %v1094_v60, %v1061_v19 }
 0x1ef   :  { %1546 = vmatmul.bf16.gmra.mxu2 %v1430_v14  ;;  %v1159_v20 = vmul.f32 %v5481_v62, %v6075_v32  ;;  %v1252_v54 = vmul.f32 %v5483_v1, %v6080_v38  ;;  %v963_v44 = vadd.f32 %v933_v15, %v902_v11  ;;  %v1251_v13 = vmul.f32 %v5483_v1, %v6068_v2 }
 0x1f0   :  { %v1221_v31 = vadd.f32 %v1191_v12, %v1160_v50  ;;  %v570_v14 = vmax.f32 %v520_v52, 0.0  ;;  %v999_v57 = vmul.f32 %v5434_v28, %v6062_v4  ;;  %v843_v11 = vmul.f32 %v5453_v39, %v6011_v21  ;;  %4217 = vmatpush.bf16.msra.mxu0 %v4848_v45 }
 0x1f1   :  { %v1220_v41 = vadd.f32 %v1190_v29, %v1159_v20  ;;  %v1311_v46 = vadd.f32 %v1126_v27, %v963_v44  ;;  %v1032_v60 = vmul.f32 %v5455_v40, %v6050_v43  ;;  %v844_v50 = vmul.f32 %v5453_v39, %v5998_v16 }
 0x1f2   :  { %v1282_v53 = vadd.f32 %v1252_v54, %v1221_v31  ;;  %v875_v12 = vmul.f32 %v5442_v33, %v5982_v22  ;;  %v6108_v51 = vmin.f32 %v570_v14, 6.0  ;;  %v998_v21 = vmul.f32 %v5434_v28, %v6075_v32 }
 0x1f3   :  { %v1281_v42 = vadd.f32 %v1251_v13, %v1220_v41  ;;  %v1064_v29 = vadd.f32 %v1032_v60, %v999_v57  ;;  %v1097_v54 = vmul.f32 %v5464_v49, %v6080_v38  ;;  %v904_v3 = vadd.f32 %v874_v10, %v843_v11 }
 0x1f4   :  { %v1344_v61 = vadd.f32 %v1312_v26, %v1282_v53  ;;  %v905_v22 = vadd.f32 %v875_v12, %v844_v50  ;;  %v936_v27 = vmul.f32 %v5462_v48, %v6016_v37  ;;  %v630_v31 = vrot.slane %v6108_v51, 7 }
 0x1f5   :  { %v1343_v6 = vadd.f32 %v1311_v46, %v1281_v42  ;;  %v695_v41 = vrot.slane %v6108_v51, 1  ;;  %v1063_v26 = vadd.f32 %v1031_v58, %v998_v21  ;;  %v1096_v14 = vmul.f32 %v5464_v49, %v6068_v2 }
 0x1f6   :  { %v522_v19 = vpop.f32.mrf.mxu1  ;;  %v1376_v52 = vmax.f32 %v1344_v61, 0.0  ;;  %v1129_v35 = vadd.f32 %v1097_v54, %v1064_v29  ;;  %v966_v12 = vadd.f32 %v936_v27, %v905_v22  ;;  %v846_v27 = vmul.f32 %v5453_v39, %v6062_v4 }
 0x1f7   :  { %v571_v47 = vmax.f32 %v522_v19, 0.0  ;;  %v1375_v5 = vmax.f32 %v1343_v6, 0.0  ;;  %v935_v19 = vmul.f32 %v5462_v48, %v6004_v36 }
 0x1f8   :  { %v1408_v20 = vmin.f32 %v1376_v52, 6.0  ;;  %v1192_v52 = vmul.f32 %v5474_v59, %v6108_v51 }
 0x1f9   :  { %v6116_v16 = vmin.f32 %v571_v47, 6.0  ;;  %v1407_v15 = vmin.f32 %v1375_v5, 6.0  ;;  %v1128_v47 = vadd.f32 %v1096_v14, %v1063_v26  ;;  %v965_v5 = vadd.f32 %v935_v19, %v904_v3 }
 0x1fa   :  { %v845_v3 = vmul.f32 %v5453_v39, %v6075_v32  ;;  %v1033_v32 = vmul.f32 %v5455_v40, %v6108_v51 }
 0x1fb   :  { %v646_v44 = vrot.slane %v6116_v16, 7  ;;  %v711_v13 = vrot.slane %v6116_v16, 1  ;;  %v1431_v53 = vpack.c.bf16 %v1408_v20, %v1407_v15  ;;  %v1193_v60 = vmul.f32 %v5474_v59, %v6116_v16 }
 0x1fc   :  { %v1314_v15 = vadd.f32 %v1129_v35, %v966_v12  ;;  %v1034_v22 = vmul.f32 %v5455_v40, %v6116_v16 }
 0x1fd   :  { %v6128_v42 = vsel %vm652_vm0, %v630_v31, %v646_v44  ;;  %v679_v37 = vsel %vm652_vm0, %v646_v44, %v630_v31  ;;  %v6134_v46 = vsel %vm717_vm1, %v695_v41, %v711_v13  ;;  %v744_v61 = vsel %vm717_vm1, %v711_v13, %v695_v41 }
 0x1fe   :  { %v525_v57 = vpop.f32.mrf.mxu1  ;;  %v6141_v45 = vsel %vm750_vm2, %v6134_v46, %v679_v37  ;;  %v6146_v10 = vsel %vm789_vm3, %v6128_v42, %v744_v61  ;;  %v1162_v11 = vmul.f32 %v5481_v62, %v6128_v42  ;;  %v1253_v58 = vmul.f32 %v5483_v1, %v6134_v46 }
 0x1ff   :  { %1551 = vmatmul.bf16.gmra.mxu2 %v1431_v53  ;;  %v1161_v6 = vmul.f32 %v5481_v62, %v6141_v45  ;;  %v1254_v50 = vmul.f32 %v5483_v1, %v6146_v10  ;;  %v572_v29 = vmax.f32 %v525_v57, 0.0  ;;  %v1313_v41 = vadd.f32 %v1128_v47, %v965_v5  ;;  %v4831_v53 = vld [vmem:[#allocation14 + $0x70] sm:$0xff] }
 0x200   :  { %v1223_v21 = vadd.f32 %v1193_v60, %v1162_v11  ;;  %v1001_v13 = vmul.f32 %v5434_v28, %v6128_v42  ;;  %v1000_v61 = vmul.f32 %v5434_v28, %v6141_v45  ;;  %3912 = vmatpush.bf16.msra.mxu2 %v4831_v53  ;;  %v876_v57 = vmul.f32 %v5442_v33, %v6038_v34  ;;  %v4823_v53 = vld [vmem:[#allocation14 + $0x30] sm:$0xff] }
 0x201   :  { %v1222_v20 = vadd.f32 %v1192_v52, %v1161_v6  ;;  %v6170_v26 = vmin.f32 %v572_v29, 6.0  ;;  %v877_v11 = vmul.f32 %v5442_v33, %v6050_v43  ;;  %v1099_v52 = vmul.f32 %v5464_v49, %v6146_v10  ;;  %3823 = vmatpush.bf16.msra.mxu1 %v4823_v53 }
 0x202   :  { %v1512_v54 = vpop.f32.mrf.mxu2  ;;  %v1284_v36 = vadd.f32 %v1254_v50, %v1223_v21  ;;  %v1066_v6 = vadd.f32 %v1034_v22, %v1001_v13  ;;  %v906_v12 = vadd.f32 %v876_v57, %v845_v3  ;;  %v938_v34 = vmul.f32 %v5462_v48, %v6080_v38 }
 0x203   :  { %v1283_v31 = vadd.f32 %v1253_v58, %v1222_v20  ;;  %v907_v47 = vadd.f32 %v877_v11, %v846_v27  ;;  %v631_v21 = vrot.slane %v6170_v26, 7  ;;  %v1065_v20 = vadd.f32 %v1033_v32, %v1000_v61 }
 0x204   :  { %v1346_v44 = vadd.f32 %v1314_v15, %v1284_v36  ;;  %v1098_v29 = vmul.f32 %v5464_v49, %v6134_v46  ;;  %v696_v58 = vrot.slane %v6170_v26, 1  ;;  %v6191_v36 = vadd.f32 %v1512_v54, %v5333_v55 }
 0x205   :  { %v1345_v35 = vadd.f32 %v1313_v41, %v1283_v31  ;;  %v937_v61 = vmul.f32 %v5462_v48, %v6068_v2  ;;  %v1194_v11 = vmul.f32 %v5474_v59, %v6170_v26 }
 0x206   :  { %v527_v14 = vpop.f32.mrf.mxu1  ;;  %v1378_v37 = vmax.f32 %v1346_v44, 0.0  ;;  %9913 = vst [vmem:[#allocation45_spill] sm:$0xff] %v6191_v36  ;;  %v1131_v44 = vadd.f32 %v1099_v52, %v1066_v6 }
 0x207   :  { %v573_v60 = vmax.f32 %v527_v14, 0.0  ;;  %v1377_v4 = vmax.f32 %v1345_v35, 0.0  ;;  %v967_v6 = vadd.f32 %v937_v61, %v906_v12  ;;  %v847_v12 = vmul.f32 %v5453_v39, %v6141_v45 }
 0x208   :  { %v1410_v19 = vmin.f32 %v1378_v37, 6.0  ;;  %v1035_v45 = vmul.f32 %v5455_v40, %v6170_v26 }
 0x209   :  { %v6182_v50 = vmin.f32 %v573_v60, 6.0  ;;  %v1409_v5 = vmin.f32 %v1377_v4, 6.0  ;;  %v968_v60 = vadd.f32 %v938_v34, %v907_v47  ;;  %v1130_v4 = vadd.f32 %v1098_v29, %v1065_v20 }
 0x20a   :  { %v1514_v43 = vpop.f32.mrf.mxu2  ;;  %v848_v34 = vmul.f32 %v5453_v39, %v6128_v42 }
 0x20b   :  { %v647_v15 = vrot.slane %v6182_v50, 7  ;;  %v712_v31 = vrot.slane %v6182_v50, 1  ;;  %v6196_v41 = vadd.f32 %v1514_v43, %v5336_v56  ;;  %v1432_v38 = vpack.c.bf16 %v1410_v19, %v1409_v5 }
 0x20c   :  { %v1195_v13 = vmul.f32 %v5474_v59, %v6182_v50  ;;  %v1036_v47 = vmul.f32 %v5455_v40, %v6182_v50 }
 0x20d   :  { %9914 = vst [vmem:[#allocation46_spill] sm:$0xff] %v6196_v41  ;;  %v6202_v22 = vsel %vm652_vm0, %v631_v21, %v647_v15  ;;  %v680_v55 = vsel %vm652_vm0, %v647_v15, %v631_v21  ;;  %v6208_v54 = vsel %vm717_vm1, %v696_v58, %v712_v31  ;;  %v745_v56 = vsel %vm717_vm1, %v712_v31, %v696_v58  ;;  %v4839_v15 = vld [vmem:[#allocation16 + $0x30] sm:$0xff] }
 0x20e   :  { %v1624_v3 = vpack.c.bf16 %v6196_v41, %v6191_v36  ;;  %v530_v27 = vpop.f32.mrf.mxu1  ;;  %v6217_v14 = vsel %vm750_vm2, %v6208_v54, %v680_v55  ;;  %v6222_v35 = vsel %vm789_vm3, %v6202_v22, %v745_v56  ;;  %v1164_v37 = vmul.f32 %v5481_v62, %v6202_v22  ;;  %v4847_v56 = vld [vmem:[#allocation16 + $0x70] sm:$0xff]  ;;  %4129 = vmatpush.bf16.msra.mxu3 %v4839_v15 }
 0x20f   :  { %1556 = vmatmul.bf16.gmra.mxu2 %v1432_v38  ;;  %v1163_v57 = vmul.f32 %v5481_v62, %v6217_v14  ;;  %v1256_v32 = vmul.f32 %v5483_v1, %v6222_v35  ;;  %v574_v21 = vmax.f32 %v530_v27, 0.0  ;;  %v1255_v2 = vmul.f32 %v5483_v1, %v6208_v54  ;;  %4218 = vmatpush.bf16.msra.mxu0 %v4847_v56 }
 0x210   :  { %1744 = vmatmul.bf16.vlgmr.msrb.gmra.mxu3 %v1624_v3  ;;  %1833 = vmatmul.bf16.vlgmr.msrb.gmra.mxu0 %v1624_v3  ;;  %v1225_v19 = vadd.f32 %v1195_v13, %v1164_v37  ;;  %v1316_v58 = vadd.f32 %v1131_v44, %v968_v60  ;;  %v1315_v38 = vadd.f32 %v1130_v4, %v967_v6 }
 0x211   :  { %v1224_v52 = vadd.f32 %v1194_v11, %v1163_v57  ;;  %v1003_v55 = vmul.f32 %v5434_v28, %v6202_v22  ;;  %v6244_v20 = vmin.f32 %v574_v21, 6.0  ;;  %v1002_v3 = vmul.f32 %v5434_v28, %v6217_v14 }
 0x212   :  { %v1517_v43 = vpop.f32.mrf.mxu2  ;;  %v1286_v5 = vadd.f32 %v1256_v32, %v1225_v19  ;;  %v878_v27 = vmul.f32 %v5442_v33, %v6108_v51  ;;  %v879_v37 = vmul.f32 %v5442_v33, %v6116_v16  ;;  %v1101_v32 = vmul.f32 %v5464_v49, %v6222_v35 }
 0x213   :  { %v1285_v31 = vadd.f32 %v1255_v2, %v1224_v52  ;;  %v1068_v11 = vadd.f32 %v1036_v47, %v1003_v55  ;;  %v940_v51 = vmul.f32 %v5462_v48, %v6146_v10  ;;  %v632_v6 = vrot.slane %v6244_v20, 7 }
 0x214   :  { %v1348_v53 = vadd.f32 %v1316_v58, %v1286_v5  ;;  %v908_v4 = vadd.f32 %v878_v27, %v847_v12  ;;  %v909_v19 = vadd.f32 %v879_v37, %v848_v34  ;;  %v1067_v21 = vadd.f32 %v1035_v45, %v1002_v3 }
 0x215   :  { %v1347_v44 = vadd.f32 %v1315_v38, %v1285_v31  ;;  %v1100_v2 = vmul.f32 %v5464_v49, %v6208_v54  ;;  %v697_v5 = vrot.slane %v6244_v20, 1  ;;  %v6265_v58 = vadd.f32 %v1517_v43, %v5341_v63 }
 0x216   :  { %v532_v29 = vpop.f32.mrf.mxu1  ;;  %v1380_v13 = vmax.f32 %v1348_v53, 0.0  ;;  %v1133_v53 = vadd.f32 %v1101_v32, %v1068_v11  ;;  %v1196_v27 = vmul.f32 %v5474_v59, %v6244_v20  ;;  %v970_v45 = vadd.f32 %v940_v51, %v909_v19 }
 0x217   :  { %v575_v42 = vmax.f32 %v532_v29, 0.0  ;;  %v1379_v61 = vmax.f32 %v1347_v44, 0.0  ;;  %9915 = vst [vmem:[#allocation47_spill] sm:$0xff] %v6265_v58  ;;  %v850_v51 = vmul.f32 %v5453_v39, %v6202_v22 }
 0x218   :  { %v1412_v57 = vmin.f32 %v1380_v13, 6.0  ;;  %v939_v13 = vmul.f32 %v5462_v48, %v6134_v46 }
 0x219   :  { %v6256_v60 = vmin.f32 %v575_v42, 6.0  ;;  %v1411_v52 = vmin.f32 %v1379_v61, 6.0  ;;  %v1132_v42 = vadd.f32 %v1100_v2, %v1067_v21 }
 0x21a   :  { %v1519_v16 = vpop.f32.mrf.mxu2 }
 0x21b   :  { %v648_v15 = vrot.slane %v6256_v60, 7  ;;  %v713_v31 = vrot.slane %v6256_v60, 1  ;;  %v6270_v38 = vadd.f32 %v1519_v16, %v5344_v0  ;;  %v1433_v10 = vpack.c.bf16 %v1412_v57, %v1411_v52 }
 0x21c   :  { %v1197_v55 = vmul.f32 %v5474_v59, %v6256_v60  ;;  %v969_v57 = vadd.f32 %v939_v13, %v908_v4  ;;  %v1318_v52 = vadd.f32 %v1133_v53, %v970_v45  ;;  %v1038_v19 = vmul.f32 %v5455_v40, %v6256_v60 }
 0x21d   :  { %9916 = vst [vmem:[#allocation48_spill] sm:$0xff] %v6270_v38  ;;  %v6276_v56 = vsel %vm652_vm0, %v632_v6, %v648_v15  ;;  %v681_v63 = vsel %vm652_vm0, %v648_v15, %v632_v6  ;;  %v6282_v43 = vsel %vm717_vm1, %v697_v5, %v713_v31  ;;  %v746_v0 = vsel %vm717_vm1, %v713_v31, %v697_v5 }
 0x21e   :  { %v535_v47 = vpop.f32.mrf.mxu1  ;;  %v1625_v12 = vpack.c.bf16 %v6270_v38, %v6265_v58  ;;  %v6291_v34 = vsel %vm750_vm2, %v6282_v43, %v681_v63  ;;  %v6296_v29 = vsel %vm789_vm3, %v6276_v56, %v746_v0  ;;  %v1166_v44 = vmul.f32 %v5481_v62, %v6276_v56  ;;  %v4830_v63 = vld [vmem:[#allocation14 + $0x68] sm:$0xff] }
 0x21f   :  { %1561 = vmatmul.bf16.gmra.mxu2 %v1433_v10  ;;  %v1165_v3 = vmul.f32 %v5481_v62, %v6291_v34  ;;  %v1258_v37 = vmul.f32 %v5483_v1, %v6296_v29  ;;  %v576_v32 = vmax.f32 %v535_v47, 0.0  ;;  %v1257_v46 = vmul.f32 %v5483_v1, %v6282_v43 }
 0x220   :  { %1749 = vmatmul.bf16.gmra.mxu3 %v1625_v12  ;;  %1838 = vmatmul.bf16.gmra.mxu0 %v1625_v12  ;;  %v1227_v61 = vadd.f32 %v1197_v55, %v1166_v44  ;;  %v1317_v15 = vadd.f32 %v1132_v42, %v969_v57  ;;  %v1005_v10 = vmul.f32 %v5434_v28, %v6276_v56 }
 0x221   :  { %v1226_v11 = vadd.f32 %v1196_v27, %v1165_v3  ;;  %v849_v4 = vmul.f32 %v5453_v39, %v6217_v14  ;;  %v6318_v21 = vmin.f32 %v576_v32, 6.0  ;;  %v1004_v0 = vmul.f32 %v5434_v28, %v6291_v34  ;;  %3913 = vmatpush.bf16.msra.mxu2 %v4830_v63 }
 0x222   :  { %v1522_v6 = vpop.f32.mrf.mxu2  ;;  %v1288_v16 = vadd.f32 %v1258_v37, %v1227_v61  ;;  %v880_v47 = vmul.f32 %v5442_v33, %v6170_v26  ;;  %v881_v12 = vmul.f32 %v5442_v33, %v6182_v50  ;;  %v1037_v14 = vmul.f32 %v5455_v40, %v6244_v20 }
 0x223   :  { %v1287_v5 = vadd.f32 %v1257_v46, %v1226_v11  ;;  %v1070_v3 = vadd.f32 %v1038_v19, %v1005_v10  ;;  %v1103_v27 = vmul.f32 %v5464_v49, %v6296_v29  ;;  %v942_v26 = vmul.f32 %v5462_v48, %v6222_v35 }
 0x224   :  { %v1350_v31 = vadd.f32 %v1318_v52, %v1288_v16  ;;  %v910_v45 = vadd.f32 %v880_v47, %v849_v4  ;;  %v911_v42 = vadd.f32 %v881_v12, %v850_v51  ;;  %v633_v61 = vrot.slane %v6318_v21, 7 }
 0x225   :  { %v1349_v53 = vadd.f32 %v1317_v15, %v1287_v5  ;;  %v1069_v11 = vadd.f32 %v1037_v14, %v1004_v0  ;;  %v1102_v32 = vmul.f32 %v5464_v49, %v6282_v43  ;;  %v698_v46 = vrot.slane %v6318_v21, 1 }
 0x226   :  { %v537_v2 = vpop.f32.mrf.mxu1  ;;  %v1382_v55 = vmax.f32 %v1350_v31, 0.0  ;;  %v6339_v16 = vadd.f32 %v1522_v6, %v5349_v7  ;;  %v1135_v31 = vadd.f32 %v1103_v27, %v1070_v3  ;;  %v1198_v47 = vmul.f32 %v5474_v59, %v6318_v21  ;;  %v4838_v3 = vld [vmem:[#allocation16 + $0x28] sm:$0xff] }
 0x227   :  { %v577_v44 = vmax.f32 %v537_v2, 0.0  ;;  %v1381_v22 = vmax.f32 %v1349_v53, 0.0  ;;  %v972_v14 = vadd.f32 %v942_v26, %v911_v42  ;;  %4130 = vmatpush.bf16.msra.mxu3 %v4838_v3  ;;  %v851_v26 = vmul.f32 %v5453_v39, %v6291_v34 }
 0x228   :  { %v1414_v13 = vmin.f32 %v1382_v55, 6.0  ;;  %9917 = vst [vmem:[#allocation49_spill] sm:$0xff] %v6339_v16  ;;  %v941_v55 = vmul.f32 %v5462_v48, %v6208_v54  ;;  %v1039_v34 = vmul.f32 %v5455_v40, %v6318_v21 }
 0x229   :  { %v6330_v37 = vmin.f32 %v577_v44, 6.0  ;;  %v1413_v57 = vmin.f32 %v1381_v22, 6.0  ;;  %v1134_v44 = vadd.f32 %v1102_v32, %v1069_v11  ;;  %v852_v11 = vmul.f32 %v5453_v39, %v6276_v56 }
 0x22a   :  { %v1524_v50 = vpop.f32.mrf.mxu2  ;;  %v971_v27 = vadd.f32 %v941_v55, %v910_v45  ;;  %v883_v55 = vmul.f32 %v5442_v33, %v6256_v60 }
 0x22b   :  { %v649_v52 = vrot.slane %v6330_v37, 7  ;;  %v714_v5 = vrot.slane %v6330_v37, 1  ;;  %v6344_v15 = vadd.f32 %v1524_v50, %v5352_v8  ;;  %v1434_v35 = vpack.c.bf16 %v1414_v13, %v1413_v57  ;;  %v4822_v13 = vld [vmem:[#allocation14 + $0x28] sm:$0xff] }
 0x22c   :  { %v1199_v10 = vmul.f32 %v5474_v59, %v6330_v37  ;;  %3824 = vmatpush.bf16.msra.mxu1 %v4822_v13  ;;  %v1040_v45 = vmul.f32 %v5455_v40, %v6330_v37  ;;  %v913_v13 = vadd.f32 %v883_v55, %v852_v11 }
 0x22d   :  { %9918 = vst [vmem:[#allocation50_spill] sm:$0xff] %v6344_v15  ;;  %v6350_v63 = vsel %vm652_vm0, %v633_v61, %v649_v52  ;;  %v682_v7 = vsel %vm652_vm0, %v649_v52, %v633_v61  ;;  %v6356_v6 = vsel %vm717_vm1, %v698_v46, %v714_v5  ;;  %v747_v8 = vsel %vm717_vm1, %v714_v5, %v698_v46  ;;  %v4846_v5 = vld [vmem:[#allocation16 + $0x68] sm:$0xff] }
 0x22e   :  { %v540_v19 = vpop.f32.mrf.mxu1  ;;  %v1626_v4 = vpack.c.bf16 %v6344_v15, %v6339_v16  ;;  %v6365_v51 = vsel %vm750_vm2, %v6356_v6, %v682_v7  ;;  %v6370_v2 = vsel %vm789_vm3, %v6350_v63, %v747_v8  ;;  %v1168_v53 = vmul.f32 %v5481_v62, %v6350_v63  ;;  %4219 = vmatpush.bf16.msra.mxu0 %v4846_v5 }
 0x22f   :  { %1566 = vmatmul.bf16.gmra.mxu2 %v1434_v35  ;;  %v1167_v0 = vmul.f32 %v5481_v62, %v6365_v51  ;;  %v1260_v12 = vmul.f32 %v5483_v1, %v6370_v2  ;;  %v578_v50 = vmax.f32 %v540_v19, 0.0  ;;  %v1259_v57 = vmul.f32 %v5483_v1, %v6356_v6 }
 0x230   :  { %1754 = vmatmul.bf16.gmra.mxu3 %v1626_v4  ;;  %1843 = vmatmul.bf16.gmra.mxu0 %v1626_v4  ;;  %v1229_v22 = vadd.f32 %v1199_v10, %v1168_v53  ;;  %v1320_v52 = vadd.f32 %v1135_v31, %v972_v14  ;;  %v1319_v7 = vadd.f32 %v1134_v44, %v971_v27 }
 0x231   :  { %v1228_v61 = vadd.f32 %v1198_v47, %v1167_v0  ;;  %v1007_v42 = vmul.f32 %v5434_v28, %v6350_v63  ;;  %v6392_v32 = vmin.f32 %v578_v50, 6.0  ;;  %v1006_v4 = vmul.f32 %v5434_v28, %v6365_v51 }
 0x232   :  { %v1527_v54 = vpop.f32.mrf.mxu2  ;;  %v1290_v46 = vadd.f32 %v1260_v12, %v1229_v22  ;;  %v882_v53 = vmul.f32 %v5442_v33, %v6244_v20  ;;  %v1105_v14 = vmul.f32 %v5464_v49, %v6370_v2  ;;  %v944_v20 = vmul.f32 %v5462_v48, %v6296_v29 }
 0x233   :  { %v1289_v35 = vadd.f32 %v1259_v57, %v1228_v61  ;;  %v1072_v12 = vadd.f32 %v1040_v45, %v1007_v42  ;;  %v634_v3 = vrot.slane %v6392_v32, 7  ;;  %v1071_v61 = vadd.f32 %v1039_v34, %v1006_v4 }
 0x234   :  { %v1352_v8 = vadd.f32 %v1320_v52, %v1290_v46  ;;  %v912_v22 = vadd.f32 %v882_v53, %v851_v26  ;;  %v1104_v50 = vmul.f32 %v5464_v49, %v6356_v6  ;;  %v699_v57 = vrot.slane %v6392_v32, 1 }
 0x235   :  { %v1351_v10 = vadd.f32 %v1319_v7, %v1289_v35  ;;  %v6413_v46 = vadd.f32 %v1527_v54, %v5357_v17  ;;  %v1137_v7 = vadd.f32 %v1105_v14, %v1072_v12  ;;  %v1200_v53 = vmul.f32 %v5474_v59, %v6392_v32 }
 0x236   :  { %v542_v31 = vpop.f32.mrf.mxu1  ;;  %v1384_v19 = vmax.f32 %v1352_v8, 0.0  ;;  %v974_v34 = vadd.f32 %v944_v20, %v913_v13  ;;  %v884_v20 = vmul.f32 %v5442_v33, %v6318_v21 }
 0x237   :  { %v579_v0 = vmax.f32 %v542_v31, 0.0  ;;  %v1383_v56 = vmax.f32 %v1351_v10, 0.0  ;;  %9919 = vst [vmem:[#allocation51_spill] sm:$0xff] %v6413_v46 }
 0x238   :  { %v1416_v47 = vmin.f32 %v1384_v19, 6.0  ;;  %v943_v19 = vmul.f32 %v5462_v48, %v6282_v43 }
 0x239   :  { %v6404_v44 = vmin.f32 %v579_v0, 6.0  ;;  %v1415_v27 = vmin.f32 %v1383_v56, 6.0  ;;  %v1136_v0 = vadd.f32 %v1104_v50, %v1071_v61  ;;  %v1041_v61 = vmul.f32 %v5455_v40, %v6392_v32 }
 0x23a   :  { %v1529_v60 = vpop.f32.mrf.mxu2  ;;  %v854_v50 = vmul.f32 %v5453_v39, %v6350_v63 }
 0x23b   :  { %v650_v52 = vrot.slane %v6404_v44, 7  ;;  %v715_v5 = vrot.slane %v6404_v44, 1  ;;  %v6418_v35 = vadd.f32 %v1529_v60, %v5360_v18  ;;  %v1435_v29 = vpack.c.bf16 %v1416_v47, %v1415_v27 }
 0x23c   :  { %v1201_v8 = vmul.f32 %v5474_v59, %v6404_v44  ;;  %v973_v47 = vadd.f32 %v943_v19, %v912_v22  ;;  %v1322_v27 = vadd.f32 %v1137_v7, %v974_v34  ;;  %v1042_v63 = vmul.f32 %v5455_v40, %v6404_v44 }
 0x23d   :  { %9920 = vst [vmem:[#allocation52_spill] sm:$0xff] %v6418_v35  ;;  %v6424_v42 = vsel %vm652_vm0, %v634_v3, %v650_v52  ;;  %v683_v17 = vsel %vm652_vm0, %v650_v52, %v634_v3  ;;  %v6430_v54 = vsel %vm717_vm1, %v699_v57, %v715_v5  ;;  %v748_v18 = vsel %vm717_vm1, %v715_v5, %v699_v57  ;;  %v4829_v52 = vld [vmem:[#allocation14 + $0x60] sm:$0xff] }
 0x23e   :  { %v545_v45 = vpop.f32.mrf.mxu1  ;;  %v1627_v26 = vpack.c.bf16 %v6418_v35, %v6413_v46  ;;  %v6439_v11 = vsel %vm750_vm2, %v6430_v54, %v683_v17  ;;  %v6444_v31 = vsel %vm789_vm3, %v6424_v42, %v748_v18  ;;  %v1170_v10 = vmul.f32 %v5481_v62, %v6424_v42  ;;  %3914 = vmatpush.bf16.msra.mxu2 %v4829_v52 }
 0x23f   :  { %1571 = vmatmul.bf16.gmra.mxu2 %v1435_v29  ;;  %v1169_v4 = vmul.f32 %v5481_v62, %v6439_v11  ;;  %v1262_v55 = vmul.f32 %v5483_v1, %v6444_v31  ;;  %v580_v14 = vmax.f32 %v545_v45, 0.0  ;;  %v1261_v43 = vmul.f32 %v5483_v1, %v6430_v54 }
 0x240   :  { %1759 = vmatmul.bf16.gmra.mxu3 %v1627_v26  ;;  %1848 = vmatmul.bf16.gmra.mxu0 %v1627_v26  ;;  %v1231_v56 = vadd.f32 %v1201_v8, %v1170_v10  ;;  %v853_v57 = vmul.f32 %v5453_v39, %v6365_v51  ;;  %v1321_v29 = vadd.f32 %v1136_v0, %v973_v47 }
 0x241   :  { %v1230_v12 = vadd.f32 %v1200_v53, %v1169_v4  ;;  %v1008_v22 = vmul.f32 %v5434_v28, %v6439_v11  ;;  %v612_v51 = vmin.f32 %v580_v14, 6.0  ;;  %v1009_v18 = vmul.f32 %v5434_v28, %v6424_v42 }
 0x242   :  { %v1532_v3 = vpop.f32.mrf.mxu2  ;;  %v6458_v60 = vadd.f32 %v1262_v55, %v1231_v56  ;;  %v885_v45 = vmul.f32 %v5442_v33, %v6330_v37  ;;  %v914_v21 = vadd.f32 %v884_v20, %v853_v57  ;;  %v945_v10 = vmul.f32 %v5462_v48, %v6356_v6 }
 0x243   :  { %v6462_v5 = vadd.f32 %v1261_v43, %v1230_v12  ;;  %v1073_v53 = vadd.f32 %v1041_v61, %v1008_v22  ;;  %v946_v0 = vmul.f32 %v5462_v48, %v6370_v2  ;;  %v1106_v56 = vmul.f32 %v5464_v49, %v6430_v54 }
 0x244   :  { %v1354_v13 = vadd.f32 %v1322_v27, %v6458_v60  ;;  %v915_v34 = vadd.f32 %v885_v45, %v854_v50  ;;  %v635_v37 = vrot.slane %v612_v51, 7  ;;  %v1074_v14 = vadd.f32 %v1042_v63, %v1009_v18 }
 0x245   :  { %v1353_v8 = vadd.f32 %v1321_v29, %v6462_v5  ;;  %v1107_v6 = vmul.f32 %v5464_v49, %v6444_v31  ;;  %v700_v43 = vrot.slane %v612_v51, 1  ;;  %v1202_v27 = vmul.f32 %v5474_v59, %v612_v51  ;;  %v4821_v29 = vld [vmem:[#allocation14 + $0x20] sm:$0xff] }
 0x246   :  { %v547_v7 = vpop.f32.mrf.mxu1  ;;  %v1386_v17 = vmax.f32 %v1354_v13, 0.0  ;;  %v6490_v13 = vadd.f32 %v1532_v3, %v5365_v24  ;;  %v1138_v20 = vadd.f32 %v1106_v56, %v1073_v53  ;;  %3825 = vmatpush.bf16.msra.mxu1 %v4821_v29  ;;  %v976_v53 = vadd.f32 %v946_v0, %v915_v34  ;;  %v4837_v56 = vld [vmem:[#allocation16 + $0x20] sm:$0xff] }
 0x247   :  { %v581_v26 = vmax.f32 %v547_v7, 0.0  ;;  %v1385_v19 = vmax.f32 %v1353_v8, 0.0  ;;  %4131 = vmatpush.bf16.msra.mxu3 %v4837_v56 }
 0x248   :  { %v1418_v4 = vmin.f32 %v1386_v17, 6.0  ;;  %9921 = vst [vmem:[#allocation53_spill] sm:$0xff] %v6490_v13  ;;  %v1139_v17 = vadd.f32 %v1107_v6, %v1074_v14  ;;  %v1043_v14 = vmul.f32 %v5455_v40, %v612_v51 }
 0x249   :  { %v613_v55 = vmin.f32 %v581_v26, 6.0  ;;  %v1417_v12 = vmin.f32 %v1385_v19, 6.0 }
 0x24a   :  { %v1534_v47 = vpop.f32.mrf.mxu2  ;;  %v1324_v0 = vadd.f32 %v1139_v17, %v976_v53 }
 0x24b   :  { %v651_v57 = vrot.slane %v613_v55, 7  ;;  %v716_v52 = vrot.slane %v613_v55, 1  ;;  %v6493_v2 = vadd.f32 %v1534_v47, %v5368_v25  ;;  %v1436_v22 = vpack.c.bf16 %v1418_v4, %v1417_v12 }
 0x24c   :  { %v1203_v18 = vmul.f32 %v5474_v59, %v613_v55  ;;  %v975_v4 = vadd.f32 %v945_v10, %v914_v21  ;;  %v1044_v6 = vmul.f32 %v5455_v40, %v613_v55 }
 0x24d   :  { %9922 = vst [vmem:[#allocation54_spill] sm:$0xff] %v6493_v2  ;;  %v668_v61 = vsel %vm652_vm0, %v635_v37, %v651_v57  ;;  %v684_v50 = vsel %vm652_vm0, %v651_v57, %v635_v37  ;;  %v733_v7 = vsel %vm717_vm1, %v700_v43, %v716_v52  ;;  %v749_v8 = vsel %vm717_vm1, %v716_v52, %v700_v43 }
 0x24e   :  { %v1628_v24 = vpack.c.bf16 %v6493_v2, %v6490_v13  ;;  %v786_v25 = vsel %vm750_vm2, %v733_v7, %v684_v50  ;;  %v825_v3 = vsel %vm789_vm3, %v668_v61, %v749_v8  ;;  %v1172_v26 = vmul.f32 %v5481_v62, %v668_v61 }
 0x24f   :  { %1576 = vmatmul.bf16.gmra.mxu2 %v1436_v22  ;;  %v1171_v45 = vmul.f32 %v5481_v62, %v786_v25  ;;  %v1264_v63 = vmul.f32 %v5483_v1, %v825_v3  ;;  %v1011_v19 = vmul.f32 %v5434_v28, %v668_v61  ;;  %v1263_v12 = vmul.f32 %v5483_v1, %v733_v7 }
 0x250   :  { %1764 = vmatmul.bf16.gmra.mxu3 %v1628_v24  ;;  %1853 = vmatmul.bf16.gmra.mxu0 %v1628_v24  ;;  %v1233_v47 = vadd.f32 %v1203_v18, %v1172_v26  ;;  %v1010_v59 = vmul.f32 %v5434_v28, %v786_v25  ;;  %v855_v43 = vmul.f32 %v5453_v39, %v6439_v11 }
 0x251   :  { %v1232_v37 = vadd.f32 %v1202_v27, %v1171_v45  ;;  %v856_v57 = vmul.f32 %v5453_v39, %v6424_v42  ;;  %v1323_v34 = vadd.f32 %v1138_v20, %v975_v4  ;;  %v4845_v27 = vld [vmem:[#allocation16 + $0x60] sm:$0xff]  ;;  %v886_v28 = vmul.f32 %v5442_v33, %v6392_v32 }
 0x252   :  { %v1537_v62 = vpop.f32.mrf.mxu2  ;;  %v1294_v10 = vadd.f32 %v1264_v63, %v1233_v47  ;;  %v887_v1 = vmul.f32 %v5442_v33, %v6404_v44  ;;  %v1076_v40 = vadd.f32 %v1044_v6, %v1011_v19  ;;  %v1075_v52 = vadd.f32 %v1043_v14, %v1010_v59  ;;  %4220 = vmatpush.bf16.msra.mxu0 %v4845_v27  ;;  %v4828_v63 = vld [vmem:[#allocation14 + $0x58] sm:$0xff]  ;;  %v9926_v47 = vld [vmem:[#allocation25_spill] sm:$0xff]  ;;  %v9928_v59 = vld [vmem:[#allocation26_spill] sm:$0xff] }
 0x253   :  { %v1293_v21 = vadd.f32 %v1263_v12, %v1232_v37  ;;  %v1109_v11 = vmul.f32 %v5464_v49, %v825_v3  ;;  %v916_v39 = vadd.f32 %v886_v28, %v855_v43  ;;  %v948_v42 = vmul.f32 %v5462_v48, %v6444_v31  ;;  %v9924_v3 = vld [vmem:[#allocation24_spill] sm:$0xff]  ;;  %3915 = vmatpush.bf16.msra.mxu2 %v4828_v63  ;;  %v4836_v43 = vld [vmem:[#allocation16 + $0x18] sm:$0xff] }
 0x254   :  { %v1356_v55 = vadd.f32 %v1324_v0, %v1294_v10  ;;  %v917_v20 = vadd.f32 %v887_v1, %v856_v57  ;;  %v1108_v61 = vmul.f32 %v5464_v49, %v733_v7  ;;  %v947_v32 = vmul.f32 %v5462_v48, %v6430_v54  ;;  %4132 = vmatpush.bf16.msra.mxu3 %v4836_v43  ;;  %v4844_v1 = vld [vmem:[#allocation16 + $0x58] sm:$0xff] }
 0x255   :  { %v1355_v51 = vadd.f32 %v1323_v34, %v1293_v21  ;;  %v1141_v8 = vadd.f32 %v1109_v11, %v1076_v40  ;;  %v6533_v25 = vadd.f32 %v1537_v62, %v5373_v30  ;;  %v4820_v62 = vld [vmem:[#allocation14 + $0x18] sm:$0xff]  ;;  %v9932_v34 = vld [vmem:[#allocation28_spill] sm:$0xff] }
 0x256   :  { %v1388_v22 = vmax.f32 %v1356_v55, 0.0  ;;  %v1140_v50 = vadd.f32 %v1108_v61, %v1075_v52  ;;  %v977_v31 = vadd.f32 %v947_v32, %v916_v39  ;;  %v978_v18 = vadd.f32 %v948_v42, %v917_v20  ;;  %3826 = vmatpush.bf16.msra.mxu1 %v4820_v62  ;;  %v9930_v21 = vld [vmem:[#allocation27_spill] sm:$0xff]  ;;  %4221 = vmatpush.bf16.msra.mxu0 %v4844_v1  ;;  %v9936_v52 = vld [vmem:[#allocation30_spill] sm:$0xff] }
 0x257   :  { %v1387_v29 = vmax.f32 %v1355_v51, 0.0  ;;  %9923 = vst [vmem:[#allocation55_spill] sm:$0xff] %v6533_v25  ;;  %v9934_v51 = vld [vmem:[#allocation29_spill] sm:$0xff] }
 0x258   :  { %v1420_v44 = vmin.f32 %v1388_v22, 6.0  ;;  %v1325_v7 = vadd.f32 %v1140_v50, %v977_v31  ;;  %v1326_v26 = vadd.f32 %v1141_v8, %v978_v18  ;;  %v2043_v22 = vld [vmem:[#allocation13 + $0x8] sm:$0x77] }
 0x259   :  { %v1419_v33 = vmin.f32 %v1387_v29, 6.0  ;;  %v6566_v29 = vld [vmem:[#allocation13] sm:$0x77]  ;;  %v2819_v8 = vperm.slane %v2043_v22, 1  ;;  %v2954_v31 = vperm.slane %v2043_v22, 6  ;;  %v4827_v18 = vld [vmem:[#allocation14 + $0x50] sm:$0xff] }
 0x25a   :  { %v1539_v24 = vpop.f32.mrf.mxu2  ;;  %v1357_v48 = vadd.f32 %v1325_v7, %v6462_v5  ;;  %v1358_v54 = vadd.f32 %v1326_v26, %v6458_v60  ;;  %v2497_v32 = vperm.slane %v6566_v29, 5  ;;  %v2496_v50 = vperm.slane %v6566_v29, 1  ;;  %3916 = vmatpush.bf16.msra.mxu2 %v4827_v18 }
 0x25b   :  { %v6536_v17 = vadd.f32 %v1539_v24, %v9924_v3  ;;  %v1437_v45 = vpack.c.bf16 %v1420_v44, %v1419_v33  ;;  %v2820_v33 = vperm.slane %v2043_v22, 5  ;;  %v2431_v24 = vperm.slane %v6566_v29, 4 }
 0x25c   :  { %v1389_v19 = vmax.f32 %v1357_v48, 0.0  ;;  %v1390_v4 = vmax.f32 %v1358_v54, 0.0  ;;  %v2750_v3 = vperm.slane %v2043_v22, 4  ;;  %v2430_v26 = vperm.slane %v6566_v29, 0  ;;  %v6573_v48 = vld [vmem:[#allocation13 + $0x10] sm:$0x77] }
 0x25d   :  { %9925 = vst [vmem:[#allocation24_spill] sm:$0xff] %v6536_v17  ;;  %v1629_v49 = vpack.c.bf16 %v6536_v17, %v6533_v25  ;;  %v6577_v63 = vperm.slane %v2820_v33, 1  ;;  %v2749_v43 = vperm.slane %v2043_v22, 0  ;;  %v3089_v33 = vperm.slane %v6573_v48, 4 }
 0x25e   :  { %v1421_v53 = vmin.f32 %v1389_v19, 6.0  ;;  %v1422_v56 = vmin.f32 %v1390_v4, 6.0  ;;  %v6579_v19 = vperm.slane %v2496_v50, 1  ;;  %v6581_v4 = vperm.slane %v2819_v8, 1 }
 0x25f   :  { %1581 = vmatmul.bf16.gmra.mxu2 %v1437_v45 }
 0x260   :  { %1769 = vmatmul.bf16.gmra.mxu3 %v1629_v49  ;;  %1858 = vmatmul.bf16.gmra.mxu0 %v1629_v49  ;;  %v1438_v6 = vpack.c.bf16 %v1422_v56, %v1421_v53  ;;  %v2623_v49 = vperm.slane %v6566_v29, 6  ;;  %9938 = vst [vmem:[#allocation56_spill] sm:$0xff] %v6581_v4  ;;  %v6583_v53 = vperm.slane %v2431_v24, 0  ;;  %v6585_v56 = vperm.slane %v2750_v3, 0  ;;  %v4843_v3 = vld [vmem:[#allocation16 + $0x50] sm:$0xff] }
 0x261   :  { %4222 = vmatpush.bf16.msra.mxu0 %v4843_v3  ;;  %v3088_v3 = vperm.slane %v6573_v48, 0 }
 0x262   :  { %v1542_v30 = vpop.f32.mrf.mxu2  ;;  %9939 = vst [vmem:[#allocation57_spill] sm:$0xff] %v6583_v53 }
 0x263   :  { %v6543_v12 = vadd.f32 %v1542_v30, %v9926_v47  ;;  %v6575_v30 = vperm.slane %v2497_v32, 1  ;;  %9940 = vst [vmem:[#allocation58_spill] sm:$0xff] %v6585_v56  ;;  %v3154_v32 = vperm.slane %v6573_v48, 1 }
 0x265   :  { %9927 = vst [vmem:[#allocation25_spill] sm:$0xff] %v6543_v12 }
 0x26a   :  { %v1544_v37 = vpop.f32.mrf.mxu2 }
 0x26b   :  { %v6546_v14 = vadd.f32 %v1544_v37, %v9928_v59  ;;  %v6587_v37 = vperm.slane %v2954_v31, 2  ;;  %v4826_v31 = vld [vmem:[#allocation14 + $0x48] sm:$0xff] }
 0x26c   :  { %3917 = vmatpush.bf16.msra.mxu2 %v4826_v31  ;;  %v4818_v31 = vld [vmem:[#allocation14 + $0x8] sm:$0xff] }
 0x26d   :  { %9929 = vst [vmem:[#allocation26_spill] sm:$0xff] %v6546_v14  ;;  %v1630_v5 = vpack.c.bf16 %v6546_v14, %v6543_v12 }
 0x26e   :  { %9941 = vst [vmem:[#allocation59_spill] sm:$0xff] %v6587_v37 }
 0x26f   :  { %1586 = vmatmul.bf16.gmra.mxu2 %v1438_v6  ;;  %v3155_v6 = vperm.slane %v6573_v48, 5 }
 0x270   :  { %1774 = vmatmul.bf16.gmra.mxu3 %v1630_v5  ;;  %1863 = vmatmul.bf16.gmra.mxu0 %v1630_v5  ;;  %v6592_v5 = vperm.slane %v2623_v49, 2 }
 0x272   :  { %v1547_v60 = vpop.f32.mrf.mxu2  ;;  %9942 = vst [vmem:[#allocation60_spill] sm:$0xff] %v6592_v5 }
 0x273   :  { %v6551_v10 = vadd.f32 %v1547_v60, %v9930_v21  ;;  %v6594_v60 = vperm.slane %v2430_v26, 0  ;;  %v2622_v21 = vperm.slane %v6566_v29, 2  ;;  %v9946_v29 = vld [vmem:[#allocation31_spill] sm:$0xff] }
 0x275   :  { %9931 = vst [vmem:[#allocation27_spill] sm:$0xff] %v6551_v10 }
 0x276   :  { %9943 = vst [vmem:[#allocation61_spill] sm:$0xff] %v6594_v60 }
 0x27a   :  { %v1549_v57 = vpop.f32.mrf.mxu2 }
 0x27b   :  { %v6554_v0 = vadd.f32 %v1549_v57, %v9932_v34  ;;  %v2953_v57 = vperm.slane %v2043_v22, 2  ;;  %v4819_v34 = vld [vmem:[#allocation14 + $0x10] sm:$0xff] }
 0x27c   :  { %3827 = vmatpush.bf16.msra.mxu1 %v4819_v34 }
 0x27d   :  { %9933 = vst [vmem:[#allocation28_spill] sm:$0xff] %v6554_v0  ;;  %v1631_v27 = vpack.c.bf16 %v6554_v0, %v6551_v10  ;;  %v6615_v49 = vperm.slane %v2953_v57, 2 }
 0x27f   :  { %9949 = vst [vmem:[#allocation63_spill] sm:$0xff] %v6615_v49 }
 0x280   :  { %1779 = vmatmul.bf16.gmra.mxu3 %v1631_v27  ;;  %1868 = vmatmul.bf16.gmra.mxu0 %v1631_v27  ;;  %v4835_v27 = vld [vmem:[#allocation16 + $0x10] sm:$0xff] }
 0x281   :  { %4133 = vmatpush.bf16.msra.mxu3 %v4835_v27  ;;  %3828 = vmatpush.bf16.msra.mxu1 %v4818_v31 }
 0x282   :  { %v1552_v28 = vpop.f32.mrf.mxu2 }
 0x283   :  { %v6559_v55 = vadd.f32 %v1552_v28, %v9934_v51 }
 0x285   :  { %9935 = vst [vmem:[#allocation29_spill] sm:$0xff] %v6559_v55 }
 0x28a   :  { %v1554_v40 = vpop.f32.mrf.mxu2 }
 0x28b   :  { %v6562_v11 = vadd.f32 %v1554_v40, %v9936_v52 }
 0x28d   :  { %9937 = vst [vmem:[#allocation30_spill] sm:$0xff] %v6562_v11  ;;  %v1632_v39 = vpack.c.bf16 %v6562_v11, %v6559_v55  ;;  %v1834_v42 = vpop.f32.mrf.mxu0 }
 0x28e   :  { %v1915_v61 = vmax.f32 %v1834_v42, 0.0 }
 0x290   :  { %1784 = vmatmul.bf16.gmra.mxu3 %v1632_v39  ;;  %1873 = vmatmul.bf16.gmra.mxu0 %v1632_v39  ;;  %v1979_v54 = vmin.f32 %v1915_v61, 6.0  ;;  %v9944_v39 = vld [vmem:[#allocation32_spill] sm:$0xff] }
 0x292   :  { %v1557_v20 = vpop.f32.mrf.mxu2  ;;  %v2046_v28 = vrot.slane %v1979_v54, 7  ;;  %v2174_v1 = vrot.slane %v1979_v54, 1  ;;  %v6627_v34 = vmul.f32 %v6575_v30, %v1979_v54  ;;  %v2826_v27 = vmul.f32 %v6577_v63, %v1979_v54 }
 0x293   :  { %v1745_v44 = vpop.f32.mrf.mxu3  ;;  %v6605_v22 = vadd.f32 %v1557_v20, %v9946_v29 }
 0x294   :  { %v1914_v47 = vmax.f32 %v1745_v44, 0.0 }
 0x295   :  { %v1836_v45 = vpop.f32.mrf.mxu0  ;;  %9947 = vst [vmem:[#allocation31_spill] sm:$0xff] %v6605_v22 }
 0x296   :  { %v1917_v7 = vmax.f32 %v1836_v45, 0.0  ;;  %v1978_v44 = vmin.f32 %v1914_v47, 6.0  ;;  %v6613_v45 = vperm.slane %v2749_v43, 0  ;;  %v6623_v47 = vperm.slane %v2622_v21, 2 }
 0x297   :  { %v6635_v21 = vperm.slane %v3089_v33, 0 }
 0x298   :  { %v6589_v59 = vmin.f32 %v1917_v7, 6.0  ;;  %9948 = vst [vmem:[#allocation62_spill] sm:$0xff] %v6613_v45  ;;  %v6617_v7 = vperm.slane %v3155_v6, 1  ;;  %v6631_v6 = vperm.slane %v3154_v32, 1  ;;  %v6656_v11 = vmul.f32 %v6579_v19, %v1978_v44 }
 0x299   :  { %9951 = vst [vmem:[#allocation65_spill] sm:$0xff] %v6623_v47 }
 0x29a   :  { %v1559_v62 = vpop.f32.mrf.mxu2  ;;  %v2078_v40 = vrot.slane %v6589_v59, 7  ;;  %v2206_v51 = vrot.slane %v6589_v59, 1  ;;  %9950 = vst [vmem:[#allocation64_spill] sm:$0xff] %v6617_v7  ;;  %v2828_v54 = vmul.f32 %v6577_v63, %v6589_v59  ;;  %v2505_v14 = vmul.f32 %v6575_v30, %v6589_v59 }
 0x29b   :  { %v1747_v52 = vpop.f32.mrf.mxu3  ;;  %v6600_v42 = vadd.f32 %v1559_v62, %v9944_v39  ;;  %v3281_v62 = vperm.slane %v6573_v48, 6  ;;  %9952 = vst [vmem:[#allocation66_spill] sm:$0xff] %v6631_v6 }
 0x29c   :  { %v1916_v61 = vmax.f32 %v1747_v52, 0.0  ;;  %v2142_v50 = vsel %vm652_vm0, %v2078_v40, %v2046_v28  ;;  %v2238_v8 = vsel %vm717_vm1, %v2174_v1, %v2206_v51  ;;  %v2110_v18 = vsel %vm652_vm0, %v2046_v28, %v2078_v40  ;;  %9953 = vst [vmem:[#allocation67_spill] sm:$0xff] %v6635_v21  ;;  %v4825_v40 = vld [vmem:[#allocation14 + $0x40] sm:$0xff] }
 0x29d   :  { %9945 = vst [vmem:[#allocation32_spill] sm:$0xff] %v6600_v42  ;;  %v1839_v24 = vpop.f32.mrf.mxu0  ;;  %v2270_v20 = vsel %vm717_vm1, %v2206_v51, %v2174_v1  ;;  %v1633_v26 = vpack.c.bf16 %v6600_v42, %v6605_v22  ;;  %v2302_v43 = vsel %vm750_vm2, %v2238_v8, %v2142_v50  ;;  %v2045_v28 = vrot.slane %v1978_v44, 7  ;;  %3918 = vmatpush.bf16.msra.mxu2 %v4825_v40 }
 0x29e   :  { %v1980_v57 = vmin.f32 %v1916_v61, 6.0  ;;  %v2758_v1 = vmul.f32 %v6585_v56, %v2110_v18  ;;  %v2173_v51 = vrot.slane %v1978_v44, 1  ;;  %v6639_v52 = vsel %vm789_vm3, %v2110_v18, %v2270_v20 }
 0x29f   :  { %v2756_v29 = vmul.f32 %v6585_v56, %v2302_v43  ;;  %v6645_v33 = vperm.slane %v3281_v62, 2  ;;  %v3280_v22 = vperm.slane %v6573_v48, 2  ;;  %v2962_v62 = vmul.f32 %v6587_v37, %v6639_v52 }
 0x2a0   :  { %1789 = vmatmul.bf16.gmra.mxu3 %v1633_v26  ;;  %1878 = vmatmul.bf16.gmra.mxu0 %v1633_v26  ;;  %v2077_v39 = vrot.slane %v1980_v57, 7  ;;  %v2205_v61 = vrot.slane %v1980_v57, 1  ;;  %v2439_v26 = vmul.f32 %v6583_v53, %v2110_v18  ;;  %v2892_v55 = vadd.f32 %v2828_v54, %v2758_v1 }
 0x2a1   :  { %v1919_v0 = vmax.f32 %v1839_v24, 0.0  ;;  %v2825_v18 = vmul.f32 %v6581_v4, %v1978_v44  ;;  %v2890_v12 = vadd.f32 %v2826_v27, %v2756_v29  ;;  %v2960_v1 = vmul.f32 %v6587_v37, %v2238_v8 }
 0x2a2   :  { %v1562_v32 = vpop.f32.mrf.mxu2  ;;  %v2141_v20 = vsel %vm652_vm0, %v2077_v39, %v2045_v28  ;;  %v6652_v42 = vsel %vm717_vm1, %v2173_v51, %v2205_v61  ;;  %v2109_v40 = vsel %vm652_vm0, %v2045_v28, %v2077_v39  ;;  %v2269_v48 = vsel %vm717_vm1, %v2205_v61, %v2173_v51 }
 0x2a3   :  { %v1750_v50 = vpop.f32.mrf.mxu3  ;;  %v2301_v24 = vsel %vm750_vm2, %v6652_v42, %v2141_v20  ;;  %v6671_v54 = vperm.slane %v3088_v3, 0  ;;  %v6673_v31 = vadd.f32 %v2505_v14, %v2439_v26  ;;  %v6675_v44 = vperm.slane %v3280_v22, 2  ;;  %v9955_v20 = vld [vmem:[#allocation33_spill] sm:$0xff] }
 0x2a4   :  { %v2437_v59 = vmul.f32 %v6583_v53, %v2302_v43  ;;  %v2629_v28 = vmul.f32 %v6592_v5, %v2238_v8  ;;  %v6679_v39 = vadd.f32 %v2962_v62, %v2892_v55  ;;  %v6683_v27 = vsel %vm789_vm3, %v2109_v40, %v2269_v48  ;;  %v4817_v43 = vld [vmem:[#allocation14] sm:$0xff]  ;;  %v9957_v62 = vld [vmem:[#allocation34_spill] sm:$0xff] }
 0x2a5   :  { %v1841_v10 = vpop.f32.mrf.mxu0  ;;  %9954 = vst [vmem:[#allocation68_spill] sm:$0xff] %v6671_v54  ;;  %v1983_v51 = vmin.f32 %v1919_v0, 6.0  ;;  %v2504_v29 = vmul.f32 %v6579_v19, %v1980_v57  ;;  %v2755_v3 = vmul.f32 %v6613_v45, %v2301_v24  ;;  %v2757_v14 = vmul.f32 %v6613_v45, %v2109_v40  ;;  %3829 = vmatpush.bf16.msra.mxu1 %v4817_v43 }
 0x2a6   :  { %v1921_v61 = vmax.f32 %v1841_v10, 0.0  ;;  %v2827_v22 = vmul.f32 %v6581_v4, %v1980_v57  ;;  %v6690_v8 = vadd.f32 %v1562_v32, %v9955_v20  ;;  %v6695_v0 = vadd.f32 %v2960_v1, %v2890_v12 }
 0x2a7   :  { %v2438_v10 = vmul.f32 %v6594_v60, %v2109_v40  ;;  %v2959_v25 = vmul.f32 %v6615_v49, %v6652_v42  ;;  %v2961_v57 = vmul.f32 %v6615_v49, %v6683_v27  ;;  %v1918_v2 = vmax.f32 %v1750_v50, 0.0 }
 0x2a8   :  { %9956 = vst [vmem:[#allocation33_spill] sm:$0xff] %v6690_v8  ;;  %v1985_v55 = vmin.f32 %v1921_v61, 6.0  ;;  %v2048_v13 = vrot.slane %v1983_v51, 7  ;;  %v2176_v32 = vrot.slane %v1983_v51, 1 }
 0x2aa   :  { %v1564_v26 = vpop.f32.mrf.mxu2  ;;  %v2080_v20 = vrot.slane %v1985_v55, 7  ;;  %v2208_v61 = vrot.slane %v1985_v55, 1  ;;  %v3163_v58 = vmul.f32 %v6617_v7, %v1985_v55 }
 0x2ab   :  { %v6693_v17 = vadd.f32 %v1564_v26, %v9957_v62  ;;  %v1752_v48 = vpop.f32.mrf.mxu3  ;;  %v2889_v26 = vadd.f32 %v2825_v18, %v2755_v3  ;;  %v2891_v62 = vadd.f32 %v2827_v22, %v2757_v14  ;;  %v6718_v18 = vadd.f32 %v2504_v29, %v2438_v10 }
 0x2ac   :  { %v1920_v40 = vmax.f32 %v1752_v48, 0.0  ;;  %v6708_v1 = vsel %vm652_vm0, %v2048_v13, %v2080_v20  ;;  %v2144_v50 = vsel %vm652_vm0, %v2080_v20, %v2048_v13  ;;  %v6714_v43 = vsel %vm717_vm1, %v2176_v32, %v2208_v61 }
 0x2ad   :  { %9958 = vst [vmem:[#allocation34_spill] sm:$0xff] %v6693_v17  ;;  %v6702_v35 = vpop.f32.mrf.mxu0  ;;  %v1634_v12 = vpack.c.bf16 %v6693_v17, %v6690_v8  ;;  %v2272_v46 = vsel %vm717_vm1, %v2208_v61, %v2176_v32  ;;  %v2507_v3 = vmul.f32 %v6575_v30, %v1983_v51  ;;  %v1982_v14 = vmin.f32 %v1918_v2, 6.0 }
 0x2ae   :  { %9959 = vst [vmem:[#allocation69_spill] sm:$0xff] %v6718_v18  ;;  %v2443_v22 = vmul.f32 %v6583_v53, %v6708_v1  ;;  %v6726_v48 = vsel %vm789_vm3, %v6708_v1, %v2272_v46  ;;  %v6728_v13 = vmin.f32 %v1920_v40, 6.0  ;;  %v2563_v20 = vadd.f32 %v6627_v34, %v2437_v59 }
 0x2af   :  { %v2631_v29 = vmul.f32 %v6592_v5, %v6639_v52  ;;  %v6734_v10 = vmul.f32 %v6577_v63, %v1983_v51  ;;  %v3161_v2 = vmul.f32 %v6617_v7, %v1983_v51  ;;  %v6740_v32 = vsel %vm750_vm2, %v6714_v43, %v2144_v50 }
 0x2b0   :  { %1794 = vmatmul.bf16.gmra.mxu3 %v1634_v12  ;;  %1883 = vmatmul.bf16.gmra.mxu0 %v1634_v12  ;;  %v2509_v46 = vmul.f32 %v6575_v30, %v1985_v55  ;;  %v6743_v40 = vadd.f32 %v2961_v57, %v2891_v62  ;;  %v2079_v34 = vrot.slane %v6728_v13, 7  ;;  %v2207_v59 = vrot.slane %v6728_v13, 1 }
 0x2b1   :  { %v6747_v12 = vadd.f32 %v2959_v25, %v2889_v26  ;;  %v2047_v17 = vrot.slane %v1982_v14, 7  ;;  %v2635_v51 = vmul.f32 %v6592_v5, %v6726_v48  ;;  %v6752_v50 = vmul.f32 %v6594_v60, %v2301_v24 }
 0x2b2   :  { %v1567_v61 = vpop.f32.mrf.mxu2  ;;  %v2569_v8 = vadd.f32 %v2509_v46, %v2443_v22  ;;  %v2175_v15 = vrot.slane %v1982_v14, 1  ;;  %v2441_v57 = vmul.f32 %v6583_v53, %v6740_v32  ;;  %v6756_v62 = vadd.f32 %v2629_v28, %v2563_v20 }
 0x2b3   :  { %v1755_v52 = vpop.f32.mrf.mxu3  ;;  %v6759_v38 = vadd.f32 %v2631_v29, %v6673_v31  ;;  %v2506_v25 = vmul.f32 %v6579_v19, %v1982_v14  ;;  %v6763_v26 = vmul.f32 %v6581_v4, %v1982_v14  ;;  %v3097_v22 = vmul.f32 %v6635_v21, %v6708_v1 }
 0x2b4   :  { %v6769_v24 = vsel %vm652_vm0, %v2047_v17, %v2079_v34  ;;  %v3160_v46 = vmul.f32 %v6631_v6, %v1982_v14  ;;  %v6773_v28 = vmul.f32 %v6577_v63, %v1985_v55  ;;  %v2271_v31 = vsel %vm717_vm1, %v2207_v59, %v2175_v15 }
 0x2b5   :  { %v1846_v16 = vpop.f32.mrf.mxu0  ;;  %9960 = vst [vmem:[#allocation70_spill] sm:$0xff] %v6763_v26  ;;  %v3095_v20 = vmul.f32 %v6635_v21, %v6740_v32  ;;  %v6779_v29 = vadd.f32 %v2635_v51, %v2569_v8  ;;  %v1923_v41 = vmax.f32 %v6702_v35, 0.0  ;;  %v2633_v36 = vmul.f32 %v6592_v5, %v6714_v43 }
 0x2b6   :  { %v2143_v14 = vsel %vm652_vm0, %v2079_v34, %v2047_v17  ;;  %v6789_v53 = vsel %vm717_vm1, %v2175_v15, %v2207_v59  ;;  %v2442_v18 = vmul.f32 %v6594_v60, %v6769_v24  ;;  %v2567_v26 = vadd.f32 %v2507_v3, %v2441_v57  ;;  %v9962_v15 = vld [vmem:[#allocation36_spill] sm:$0xff] }
 0x2b7   :  { %9961 = vst [vmem:[#allocation71_spill] sm:$0xff] %v6779_v29  ;;  %v3223_v8 = vadd.f32 %v3163_v58, %v3097_v22  ;;  %v6796_v55 = vsel %vm789_vm3, %v6769_v24, %v2271_v31  ;;  %v1922_v35 = vmax.f32 %v1755_v52, 0.0  ;;  %v3289_v5 = vmul.f32 %v6645_v33, %v6726_v48  ;;  %v9965_v52 = vld [vmem:[#allocation35_spill] sm:$0xff] }
 0x2b8   :  { %v2508_v17 = vmul.f32 %v6579_v19, %v6728_v13  ;;  %v6805_v49 = vadd.f32 %v2633_v36, %v2567_v26  ;;  %v3221_v58 = vadd.f32 %v3161_v2, %v3095_v20  ;;  %v6810_v3 = vsel %vm750_vm2, %v6789_v53, %v2143_v14 }
 0x2b9   :  { %v6813_v57 = vadd.f32 %v1567_v61, %v9965_v52  ;;  %v1925_v22 = vmax.f32 %v1846_v16, 0.0  ;;  %v3409_v31 = vadd.f32 %v6679_v39, %v6779_v29  ;;  %v3287_v36 = vmul.f32 %v6645_v33, %v6714_v43 }
 0x2ba   :  { %v1569_v51 = vpop.f32.mrf.mxu2  ;;  %9964 = vst [vmem:[#allocation72_spill] sm:$0xff] %v6805_v49  ;;  %v2568_v45 = vadd.f32 %v2508_v17, %v2442_v18  ;;  %v3096_v2 = vmul.f32 %v6671_v54, %v6769_v24  ;;  %v6825_v26 = vmin.f32 %v1922_v35, 6.0  ;;  %v3349_v20 = vadd.f32 %v3289_v5, %v3223_v8  ;;  %v4834_v8 = vld [vmem:[#allocation16 + $0x8] sm:$0xff] }
 0x2bb   :  { %v6803_v34 = vadd.f32 %v1569_v51, %v9962_v15  ;;  %v1757_v59 = vpop.f32.mrf.mxu3  ;;  %9966 = vst [vmem:[#allocation35_spill] sm:$0xff] %v6813_v57  ;;  %v2634_v51 = vmul.f32 %v6623_v47, %v6796_v55  ;;  %v6819_v15 = vmin.f32 %v1923_v41, 6.0  ;;  %v3347_v39 = vadd.f32 %v3287_v36, %v3221_v58  ;;  %4134 = vmatpush.bf16.msra.mxu3 %v4834_v8 }
 0x2bc   :  { %v3407_v18 = vadd.f32 %v6695_v0, %v6805_v49  ;;  %v2440_v41 = vmul.f32 %v6594_v60, %v6810_v3  ;;  %v3094_v14 = vmul.f32 %v6671_v54, %v6810_v3  ;;  %v6837_v17 = vmul.f32 %v6581_v4, %v6728_v13 }
 0x2bd   :  { %9963 = vst [vmem:[#allocation36_spill] sm:$0xff] %v6803_v34  ;;  %v1635_v16 = vpack.c.bf16 %v6803_v34, %v6813_v57  ;;  %v1849_v61 = vpop.f32.mrf.mxu0  ;;  %v3162_v35 = vmul.f32 %v6631_v6, %v6728_v13  ;;  %v6841_v52 = vmin.f32 %v1925_v22, 6.0  ;;  %v3473_v5 = vadd.f32 %v3409_v31, %v3349_v20 }
 0x2be   :  { %v6843_v58 = vadd.f32 %v2634_v51, %v2568_v45  ;;  %v2050_v0 = vrot.slane %v6819_v15, 7  ;;  %v3471_v36 = vadd.f32 %v3407_v18, %v3347_v39  ;;  %v2566_v34 = vadd.f32 %v2506_v25, %v2440_v41 }
 0x2bf   :  { %v3222_v57 = vadd.f32 %v3162_v35, %v3096_v2  ;;  %v2178_v60 = vrot.slane %v6819_v15, 1  ;;  %v6849_v29 = vmul.f32 %v6575_v30, %v6819_v15  ;;  %v1924_v13 = vmax.f32 %v1757_v59, 0.0 }
 0x2c0   :  { %9967 = vst [vmem:[#allocation73_spill] sm:$0xff] %v6843_v58  ;;  %1799 = vmatmul.bf16.gmra.mxu3 %v1635_v16  ;;  %1888 = vmatmul.bf16.gmra.mxu0 %v1635_v16  ;;  %v6853_v45 = vmul.f32 %v6577_v63, %v6819_v15  ;;  %v2632_v25 = vmul.f32 %v6623_v47, %v6789_v53  ;;  %v2082_v20 = vrot.slane %v6841_v52, 7  ;;  %v3535_v39 = vmax.f32 %v3471_v36, 0.0 }
 0x2c1   :  { %9968 = vst [vmem:[#allocation74_spill] sm:$0xff] %v6849_v29  ;;  %v3220_v2 = vadd.f32 %v3160_v46, %v3094_v14  ;;  %v3537_v18 = vmax.f32 %v3473_v5, 0.0  ;;  %v3286_v41 = vmul.f32 %v6675_v44, %v6789_v53  ;;  %v3288_v35 = vmul.f32 %v6675_v44, %v6796_v55 }
 0x2c2   :  { %v1572_v22 = vpop.f32.mrf.mxu2  ;;  %v6860_v59 = vadd.f32 %v2632_v25, %v2566_v34  ;;  %v3408_v8 = vadd.f32 %v6743_v40, %v6843_v58  ;;  %v6868_v31 = vmin.f32 %v1924_v13, 6.0  ;;  %v1927_v46 = vmax.f32 %v1849_v61, 0.0 }
 0x2c3   :  { %v1760_v51 = vpop.f32.mrf.mxu3  ;;  %v3599_v14 = vmin.f32 %v3535_v39, 6.0  ;;  %v3601_v16 = vmin.f32 %v3537_v18, 6.0  ;;  %v2210_v29 = vrot.slane %v6841_v52, 1  ;;  %v3346_v36 = vadd.f32 %v3286_v41, %v3220_v2  ;;  %v9976_v18 = vld [vmem:[#allocation38_spill] sm:$0xff] }
 0x2c4   :  { %9969 = vst [vmem:[#allocation75_spill] sm:$0xff] %v6860_v59  ;;  %v3348_v5 = vadd.f32 %v3288_v35, %v3222_v57  ;;  %v3406_v34 = vadd.f32 %v6747_v12, %v6860_v59  ;;  %v6875_v25 = vmul.f32 %v6579_v19, %v6825_v26  ;;  %v6879_v49 = vmul.f32 %v6581_v4, %v6825_v26 }
 0x2c5   :  { %v6881_v40 = vpack.c.bf16 %v3601_v16, %v3599_v14  ;;  %v1926_v61 = vmax.f32 %v1760_v51, 0.0  ;;  %v1851_v13 = vpop.f32.mrf.mxu0  ;;  %v6885_v39 = vmul.f32 %v6575_v30, %v6841_v52  ;;  %v6889_v57 = vmul.f32 %v6577_v63, %v6841_v52 }
 0x2c6   :  { %9970 = vst [vmem:[#allocation76_spill] sm:$0xff] %v6875_v25  ;;  %v3470_v12 = vadd.f32 %v3406_v34, %v3346_v36  ;;  %v3472_v2 = vadd.f32 %v3408_v8, %v3348_v5  ;;  %v6892_v41 = vmin.f32 %v1927_v46, 6.0  ;;  %v2146_v51 = vsel %vm652_vm0, %v2082_v20, %v2050_v0  ;;  %v9974_v36 = vld [vmem:[#allocation37_spill] sm:$0xff] }
 0x2c7   :  { %9971 = vst [vmem:[#allocation77_spill] sm:$0xff] %v6879_v49  ;;  %3919 = vmatmul.bf16.vlgmr.msra.gmra.mxu2 %v6881_v40  ;;  %v2760_v35 = vmul.f32 %v6585_v56, %v6740_v32  ;;  %v2762_v8 = vmul.f32 %v6585_v56, %v6708_v1  ;;  %v2209_v46 = vrot.slane %v6868_v31, 1  ;;  %v6907_v5 = vadd.f32 %v1572_v22, %v9974_v36 }
 0x2c8   :  { %9972 = vst [vmem:[#allocation78_spill] sm:$0xff] %v6881_v40  ;;  %v3534_v14 = vmax.f32 %v3470_v12, 0.0  ;;  %v3536_v25 = vmax.f32 %v3472_v2, 0.0  ;;  %v6909_v34 = vmin.f32 %v1926_v61, 6.0  ;;  %v4842_v12 = vld [vmem:[#allocation16 + $0x48] sm:$0xff]  ;;  %v6916_v59 = vsel %vm652_vm0, %v2050_v0, %v2082_v20 }
 0x2c9   :  { %9973 = vst [vmem:[#allocation79_spill] sm:$0xff] %v6885_v39  ;;  %v6901_v39 = vsel %vm717_vm1, %v2178_v60, %v2210_v29  ;;  %v2274_v1 = vsel %vm717_vm1, %v2210_v29, %v2178_v60  ;;  %v1929_v49 = vmax.f32 %v1851_v13, 0.0  ;;  %4223 = vmatpush.bf16.msra.mxu0 %v4842_v12  ;;  %v2896_v0 = vadd.f32 %v6773_v28, %v2762_v8 }
 0x2ca   :  { %v1574_v16 = vpop.f32.mrf.mxu2  ;;  %9975 = vst [vmem:[#allocation37_spill] sm:$0xff] %v6907_v5  ;;  %v3598_v2 = vmin.f32 %v3534_v14, 6.0  ;;  %v3600_v58 = vmin.f32 %v3536_v25, 6.0  ;;  %v6925_v61 = vsel %vm750_vm2, %v6901_v39, %v2146_v51  ;;  %v2964_v20 = vmul.f32 %v6587_v37, %v6714_v43 }
 0x2cb   :  { %v6912_v40 = vadd.f32 %v1574_v16, %v9976_v18  ;;  %v1762_v32 = vpop.f32.mrf.mxu3  ;;  %v2894_v18 = vadd.f32 %v6734_v10, %v2760_v35  ;;  %v2966_v60 = vmul.f32 %v6587_v37, %v6726_v48  ;;  %v6937_v29 = vmul.f32 %v6579_v19, %v6868_v31 }
 0x2cc   :  { %v6928_v25 = vpack.c.bf16 %v3600_v58, %v3598_v2  ;;  %v6941_v13 = vmul.f32 %v6581_v4, %v6868_v31  ;;  %v6947_v28 = vsel %vm789_vm3, %v6916_v59, %v2274_v1  ;;  %v3099_v16 = vmul.f32 %v6635_v21, %v6925_v61 }
 0x2cd   :  { %9977 = vst [vmem:[#allocation38_spill] sm:$0xff] %v6912_v40  ;;  %v1636_v22 = vpack.c.bf16 %v6912_v40, %v6907_v5  ;;  %v3028_v48 = vadd.f32 %v2964_v20, %v2894_v18  ;;  %v3030_v58 = vadd.f32 %v2966_v60, %v2896_v0  ;;  %v6955_v51 = vmul.f32 %v6575_v30, %v6892_v41  ;;  %v1854_v35 = vpop.f32.mrf.mxu0 }
 0x2ce   :  { %9978 = vst [vmem:[#allocation80_spill] sm:$0xff] %v6928_v25  ;;  %3830 = vmatmul.bf16.vlgmr.msra.gmra.mxu1 %v6928_v25  ;;  %v3101_v14 = vmul.f32 %v6635_v21, %v6916_v59  ;;  %v3165_v8 = vmul.f32 %v6617_v7, %v6819_v15  ;;  %v3167_v36 = vmul.f32 %v6617_v7, %v6841_v52  ;;  %v6968_v1 = vmin.f32 %v1929_v49, 6.0 }
 0x2cf   :  { %9979 = vst [vmem:[#allocation81_spill] sm:$0xff] %v6955_v51  ;;  %v6965_v12 = vmul.f32 %v6577_v63, %v6892_v41  ;;  %v1928_v18 = vmax.f32 %v1762_v32, 0.0  ;;  %v3291_v43 = vmul.f32 %v6645_v33, %v6901_v39  ;;  %v3293_v15 = vmul.f32 %v6645_v33, %v6947_v28 }
 0x2d0   :  { %1804 = vmatmul.bf16.gmra.mxu3 %v1636_v22  ;;  %1893 = vmatmul.bf16.gmra.mxu0 %v1636_v22  ;;  %v3225_v20 = vadd.f32 %v3165_v8, %v3099_v16  ;;  %v3227_v60 = vadd.f32 %v3167_v36, %v3101_v14  ;;  %v1931_v22 = vmax.f32 %v1854_v35, 0.0  ;;  %v3411_v10 = vadd.f32 %v3028_v48, %v6756_v62 }
 0x2d1   :  { %v3413_v40 = vadd.f32 %v3030_v58, %v6759_v38  ;;  %v9980_v32 = vrot.slane %v6825_v26, 7  ;;  %v9981_v16 = vrot.slane %v6868_v31, 7  ;;  %v9982_v8 = vrot.slane %v6825_v26, 1 }
 0x2d2   :  { %v1577_v0 = vpop.f32.mrf.mxu2  ;;  %v3351_v2 = vadd.f32 %v3291_v43, %v3225_v20  ;;  %v3353_v49 = vadd.f32 %v3293_v15, %v3227_v60  ;;  %v6991_v62 = vmul.f32 %v6579_v19, %v6909_v34  ;;  %v6995_v38 = vmul.f32 %v6581_v4, %v6909_v34 }
 0x2d3   :  { %v1765_v5 = vpop.f32.mrf.mxu3  ;;  %v2145_v14 = vsel %vm652_vm0, %v9981_v16, %v9980_v32  ;;  %v6987_v36 = vsel %vm717_vm1, %v9982_v8, %v2209_v46  ;;  %v9985_v43 = vmov %v9981_v16  ;;  %v9986_v48 = vmov %v9980_v32 }
 0x2d4   :  { %9983 = vst [vmem:[#allocation82_spill] sm:$0xff] %v6991_v62  ;;  %v7003_v58 = vsel %vm652_vm0, %v9986_v48, %v9985_v43  ;;  %v9987_v35 = vmov %v9982_v8  ;;  %v7010_v15 = vmin.f32 %v1928_v18, 6.0  ;;  %v3475_v32 = vadd.f32 %v3411_v10, %v3351_v2  ;;  %v9989_v10 = vld [vmem:[#allocation62_spill] sm:$0xff] }
 0x2d5   :  { %9984 = vst [vmem:[#allocation83_spill] sm:$0xff] %v6995_v38  ;;  %v2273_v20 = vsel %vm717_vm1, %v2209_v46, %v9987_v35  ;;  %v3477_v16 = vadd.f32 %v3413_v40, %v3353_v49  ;;  %v7012_v8 = vmin.f32 %v1931_v22, 6.0  ;;  %v1930_v52 = vmax.f32 %v1765_v5, 0.0  ;;  %v9991_v35 = vld [vmem:[#allocation70_spill] sm:$0xff] }
 0x2d6   :  { %v7017_v62 = vsel %vm750_vm2, %v6987_v36, %v2145_v14  ;;  %v2562_v43 = vadd.f32 %v6656_v11, %v6752_v50  ;;  %v3539_v48 = vmax.f32 %v3475_v32, 0.0  ;;  %v7024_v46 = vsel %vm789_vm3, %v7003_v58, %v2273_v20  ;;  %v9990_v11 = vld [vmem:[#allocation63_spill] sm:$0xff] }
 0x2d7   :  { %v3541_v25 = vmax.f32 %v3477_v16, 0.0  ;;  %9988 = vst [vmem:[#allocation84_spill] sm:$0xff] %v7024_v46  ;;  %v2628_v40 = vmul.f32 %v6623_v47, %v6652_v42  ;;  %v2630_v5 = vmul.f32 %v6623_v47, %v6683_v27  ;;  %v2759_v2 = vmul.f32 %v9989_v10, %v6810_v3 }
 0x2d8   :  { %v2761_v18 = vmul.f32 %v9989_v10, %v6769_v24  ;;  %v2965_v50 = vmul.f32 %v9990_v11, %v6796_v55  ;;  %v3603_v22 = vmin.f32 %v3539_v48, 6.0  ;;  %v2963_v14 = vmul.f32 %v9990_v11, %v6789_v53 }
 0x2d9   :  { %v3605_v49 = vmin.f32 %v3541_v25, 6.0  ;;  %v3098_v42 = vmul.f32 %v6671_v54, %v7017_v62  ;;  %v2893_v20 = vadd.f32 %v9991_v35, %v2759_v2  ;;  %v3100_v3 = vmul.f32 %v6671_v54, %v7003_v58 }
 0x2da   :  { %v2895_v27 = vadd.f32 %v6837_v17, %v2761_v18  ;;  %v3164_v24 = vmul.f32 %v6631_v6, %v6825_v26  ;;  %v1579_v32 = vpop.f32.mrf.mxu2  ;;  %v2688_v25 = vadd.f32 %v2628_v40, %v2562_v43  ;;  %v3166_v53 = vmul.f32 %v6631_v6, %v6868_v31  ;;  %v1856_v18 = vpop.f32.mrf.mxu0  ;;  %v9993_v26 = vld [vmem:[#allocation39_spill] sm:$0xff] }
 0x2db   :  { %v7046_v55 = vpack.c.bf16 %v3605_v49, %v3603_v22  ;;  %v3292_v16 = vmul.f32 %v6675_v44, %v7024_v46  ;;  %v3027_v48 = vadd.f32 %v2963_v14, %v2893_v20  ;;  %v3290_v17 = vmul.f32 %v6675_v44, %v6987_v36  ;;  %v9995_v22 = vld [vmem:[#allocation69_spill] sm:$0xff]  ;;  %v9996_v49 = vld [vmem:[#allocation40_spill] sm:$0xff] }
 0x2dc   :  { %v3029_v2 = vadd.f32 %v2965_v50, %v2895_v27  ;;  %v3224_v35 = vadd.f32 %v3164_v24, %v3098_v42  ;;  %v7056_v60 = vadd.f32 %v1577_v0, %v9993_v26  ;;  %v2690_v43 = vadd.f32 %v2630_v5, %v9995_v22 }
 0x2dd   :  { %9992 = vst [vmem:[#allocation70_spill] sm:$0xff] %v7046_v55  ;;  %3924 = vmatmul.bf16.gmra.mxu2 %v7046_v55  ;;  %v3226_v40 = vadd.f32 %v3166_v53, %v3100_v3  ;;  %v7060_v31 = vadd.f32 %v1579_v32, %v9996_v49  ;;  %v2212_v51 = vrot.slane %v6968_v1, 1  ;;  %v7065_v50 = vmul.f32 %v6575_v30, %v6968_v1 }
 0x2de   :  { %9994 = vst [vmem:[#allocation39_spill] sm:$0xff] %v7056_v60  ;;  %v3350_v14 = vadd.f32 %v3290_v17, %v3224_v35  ;;  %v3410_v42 = vadd.f32 %v3027_v48, %v2688_v25  ;;  %v7067_v20 = vmin.f32 %v1930_v52, 6.0  ;;  %v3412_v24 = vadd.f32 %v3029_v2, %v2690_v43 }
 0x2df   :  { %9997 = vst [vmem:[#allocation69_spill] sm:$0xff] %v7060_v31  ;;  %v3352_v27 = vadd.f32 %v3292_v16, %v3226_v40  ;;  %v1637_v0 = vpack.c.bf16 %v7060_v31, %v7056_v60  ;;  %v7073_v5 = vmul.f32 %v6577_v63, %v6968_v1  ;;  %v2083_v3 = vrot.slane %v7010_v15, 7 }
 0x2e0   :  { %9998 = vst [vmem:[#allocation40_spill] sm:$0xff] %v7065_v50  ;;  %v2211_v32 = vrot.slane %v7010_v15, 1  ;;  %v3474_v53 = vadd.f32 %v3410_v42, %v3350_v14  ;;  %v7079_v35 = vmul.f32 %v6579_v19, %v7010_v15  ;;  %v7083_v52 = vmul.f32 %v6581_v4, %v7010_v15 }
 0x2e1   :  { %v3476_v16 = vadd.f32 %v3412_v24, %v3352_v27  ;;  %1809 = vmatmul.bf16.gmra.mxu3 %v1637_v0  ;;  %1898 = vmatmul.bf16.gmra.mxu0 %v1637_v0  ;;  %v7089_v2 = vmul.f32 %v6575_v30, %v7012_v8  ;;  %v7093_v17 = vmul.f32 %v6577_v63, %v7012_v8  ;;  %v1933_v49 = vmax.f32 %v1856_v18, 0.0 }
 0x2e2   :  { %9999 = vst [vmem:[#allocation85_spill] sm:$0xff] %v7079_v35  ;;  %v3538_v26 = vmax.f32 %v3474_v53, 0.0  ;;  %v10003_v42 = vrot.slane %v6968_v1, 7  ;;  %v10004_v27 = vrot.slane %v6892_v41, 7  ;;  %v10007_v43 = vrot.slane %v6892_v41, 1  ;;  %v1582_v60 = vpop.f32.mrf.mxu2 }
 0x2e3   :  { %10000 = vst [vmem:[#allocation86_spill] sm:$0xff] %v7083_v52  ;;  %v3540_v40 = vmax.f32 %v3476_v16, 0.0  ;;  %v3169_v35 = vmul.f32 %v6617_v7, %v6892_v41  ;;  %v10011_v38 = vrot.slane %v6909_v34, 7 }
 0x2e4   :  { %10001 = vst [vmem:[#allocation87_spill] sm:$0xff] %v7089_v2  ;;  %v3602_v14 = vmin.f32 %v3538_v26, 6.0  ;;  %v7103_v24 = vsel %vm652_vm0, %v10004_v27, %v10003_v42  ;;  %v10005_v0 = vmov %v10004_v27  ;;  %v10006_v48 = vmov %v10003_v42  ;;  %v1767_v26 = vpop.f32.mrf.mxu3 }
 0x2e5   :  { %10002 = vst [vmem:[#allocation88_spill] sm:$0xff] %v7093_v17  ;;  %v2148_v53 = vsel %vm652_vm0, %v10006_v48, %v10005_v0  ;;  %v7115_v18 = vsel %vm717_vm1, %v10007_v43, %v2212_v51  ;;  %v3604_v16 = vmin.f32 %v3540_v40, 6.0  ;;  %v10008_v22 = vmov %v10007_v43  ;;  %v1859_v0 = vpop.f32.mrf.mxu0 }
 0x2e6   :  { %v2276_v42 = vsel %vm717_vm1, %v2212_v51, %v10008_v22  ;;  %v7124_v27 = vsel %vm750_vm2, %v7115_v18, %v2148_v53  ;;  %v2764_v48 = vmul.f32 %v6585_v56, %v6925_v61  ;;  %v2766_v40 = vmul.f32 %v6585_v56, %v6916_v59 }
 0x2e7   :  { %v7131_v43 = vsel %vm789_vm3, %v7103_v24, %v2276_v42  ;;  %v2968_v51 = vmul.f32 %v6587_v37, %v6901_v39  ;;  %v2970_v22 = vmul.f32 %v6587_v37, %v6947_v28  ;;  %v7139_v53 = vpack.c.bf16 %v3604_v16, %v3602_v14 }
 0x2e8   :  { %v2898_v25 = vadd.f32 %v6853_v45, %v2764_v48  ;;  %v3103_v31 = vmul.f32 %v6635_v21, %v7124_v27  ;;  %v3105_v42 = vmul.f32 %v6635_v21, %v7103_v24  ;;  %v1932_v2 = vmax.f32 %v1767_v26, 0.0 }
 0x2e9   :  { %10009 = vst [vmem:[#allocation89_spill] sm:$0xff] %v7139_v53  ;;  %v2900_v55 = vadd.f32 %v6889_v57, %v2766_v40  ;;  %v3171_v17 = vmul.f32 %v6617_v7, %v6968_v1  ;;  %3835 = vmatmul.bf16.gmra.mxu1 %v7139_v53  ;;  %v7152_v14 = vmin.f32 %v1933_v49, 6.0  ;;  %v1935_v45 = vmax.f32 %v1859_v0, 0.0  ;;  %v10010_v40 = vld [vmem:[#allocation72_spill] sm:$0xff]  ;;  %v10016_v0 = vld [vmem:[#allocation71_spill] sm:$0xff] }
 0x2ea   :  { %v3032_v16 = vadd.f32 %v2968_v51, %v2898_v25  ;;  %v3297_v48 = vmul.f32 %v6645_v33, %v7131_v43  ;;  %v3229_v52 = vadd.f32 %v3169_v35, %v3103_v31  ;;  %v3295_v57 = vmul.f32 %v6645_v33, %v7115_v18  ;;  %v1584_v53 = vpop.f32.mrf.mxu2 }
 0x2eb   :  { %v3034_v50 = vadd.f32 %v2970_v22, %v2900_v55  ;;  %v3231_v26 = vadd.f32 %v3171_v17, %v3105_v42  ;;  %v7163_v1 = vsel %vm652_vm0, %v10011_v38, %v2083_v3  ;;  %v10013_v49 = vmov %v10011_v38 }
 0x2ec   :  { %v3415_v41 = vadd.f32 %v3032_v16, %v10010_v40  ;;  %10012 = vst [vmem:[#allocation72_spill] sm:$0xff] %v7163_v1  ;;  %v2147_v25 = vsel %vm652_vm0, %v2083_v3, %v10013_v49  ;;  %v10014_v55 = vrot.slane %v6909_v34, 1  ;;  %v3355_v35 = vadd.f32 %v3295_v57, %v3229_v52  ;;  %v4833_v57 = vld [vmem:[#allocation16] sm:$0xff] }
 0x2ed   :  { %v3357_v17 = vadd.f32 %v3297_v48, %v3231_v26  ;;  %v3417_v51 = vadd.f32 %v3034_v50, %v10016_v0  ;;  %v7182_v42 = vmul.f32 %v6579_v19, %v7067_v20  ;;  %v2086_v3 = vrot.slane %v7152_v14, 7  ;;  %v10020_v0 = vld [vmem:[#allocation77_spill] sm:$0xff]  ;;  %4135 = vmatpush.bf16.msra.mxu3 %v4833_v57 }
 0x2ee   :  { %v7173_v31 = vsel %vm717_vm1, %v10014_v55, %v2211_v32  ;;  %v10017_v22 = vmov %v10014_v55  ;;  %v7185_v16 = vmin.f32 %v1932_v2, 6.0  ;;  %v7187_v40 = vmin.f32 %v1935_v45, 6.0 }
 0x2ef   :  { %10015 = vst [vmem:[#allocation90_spill] sm:$0xff] %v7173_v31  ;;  %v2275_v38 = vsel %vm717_vm1, %v2211_v32, %v10017_v22  ;;  %v3479_v49 = vadd.f32 %v3415_v41, %v3355_v35  ;;  %v3481_v52 = vadd.f32 %v3417_v51, %v3357_v17  ;;  %v7192_v50 = vsel %vm750_vm2, %v7173_v31, %v2147_v25  ;;  %v1770_v17 = vpop.f32.mrf.mxu3 }
 0x2f0   :  { %10018 = vst [vmem:[#allocation71_spill] sm:$0xff] %v7182_v42  ;;  %v7197_v32 = vsel %vm789_vm3, %v7163_v1, %v2275_v38  ;;  %v2763_v48 = vmul.f32 %v9989_v10, %v7017_v62  ;;  %v2765_v2 = vmul.f32 %v9989_v10, %v7003_v58  ;;  %v2967_v45 = vmul.f32 %v9990_v11, %v6987_v36 }
 0x2f1   :  { %10019 = vst [vmem:[#allocation91_spill] sm:$0xff] %v7192_v50  ;;  %v2969_v26 = vmul.f32 %v9990_v11, %v7024_v46  ;;  %v3543_v41 = vmax.f32 %v3479_v49, 0.0  ;;  %v3545_v25 = vmax.f32 %v3481_v52, 0.0  ;;  %v3102_v55 = vmul.f32 %v6671_v54, %v7192_v50  ;;  %v10026_v50 = vld [vmem:[#allocation75_spill] sm:$0xff]  ;;  %v10027_v46 = vld [vmem:[#allocation73_spill] sm:$0xff] }
 0x2f2   :  { %v3104_v35 = vmul.f32 %v6671_v54, %v7163_v1  ;;  %v2897_v51 = vadd.f32 %v10020_v0, %v2763_v48  ;;  %v2899_v22 = vadd.f32 %v6941_v13, %v2765_v2  ;;  %v3168_v38 = vmul.f32 %v6631_v6, %v6909_v34  ;;  %v10022_v34 = vld [vmem:[#allocation41_spill] sm:$0xff] }
 0x2f3   :  { %v3170_v42 = vmul.f32 %v6631_v6, %v7010_v15  ;;  %v3607_v49 = vmin.f32 %v3543_v41, 6.0  ;;  %v3609_v52 = vmin.f32 %v3545_v25, 6.0  ;;  %v3294_v11 = vmul.f32 %v6675_v44, %v7173_v31  ;;  %v10024_v6 = vld [vmem:[#allocation42_spill] sm:$0xff] }
 0x2f4   :  { %v3296_v54 = vmul.f32 %v6675_v44, %v7197_v32  ;;  %v3031_v1 = vadd.f32 %v2967_v45, %v2897_v51  ;;  %v3033_v48 = vadd.f32 %v2969_v26, %v2899_v22  ;;  %v3228_v0 = vadd.f32 %v3168_v38, %v3102_v55 }
 0x2f5   :  { %v3230_v13 = vadd.f32 %v3170_v42, %v3104_v35  ;;  %v7221_v2 = vpack.c.bf16 %v3609_v52, %v3607_v49  ;;  %v7224_v10 = vadd.f32 %v1582_v60, %v10022_v34  ;;  %v1934_v15 = vmax.f32 %v1770_v17, 0.0 }
 0x2f6   :  { %v7227_v57 = vadd.f32 %v1584_v53, %v10024_v6  ;;  %v3354_v41 = vadd.f32 %v3294_v11, %v3228_v0  ;;  %v3414_v31 = vadd.f32 %v3031_v1, %v10026_v50  ;;  %v3416_v47 = vadd.f32 %v3033_v48, %v10027_v46 }
 0x2f7   :  { %10021 = vst [vmem:[#allocation77_spill] sm:$0xff] %v7221_v2  ;;  %v3356_v25 = vadd.f32 %v3296_v54, %v3230_v13  ;;  %v7233_v45 = vmul.f32 %v6581_v4, %v7067_v20  ;;  %v2214_v42 = vrot.slane %v7152_v14, 1  ;;  %v7238_v60 = vmul.f32 %v6575_v30, %v7152_v14  ;;  %3929 = vmatmul.bf16.gmra.mxu2 %v7221_v2 }
 0x2f8   :  { %10023 = vst [vmem:[#allocation41_spill] sm:$0xff] %v7224_v10  ;;  %v1638_v6 = vpack.c.bf16 %v7227_v57, %v7224_v10  ;;  %v7245_v54 = vmul.f32 %v6577_v63, %v7152_v14  ;;  %v3478_v11 = vadd.f32 %v3414_v31, %v3354_v41  ;;  %v7251_v50 = vmul.f32 %v6579_v19, %v7185_v16  ;;  %v1861_v31 = vpop.f32.mrf.mxu0 }
 0x2f9   :  { %10025 = vst [vmem:[#allocation42_spill] sm:$0xff] %v7227_v57  ;;  %v3480_v53 = vadd.f32 %v3416_v47, %v3356_v25  ;;  %v7255_v26 = vmul.f32 %v6581_v4, %v7185_v16  ;;  %v7257_v55 = vmin.f32 %v1934_v15, 6.0  ;;  %v10032_v47 = vrot.slane %v7012_v8, 7  ;;  %v1772_v25 = vpop.f32.mrf.mxu3  ;;  %v1587_v57 = vpop.f32.mrf.mxu2 }
 0x2fa   :  { %10028 = vst [vmem:[#allocation75_spill] sm:$0xff] %v7233_v45  ;;  %1814 = vmatmul.bf16.gmra.mxu3 %v1638_v6  ;;  %1903 = vmatmul.bf16.gmra.mxu0 %v1638_v6  ;;  %v3542_v17 = vmax.f32 %v3478_v11, 0.0  ;;  %v7267_v49 = vmul.f32 %v6575_v30, %v7187_v40  ;;  %v10035_v0 = vrot.slane %v7012_v8, 1  ;;  %v7283_v34 = vmul.f32 %v6577_v63, %v7187_v40 }
 0x2fb   :  { %10029 = vst [vmem:[#allocation73_spill] sm:$0xff] %v7238_v60  ;;  %v3544_v51 = vmax.f32 %v3480_v53, 0.0  ;;  %v2150_v22 = vsel %vm652_vm0, %v2086_v3, %v10032_v47  ;;  %v10034_v52 = vmov %v10032_v47  ;;  %v10042_v53 = vld [vmem:[#allocation79_spill] sm:$0xff]  ;;  %v1936_v10 = vmax.f32 %v1772_v25, 0.0 }
 0x2fc   :  { %10030 = vst [vmem:[#allocation92_spill] sm:$0xff] %v7251_v50  ;;  %v7273_v48 = vsel %vm652_vm0, %v10034_v52, %v2086_v3  ;;  %v7279_v13 = vsel %vm717_vm1, %v10035_v0, %v2214_v42  ;;  %v3606_v15 = vmin.f32 %v3542_v17, 6.0  ;;  %v10037_v6 = vmov %v10035_v0  ;;  %v4841_v3 = vld [vmem:[#allocation16 + $0x40] sm:$0xff]  ;;  %v10065_v50 = vld [vmem:[#allocation83_spill] sm:$0xff] }
 0x2fd   :  { %10031 = vst [vmem:[#allocation93_spill] sm:$0xff] %v7255_v26  ;;  %v3608_v41 = vmin.f32 %v3544_v51, 6.0  ;;  %v2278_v11 = vsel %vm717_vm1, %v2214_v42, %v10037_v6  ;;  %v1937_v52 = vmax.f32 %v1861_v31, 0.0  ;;  %v7294_v0 = vsel %vm750_vm2, %v7279_v13, %v2150_v22  ;;  %v10039_v42 = vld [vmem:[#allocation57_spill] sm:$0xff]  ;;  %4224 = vmatpush.bf16.msra.mxu0 %v4841_v3  ;;  %v10040_v31 = vld [vmem:[#allocation60_spill] sm:$0xff] }
 0x2fe   :  { %10033 = vst [vmem:[#allocation94_spill] sm:$0xff] %v7267_v49  ;;  %v7301_v17 = vsel %vm789_vm3, %v7273_v48, %v2278_v11  ;;  %v2445_v51 = vmul.f32 %v10039_v42, %v6925_v61  ;;  %v2447_v6 = vmul.f32 %v10039_v42, %v6916_v59  ;;  %v2637_v47 = vmul.f32 %v10040_v31, %v6901_v39  ;;  %v10041_v11 = vld [vmem:[#allocation74_spill] sm:$0xff] }
 0x2ff   :  { %10036 = vst [vmem:[#allocation95_spill] sm:$0xff] %v7283_v34  ;;  %v7296_v38 = vpack.c.bf16 %v3608_v41, %v3606_v15  ;;  %v2639_v22 = vmul.f32 %v10040_v31, %v6947_v28  ;;  %v2768_v15 = vmul.f32 %v6585_v56, %v7124_v27  ;;  %v2770_v41 = vmul.f32 %v6585_v56, %v7103_v24  ;;  %v10066_v34 = vld [vmem:[#allocation86_spill] sm:$0xff] }
 0x300   :  { %v2571_v61 = vadd.f32 %v10041_v11, %v2445_v51  ;;  %v2573_v35 = vadd.f32 %v10042_v53, %v2447_v6  ;;  %v2972_v59 = vmul.f32 %v6587_v37, %v7115_v18  ;;  %v2974_v39 = vmul.f32 %v6587_v37, %v7131_v43 }
 0x301   :  { %10038 = vst [vmem:[#allocation96_spill] sm:$0xff] %v7296_v38  ;;  %3840 = vmatmul.bf16.gmra.mxu1 %v7296_v38  ;;  %v2902_v28 = vadd.f32 %v6965_v12, %v2768_v15  ;;  %v2904_v3 = vadd.f32 %v7073_v5, %v2770_v41  ;;  %v3107_v1 = vmul.f32 %v6635_v21, %v7294_v0  ;;  %v10047_v25 = vrot.slane %v7185_v16, 1  ;;  %v1589_v45 = vpop.f32.mrf.mxu2 }
 0x302   :  { %v3109_v46 = vmul.f32 %v6635_v21, %v7273_v48  ;;  %v7330_v51 = vmul.f32 %v6579_v19, %v7257_v55  ;;  %v2697_v53 = vadd.f32 %v2637_v47, %v2571_v61  ;;  %v3173_v6 = vmul.f32 %v6617_v7, %v7012_v8 }
 0x303   :  { %v3175_v11 = vmul.f32 %v6617_v7, %v7152_v14  ;;  %v2699_v12 = vadd.f32 %v2639_v22, %v2573_v35  ;;  %v3036_v15 = vadd.f32 %v2972_v59, %v2902_v28  ;;  %v3038_v5 = vadd.f32 %v2974_v39, %v2904_v3  ;;  %v1864_v14 = vpop.f32.mrf.mxu0  ;;  %v1775_v39 = vpop.f32.mrf.mxu3 }
 0x304   :  { %10043 = vst [vmem:[#allocation57_spill] sm:$0xff] %v7330_v51  ;;  %v3301_v41 = vmul.f32 %v6645_v33, %v7301_v17  ;;  %v3233_v49 = vadd.f32 %v3173_v6, %v3107_v1  ;;  %v3299_v51 = vmul.f32 %v6645_v33, %v7279_v13  ;;  %v7342_v47 = vmul.f32 %v6581_v4, %v7257_v55 }
 0x305   :  { %v3235_v2 = vadd.f32 %v3175_v11, %v3109_v46  ;;  %v7344_v8 = vmin.f32 %v1937_v52, 6.0  ;;  %v3419_v35 = vadd.f32 %v3036_v15, %v2697_v53  ;;  %v3421_v22 = vadd.f32 %v3038_v5, %v2699_v12  ;;  %v10053_v12 = vld [vmem:[#allocation61_spill] sm:$0xff] }
 0x306   :  { %10044 = vst [vmem:[#allocation74_spill] sm:$0xff] %v7342_v47  ;;  %v3359_v61 = vadd.f32 %v3299_v51, %v3233_v49  ;;  %v10045_v28 = vrot.slane %v7067_v20, 7  ;;  %v10046_v1 = vrot.slane %v7185_v16, 7  ;;  %v10048_v3 = vrot.slane %v7067_v20, 1 }
 0x307   :  { %v3361_v59 = vadd.f32 %v3301_v41, %v3235_v2  ;;  %v10052_v6 = vmov %v10047_v25  ;;  %v2444_v15 = vmul.f32 %v10053_v12, %v7017_v62  ;;  %v2446_v5 = vmul.f32 %v10053_v12, %v7003_v58 }
 0x308   :  { %v2149_v46 = vsel %vm652_vm0, %v10046_v1, %v10045_v28  ;;  %v7358_v52 = vsel %vm717_vm1, %v10048_v3, %v10047_v25  ;;  %v10049_v53 = vmov %v10046_v1  ;;  %v10050_v2 = vmov %v10045_v28 }
 0x309   :  { %v7366_v49 = vsel %vm652_vm0, %v10050_v2, %v10049_v53  ;;  %v10051_v51 = vmov %v10048_v3  ;;  %v7378_v41 = vmin.f32 %v1936_v10, 6.0  ;;  %v1939_v28 = vmax.f32 %v1864_v14, 0.0  ;;  %v10054_v3 = vld [vmem:[#allocation43_spill] sm:$0xff] }
 0x30a   :  { %v2277_v11 = vsel %vm717_vm1, %v10052_v6, %v10051_v51  ;;  %v3483_v1 = vadd.f32 %v3419_v35, %v3359_v61  ;;  %v3485_v25 = vadd.f32 %v3421_v22, %v3361_v59  ;;  %v7381_v53 = vadd.f32 %v1587_v57, %v10054_v3  ;;  %v10056_v51 = vld [vmem:[#allocation76_spill] sm:$0xff]  ;;  %v10058_v57 = vld [vmem:[#allocation65_spill] sm:$0xff]  ;;  %v10060_v61 = vld [vmem:[#allocation91_spill] sm:$0xff] }
 0x30b   :  { %v1938_v2 = vmax.f32 %v1775_v39, 0.0  ;;  %v7386_v38 = vsel %vm750_vm2, %v7358_v52, %v2149_v46  ;;  %v2570_v6 = vadd.f32 %v10056_v51, %v2444_v15  ;;  %v7392_v58 = vsel %vm789_vm3, %v7366_v49, %v2277_v11  ;;  %v10059_v35 = vld [vmem:[#allocation84_spill] sm:$0xff]  ;;  %v10061_v59 = vld [vmem:[#allocation62_spill] sm:$0xff]  ;;  %v10064_v51 = vld [vmem:[#allocation63_spill] sm:$0xff] }
 0x30c   :  { %10055 = vst [vmem:[#allocation79_spill] sm:$0xff] %v7381_v53  ;;  %v3547_v62 = vmax.f32 %v3483_v1, 0.0  ;;  %v3549_v47 = vmax.f32 %v3485_v25, 0.0  ;;  %v2572_v10 = vadd.f32 %v6937_v29, %v2446_v5  ;;  %v2636_v14 = vmul.f32 %v10058_v57, %v6987_v36  ;;  %v10062_v46 = vld [vmem:[#allocation72_spill] sm:$0xff]  ;;  %v10063_v3 = vld [vmem:[#allocation90_spill] sm:$0xff] }
 0x30d   :  { %10057 = vst [vmem:[#allocation61_spill] sm:$0xff] %v7392_v58  ;;  %v2638_v22 = vmul.f32 %v10058_v57, %v10059_v35  ;;  %v2767_v39 = vmul.f32 %v10061_v59, %v10060_v61  ;;  %v2769_v15 = vmul.f32 %v10061_v59, %v10062_v46  ;;  %v2971_v11 = vmul.f32 %v10064_v51, %v10063_v3  ;;  %v10067_v35 = vld [vmem:[#allocation68_spill] sm:$0xff] }
 0x30e   :  { %v3611_v1 = vmin.f32 %v3547_v62, 6.0  ;;  %v3613_v25 = vmin.f32 %v3549_v47, 6.0  ;;  %v2973_v29 = vmul.f32 %v10064_v51, %v7197_v32  ;;  %v2696_v5 = vadd.f32 %v2636_v14, %v2570_v6  ;;  %v10069_v62 = vld [vmem:[#allocation66_spill] sm:$0xff] }
 0x30f   :  { %v2901_v36 = vadd.f32 %v10065_v50, %v2767_v39  ;;  %v2903_v60 = vadd.f32 %v10066_v34, %v2769_v15  ;;  %v3106_v26 = vmul.f32 %v10067_v35, %v7386_v38  ;;  %v3108_v47 = vmul.f32 %v10067_v35, %v7366_v49 }
 0x310   :  { %v7411_v57 = vpack.c.bf16 %v3613_v25, %v3611_v1  ;;  %v3172_v3 = vmul.f32 %v10069_v62, %v7067_v20  ;;  %v3174_v51 = vmul.f32 %v10069_v62, %v7185_v16  ;;  %v2698_v6 = vadd.f32 %v2638_v22, %v2572_v10  ;;  %v10070_v25 = vld [vmem:[#allocation44_spill] sm:$0xff]  ;;  %v7431_v22 = vpop.f32.mrf.mxu0 }
 0x311   :  { %v3035_v14 = vadd.f32 %v2971_v11, %v2901_v36  ;;  %v3037_v50 = vadd.f32 %v2973_v29, %v2903_v60  ;;  %v3300_v34 = vmul.f32 %v6675_v44, %v7392_v58  ;;  %v3298_v1 = vmul.f32 %v6675_v44, %v7358_v52 }
 0x312   :  { %10068 = vst [vmem:[#allocation43_spill] sm:$0xff] %v7411_v57  ;;  %3934 = vmatmul.bf16.gmra.mxu2 %v7411_v57  ;;  %v3232_v39 = vadd.f32 %v3172_v3, %v3106_v26  ;;  %v3234_v15 = vadd.f32 %v3174_v51, %v3108_v47  ;;  %v7425_v35 = vadd.f32 %v1589_v45, %v10070_v25  ;;  %v2088_v20 = vrot.slane %v7344_v8, 7 }
 0x313   :  { %v2216_v16 = vrot.slane %v7344_v8, 1  ;;  %v7429_v10 = vmin.f32 %v1939_v28, 6.0  ;;  %v3418_v60 = vadd.f32 %v3035_v14, %v2696_v5  ;;  %v3420_v36 = vadd.f32 %v3037_v50, %v2698_v6 }
 0x314   :  { %10071 = vst [vmem:[#allocation76_spill] sm:$0xff] %v7425_v35  ;;  %v3358_v11 = vadd.f32 %v3298_v1, %v3232_v39  ;;  %v3360_v29 = vadd.f32 %v3300_v34, %v3234_v15  ;;  %v1639_v26 = vpack.c.bf16 %v7425_v35, %v7381_v53  ;;  %v7437_v3 = vmul.f32 %v6575_v30, %v7344_v8  ;;  %v1777_v39 = vpop.f32.mrf.mxu3 }
 0x315   :  { %v7441_v45 = vmul.f32 %v6577_v63, %v7344_v8  ;;  %v7444_v51 = vmin.f32 %v1938_v2, 6.0  ;;  %v7449_v47 = vmul.f32 %v6579_v19, %v7378_v41  ;;  %v7453_v50 = vmul.f32 %v6581_v4, %v7378_v41 }
 0x316   :  { %10072 = vst [vmem:[#allocation84_spill] sm:$0xff] %v7437_v3  ;;  %v3482_v6 = vadd.f32 %v3418_v60, %v3358_v11  ;;  %v3484_v14 = vadd.f32 %v3420_v36, %v3360_v29  ;;  %1819 = vmatmul.bf16.gmra.mxu3 %v1639_v26  ;;  %1908 = vmatmul.bf16.gmra.mxu0 %v1639_v26  ;;  %v10077_v60 = vrot.slane %v7187_v40, 7  ;;  %v10080_v28 = vrot.slane %v7187_v40, 1 }
 0x317   :  { %10073 = vst [vmem:[#allocation91_spill] sm:$0xff] %v7449_v47  ;;  %v7459_v2 = vmul.f32 %v6575_v30, %v7429_v10  ;;  %v7463_v15 = vmul.f32 %v6577_v63, %v7429_v10  ;;  %v7473_v26 = vmul.f32 %v6579_v19, %v7444_v51  ;;  %v1941_v35 = vmax.f32 %v7431_v22, 0.0 }
 0x318   :  { %10074 = vst [vmem:[#allocation72_spill] sm:$0xff] %v7453_v50  ;;  %v3546_v1 = vmax.f32 %v3482_v6, 0.0  ;;  %v3548_v25 = vmax.f32 %v3484_v14, 0.0  ;;  %v2152_v11 = vsel %vm652_vm0, %v2088_v20, %v10077_v60  ;;  %v10079_v34 = vmov %v10077_v60 }
 0x319   :  { %10075 = vst [vmem:[#allocation83_spill] sm:$0xff] %v7459_v2  ;;  %v7479_v6 = vsel %vm652_vm0, %v10079_v34, %v2088_v20  ;;  %v7485_v60 = vsel %vm717_vm1, %v10080_v28, %v2216_v16  ;;  %v10082_v36 = vmov %v10080_v28  ;;  %v2449_v34 = vmul.f32 %v10039_v42, %v7124_v27  ;;  %v10085_v27 = vld [vmem:[#allocation40_spill] sm:$0xff] }
 0x31a   :  { %10076 = vst [vmem:[#allocation86_spill] sm:$0xff] %v7463_v15  ;;  %v3610_v14 = vmin.f32 %v3546_v1, 6.0  ;;  %v3612_v5 = vmin.f32 %v3548_v25, 6.0  ;;  %v2280_v29 = vsel %vm717_vm1, %v2216_v16, %v10082_v36  ;;  %v7495_v20 = vsel %vm750_vm2, %v7485_v60, %v2152_v11  ;;  %v1869_v11 = vpop.f32.mrf.mxu0  ;;  %v10084_v36 = vld [vmem:[#allocation81_spill] sm:$0xff] }
 0x31b   :  { %10078 = vst [vmem:[#allocation66_spill] sm:$0xff] %v7473_v26  ;;  %v2451_v1 = vmul.f32 %v10039_v42, %v7103_v24  ;;  %v7506_v25 = vsel %vm789_vm3, %v7479_v6, %v2280_v29  ;;  %v2643_v16 = vmul.f32 %v10040_v31, %v7131_v43  ;;  %v2772_v22 = vmul.f32 %v6585_v56, %v7294_v0  ;;  %v10086_v29 = vld [vmem:[#allocation88_spill] sm:$0xff] }
 0x31c   :  { %10081 = vst [vmem:[#allocation44_spill] sm:$0xff] %v7485_v60  ;;  %v7501_v28 = vpack.c.bf16 %v3612_v5, %v3610_v14  ;;  %v2575_v53 = vadd.f32 %v10084_v36, %v2449_v34  ;;  %v2774_v24 = vmul.f32 %v6585_v56, %v7273_v48  ;;  %v2976_v5 = vmul.f32 %v6587_v37, %v7279_v13 }
 0x31d   :  { %v2577_v26 = vadd.f32 %v10085_v27, %v2451_v1  ;;  %v2906_v14 = vadd.f32 %v10086_v29, %v2772_v22  ;;  %v2978_v43 = vmul.f32 %v6587_v37, %v7301_v17  ;;  %v3111_v2 = vmul.f32 %v6635_v21, %v7495_v20 }
 0x31e   :  { %10083 = vst [vmem:[#allocation97_spill] sm:$0xff] %v7501_v28  ;;  %3845 = vmatmul.bf16.gmra.mxu1 %v7501_v28  ;;  %v3113_v34 = vmul.f32 %v6635_v21, %v7479_v6  ;;  %v1940_v1 = vmax.f32 %v1777_v39, 0.0  ;;  %v2641_v36 = vmul.f32 %v10040_v31, %v7115_v18  ;;  %v2908_v27 = vadd.f32 %v7245_v54, %v2774_v24 }
 0x31f   :  { %v3177_v47 = vmul.f32 %v6617_v7, %v7187_v40  ;;  %v1943_v57 = vmax.f32 %v1869_v11, 0.0  ;;  %v3040_v22 = vadd.f32 %v2976_v5, %v2906_v14  ;;  %v3179_v29 = vmul.f32 %v6617_v7, %v7344_v8 }
 0x320   :  { %v3305_v28 = vmul.f32 %v6645_v33, %v7506_v25  ;;  %v2701_v15 = vadd.f32 %v2641_v36, %v2575_v53  ;;  %v3042_v3 = vadd.f32 %v2978_v43, %v2908_v27  ;;  %v3303_v39 = vmul.f32 %v6645_v33, %v7485_v60 }
 0x321   :  { %v3237_v50 = vadd.f32 %v3177_v47, %v3111_v2  ;;  %v7539_v18 = vmul.f32 %v6581_v4, %v7444_v51  ;;  %v2703_v54 = vadd.f32 %v2643_v16, %v2577_v26  ;;  %v3239_v40 = vadd.f32 %v3179_v29, %v3113_v34  ;;  %v1780_v47 = vpop.f32.mrf.mxu3 }
 0x322   :  { %v10088_v11 = vrot.slane %v7378_v41, 7  ;;  %v10089_v24 = vrot.slane %v7257_v55, 7  ;;  %v3423_v5 = vadd.f32 %v3040_v22, %v2701_v15  ;;  %v10092_v26 = vrot.slane %v7378_v41, 1 }
 0x323   :  { %10087 = vst [vmem:[#allocation81_spill] sm:$0xff] %v7539_v18  ;;  %v3363_v53 = vadd.f32 %v3303_v39, %v3237_v50  ;;  %v10093_v16 = vrot.slane %v7257_v55, 1  ;;  %v3365_v36 = vadd.f32 %v3305_v28, %v3239_v40  ;;  %v3425_v27 = vadd.f32 %v3042_v3, %v2703_v54  ;;  %v10096_v40 = vld [vmem:[#allocation80_spill] sm:$0xff] }
 0x324   :  { %v7547_v8 = vsel %vm652_vm0, %v10089_v24, %v10088_v11  ;;  %v10090_v2 = vmov %v10089_v24  ;;  %v10091_v14 = vmov %v10088_v11  ;;  %v10095_v15 = vmov %v10092_v26 }
 0x325   :  { %v2151_v43 = vsel %vm652_vm0, %v10091_v14, %v10090_v2  ;;  %v7561_v34 = vsel %vm717_vm1, %v10093_v16, %v10092_v26  ;;  %v10094_v50 = vmov %v10093_v16  ;;  %v2448_v29 = vmul.f32 %v10053_v12, %v10060_v61 }
 0x326   :  { %v2279_v22 = vsel %vm717_vm1, %v10095_v15, %v10094_v50  ;;  %v7571_v39 = vmin.f32 %v1941_v35, 6.0  ;;  %v7573_v11 = vmin.f32 %v1940_v1, 6.0  ;;  %v7575_v24 = vmin.f32 %v1943_v57, 6.0  ;;  %4136 = vmatmul.bf16.vlgmr.msra.gmra.mxu3 %v10096_v40  ;;  %v10097_v57 = vld [vmem:[#allocation82_spill] sm:$0xff]  ;;  %v10101_v50 = vld [vmem:[#allocation75_spill] sm:$0xff] }
 0x327   :  { %v3487_v2 = vadd.f32 %v3423_v5, %v3363_v53  ;;  %v3489_v14 = vadd.f32 %v3425_v27, %v3365_v36  ;;  %v1942_v28 = vmax.f32 %v1780_v47, 0.0  ;;  %v7580_v3 = vsel %vm750_vm2, %v7561_v34, %v2151_v43  ;;  %v10098_v5 = vld [vmem:[#allocation78_spill] sm:$0xff]  ;;  %v10099_v43 = vld [vmem:[#allocation85_spill] sm:$0xff] }
 0x328   :  { %v2450_v54 = vmul.f32 %v10053_v12, %v10062_v46  ;;  %v7588_v35 = vsel %vm789_vm3, %v7547_v8, %v2279_v22  ;;  %v2574_v1 = vadd.f32 %v10097_v57, %v2448_v29  ;;  %v2771_v53 = vmul.f32 %v10061_v59, %v7386_v38  ;;  %4225 = vmatmul.bf16.vlgmr.msra.gmra.mxu0 %v10098_v5  ;;  %v10100_v46 = vld [vmem:[#allocation65_spill] sm:$0xff]  ;;  %v10102_v22 = vld [vmem:[#allocation63_spill] sm:$0xff]  ;;  %v10103_v57 = vld [vmem:[#allocation90_spill] sm:$0xff] }
 0x329   :  { %v3551_v61 = vmax.f32 %v3487_v2, 0.0  ;;  %v3553_v47 = vmax.f32 %v3489_v14, 0.0  ;;  %v2642_v16 = vmul.f32 %v10100_v46, %v7197_v32  ;;  %v2773_v36 = vmul.f32 %v10061_v59, %v7366_v49  ;;  %v10105_v32 = vld [vmem:[#allocation68_spill] sm:$0xff] }
 0x32a   :  { %v2576_v26 = vadd.f32 %v10099_v43, %v2450_v54  ;;  %v2905_v15 = vadd.f32 %v10101_v50, %v2771_v53  ;;  %v2975_v29 = vmul.f32 %v10102_v22, %v7358_v52  ;;  %v2977_v2 = vmul.f32 %v10102_v22, %v7392_v58  ;;  %v10104_v54 = vld [vmem:[#allocation93_spill] sm:$0xff] }
 0x32b   :  { %v3615_v27 = vmin.f32 %v3551_v61, 6.0  ;;  %v3617_v40 = vmin.f32 %v3553_v47, 6.0  ;;  %v2640_v14 = vmul.f32 %v10100_v46, %v10103_v57  ;;  %v2907_v5 = vadd.f32 %v10104_v54, %v2773_v36 }
 0x32c   :  { %v3110_v43 = vmul.f32 %v10105_v32, %v7580_v3  ;;  %v3039_v18 = vadd.f32 %v2975_v29, %v2905_v15  ;;  %v3112_v61 = vmul.f32 %v10105_v32, %v7547_v8  ;;  %v3176_v53 = vmul.f32 %v10069_v62, %v7257_v55 }
 0x32d   :  { %v3178_v50 = vmul.f32 %v10069_v62, %v7378_v41  ;;  %v7615_v58 = vpack.c.bf16 %v3617_v40, %v3615_v27  ;;  %v2700_v47 = vadd.f32 %v2640_v14, %v2574_v1  ;;  %v3041_v22 = vadd.f32 %v2977_v2, %v2907_v5  ;;  %v7632_v40 = vpop.f32.mrf.mxu0  ;;  %v10118_v5 = vld [vmem:[#allocation89_spill] sm:$0xff] }
 0x32e   :  { %v3304_v36 = vmul.f32 %v6675_v44, %v7588_v35  ;;  %v2702_v57 = vadd.f32 %v2642_v16, %v2576_v26  ;;  %v3236_v54 = vadd.f32 %v3176_v53, %v3110_v43  ;;  %v3302_v15 = vmul.f32 %v6675_v44, %v7561_v34 }
 0x32f   :  { %10106 = vst [vmem:[#allocation40_spill] sm:$0xff] %v7615_v58  ;;  %v3238_v46 = vadd.f32 %v3178_v50, %v3112_v61  ;;  %v2090_v29 = vrot.slane %v7571_v39, 7  ;;  %v2218_v55 = vrot.slane %v7571_v39, 1  ;;  %v7625_v41 = vmul.f32 %v6575_v30, %v7571_v39  ;;  %3939 = vmatmul.bf16.gmra.mxu2 %v7615_v58 }
 0x330   :  { %v7629_v1 = vmul.f32 %v6577_v63, %v7571_v39  ;;  %v3362_v26 = vadd.f32 %v3302_v15, %v3236_v54  ;;  %v3422_v27 = vadd.f32 %v3039_v18, %v2700_v47  ;;  %v3424_v2 = vadd.f32 %v3041_v22, %v2702_v57 }
 0x331   :  { %10107 = vst [vmem:[#allocation88_spill] sm:$0xff] %v7625_v41  ;;  %v3364_v16 = vadd.f32 %v3304_v36, %v3238_v46  ;;  %v2089_v14 = vrot.slane %v7573_v11, 7  ;;  %v7638_v43 = vmul.f32 %v6579_v19, %v7573_v11  ;;  %v7640_v61 = vmin.f32 %v1942_v28, 6.0 }
 0x332   :  { %10108 = vst [vmem:[#allocation80_spill] sm:$0xff] %v7629_v1  ;;  %v7644_v53 = vmul.f32 %v6581_v4, %v7573_v11  ;;  %v3486_v18 = vadd.f32 %v3422_v27, %v3362_v26  ;;  %v10111_v50 = vrot.slane %v7429_v10, 7  ;;  %v10113_v57 = vrot.slane %v7429_v10, 1 }
 0x333   :  { %10109 = vst [vmem:[#allocation82_spill] sm:$0xff] %v7638_v43  ;;  %v3488_v22 = vadd.f32 %v3424_v2, %v3364_v16  ;;  %v7670_v27 = vmul.f32 %v6575_v30, %v7575_v24  ;;  %v7680_v46 = vmul.f32 %v6579_v19, %v7640_v61  ;;  %v10122_v43 = vld [vmem:[#allocation73_spill] sm:$0xff] }
 0x334   :  { %10110 = vst [vmem:[#allocation78_spill] sm:$0xff] %v7644_v53  ;;  %v7651_v47 = vsel %vm652_vm0, %v10111_v50, %v2090_v29  ;;  %v10112_v36 = vmov %v10111_v50  ;;  %v7661_v54 = vsel %vm717_vm1, %v10113_v57, %v2218_v55  ;;  %v10114_v15 = vmov %v10113_v57 }
 0x335   :  { %v2154_v28 = vsel %vm652_vm0, %v2090_v29, %v10112_v36  ;;  %v2282_v26 = vsel %vm717_vm1, %v2218_v55, %v10114_v15  ;;  %10115 = vst [vmem:[#allocation85_spill] sm:$0xff] %v7670_v27  ;;  %v3550_v2 = vmax.f32 %v3486_v18, 0.0  ;;  %v3552_v50 = vmax.f32 %v3488_v22, 0.0  ;;  %v1782_v55 = vpop.f32.mrf.mxu3  ;;  %v10121_v27 = vld [vmem:[#allocation87_spill] sm:$0xff] }
 0x336   :  { %v7674_v29 = vmul.f32 %v6577_v63, %v7575_v24  ;;  %10117 = vst [vmem:[#allocation90_spill] sm:$0xff] %v7680_v46  ;;  %v7685_v18 = vsel %vm750_vm2, %v7661_v54, %v2154_v28  ;;  %v7690_v22 = vsel %vm789_vm3, %v7651_v47, %v2282_v26  ;;  %v2453_v57 = vmul.f32 %v10039_v42, %v7294_v0 }
 0x337   :  { %v3614_v15 = vmin.f32 %v3550_v2, 6.0  ;;  %v3616_v16 = vmin.f32 %v3552_v50, 6.0  ;;  %v2455_v36 = vmul.f32 %v10039_v42, %v7273_v48  ;;  %v2645_v2 = vmul.f32 %v10040_v31, %v7279_v13  ;;  %4141 = vmatmul.bf16.gmra.mxu3 %v10118_v5  ;;  %v10120_v48 = vld [vmem:[#allocation70_spill] sm:$0xff] }
 0x338   :  { %10116 = vst [vmem:[#allocation75_spill] sm:$0xff] %v7674_v29  ;;  %v2647_v50 = vmul.f32 %v10040_v31, %v7301_v17  ;;  %v2776_v26 = vmul.f32 %v6585_v56, %v7495_v20  ;;  %v2778_v46 = vmul.f32 %v6585_v56, %v7479_v6  ;;  %v2980_v0 = vmul.f32 %v6587_v37, %v7485_v60 }
 0x339   :  { %v7701_v28 = vpack.c.bf16 %v3616_v16, %v3614_v15  ;;  %4230 = vmatmul.bf16.gmra.mxu0 %v10120_v48  ;;  %v2579_v13 = vadd.f32 %v10121_v27, %v2453_v57  ;;  %v2581_v29 = vadd.f32 %v10122_v43, %v2455_v36  ;;  %v2982_v17 = vmul.f32 %v6587_v37, %v7506_v25  ;;  %v1874_v16 = vpop.f32.mrf.mxu0  ;;  %v10123_v15 = vld [vmem:[#allocation95_spill] sm:$0xff] }
 0x33a   :  { %v3115_v5 = vmul.f32 %v6635_v21, %v7685_v18  ;;  %v2910_v41 = vadd.f32 %v10123_v15, %v2776_v26  ;;  %v2912_v58 = vadd.f32 %v7441_v45, %v2778_v46  ;;  %v3117_v48 = vmul.f32 %v6635_v21, %v7651_v47 }
 0x33b   :  { %10119 = vst [vmem:[#allocation93_spill] sm:$0xff] %v7701_v28  ;;  %3850 = vmatmul.bf16.gmra.mxu1 %v7701_v28  ;;  %v3181_v27 = vmul.f32 %v6617_v7, %v7429_v10  ;;  %v1945_v43 = vmax.f32 %v7632_v40, 0.0  ;;  %v2705_v36 = vadd.f32 %v2645_v2, %v2579_v13  ;;  %v3183_v57 = vmul.f32 %v6617_v7, %v7571_v39 }
 0x33c   :  { %v3307_v28 = vmul.f32 %v6645_v33, %v7661_v54  ;;  %v3044_v53 = vadd.f32 %v2980_v0, %v2910_v41  ;;  %v3046_v1 = vadd.f32 %v2982_v17, %v2912_v58  ;;  %v3309_v45 = vmul.f32 %v6645_v33, %v7690_v22 }
 0x33d   :  { %v3241_v26 = vadd.f32 %v3181_v27, %v3115_v5  ;;  %v1944_v46 = vmax.f32 %v1782_v55, 0.0  ;;  %v1947_v15 = vmax.f32 %v1874_v16, 0.0  ;;  %v2707_v60 = vadd.f32 %v2647_v50, %v2581_v29  ;;  %v1785_v13 = vpop.f32.mrf.mxu3 }
 0x33e   :  { %v3243_v21 = vadd.f32 %v3183_v57, %v3117_v48  ;;  %v3427_v37 = vadd.f32 %v3044_v53, %v2705_v36  ;;  %v10124_v40 = vrot.slane %v7444_v51, 7  ;;  %v10126_v55 = vrot.slane %v7573_v11, 1 }
 0x33f   :  { %v3367_v10 = vadd.f32 %v3307_v28, %v3241_v26  ;;  %v3429_v0 = vadd.f32 %v3046_v1, %v2707_v60  ;;  %v10127_v29 = vrot.slane %v7444_v51, 1  ;;  %v2452_v1 = vmul.f32 %v10053_v12, %v7386_v38 }
 0x340   :  { %v7734_v39 = vsel %vm652_vm0, %v10124_v40, %v2089_v14  ;;  %v10125_v2 = vmov %v10124_v40  ;;  %v3369_v41 = vadd.f32 %v3309_v45, %v3243_v21  ;;  %v10129_v28 = vmov %v10126_v55  ;;  %v10132_v45 = vld [vmem:[#allocation92_spill] sm:$0xff]  ;;  %v10133_v40 = vld [vmem:[#allocation65_spill] sm:$0xff] }
 0x341   :  { %v2153_v58 = vsel %vm652_vm0, %v2089_v14, %v10125_v2  ;;  %v7746_v53 = vsel %vm717_vm1, %v10127_v29, %v10126_v55  ;;  %v10128_v50 = vmov %v10127_v29  ;;  %v7756_v21 = vmul.f32 %v6581_v4, %v7640_v61  ;;  %v10135_v55 = vld [vmem:[#allocation61_spill] sm:$0xff] }
 0x342   :  { %v2281_v17 = vsel %vm717_vm1, %v10129_v28, %v10128_v50  ;;  %v3491_v60 = vadd.f32 %v3427_v37, %v3367_v10  ;;  %v2454_v14 = vmul.f32 %v10053_v12, %v7366_v49  ;;  %v7762_v5 = vmin.f32 %v1945_v43, 6.0  ;;  %v10131_v49 = vld [vmem:[#allocation71_spill] sm:$0xff]  ;;  %v10136_v50 = vld [vmem:[#allocation74_spill] sm:$0xff] }
 0x343   :  { %10130 = vst [vmem:[#allocation68_spill] sm:$0xff] %v7756_v21  ;;  %v7764_v16 = vmin.f32 %v1944_v46, 6.0  ;;  %v7766_v48 = vmin.f32 %v1947_v15, 6.0  ;;  %v3493_v27 = vadd.f32 %v3429_v0, %v3369_v41  ;;  %v1946_v57 = vmax.f32 %v1785_v13, 0.0  ;;  %v10134_v41 = vld [vmem:[#allocation63_spill] sm:$0xff]  ;;  %v10140_v21 = vld [vmem:[#allocation77_spill] sm:$0xff] }
 0x344   :  { %v3555_v36 = vmax.f32 %v3491_v60, 0.0  ;;  %v7771_v26 = vsel %vm750_vm2, %v7746_v53, %v2153_v58  ;;  %v7776_v37 = vsel %vm789_vm3, %v7734_v39, %v2281_v17  ;;  %v2578_v43 = vadd.f32 %v10131_v49, %v2452_v1  ;;  %v10137_v60 = vld [vmem:[#allocation72_spill] sm:$0xff] }
 0x345   :  { %v3557_v38 = vmax.f32 %v3493_v27, 0.0  ;;  %v2580_v46 = vadd.f32 %v10132_v45, %v2454_v14  ;;  %v2775_v15 = vmul.f32 %v10061_v59, %v7580_v3  ;;  %v2644_v2 = vmul.f32 %v10133_v40, %v7358_v52 }
 0x346   :  { %v3619_v10 = vmin.f32 %v3555_v36, 6.0  ;;  %v2777_v58 = vmul.f32 %v10061_v59, %v7547_v8  ;;  %v2981_v0 = vmul.f32 %v10134_v41, %v7588_v35  ;;  %v2646_v29 = vmul.f32 %v10133_v40, %v10135_v55 }
 0x347   :  { %v3621_v13 = vmin.f32 %v3557_v38, 6.0  ;;  %v2909_v28 = vadd.f32 %v10136_v50, %v2775_v15  ;;  %v2979_v17 = vmul.f32 %v10134_v41, %v7561_v34  ;;  %v3114_v52 = vmul.f32 %v10105_v32, %v7771_v26  ;;  %v10139_v15 = vld [vmem:[#allocation96_spill] sm:$0xff] }
 0x348   :  { %v2911_v1 = vadd.f32 %v10137_v60, %v2777_v58  ;;  %v3116_v14 = vmul.f32 %v10105_v32, %v7734_v39  ;;  %v3180_v27 = vmul.f32 %v10069_v62, %v7444_v51  ;;  %v2704_v38 = vadd.f32 %v2644_v2, %v2578_v43  ;;  %4146 = vmatmul.bf16.gmra.mxu3 %v10139_v15  ;;  %v7813_v2 = vpop.f32.mrf.mxu0 }
 0x349   :  { %v7800_v36 = vpack.c.bf16 %v3621_v13, %v3619_v10  ;;  %v3043_v49 = vadd.f32 %v2979_v17, %v2909_v28  ;;  %v3182_v45 = vmul.f32 %v10069_v62, %v7573_v11  ;;  %v3306_v50 = vmul.f32 %v6675_v44, %v7746_v53  ;;  %4235 = vmatmul.bf16.gmra.mxu0 %v10140_v21 }
 0x34a   :  { %v3045_v55 = vadd.f32 %v2981_v0, %v2911_v1  ;;  %v3240_v58 = vadd.f32 %v3180_v27, %v3114_v52  ;;  %v3308_v60 = vmul.f32 %v6675_v44, %v7776_v37  ;;  %v2092_v51 = vrot.slane %v7762_v5, 7 }
 0x34b   :  { %10138 = vst [vmem:[#allocation89_spill] sm:$0xff] %v7800_v36  ;;  %v2220_v43 = vrot.slane %v7762_v5, 1  ;;  %3944 = vmatmul.bf16.gmra.mxu2 %v7800_v36  ;;  %v2706_v10 = vadd.f32 %v2646_v29, %v2580_v46  ;;  %v3242_v11 = vadd.f32 %v3182_v45, %v3116_v14  ;;  %v7817_v0 = vmul.f32 %v6575_v30, %v7762_v5 }
 0x34c   :  { %v7819_v13 = vmin.f32 %v1946_v57, 6.0  ;;  %v3366_v28 = vadd.f32 %v3306_v50, %v3240_v58  ;;  %v3426_v17 = vadd.f32 %v3043_v49, %v2704_v38  ;;  %v7823_v21 = vmul.f32 %v6577_v63, %v7762_v5 }
 0x34d   :  { %10141 = vst [vmem:[#allocation70_spill] sm:$0xff] %v7817_v0  ;;  %v3368_v52 = vadd.f32 %v3308_v60, %v3242_v11  ;;  %v3428_v27 = vadd.f32 %v3045_v55, %v2706_v10  ;;  %v7829_v29 = vmul.f32 %v6579_v19, %v7764_v16  ;;  %v7833_v57 = vmul.f32 %v6581_v4, %v7764_v16 }
 0x34e   :  { %10142 = vst [vmem:[#allocation87_spill] sm:$0xff] %v7823_v21  ;;  %v3490_v14 = vadd.f32 %v3426_v17, %v3366_v28  ;;  %v7839_v45 = vmul.f32 %v6575_v30, %v7766_v48  ;;  %v7843_v55 = vmul.f32 %v6577_v63, %v7766_v48  ;;  %v10147_v60 = vrot.slane %v7575_v24, 7 }
 0x34f   :  { %10143 = vst [vmem:[#allocation73_spill] sm:$0xff] %v7829_v29  ;;  %v3492_v15 = vadd.f32 %v3428_v27, %v3368_v52  ;;  %v7853_v28 = vmul.f32 %v6579_v19, %v7819_v13  ;;  %v1787_v52 = vpop.f32.mrf.mxu3  ;;  %v10150_v58 = vrot.slane %v7575_v24, 1  ;;  %v1949_v1 = vmax.f32 %v7813_v2, 0.0 }
 0x350   :  { %10144 = vst [vmem:[#allocation95_spill] sm:$0xff] %v7833_v57  ;;  %v3554_v50 = vmax.f32 %v3490_v14, 0.0  ;;  %v2156_v10 = vsel %vm652_vm0, %v2092_v51, %v10147_v60  ;;  %v10149_v27 = vmov %v10147_v60  ;;  %v3187_v36 = vmul.f32 %v6617_v7, %v7762_v5 }
 0x351   :  { %10145 = vst [vmem:[#allocation71_spill] sm:$0xff] %v7839_v45  ;;  %v3556_v17 = vmax.f32 %v3492_v15, 0.0  ;;  %v7859_v49 = vsel %vm652_vm0, %v10149_v27, %v2092_v51  ;;  %v7865_v60 = vsel %vm717_vm1, %v10150_v58, %v2220_v43  ;;  %v10152_v11 = vmov %v10150_v58 }
 0x352   :  { %10146 = vst [vmem:[#allocation92_spill] sm:$0xff] %v7843_v55  ;;  %v3618_v14 = vmin.f32 %v3554_v50, 6.0  ;;  %v2284_v38 = vsel %vm717_vm1, %v2220_v43, %v10152_v11  ;;  %v2457_v15 = vmul.f32 %v10039_v42, %v7495_v20  ;;  %v7877_v51 = vsel %vm750_vm2, %v7865_v60, %v2156_v10  ;;  %v10154_v43 = vld [vmem:[#allocation94_spill] sm:$0xff] }
 0x353   :  { %10148 = vst [vmem:[#allocation65_spill] sm:$0xff] %v7853_v28  ;;  %v3620_v46 = vmin.f32 %v3556_v17, 6.0  ;;  %v2459_v58 = vmul.f32 %v10039_v42, %v7479_v6  ;;  %v1948_v50 = vmax.f32 %v1787_v52, 0.0  ;;  %v7884_v27 = vsel %vm789_vm3, %v7859_v49, %v2284_v38  ;;  %v1879_v17 = vpop.f32.mrf.mxu0  ;;  %v10156_v28 = vld [vmem:[#allocation84_spill] sm:$0xff]  ;;  %v10157_v52 = vld [vmem:[#allocation86_spill] sm:$0xff]  ;;  %v10158_v38 = vld [vmem:[#allocation59_spill] sm:$0xff] }
 0x354   :  { %10151 = vst [vmem:[#allocation61_spill] sm:$0xff] %v7865_v60  ;;  %v2583_v11 = vadd.f32 %v10154_v43, %v2457_v15  ;;  %v2780_v20 = vmul.f32 %v6585_v56, %v7685_v18  ;;  %v2651_v45 = vmul.f32 %v10040_v31, %v7506_v25  ;;  %v2782_v6 = vmul.f32 %v6585_v56, %v7651_v47  ;;  %v10161_v25 = vld [vmem:[#allocation80_spill] sm:$0xff] }
 0x355   :  { %10153 = vst [vmem:[#allocation74_spill] sm:$0xff] %v7884_v27  ;;  %v7889_v2 = vpack.c.bf16 %v3620_v46, %v3618_v14  ;;  %v2585_v10 = vadd.f32 %v10156_v28, %v2459_v58  ;;  %v2984_v55 = vmul.f32 %v10158_v38, %v7661_v54  ;;  %v2986_v15 = vmul.f32 %v10158_v38, %v7690_v22  ;;  %v10159_v46 = vld [vmem:[#allocation67_spill] sm:$0xff]  ;;  %v10160_v28 = vld [vmem:[#allocation44_spill] sm:$0xff] }
 0x356   :  { %v2914_v29 = vadd.f32 %v10157_v52, %v2780_v20  ;;  %v3119_v14 = vmul.f32 %v10159_v46, %v7877_v51  ;;  %v2649_v58 = vmul.f32 %v10040_v31, %v10160_v28  ;;  %v2916_v43 = vadd.f32 %v10161_v25, %v2782_v6  ;;  %v10162_v28 = vld [vmem:[#allocation97_spill] sm:$0xff] }
 0x357   :  { %10155 = vst [vmem:[#allocation72_spill] sm:$0xff] %v7889_v2  ;;  %3855 = vmatmul.bf16.gmra.mxu1 %v7889_v2  ;;  %v3121_v0 = vmul.f32 %v10159_v46, %v7859_v49  ;;  %v3185_v20 = vmul.f32 %v6617_v7, %v7575_v24  ;;  %v1951_v52 = vmax.f32 %v1879_v17, 0.0  ;;  %v3313_v21 = vmul.f32 %v6645_v33, %v7884_v27  ;;  %v10166_v17 = vld [vmem:[#allocation43_spill] sm:$0xff] }
 0x358   :  { %v3048_v57 = vadd.f32 %v2984_v55, %v2914_v29  ;;  %v2709_v2 = vadd.f32 %v2649_v58, %v2583_v11  ;;  %v3050_v38 = vadd.f32 %v2986_v15, %v2916_v43  ;;  %v3311_v6 = vmul.f32 %v6645_v33, %v7865_v60  ;;  %4151 = vmatmul.bf16.gmra.mxu3 %v10162_v28  ;;  %v1790_v58 = vpop.f32.mrf.mxu3 }
 0x359   :  { %v3245_v56 = vadd.f32 %v3185_v20, %v3119_v14  ;;  %v7920_v25 = vmul.f32 %v6581_v4, %v7819_v13  ;;  %v2711_v24 = vadd.f32 %v2651_v45, %v2585_v10  ;;  %v3247_v29 = vadd.f32 %v3187_v36, %v3121_v0  ;;  %4240 = vmatmul.bf16.gmra.mxu0 %v10166_v17 }
 0x35a   :  { %v10164_v55 = vrot.slane %v7764_v16, 7  ;;  %v10165_v5 = vrot.slane %v7640_v61, 7  ;;  %v3431_v14 = vadd.f32 %v3048_v57, %v2709_v2  ;;  %v10169_v0 = vrot.slane %v7764_v16, 1 }
 0x35b   :  { %10163 = vst [vmem:[#allocation96_spill] sm:$0xff] %v7920_v25  ;;  %v3371_v15 = vadd.f32 %v3311_v6, %v3245_v56  ;;  %v10170_v45 = vrot.slane %v7640_v61, 1  ;;  %v3373_v28 = vadd.f32 %v3313_v21, %v3247_v29  ;;  %v2456_v6 = vmul.f32 %v10053_v12, %v7580_v3 }
 0x35c   :  { %v7928_v11 = vsel %vm652_vm0, %v10165_v5, %v10164_v55  ;;  %v10167_v43 = vmov %v10165_v5  ;;  %v10168_v20 = vmov %v10164_v55  ;;  %v3433_v55 = vadd.f32 %v3050_v38, %v2711_v24 }
 0x35d   :  { %v2155_v36 = vsel %vm652_vm0, %v10168_v20, %v10167_v43  ;;  %v7943_v10 = vsel %vm717_vm1, %v10170_v45, %v10169_v0  ;;  %v10171_v56 = vmov %v10170_v45  ;;  %v10172_v57 = vmov %v10169_v0 }
 0x35e   :  { %v2283_v2 = vsel %vm717_vm1, %v10172_v57, %v10171_v56  ;;  %v7953_v5 = vmin.f32 %v1949_v1, 6.0  ;;  %v7955_v17 = vmin.f32 %v1948_v50, 6.0  ;;  %v7957_v43 = vmin.f32 %v1951_v52, 6.0  ;;  %v10173_v1 = vld [vmem:[#allocation57_spill] sm:$0xff] }
 0x35f   :  { %v3495_v20 = vadd.f32 %v3431_v14, %v3371_v15  ;;  %v3497_v0 = vadd.f32 %v3433_v55, %v3373_v28  ;;  %v1950_v21 = vmax.f32 %v1790_v58, 0.0  ;;  %v7962_v38 = vsel %vm750_vm2, %v7943_v10, %v2155_v36  ;;  %v10174_v14 = vld [vmem:[#allocation91_spill] sm:$0xff]  ;;  %v10175_v28 = vld [vmem:[#allocation81_spill] sm:$0xff] }
 0x360   :  { %v2458_v24 = vmul.f32 %v10053_v12, %v7547_v8  ;;  %v7969_v3 = vsel %vm789_vm3, %v7928_v11, %v2283_v2  ;;  %v2582_v50 = vadd.f32 %v10173_v1, %v2456_v6  ;;  %v2779_v52 = vmul.f32 %v10061_v59, %v7771_v26 }
 0x361   :  { %v3559_v29 = vmax.f32 %v3495_v20, 0.0  ;;  %v3561_v15 = vmax.f32 %v3497_v0, 0.0  ;;  %v2650_v36 = vmul.f32 %v10133_v40, %v7588_v35  ;;  %v2781_v8 = vmul.f32 %v10061_v59, %v7734_v39  ;;  %v10176_v20 = vld [vmem:[#allocation78_spill] sm:$0xff] }
 0x362   :  { %v2584_v58 = vadd.f32 %v10174_v14, %v2458_v24  ;;  %v2913_v55 = vadd.f32 %v10175_v28, %v2779_v52  ;;  %v2983_v56 = vmul.f32 %v10134_v41, %v7746_v53  ;;  %v2985_v57 = vmul.f32 %v10134_v41, %v7776_v37 }
 0x363   :  { %v3623_v45 = vmin.f32 %v3559_v29, 6.0  ;;  %v3625_v2 = vmin.f32 %v3561_v15, 6.0  ;;  %v2648_v6 = vmul.f32 %v10133_v40, %v7561_v34  ;;  %v2915_v0 = vadd.f32 %v10176_v20, %v2781_v8 }
 0x364   :  { %v3118_v35 = vmul.f32 %v10105_v32, %v7962_v38  ;;  %v3047_v24 = vadd.f32 %v2983_v56, %v2913_v55  ;;  %v3120_v29 = vmul.f32 %v10105_v32, %v7928_v11  ;;  %v3184_v1 = vmul.f32 %v10069_v62, %v7640_v61 }
 0x365   :  { %v3186_v52 = vmul.f32 %v10069_v62, %v7764_v16  ;;  %v7995_v14 = vpack.c.bf16 %v3625_v2, %v3623_v45  ;;  %v2708_v15 = vadd.f32 %v2648_v6, %v2582_v50  ;;  %v3049_v28 = vadd.f32 %v2985_v57, %v2915_v0  ;;  %v8012_v2 = vpop.f32.mrf.mxu0 }
 0x366   :  { %v3312_v34 = vmul.f32 %v6675_v44, %v7969_v3  ;;  %v2710_v8 = vadd.f32 %v2650_v36, %v2584_v58  ;;  %v3244_v20 = vadd.f32 %v3184_v1, %v3118_v35  ;;  %v3310_v55 = vmul.f32 %v6675_v44, %v7943_v10 }
 0x367   :  { %10177 = vst [vmem:[#allocation77_spill] sm:$0xff] %v7995_v14  ;;  %v3246_v25 = vadd.f32 %v3186_v52, %v3120_v29  ;;  %v2094_v56 = vrot.slane %v7953_v5, 7  ;;  %v2222_v61 = vrot.slane %v7953_v5, 1  ;;  %v8005_v16 = vmul.f32 %v6575_v30, %v7953_v5  ;;  %3949 = vmatmul.bf16.gmra.mxu2 %v7995_v14 }
 0x368   :  { %v8009_v50 = vmul.f32 %v6577_v63, %v7953_v5  ;;  %v3370_v58 = vadd.f32 %v3310_v55, %v3244_v20  ;;  %v3430_v45 = vadd.f32 %v3047_v24, %v2708_v15  ;;  %v3432_v57 = vadd.f32 %v3049_v28, %v2710_v8  ;;  %v10182_v15 = vld [vmem:[#allocation93_spill] sm:$0xff] }
 0x369   :  { %10178 = vst [vmem:[#allocation94_spill] sm:$0xff] %v8005_v16  ;;  %v3372_v36 = vadd.f32 %v3312_v34, %v3246_v25  ;;  %v2093_v6 = vrot.slane %v7955_v17, 7  ;;  %v8018_v35 = vmul.f32 %v6579_v19, %v7955_v17  ;;  %v8020_v29 = vmin.f32 %v1950_v21, 6.0  ;;  %4156 = vmatmul.bf16.gmra.mxu3 %v10182_v15 }
 0x36a   :  { %10179 = vst [vmem:[#allocation84_spill] sm:$0xff] %v8009_v50  ;;  %v8024_v1 = vmul.f32 %v6581_v4, %v7955_v17  ;;  %v3494_v24 = vadd.f32 %v3430_v45, %v3370_v58  ;;  %v10183_v28 = vrot.slane %v7766_v48, 7  ;;  %v10186_v20 = vrot.slane %v7766_v48, 1  ;;  %v10189_v45 = vld [vmem:[#allocation40_spill] sm:$0xff]  ;;  %v10200_v50 = vld [vmem:[#allocation87_spill] sm:$0xff] }
 0x36b   :  { %10180 = vst [vmem:[#allocation86_spill] sm:$0xff] %v8018_v35  ;;  %v3496_v52 = vadd.f32 %v3432_v57, %v3372_v36  ;;  %4245 = vmatmul.bf16.gmra.mxu0 %v10189_v45  ;;  %v8052_v15 = vmul.f32 %v6575_v30, %v7957_v43  ;;  %v2461_v25 = vmul.f32 %v10039_v42, %v7685_v18  ;;  %v10197_v35 = vld [vmem:[#allocation83_spill] sm:$0xff] }
 0x36c   :  { %10181 = vst [vmem:[#allocation44_spill] sm:$0xff] %v8024_v1  ;;  %v8032_v34 = vsel %vm652_vm0, %v10183_v28, %v2094_v56  ;;  %v10185_v8 = vmov %v10183_v28  ;;  %v8042_v55 = vsel %vm717_vm1, %v10186_v20, %v2222_v61  ;;  %v10188_v58 = vmov %v10186_v20 }
 0x36d   :  { %10184 = vst [vmem:[#allocation80_spill] sm:$0xff] %v8032_v34  ;;  %v2158_v21 = vsel %vm652_vm0, %v2094_v56, %v10185_v8  ;;  %v2286_v36 = vsel %vm717_vm1, %v2222_v61, %v10188_v58  ;;  %v3558_v56 = vmax.f32 %v3494_v24, 0.0  ;;  %v3560_v28 = vmax.f32 %v3496_v52, 0.0  ;;  %v1792_v58 = vpop.f32.mrf.mxu3 }
 0x36e   :  { %10187 = vst [vmem:[#allocation97_spill] sm:$0xff] %v8042_v55  ;;  %v8056_v8 = vmul.f32 %v6577_v63, %v7957_v43  ;;  %v8062_v61 = vmul.f32 %v6579_v19, %v8020_v29  ;;  %v8067_v24 = vsel %vm750_vm2, %v8042_v55, %v2158_v21  ;;  %v8072_v52 = vsel %vm789_vm3, %v8032_v34, %v2286_v36  ;;  %v10195_v21 = vld [vmem:[#allocation58_spill] sm:$0xff] }
 0x36f   :  { %10190 = vst [vmem:[#allocation43_spill] sm:$0xff] %v8052_v15  ;;  %v3622_v45 = vmin.f32 %v3558_v56, 6.0  ;;  %v3624_v57 = vmin.f32 %v3560_v28, 6.0  ;;  %v2463_v20 = vmul.f32 %v10039_v42, %v7651_v47  ;;  %v2653_v56 = vmul.f32 %v10040_v31, %v7661_v54  ;;  %v10196_v15 = vld [vmem:[#allocation59_spill] sm:$0xff]  ;;  %v10198_v47 = vld [vmem:[#allocation88_spill] sm:$0xff] }
 0x370   :  { %10191 = vst [vmem:[#allocation57_spill] sm:$0xff] %v8056_v8  ;;  %v2655_v28 = vmul.f32 %v10040_v31, %v7690_v22  ;;  %v2786_v36 = vmul.f32 %v10195_v21, %v7859_v49  ;;  %v2988_v18 = vmul.f32 %v10196_v15, %v7865_v60  ;;  %v2587_v8 = vadd.f32 %v10197_v35, %v2461_v25 }
 0x371   :  { %10192 = vst [vmem:[#allocation91_spill] sm:$0xff] %v8062_v61  ;;  %v8082_v0 = vpack.c.bf16 %v3624_v57, %v3622_v45  ;;  %v2784_v61 = vmul.f32 %v10195_v21, %v7877_v51  ;;  %v2589_v16 = vadd.f32 %v10198_v47, %v2463_v20  ;;  %v2990_v54 = vmul.f32 %v10196_v15, %v7884_v27  ;;  %v1884_v57 = vpop.f32.mrf.mxu0  ;;  %v10199_v45 = vld [vmem:[#allocation75_spill] sm:$0xff] }
 0x372   :  { %10193 = vst [vmem:[#allocation81_spill] sm:$0xff] %v8072_v52  ;;  %v3123_v22 = vmul.f32 %v10159_v46, %v8067_v24  ;;  %v2920_v14 = vadd.f32 %v10200_v50, %v2786_v36  ;;  %v3125_v60 = vmul.f32 %v10159_v46, %v8032_v34  ;;  %v3189_v35 = vmul.f32 %v6617_v7, %v7766_v48 }
 0x373   :  { %10194 = vst [vmem:[#allocation78_spill] sm:$0xff] %v8082_v0  ;;  %3860 = vmatmul.bf16.gmra.mxu1 %v8082_v0  ;;  %v2918_v1 = vadd.f32 %v10199_v45, %v2784_v61  ;;  %v1953_v25 = vmax.f32 %v8012_v2, 0.0  ;;  %v2713_v20 = vadd.f32 %v2653_v56, %v2587_v8  ;;  %v3191_v47 = vmul.f32 %v6617_v7, %v7953_v5 }
 0x374   :  { %v3315_v15 = vmul.f32 %v6645_v33, %v8042_v55  ;;  %v3054_v27 = vadd.f32 %v2990_v54, %v2920_v14  ;;  %v3249_v61 = vadd.f32 %v3189_v35, %v3123_v22  ;;  %v3317_v50 = vmul.f32 %v6645_v33, %v8072_v52 }
 0x375   :  { %v3052_v31 = vadd.f32 %v2988_v18, %v2918_v1  ;;  %v1952_v36 = vmax.f32 %v1792_v58, 0.0  ;;  %v1955_v45 = vmax.f32 %v1884_v57, 0.0  ;;  %v2715_v46 = vadd.f32 %v2655_v28, %v2589_v16  ;;  %v1795_v18 = vpop.f32.mrf.mxu3 }
 0x376   :  { %v3251_v34 = vadd.f32 %v3191_v47, %v3125_v60  ;;  %v3375_v48 = vadd.f32 %v3315_v15, %v3249_v61  ;;  %v10201_v2 = vrot.slane %v7819_v13, 7  ;;  %v10203_v58 = vrot.slane %v7955_v17, 1 }
 0x377   :  { %v3435_v0 = vadd.f32 %v3052_v31, %v2713_v20  ;;  %v3437_v56 = vadd.f32 %v3054_v27, %v2715_v46  ;;  %v10204_v60 = vrot.slane %v7819_v13, 1  ;;  %v2460_v46 = vmul.f32 %v10053_v12, %v7771_v26 }
 0x378   :  { %v8114_v5 = vsel %vm652_vm0, %v10201_v2, %v2093_v6  ;;  %v10202_v8 = vmov %v10201_v2  ;;  %v3377_v1 = vadd.f32 %v3317_v50, %v3251_v34  ;;  %v10206_v15 = vmov %v10203_v58  ;;  %v10211_v2 = vld [vmem:[#allocation89_spill] sm:$0xff] }
 0x379   :  { %v2157_v14 = vsel %vm652_vm0, %v2093_v6, %v10202_v8  ;;  %v8126_v31 = vsel %vm717_vm1, %v10204_v60, %v10203_v58  ;;  %v10205_v16 = vmov %v10204_v60  ;;  %v8136_v6 = vmul.f32 %v6581_v4, %v8020_v29  ;;  %v10212_v60 = vld [vmem:[#allocation68_spill] sm:$0xff] }
 0x37a   :  { %v2285_v28 = vsel %vm717_vm1, %v10206_v15, %v10205_v16  ;;  %v3499_v27 = vadd.f32 %v3435_v0, %v3375_v48  ;;  %v2462_v34 = vmul.f32 %v10053_v12, %v7734_v39  ;;  %v8142_v54 = vmin.f32 %v1953_v25, 6.0  ;;  %v10208_v39 = vld [vmem:[#allocation72_spill] sm:$0xff]  ;;  %v10209_v25 = vld [vmem:[#allocation66_spill] sm:$0xff] }
 0x37b   :  { %10207 = vst [vmem:[#allocation93_spill] sm:$0xff] %v8136_v6  ;;  %v8144_v22 = vmin.f32 %v1952_v36, 6.0  ;;  %v8146_v57 = vmin.f32 %v1955_v45, 6.0  ;;  %v3501_v35 = vadd.f32 %v3437_v56, %v3377_v1  ;;  %v1954_v47 = vmax.f32 %v1795_v18, 0.0  ;;  %4161 = vmatmul.bf16.gmra.mxu3 %v10208_v39  ;;  %v10210_v36 = vld [vmem:[#allocation82_spill] sm:$0xff]  ;;  %4250 = vmatmul.bf16.gmra.mxu0 %v10211_v2 }
 0x37c   :  { %v3563_v20 = vmax.f32 %v3499_v27, 0.0  ;;  %v8151_v61 = vsel %vm750_vm2, %v8126_v31, %v2157_v14  ;;  %v8156_v26 = vsel %vm789_vm3, %v8114_v5, %v2285_v28  ;;  %v2586_v50 = vadd.f32 %v10209_v25, %v2460_v46  ;;  %v10213_v28 = vld [vmem:[#allocation95_spill] sm:$0xff] }
 0x37d   :  { %v3565_v0 = vmax.f32 %v3501_v35, 0.0  ;;  %v2588_v45 = vadd.f32 %v10210_v36, %v2462_v34  ;;  %v2783_v48 = vmul.f32 %v10061_v59, %v7962_v38  ;;  %v2652_v14 = vmul.f32 %v10133_v40, %v7746_v53 }
 0x37e   :  { %v3627_v8 = vmin.f32 %v3563_v20, 6.0  ;;  %v2785_v1 = vmul.f32 %v10061_v59, %v7928_v11  ;;  %v2989_v56 = vmul.f32 %v10134_v41, %v7969_v3  ;;  %v2654_v58 = vmul.f32 %v10133_v40, %v7776_v37 }
 0x37f   :  { %v3629_v18 = vmin.f32 %v3565_v0, 6.0  ;;  %v2917_v16 = vadd.f32 %v10212_v60, %v2783_v48  ;;  %v2987_v15 = vmul.f32 %v10134_v41, %v7943_v10  ;;  %v3122_v53 = vmul.f32 %v10105_v32, %v8151_v61  ;;  %v1797_v60 = vpop.f32.mrf.mxu3 }
 0x380   :  { %v2919_v27 = vadd.f32 %v10213_v28, %v2785_v1  ;;  %v3124_v46 = vmul.f32 %v10105_v32, %v8114_v5  ;;  %v3188_v34 = vmul.f32 %v10069_v62, %v7819_v13  ;;  %v2712_v20 = vadd.f32 %v2652_v14, %v2586_v50 }
 0x381   :  { %v8182_v35 = vpack.c.bf16 %v3629_v18, %v3627_v8  ;;  %v3051_v37 = vadd.f32 %v2987_v15, %v2917_v16  ;;  %v3190_v39 = vmul.f32 %v10069_v62, %v7955_v17  ;;  %v3314_v36 = vmul.f32 %v6675_v44, %v8126_v31  ;;  %v8193_v8 = vpop.f32.mrf.mxu0 }
 0x382   :  { %v3053_v0 = vadd.f32 %v2989_v56, %v2919_v27  ;;  %v3248_v25 = vadd.f32 %v3188_v34, %v3122_v53  ;;  %v3316_v48 = vmul.f32 %v6675_v44, %v8156_v26  ;;  %v2096_v2 = vrot.slane %v8142_v54, 7 }
 0x383   :  { %v2224_v1 = vrot.slane %v8142_v54, 1  ;;  %3954 = vmatmul.bf16.gmra.mxu2 %v8182_v35  ;;  %v2714_v13 = vadd.f32 %v2654_v58, %v2588_v45  ;;  %v3250_v50 = vadd.f32 %v3190_v39, %v3124_v46  ;;  %v8197_v17 = vmul.f32 %v6575_v30, %v8142_v54  ;;  %v10229_v58 = vld [vmem:[#allocation70_spill] sm:$0xff] }
 0x384   :  { %v8199_v14 = vmin.f32 %v1954_v47, 6.0  ;;  %v3374_v56 = vadd.f32 %v3314_v36, %v3248_v25  ;;  %v3434_v18 = vadd.f32 %v3051_v37, %v2712_v20  ;;  %v8203_v16 = vmul.f32 %v6577_v63, %v8142_v54 }
 0x385   :  { %10214 = vst [vmem:[#allocation40_spill] sm:$0xff] %v8197_v17  ;;  %v3376_v28 = vadd.f32 %v3316_v48, %v3250_v50  ;;  %v3436_v45 = vadd.f32 %v3053_v0, %v2714_v13  ;;  %v8209_v27 = vmul.f32 %v6579_v19, %v8144_v22  ;;  %v8213_v47 = vmul.f32 %v6581_v4, %v8144_v22 }
 0x386   :  { %10215 = vst [vmem:[#allocation83_spill] sm:$0xff] %v8203_v16  ;;  %v3498_v53 = vadd.f32 %v3434_v18, %v3374_v56  ;;  %v8219_v20 = vmul.f32 %v6575_v30, %v8146_v57  ;;  %v8223_v39 = vmul.f32 %v6577_v63, %v8146_v57  ;;  %v10220_v36 = vrot.slane %v7957_v43, 7 }
 0x387   :  { %10216 = vst [vmem:[#allocation88_spill] sm:$0xff] %v8209_v27  ;;  %v3500_v37 = vadd.f32 %v3436_v45, %v3376_v28  ;;  %v8233_v50 = vmul.f32 %v6579_v19, %v8199_v14  ;;  %v1957_v46 = vmax.f32 %v8193_v8, 0.0  ;;  %v10228_v8 = vld [vmem:[#allocation78_spill] sm:$0xff] }
 0x388   :  { %10217 = vst [vmem:[#allocation75_spill] sm:$0xff] %v8213_v47  ;;  %v3562_v25 = vmax.f32 %v3498_v53, 0.0  ;;  %v2160_v48 = vsel %vm652_vm0, %v2096_v2, %v10220_v36  ;;  %v10222_v18 = vmov %v10220_v36  ;;  %v10223_v53 = vrot.slane %v7957_v43, 1  ;;  %v10238_v47 = vld [vmem:[#allocation84_spill] sm:$0xff] }
 0x389   :  { %10218 = vst [vmem:[#allocation87_spill] sm:$0xff] %v8219_v20  ;;  %v3564_v56 = vmax.f32 %v3500_v37, 0.0  ;;  %v8239_v28 = vsel %vm652_vm0, %v10222_v18, %v2096_v2  ;;  %v2465_v37 = vmul.f32 %v10039_v42, %v7877_v51  ;;  %v1956_v18 = vmax.f32 %v1797_v60, 0.0  ;;  %v10232_v20 = vld [vmem:[#allocation80_spill] sm:$0xff] }
 0x38a   :  { %10219 = vst [vmem:[#allocation72_spill] sm:$0xff] %v8223_v39  ;;  %v3626_v45 = vmin.f32 %v3562_v25, 6.0  ;;  %v8245_v0 = vsel %vm717_vm1, %v10223_v53, %v2224_v1  ;;  %v10225_v36 = vmov %v10223_v53  ;;  %v2467_v25 = vmul.f32 %v10039_v42, %v7859_v49  ;;  %v10231_v49 = vld [vmem:[#allocation60_spill] sm:$0xff] }
 0x38b   :  { %10221 = vst [vmem:[#allocation66_spill] sm:$0xff] %v8233_v50  ;;  %v2288_v13 = vsel %vm717_vm1, %v2224_v1, %v10225_v36  ;;  %v3628_v34 = vmin.f32 %v3564_v56, 6.0  ;;  %v8257_v2 = vsel %vm750_vm2, %v8245_v0, %v2160_v48  ;;  %v10227_v1 = vld [vmem:[#allocation85_spill] sm:$0xff]  ;;  %v2788_v51 = vmul.f32 %v10195_v21, %v8067_v24  ;;  %4166 = vmatmul.bf16.gmra.mxu3 %v10228_v8  ;;  %v1889_v48 = vpop.f32.mrf.mxu0  ;;  %v10230_v50 = vld [vmem:[#allocation74_spill] sm:$0xff]  ;;  %v10234_v39 = vld [vmem:[#allocation92_spill] sm:$0xff] }
 0x38c   :  { %10224 = vst [vmem:[#allocation82_spill] sm:$0xff] %v8245_v0  ;;  %v8264_v53 = vsel %vm789_vm3, %v8239_v28, %v2288_v13  ;;  %v2591_v36 = vadd.f32 %v10227_v1, %v2465_v37  ;;  %v2593_v15 = vadd.f32 %v10229_v58, %v2467_v25  ;;  %v2659_v60 = vmul.f32 %v10231_v49, %v10230_v50  ;;  %v10233_v13 = vld [vmem:[#allocation77_spill] sm:$0xff]  ;;  %v10235_v1 = vld [vmem:[#allocation59_spill] sm:$0xff]  ;;  %v8285_v58 = vpop.f32.mrf.mxu3 }
 0x38d   :  { %10226 = vst [vmem:[#allocation89_spill] sm:$0xff] %v8257_v2  ;;  %v8270_v56 = vpack.c.bf16 %v3628_v34, %v3626_v45  ;;  %v2790_v27 = vmul.f32 %v10195_v21, %v10232_v20  ;;  %4255 = vmatmul.bf16.gmra.mxu0 %v10233_v13  ;;  %v2922_v37 = vadd.f32 %v10234_v39, %v2788_v51  ;;  %v10236_v45 = vld [vmem:[#allocation67_spill] sm:$0xff]  ;;  %v10237_v50 = vld [vmem:[#allocation61_spill] sm:$0xff]  ;;  %v1959_v6 = vmax.f32 %v1889_v48, 0.0 }
 0x38e   :  { %v2992_v17 = vmul.f32 %v10235_v1, %v8042_v55  ;;  %v2994_v34 = vmul.f32 %v10235_v1, %v8072_v52  ;;  %v3127_v8 = vmul.f32 %v10236_v45, %v8257_v2  ;;  %v2657_v25 = vmul.f32 %v10231_v49, %v10237_v50 }
 0x38f   :  { %3865 = vmatmul.bf16.gmra.mxu1 %v8270_v56  ;;  %v2924_v13 = vadd.f32 %v10238_v47, %v2790_v27  ;;  %v3129_v39 = vmul.f32 %v10236_v45, %v8239_v28  ;;  %v3193_v51 = vmul.f32 %v6617_v7, %v7957_v43  ;;  %v3195_v55 = vmul.f32 %v6617_v7, %v8142_v54  ;;  %v3831_v7 = vpop.f32.mrf.mxu1  ;;  %v3920_v45 = vpop.f32.mrf.mxu2 }
 0x390   :  { %v3056_v16 = vadd.f32 %v2992_v17, %v2922_v37  ;;  %v3321_v1 = vmul.f32 %v6645_v33, %v8264_v53  ;;  %v2717_v21 = vadd.f32 %v2657_v25, %v2591_v36  ;;  %v3319_v27 = vmul.f32 %v6645_v33, %v8245_v0 }
 0x391   :  { %v3058_v2 = vadd.f32 %v2994_v34, %v2924_v13  ;;  %v3253_v52 = vadd.f32 %v3193_v51, %v3127_v8  ;;  %v8303_v47 = vmul.f32 %v6581_v4, %v8199_v14  ;;  %v8305_v50 = vmin.f32 %v1957_v46, 6.0 }
 0x392   :  { %v2719_v43 = vadd.f32 %v2659_v60, %v2593_v15  ;;  %v3255_v17 = vadd.f32 %v3195_v55, %v3129_v39  ;;  %v8307_v48 = vmin.f32 %v1956_v18, 6.0  ;;  %v3439_v37 = vadd.f32 %v3056_v16, %v2717_v21 }
 0x393   :  { %10239 = vst [vmem:[#allocation68_spill] sm:$0xff] %v8303_v47  ;;  %v3379_v54 = vadd.f32 %v3319_v27, %v3253_v52  ;;  %v10240_v36 = vrot.slane %v8020_v29, 7  ;;  %v10241_v34 = vrot.slane %v8144_v22, 7  ;;  %v10242_v46 = vrot.slane %v8144_v22, 1 }
 0x394   :  { %v3381_v25 = vadd.f32 %v3321_v1, %v3255_v17  ;;  %v3441_v13 = vadd.f32 %v3058_v2, %v2719_v43  ;;  %v10243_v15 = vrot.slane %v8020_v29, 1  ;;  %v2464_v52 = vmul.f32 %v10053_v12, %v7962_v38 }
 0x395   :  { %v2159_v8 = vsel %vm652_vm0, %v10241_v34, %v10240_v36  ;;  %v8325_v21 = vmin.f32 %v1959_v6, 6.0  ;;  %v3503_v16 = vadd.f32 %v3439_v37, %v3379_v54  ;;  %v10244_v18 = vmov %v10241_v34 }
 0x396   :  { %v8321_v55 = vsel %vm717_vm1, %v10243_v15, %v10242_v46  ;;  %v10245_v60 = vmov %v10240_v36  ;;  %v10246_v1 = vmov %v10243_v15  ;;  %v10247_v39 = vmov %v10242_v46  ;;  %v10248_v15 = vld [vmem:[#allocation90_spill] sm:$0xff] }
 0x397   :  { %v8333_v2 = vsel %vm652_vm0, %v10245_v60, %v10244_v18  ;;  %v2287_v51 = vsel %vm717_vm1, %v10247_v39, %v10246_v1  ;;  %v2098_v38 = vrot.slane %v8305_v50, 7  ;;  %v3505_v27 = vadd.f32 %v3441_v13, %v3381_v25  ;;  %v10249_v13 = vld [vmem:[#allocation73_spill] sm:$0xff]  ;;  %v1891_v18 = vpop.f32.mrf.mxu0  ;;  %v10250_v1 = vld [vmem:[#allocation96_spill] sm:$0xff] }
 0x398   :  { %v3921_v43 = vadd.f32 %v3920_v45, %v3831_v7  ;;  %v3567_v17 = vmax.f32 %v3503_v16, 0.0  ;;  %v1958_v54 = vmax.f32 %v8285_v58, 0.0  ;;  %v8347_v37 = vsel %vm750_vm2, %v8321_v55, %v2159_v8  ;;  %v8359_v45 = vpop.f32.mrf.mxu3 }
 0x399   :  { %v2466_v36 = vmul.f32 %v10053_v12, %v7928_v11  ;;  %v3569_v34 = vmax.f32 %v3505_v27, 0.0  ;;  %v8354_v46 = vsel %vm789_vm3, %v8333_v2, %v2287_v51  ;;  %v2590_v25 = vadd.f32 %v10248_v15, %v2464_v52 }
 0x39a   :  { %v2787_v7 = vmul.f32 %v10061_v59, %v8151_v61  ;;  %v3631_v58 = vmin.f32 %v3567_v17, 6.0  ;;  %v2658_v16 = vmul.f32 %v10133_v40, %v7969_v3  ;;  %v2789_v11 = vmul.f32 %v10061_v59, %v8114_v5  ;;  %v10251_v17 = vld [vmem:[#allocation44_spill] sm:$0xff] }
 0x39b   :  { %v2592_v8 = vadd.f32 %v10249_v13, %v2466_v36  ;;  %v3633_v60 = vmin.f32 %v3569_v34, 6.0  ;;  %v2991_v52 = vmul.f32 %v10134_v41, %v8126_v31  ;;  %v2993_v51 = vmul.f32 %v10134_v41, %v8156_v26  ;;  %4171 = vmatmul.bf16.gmra.mxu3 %v8270_v56 }
 0x39c   :  { %v2921_v39 = vadd.f32 %v10250_v1, %v2787_v7  ;;  %v2656_v27 = vmul.f32 %v10133_v40, %v7943_v10  ;;  %v2923_v36 = vadd.f32 %v10251_v17, %v2789_v11  ;;  %v3126_v3 = vmul.f32 %v10105_v32, %v8347_v37 }
 0x39d   :  { %v3128_v15 = vmul.f32 %v10105_v32, %v8333_v2  ;;  %v8378_v34 = vpack.c.bf16 %v3633_v60, %v3631_v58  ;;  %v3192_v13 = vmul.f32 %v10069_v62, %v8020_v29  ;;  %v3194_v1 = vmul.f32 %v10069_v62, %v8144_v22  ;;  %4260 = vmatmul.bf16.gmra.mxu0 %v8182_v35 }
 0x39e   :  { %v3055_v7 = vadd.f32 %v2991_v52, %v2921_v39  ;;  %v8387_v10 = vmul.f32 %v6575_v30, %v8305_v50  ;;  %v2716_v11 = vadd.f32 %v2656_v27, %v2590_v25  ;;  %v3057_v17 = vadd.f32 %v2993_v51, %v2923_v36 }
 0x39f   :  { %v3320_v6 = vmul.f32 %v6675_v44, %v8354_v46  ;;  %3959 = vmatmul.bf16.gmra.mxu2 %v8378_v34  ;;  %v2718_v58 = vadd.f32 %v2658_v16, %v2592_v8  ;;  %v3252_v29 = vadd.f32 %v3192_v13, %v3126_v3  ;;  %v3254_v60 = vadd.f32 %v3194_v1, %v3128_v15  ;;  %v3833_v13 = vpop.f32.mrf.mxu1 }
 0x3a0   :  { %10252 = vst [vmem:[#allocation95_spill] sm:$0xff] %v8387_v10  ;;  %v3318_v22 = vmul.f32 %v6675_v44, %v8321_v55  ;;  %v8397_v56 = vmul.f32 %v6577_v63, %v8305_v50  ;;  %v4306_v39 = vmul.f32 1.442695, %v3921_v43  ;;  %v8400_v52 = vmin.f32 %v1958_v54, 6.0  ;;  %v8417_v1 = vpop.f32.mrf.mxu3 }
 0x3a1   :  { %v3380_v27 = vadd.f32 %v3320_v6, %v3254_v60  ;;  %v3438_v35 = vadd.f32 %v3055_v7, %v2716_v11  ;;  %v3440_v36 = vadd.f32 %v3057_v17, %v2718_v58  ;;  %v8405_v16 = vmul.f32 %v6579_v19, %v8307_v48  ;;  %v8424_v60 = vpop.f32.mrf.mxu0 }
 0x3a2   :  { %10253 = vst [vmem:[#allocation85_spill] sm:$0xff] %v8397_v56  ;;  %v3378_v51 = vadd.f32 %v3318_v22, %v3252_v29  ;;  %v8409_v3 = vmul.f32 %v6581_v4, %v8307_v48  ;;  %v8415_v54 = vmul.f32 %v6575_v30, %v8325_v21  ;;  %v8421_v11 = vmul.f32 %v6577_v63, %v8325_v21  ;;  %v3922_v29 = vpop.f32.mrf.mxu2  ;;  %v10280_v56 = vld [vmem:[#allocation64_spill] sm:$0xff] }
 0x3a3   :  { %10254 = vst [vmem:[#allocation78_spill] sm:$0xff] %v8400_v52  ;;  %v3504_v7 = vadd.f32 %v3440_v36, %v3380_v27  ;;  %4888 = vpow2.f32 %v4306_v39  ;;  %v1961_v58 = vmax.f32 %v1891_v18, 0.0  ;;  %v10259_v15 = vrot.slane %v8146_v57, 7 }
 0x3a4   :  { %10255 = vst [vmem:[#allocation70_spill] sm:$0xff] %v8405_v16  ;;  %v3502_v6 = vadd.f32 %v3438_v35, %v3378_v51  ;;  %v10260_v27 = vrot.slane %v8305_v50, 1  ;;  %v10261_v35 = vrot.slane %v8146_v57, 1  ;;  %v8443_v36 = vmul.f32 %v6579_v19, %v8400_v52 }
 0x3a5   :  { %10256 = vst [vmem:[#allocation74_spill] sm:$0xff] %v8409_v3  ;;  %v3568_v43 = vmax.f32 %v3504_v7, 0.0  ;;  %v2162_v51 = vsel %vm652_vm0, %v2098_v38, %v10259_v15  ;;  %v3923_v25 = vadd.f32 %v3922_v29, %v3833_v13  ;;  %v10271_v29 = vld [vmem:[#allocation58_spill] sm:$0xff]  ;;  %v10277_v3 = vld [vmem:[#allocation67_spill] sm:$0xff] }
 0x3a6   :  { %10257 = vst [vmem:[#allocation80_spill] sm:$0xff] %v8415_v54  ;;  %v3566_v22 = vmax.f32 %v3502_v6, 0.0  ;;  %v8438_v39 = vsel %vm717_vm1, %v10261_v35, %v10260_v27  ;;  %v10264_v6 = vmov %v10259_v15  ;;  %v10266_v7 = vmov %v10261_v35 }
 0x3a7   :  { %10258 = vst [vmem:[#allocation77_spill] sm:$0xff] %v8421_v11  ;;  %v8451_v15 = vsel %vm652_vm0, %v10264_v6, %v2098_v38  ;;  %v10267_v17 = vmov %v10260_v27  ;;  %v8461_v35 = vmul.f32 %v6581_v4, %v8400_v52  ;;  %v3632_v8 = vmin.f32 %v3568_v43, 6.0  ;;  %v10269_v43 = vld [vmem:[#allocation81_spill] sm:$0xff] }
 0x3a8   :  { %10262 = vst [vmem:[#allocation92_spill] sm:$0xff] %v8438_v39  ;;  %v2290_v27 = vsel %vm717_vm1, %v10267_v17, %v10266_v7  ;;  %v3630_v18 = vmin.f32 %v3566_v22, 6.0  ;;  %v8468_v38 = vsel %vm750_vm2, %v8438_v39, %v2162_v51  ;;  %v2469_v6 = vmul.f32 %v10039_v42, %v8067_v24  ;;  %v10274_v24 = vld [vmem:[#allocation94_spill] sm:$0xff] }
 0x3a9   :  { %10263 = vst [vmem:[#allocation61_spill] sm:$0xff] %v8443_v36  ;;  %v8463_v36 = vmin.f32 %v1961_v58, 6.0  ;;  %v2471_v17 = vmul.f32 %v10039_v42, %v10232_v20  ;;  %v8477_v22 = vsel %vm789_vm3, %v8451_v15, %v2290_v27  ;;  %v2663_v13 = vmul.f32 %v10231_v49, %v10269_v43  ;;  %v10270_v58 = vld [vmem:[#allocation89_spill] sm:$0xff]  ;;  %v8483_v51 = vpop.eup %4888 }
 0x3aa   :  { %10265 = vst [vmem:[#allocation84_spill] sm:$0xff] %v8451_v15  ;;  %v3678_v7 = vpack.c.bf16 %v3632_v8, %v3630_v18  ;;  %v2792_v54 = vmul.f32 %v10271_v29, %v10270_v58  ;;  %v2794_v20 = vmul.f32 %v10271_v29, %v8239_v28  ;;  %v10275_v8 = vld [vmem:[#allocation59_spill] sm:$0xff]  ;;  %v10276_v27 = vld [vmem:[#allocation57_spill] sm:$0xff]  ;;  %v3131_v47 = vmul.f32 %v10277_v3, %v8468_v38 }
 0x3ab   :  { %10268 = vst [vmem:[#allocation90_spill] sm:$0xff] %v8461_v35  ;;  %v10273_v35 = vld [vmem:[#allocation71_spill] sm:$0xff]  ;;  %v2597_v11 = vadd.f32 %v10274_v24, %v2471_v17  ;;  %v2996_v18 = vmul.f32 %v10275_v8, %v8245_v0  ;;  %v2998_v43 = vmul.f32 %v10275_v8, %v8264_v53  ;;  %v10278_v17 = vld [vmem:[#allocation97_spill] sm:$0xff]  ;;  %v3197_v0 = vmul.f32 %v10280_v56, %v8146_v57 }
 0x3ac   :  { %10272 = vst [vmem:[#allocation73_spill] sm:$0xff] %v8483_v51  ;;  %v2595_v16 = vadd.f32 %v10273_v35, %v2469_v6  ;;  %3870 = vmatmul.bf16.gmra.mxu1 %v3678_v7  ;;  %v2926_v10 = vadd.f32 %v10276_v27, %v2792_v54  ;;  %v3133_v35 = vmul.f32 %v10277_v3, %v8451_v15  ;;  %v1960_v6 = vmax.f32 %v8359_v45, 0.0  ;;  %v10279_v51 = vld [vmem:[#allocation83_spill] sm:$0xff]  ;;  %v8509_v3 = vpop.f32.mrf.mxu3 }
 0x3ad   :  { %v2661_v24 = vmul.f32 %v10231_v49, %v10278_v17  ;;  %v2928_v52 = vadd.f32 %v10279_v51, %v2794_v20  ;;  %v1963_v54 = vmax.f32 %v8424_v60, 0.0  ;;  %v3199_v8 = vmul.f32 %v10280_v56, %v8305_v50  ;;  %10281 = vst [vmem:[#allocation96_spill] sm:$0xff] %v8509_v3  ;;  %4176 = vmatmul.bf16.gmra.mxu3 %v3678_v7  ;;  %v8513_v20 = vpop.f32.mrf.mxu0  ;;  %v3836_v7 = vpop.f32.mrf.mxu1 }
 0x3ae   :  { %v3060_v27 = vadd.f32 %v2996_v18, %v2926_v10  ;;  %v3325_v29 = vmul.f32 %v6645_v33, %v8477_v22  ;;  %v3257_v17 = vadd.f32 %v3197_v0, %v3131_v47  ;;  %v3323_v51 = vmul.f32 %v6645_v33, %v8438_v39  ;;  %4265 = vmatmul.bf16.gmra.mxu0 %v8378_v34 }
 0x3af   :  { %v2721_v45 = vadd.f32 %v2661_v24, %v2595_v16  ;;  %v3062_v15 = vadd.f32 %v2998_v43, %v2928_v52  ;;  %v4308_v10 = vmul.f32 1.442695, %v3923_v25  ;;  %v2723_v50 = vadd.f32 %v2663_v13, %v2597_v11  ;;  %v3925_v16 = vpop.f32.mrf.mxu2 }
 0x3b0   :  { %v3259_v60 = vadd.f32 %v3199_v8, %v3133_v35  ;;  %v3383_v56 = vadd.f32 %v3323_v51, %v3257_v17  ;;  %v10282_v0 = vrot.slane %v8199_v14, 7  ;;  %v10283_v47 = vrot.slane %v8307_v48, 7 }
 0x3b1   :  { %v3443_v3 = vadd.f32 %v3060_v27, %v2721_v45  ;;  %v3445_v34 = vadd.f32 %v3062_v15, %v2723_v50  ;;  %v10284_v24 = vrot.slane %v8307_v48, 1  ;;  %v10285_v25 = vrot.slane %v8199_v14, 1 }
 0x3b2   :  { %v2161_v52 = vsel %vm652_vm0, %v10283_v47, %v10282_v0  ;;  %v3385_v43 = vadd.f32 %v3325_v29, %v3259_v60  ;;  %v2468_v13 = vmul.f32 %v10053_v12, %v8151_v61  ;;  %v8536_v8 = vmul.f32 %v6575_v30, %v8463_v36 }
 0x3b3   :  { %v8530_v11 = vsel %vm717_vm1, %v10285_v25, %v10284_v24  ;;  %v3507_v35 = vadd.f32 %v3443_v3, %v3383_v56  ;;  %v10287_v27 = vmov %v10283_v47  ;;  %v10288_v15 = vmov %v10282_v0 }
 0x3b4   :  { %10286 = vst [vmem:[#allocation44_spill] sm:$0xff] %v8536_v8  ;;  %v8544_v29 = vsel %vm652_vm0, %v10288_v15, %v10287_v27  ;;  %v10289_v45 = vmov %v10285_v25  ;;  %v10290_v17 = vmov %v10284_v24  ;;  %v8554_v51 = vmul.f32 %v6577_v63, %v8463_v36  ;;  %v10294_v15 = vld [vmem:[#allocation93_spill] sm:$0xff] }
 0x3b5   :  { %v2289_v61 = vsel %vm717_vm1, %v10290_v17, %v10289_v45  ;;  %v8556_v56 = vmin.f32 %v1960_v6, 6.0  ;;  %v3509_v3 = vadd.f32 %v3445_v34, %v3385_v43  ;;  %v3926_v50 = vadd.f32 %v3925_v16, %v3836_v7  ;;  %v10292_v6 = vld [vmem:[#allocation65_spill] sm:$0xff]  ;;  %v10293_v16 = vld [vmem:[#allocation86_spill] sm:$0xff] }
 0x3b6   :  { %10291 = vst [vmem:[#allocation81_spill] sm:$0xff] %v8554_v51  ;;  %v3571_v60 = vmax.f32 %v3507_v35, 0.0  ;;  %v1962_v0 = vmax.f32 %v8417_v1, 0.0  ;;  %v8562_v47 = vsel %vm750_vm2, %v8530_v11, %v2161_v52  ;;  %v2470_v24 = vmul.f32 %v10053_v12, %v8114_v5 }
 0x3b7   :  { %v3573_v25 = vmax.f32 %v3509_v3, 0.0  ;;  %v8569_v27 = vsel %vm789_vm3, %v8544_v29, %v2289_v61  ;;  %v2594_v43 = vadd.f32 %v10292_v6, %v2468_v13  ;;  %v2791_v7 = vmul.f32 %v10061_v59, %v8347_v37  ;;  %v10295_v3 = vld [vmem:[#allocation75_spill] sm:$0xff] }
 0x3b8   :  { %v3635_v1 = vmin.f32 %v3571_v60, 6.0  ;;  %v2596_v34 = vadd.f32 %v10293_v16, %v2470_v24  ;;  %v2662_v52 = vmul.f32 %v10133_v40, %v8156_v26  ;;  %v2793_v5 = vmul.f32 %v10061_v59, %v8333_v2 }
 0x3b9   :  { %v3637_v35 = vmin.f32 %v3573_v25, 6.0  ;;  %v2925_v45 = vadd.f32 %v10294_v15, %v2791_v7  ;;  %v2995_v17 = vmul.f32 %v10134_v41, %v8321_v55  ;;  %v2997_v13 = vmul.f32 %v10134_v41, %v8354_v46  ;;  %v8595_v15 = vpop.f32.mrf.mxu0 }
 0x3ba   :  { %v2660_v61 = vmul.f32 %v10133_v40, %v8126_v31  ;;  %v2927_v60 = vadd.f32 %v10295_v3, %v2793_v5  ;;  %v3130_v26 = vmul.f32 %v10105_v32, %v8562_v47  ;;  %v3132_v24 = vmul.f32 %v10105_v32, %v8544_v29 }
 0x3bb   :  { %v3681_v25 = vpack.c.bf16 %v3637_v35, %v3635_v1  ;;  %v3059_v6 = vadd.f32 %v2995_v17, %v2925_v45  ;;  %v3196_v7 = vmul.f32 %v10069_v62, %v8199_v14  ;;  %v3198_v16 = vmul.f32 %v10069_v62, %v8307_v48 }
 0x3bc   :  { %v8597_v18 = vmin.f32 %v1963_v54, 6.0  ;;  %v2720_v31 = vadd.f32 %v2660_v61, %v2594_v43  ;;  %v3061_v5 = vadd.f32 %v2997_v13, %v2927_v60  ;;  %v3324_v3 = vmul.f32 %v6675_v44, %v8569_v27  ;;  %v8616_v60 = vpop.f32.mrf.mxu3 }
 0x3bd   :  { %3964 = vmatmul.bf16.gmra.mxu2 %v3681_v25  ;;  %v2722_v57 = vadd.f32 %v2662_v52, %v2596_v34  ;;  %v3256_v8 = vadd.f32 %v3196_v7, %v3130_v26  ;;  %v3258_v1 = vadd.f32 %v3198_v16, %v3132_v24  ;;  %v3322_v35 = vmul.f32 %v6675_v44, %v8530_v11  ;;  %v3838_v7 = vpop.f32.mrf.mxu1  ;;  %v3927_v16 = vpop.f32.mrf.mxu2 }
 0x3be   :  { %4890 = vpow2.f32 %v4308_v10  ;;  %v4310_v48 = vmul.f32 1.442695, %v3926_v50  ;;  %v8604_v45 = vmin.f32 %v1962_v0, 6.0  ;;  %v3442_v43 = vadd.f32 %v3059_v6, %v2720_v31 }
 0x3bf   :  { %v3382_v54 = vadd.f32 %v3322_v35, %v3256_v8  ;;  %v3384_v17 = vadd.f32 %v3324_v3, %v3258_v1  ;;  %v3444_v13 = vadd.f32 %v3061_v5, %v2722_v57  ;;  %v8609_v34 = vmul.f32 %v6579_v19, %v8556_v56 }
 0x3c0   :  { %10296 = vst [vmem:[#allocation89_spill] sm:$0xff] %v8604_v45  ;;  %v8613_v52 = vmul.f32 %v6581_v4, %v8556_v56  ;;  %v8621_v8 = vmul.f32 %v6575_v30, %v8597_v18  ;;  %v8625_v26 = vmul.f32 %v6577_v63, %v8597_v18  ;;  %4892 = vpow2.f32 %v4310_v48 }
 0x3c1   :  { %10297 = vst [vmem:[#allocation71_spill] sm:$0xff] %v8609_v34  ;;  %v3506_v57 = vadd.f32 %v3442_v43, %v3382_v54  ;;  %v3508_v0 = vadd.f32 %v3444_v13, %v3384_v17  ;;  %v1965_v6 = vmax.f32 %v8513_v20, 0.0  ;;  %v10301_v3 = vrot.slane %v8325_v21, 7  ;;  %v8668_v61 = vpop.f32.mrf.mxu0  ;;  %4270 = vmatmul.bf16.gmra.mxu0 %v3681_v25 }
 0x3c2   :  { %10298 = vst [vmem:[#allocation94_spill] sm:$0xff] %v8613_v52  ;;  %v10302_v1 = vrot.slane %v8463_v36, 7  ;;  %v10303_v54 = vrot.slane %v8463_v36, 1  ;;  %v10304_v17 = vrot.slane %v8325_v21, 1  ;;  %v8648_v13 = vmul.f32 %v6579_v19, %v8604_v45 }
 0x3c3   :  { %10299 = vst [vmem:[#allocation57_spill] sm:$0xff] %v8621_v8  ;;  %v3570_v31 = vmax.f32 %v3506_v57, 0.0  ;;  %v3572_v5 = vmax.f32 %v3508_v0, 0.0  ;;  %v10309_v0 = vmov %v10301_v3  ;;  %v8666_v43 = vmul.f32 %v6581_v4, %v8604_v45  ;;  %v10325_v45 = vld [vmem:[#allocation64_spill] sm:$0xff] }
 0x3c4   :  { %10300 = vst [vmem:[#allocation97_spill] sm:$0xff] %v8625_v26  ;;  %v2164_v35 = vsel %vm652_vm0, %v10302_v1, %v10301_v3  ;;  %v8641_v48 = vsel %vm717_vm1, %v10304_v17, %v10303_v54  ;;  %v8643_v20 = vpop.eup %4890  ;;  %v10308_v57 = vmov %v10302_v1  ;;  %v10311_v1 = vmov %v10304_v17  ;;  %v10324_v26 = vld [vmem:[#allocation85_spill] sm:$0xff] }
 0x3c5   :  { %10305 = vst [vmem:[#allocation83_spill] sm:$0xff] %v8641_v48  ;;  %v8656_v3 = vsel %vm652_vm0, %v10309_v0, %v10308_v57  ;;  %v2292_v17 = vsel %vm717_vm1, %v10303_v54, %v10311_v1  ;;  %v3634_v24 = vmin.f32 %v3570_v31, 6.0  ;;  %v3636_v50 = vmin.f32 %v3572_v5, 6.0  ;;  %v10316_v5 = vld [vmem:[#allocation43_spill] sm:$0xff] }
 0x3c6   :  { %10306 = vst [vmem:[#allocation65_spill] sm:$0xff] %v8643_v20  ;;  %v3928_v10 = vadd.f32 %v3927_v16, %v3838_v7  ;;  %v8670_v14 = vmin.f32 %v1965_v6, 6.0  ;;  %v8675_v57 = vsel %vm750_vm2, %v8641_v48, %v2164_v35  ;;  %v2473_v0 = vmul.f32 %v10039_v42, %v10270_v58  ;;  %v10314_v6 = vld [vmem:[#allocation58_spill] sm:$0xff]  ;;  %v8690_v31 = vpop.eup %4892  ;;  %v10317_v58 = vld [vmem:[#allocation40_spill] sm:$0xff] }
 0x3c7   :  { %10307 = vst [vmem:[#allocation86_spill] sm:$0xff] %v8648_v13  ;;  %v2475_v1 = vmul.f32 %v10039_v42, %v8239_v28  ;;  %v3680_v54 = vpack.c.bf16 %v3636_v50, %v3634_v24  ;;  %v8684_v7 = vsel %vm789_vm3, %v8656_v3, %v2292_v17  ;;  %v2667_v25 = vmul.f32 %v10231_v49, %v8264_v53  ;;  %v10318_v13 = vld [vmem:[#allocation84_spill] sm:$0xff]  ;;  %v10319_v50 = vld [vmem:[#allocation59_spill] sm:$0xff] }
 0x3c8   :  { %10310 = vst [vmem:[#allocation93_spill] sm:$0xff] %v8656_v3  ;;  %v2796_v16 = vmul.f32 %v10314_v6, %v8468_v38  ;;  %v2599_v35 = vadd.f32 %v10316_v5, %v2473_v0  ;;  %v2798_v28 = vmul.f32 %v10314_v6, %v10318_v13  ;;  %v3000_v24 = vmul.f32 %v10319_v50, %v8438_v39  ;;  %v10320_v17 = vld [vmem:[#allocation72_spill] sm:$0xff]  ;;  %v3841_v6 = vpop.f32.mrf.mxu1 }
 0x3c9   :  { %10312 = vst [vmem:[#allocation75_spill] sm:$0xff] %v8666_v43  ;;  %v2601_v20 = vadd.f32 %v10317_v58, %v2475_v1  ;;  %3875 = vmatmul.bf16.gmra.mxu1 %v3680_v54  ;;  %v3002_v53 = vmul.f32 %v10319_v50, %v8477_v22  ;;  %v10321_v43 = vld [vmem:[#allocation67_spill] sm:$0xff]  ;;  %v10322_v5 = vld [vmem:[#allocation96_spill] sm:$0xff]  ;;  %v10323_v58 = vld [vmem:[#allocation82_spill] sm:$0xff]  ;;  %v3201_v51 = vmul.f32 %v10325_v45, %v8325_v21 }
 0x3ca   :  { %10313 = vst [vmem:[#allocation98_spill] sm:$0xff] %v8675_v57  ;;  %v2930_v8 = vadd.f32 %v10320_v17, %v2796_v16  ;;  %v3135_v34 = vmul.f32 %v10321_v43, %v8675_v57  ;;  %v3137_v0 = vmul.f32 %v10321_v43, %v8656_v3  ;;  %v1964_v1 = vmax.f32 %v10322_v5, 0.0  ;;  %v8711_v16 = vpop.f32.mrf.mxu3  ;;  %4181 = vmatmul.bf16.gmra.mxu3 %v3680_v54 }
 0x3cb   :  { %10315 = vst [vmem:[#allocation99_spill] sm:$0xff] %v8690_v31  ;;  %v2665_v31 = vmul.f32 %v10231_v49, %v10323_v58  ;;  %v2932_v52 = vadd.f32 %v10324_v26, %v2798_v28  ;;  %v1967_v17 = vmax.f32 %v8595_v15, 0.0  ;;  %v3203_v50 = vmul.f32 %v10325_v45, %v8463_v36  ;;  %v3930_v36 = vpop.f32.mrf.mxu2  ;;  %v10327_v45 = vld [vmem:[#allocation78_spill] sm:$0xff] }
 0x3cc   :  { %10326 = vst [vmem:[#allocation43_spill] sm:$0xff] %v8711_v16  ;;  %v3064_v39 = vadd.f32 %v3000_v24, %v2930_v8  ;;  %v3329_v5 = vmul.f32 %v6645_v33, %v8684_v7  ;;  %v3261_v58 = vadd.f32 %v3201_v51, %v3135_v34  ;;  %v3327_v26 = vmul.f32 %v6645_v33, %v8641_v48 }
 0x3cd   :  { %v2725_v43 = vadd.f32 %v2665_v31, %v2599_v35  ;;  %v3066_v3 = vadd.f32 %v3002_v53, %v2932_v52  ;;  %v4312_v28 = vmul.f32 1.442695, %v3928_v10  ;;  %v2727_v16 = vadd.f32 %v2667_v25, %v2601_v20 }
 0x3ce   :  { %v3263_v54 = vadd.f32 %v3203_v50, %v3137_v0  ;;  %v3387_v8 = vadd.f32 %v3327_v26, %v3261_v58  ;;  %v10328_v57 = vrot.slane %v10327_v45, 7  ;;  %v10329_v31 = vrot.slane %v8556_v56, 7 }
 0x3cf   :  { %v3447_v24 = vadd.f32 %v3064_v39, %v2725_v43  ;;  %v3449_v52 = vadd.f32 %v3066_v3, %v2727_v16  ;;  %v10330_v35 = vrot.slane %v8556_v56, 1  ;;  %v10331_v10 = vrot.slane %v10327_v45, 1 }
 0x3d0   :  { %v2163_v51 = vsel %vm652_vm0, %v10329_v31, %v10328_v57  ;;  %v3389_v34 = vadd.f32 %v3329_v5, %v3263_v54  ;;  %v2472_v39 = vmul.f32 %v10053_v12, %v8347_v37  ;;  %v8740_v43 = vmul.f32 %v6575_v30, %v8670_v14 }
 0x3d1   :  { %v8734_v20 = vsel %vm717_vm1, %v10331_v10, %v10330_v35  ;;  %v3511_v25 = vadd.f32 %v3447_v24, %v3387_v8  ;;  %v10333_v57 = vmov %v10329_v31  ;;  %v10334_v3 = vrot.slane %v10327_v45, 7 }
 0x3d2   :  { %10332 = vst [vmem:[#allocation40_spill] sm:$0xff] %v8740_v43  ;;  %v10335_v53 = vmov %v10331_v10  ;;  %v10336_v0 = vmov %v10330_v35  ;;  %v8758_v16 = vmul.f32 %v6577_v63, %v8670_v14  ;;  %v8760_v5 = vmin.f32 %v1964_v1, 6.0  ;;  %v10338_v1 = vld [vmem:[#allocation91_spill] sm:$0xff]  ;;  %v10371_v43 = vld [vmem:[#allocation81_spill] sm:$0xff] }
 0x3d3   :  { %v8748_v50 = vsel %vm652_vm0, %v10334_v3, %v10333_v57  ;;  %v2291_v37 = vsel %vm717_vm1, %v10336_v0, %v10335_v53  ;;  %v3513_v58 = vadd.f32 %v3449_v52, %v3389_v34  ;;  %v3931_v26 = vadd.f32 %v3930_v36, %v3841_v6  ;;  %v10339_v36 = vld [vmem:[#allocation88_spill] sm:$0xff] }
 0x3d4   :  { %10337 = vst [vmem:[#allocation84_spill] sm:$0xff] %v8758_v16  ;;  %v3575_v54 = vmax.f32 %v3511_v25, 0.0  ;;  %v1966_v8 = vmax.f32 %v8616_v60, 0.0  ;;  %v8766_v24 = vsel %vm750_vm2, %v8734_v20, %v2163_v51  ;;  %v2474_v31 = vmul.f32 %v10053_v12, %v8333_v2  ;;  %v10340_v57 = vld [vmem:[#allocation68_spill] sm:$0xff] }
 0x3d5   :  { %v3577_v35 = vmax.f32 %v3513_v58, 0.0  ;;  %v8773_v10 = vsel %vm789_vm3, %v8748_v50, %v2291_v37  ;;  %v2598_v34 = vadd.f32 %v10338_v1, %v2472_v39  ;;  %v2795_v6 = vmul.f32 %v10061_v59, %v8562_v47  ;;  %v10341_v37 = vld [vmem:[#allocation74_spill] sm:$0xff] }
 0x3d6   :  { %v3639_v60 = vmin.f32 %v3575_v54, 6.0  ;;  %v2600_v52 = vadd.f32 %v10339_v36, %v2474_v31  ;;  %v2666_v51 = vmul.f32 %v10133_v40, %v8354_v46  ;;  %v2797_v2 = vmul.f32 %v10061_v59, %v8544_v29  ;;  %v8799_v36 = vpop.f32.mrf.mxu0 }
 0x3d7   :  { %v3641_v25 = vmin.f32 %v3577_v35, 6.0  ;;  %v2929_v3 = vadd.f32 %v10340_v57, %v2795_v6  ;;  %v2999_v53 = vmul.f32 %v10134_v41, %v8530_v11  ;;  %v3001_v39 = vmul.f32 %v10134_v41, %v8569_v27 }
 0x3d8   :  { %v2664_v0 = vmul.f32 %v10133_v40, %v8321_v55  ;;  %v2931_v58 = vadd.f32 %v10341_v37, %v2797_v2  ;;  %v3134_v46 = vmul.f32 %v10105_v32, %v8766_v24  ;;  %v3136_v54 = vmul.f32 %v10105_v32, %v8748_v50 }
 0x3d9   :  { %v3683_v31 = vpack.c.bf16 %v3641_v25, %v3639_v60  ;;  %v3063_v35 = vadd.f32 %v2999_v53, %v2929_v3  ;;  %v3200_v1 = vmul.f32 %v10069_v62, %v10327_v45  ;;  %v3202_v6 = vmul.f32 %v10069_v62, %v8556_v56 }
 0x3da   :  { %v8801_v57 = vmin.f32 %v1967_v17, 6.0  ;;  %v2724_v55 = vadd.f32 %v2664_v0, %v2598_v34  ;;  %v3065_v2 = vadd.f32 %v3001_v39, %v2931_v58  ;;  %v3328_v37 = vmul.f32 %v6675_v44, %v8773_v10  ;;  %v8820_v58 = vpop.f32.mrf.mxu3 }
 0x3db   :  { %3969 = vmatmul.bf16.gmra.mxu2 %v3683_v31  ;;  %v2726_v15 = vadd.f32 %v2666_v51, %v2600_v52  ;;  %v3260_v21 = vadd.f32 %v3200_v1, %v3134_v46  ;;  %v3262_v60 = vadd.f32 %v3202_v6, %v3136_v54  ;;  %v3326_v25 = vmul.f32 %v6675_v44, %v8734_v20  ;;  %v3843_v1 = vpop.f32.mrf.mxu1  ;;  %v3932_v6 = vpop.f32.mrf.mxu2 }
 0x3dc   :  { %4894 = vpow2.f32 %v4312_v28  ;;  %v4314_v56 = vmul.f32 1.442695, %v3931_v26  ;;  %v8808_v3 = vmin.f32 %v1966_v8, 6.0  ;;  %v3446_v34 = vadd.f32 %v3063_v35, %v2724_v55 }
 0x3dd   :  { %v3386_v17 = vadd.f32 %v3326_v25, %v3260_v21  ;;  %v3388_v53 = vadd.f32 %v3328_v37, %v3262_v60  ;;  %v3448_v39 = vadd.f32 %v3065_v2, %v2726_v15  ;;  %v8813_v52 = vmul.f32 %v6579_v19, %v8760_v5 }
 0x3de   :  { %10342 = vst [vmem:[#allocation72_spill] sm:$0xff] %v8808_v3  ;;  %v8817_v51 = vmul.f32 %v6581_v4, %v8760_v5  ;;  %v8825_v21 = vmul.f32 %v6575_v30, %v8801_v57  ;;  %v8829_v46 = vmul.f32 %v6577_v63, %v8801_v57  ;;  %4896 = vpow2.f32 %v4314_v56  ;;  %v8872_v0 = vpop.f32.mrf.mxu0  ;;  %4275 = vmatmul.bf16.gmra.mxu0 %v3683_v31 }
 0x3df   :  { %10343 = vst [vmem:[#allocation96_spill] sm:$0xff] %v8813_v52  ;;  %v3510_v15 = vadd.f32 %v3446_v34, %v3386_v17  ;;  %v3512_v8 = vadd.f32 %v3448_v39, %v3388_v53  ;;  %v1969_v35 = vmax.f32 %v8668_v61, 0.0  ;;  %v10347_v37 = vrot.slane %v8597_v18, 7  ;;  %v10368_v52 = vld [vmem:[#allocation67_spill] sm:$0xff] }
 0x3e0   :  { %10344 = vst [vmem:[#allocation82_spill] sm:$0xff] %v8817_v51  ;;  %v10348_v60 = vrot.slane %v8670_v14, 7  ;;  %v10349_v17 = vrot.slane %v8670_v14, 1  ;;  %v10350_v53 = vrot.slane %v8597_v18, 1  ;;  %v8852_v39 = vmul.f32 %v6579_v19, %v8808_v3 }
 0x3e1   :  { %10345 = vst [vmem:[#allocation85_spill] sm:$0xff] %v8825_v21  ;;  %v3574_v55 = vmax.f32 %v3510_v15, 0.0  ;;  %v3576_v2 = vmax.f32 %v3512_v8, 0.0  ;;  %v10355_v8 = vmov %v10347_v37  ;;  %v8870_v34 = vmul.f32 %v6581_v4, %v8808_v3  ;;  %v10365_v21 = vld [vmem:[#allocation93_spill] sm:$0xff]  ;;  %v10372_v3 = vld [vmem:[#allocation64_spill] sm:$0xff] }
 0x3e2   :  { %10346 = vst [vmem:[#allocation78_spill] sm:$0xff] %v8829_v46  ;;  %v2166_v25 = vsel %vm652_vm0, %v10348_v60, %v10347_v37  ;;  %v8845_v56 = vsel %vm717_vm1, %v10350_v53, %v10349_v17  ;;  %v8847_v61 = vpop.eup %4894  ;;  %v10354_v15 = vmov %v10348_v60  ;;  %v10357_v60 = vmov %v10350_v53 }
 0x3e3   :  { %10351 = vst [vmem:[#allocation91_spill] sm:$0xff] %v8845_v56  ;;  %v8860_v37 = vsel %vm652_vm0, %v10355_v8, %v10354_v15  ;;  %v2294_v53 = vsel %vm717_vm1, %v10349_v17, %v10357_v60  ;;  %v3638_v54 = vmin.f32 %v3574_v55, 6.0  ;;  %v3640_v26 = vmin.f32 %v3576_v2, 6.0 }
 0x3e4   :  { %10352 = vst [vmem:[#allocation88_spill] sm:$0xff] %v8847_v61  ;;  %v3933_v28 = vadd.f32 %v3932_v6, %v3843_v1  ;;  %v8874_v45 = vmin.f32 %v1969_v35, 6.0  ;;  %v8879_v15 = vsel %vm750_vm2, %v8845_v56, %v2166_v25  ;;  %v2477_v8 = vmul.f32 %v10039_v42, %v8468_v38  ;;  %v10360_v35 = vld [vmem:[#allocation98_spill] sm:$0xff]  ;;  %v8894_v2 = vpop.eup %4896  ;;  %v10363_v25 = vld [vmem:[#allocation87_spill] sm:$0xff] }
 0x3e5   :  { %10353 = vst [vmem:[#allocation68_spill] sm:$0xff] %v8852_v39  ;;  %v2479_v60 = vmul.f32 %v10039_v42, %v10318_v13  ;;  %v3682_v17 = vpack.c.bf16 %v3640_v26, %v3638_v54  ;;  %v8888_v1 = vsel %vm789_vm3, %v8860_v37, %v2294_v53  ;;  %v2671_v31 = vmul.f32 %v10231_v49, %v8477_v22  ;;  %v10361_v6 = vld [vmem:[#allocation58_spill] sm:$0xff]  ;;  %v10364_v38 = vld [vmem:[#allocation95_spill] sm:$0xff]  ;;  %v10367_v53 = vld [vmem:[#allocation77_spill] sm:$0xff] }
 0x3e6   :  { %10356 = vst [vmem:[#allocation74_spill] sm:$0xff] %v8860_v37  ;;  %v2800_v55 = vmul.f32 %v10361_v6, %v10360_v35  ;;  %v2603_v61 = vadd.f32 %v10363_v25, %v2477_v8  ;;  %v2802_v13 = vmul.f32 %v10361_v6, %v10365_v21  ;;  %v10366_v26 = vld [vmem:[#allocation59_spill] sm:$0xff]  ;;  %v3139_v46 = vmul.f32 %v10368_v52, %v8879_v15  ;;  %v3846_v6 = vpop.f32.mrf.mxu1 }
 0x3e7   :  { %10358 = vst [vmem:[#allocation100_spill] sm:$0xff] %v8870_v34  ;;  %v2605_v39 = vadd.f32 %v10364_v38, %v2479_v60  ;;  %v3004_v54 = vmul.f32 %v10366_v26, %v8641_v48  ;;  %3880 = vmatmul.bf16.gmra.mxu1 %v3682_v17  ;;  %v3006_v22 = vmul.f32 %v10366_v26, %v8684_v7  ;;  %v10369_v25 = vld [vmem:[#allocation43_spill] sm:$0xff]  ;;  %v10370_v38 = vld [vmem:[#allocation92_spill] sm:$0xff] }
 0x3e8   :  { %10359 = vst [vmem:[#allocation101_spill] sm:$0xff] %v8879_v15  ;;  %v2934_v34 = vadd.f32 %v10367_v53, %v2800_v55  ;;  %v3141_v8 = vmul.f32 %v10368_v52, %v8860_v37  ;;  %v1968_v60 = vmax.f32 %v10369_v25, 0.0  ;;  %v2936_v51 = vadd.f32 %v10371_v43, %v2802_v13  ;;  %v8915_v55 = vpop.f32.mrf.mxu3  ;;  %4186 = vmatmul.bf16.gmra.mxu3 %v3682_v17 }
 0x3e9   :  { %10362 = vst [vmem:[#allocation98_spill] sm:$0xff] %v8894_v2  ;;  %v2669_v2 = vmul.f32 %v10231_v49, %v10370_v38  ;;  %v3205_v16 = vmul.f32 %v10372_v3, %v8597_v18  ;;  %v1971_v53 = vmax.f32 %v8799_v36, 0.0  ;;  %v3207_v26 = vmul.f32 %v10372_v3, %v8670_v14  ;;  %v3935_v14 = vpop.f32.mrf.mxu2  ;;  %v10374_v3 = vld [vmem:[#allocation89_spill] sm:$0xff] }
 0x3ea   :  { %10373 = vst [vmem:[#allocation87_spill] sm:$0xff] %v8915_v55  ;;  %v3068_v48 = vadd.f32 %v3004_v54, %v2934_v34  ;;  %v3333_v25 = vmul.f32 %v6645_v33, %v8888_v1  ;;  %v3070_v37 = vadd.f32 %v3006_v22, %v2936_v51  ;;  %v3331_v43 = vmul.f32 %v6645_v33, %v8845_v56 }
 0x3eb   :  { %v2729_v52 = vadd.f32 %v2669_v2, %v2603_v61  ;;  %v3265_v38 = vadd.f32 %v3205_v16, %v3139_v46  ;;  %v4316_v13 = vmul.f32 1.442695, %v3933_v28  ;;  %v2731_v55 = vadd.f32 %v2671_v31, %v2605_v39 }
 0x3ec   :  { %v3267_v17 = vadd.f32 %v3207_v26, %v3141_v8  ;;  %v10375_v15 = vrot.slane %v10374_v3, 7  ;;  %v10376_v61 = vrot.slane %v8760_v5, 7  ;;  %v10377_v2 = vrot.slane %v8760_v5, 1 }
 0x3ed   :  { %v3391_v34 = vadd.f32 %v3331_v43, %v3265_v38  ;;  %v3451_v54 = vadd.f32 %v3068_v48, %v2729_v52  ;;  %v3453_v46 = vadd.f32 %v3070_v37, %v2731_v55  ;;  %v10378_v28 = vrot.slane %v10374_v3, 1 }
 0x3ee   :  { %v2165_v16 = vsel %vm652_vm0, %v10376_v61, %v10375_v15  ;;  %v3393_v51 = vadd.f32 %v3333_v25, %v3267_v17  ;;  %v2476_v48 = vmul.f32 %v10053_v12, %v8562_v47  ;;  %v8944_v52 = vmul.f32 %v6575_v30, %v8874_v45 }
 0x3ef   :  { %v8938_v39 = vsel %vm717_vm1, %v10378_v28, %v10377_v2  ;;  %v3515_v31 = vadd.f32 %v3451_v54, %v3391_v34  ;;  %v10380_v15 = vmov %v10376_v61  ;;  %v10381_v37 = vrot.slane %v10374_v3, 7 }
 0x3f0   :  { %10379 = vst [vmem:[#allocation95_spill] sm:$0xff] %v8944_v52  ;;  %v10382_v22 = vmov %v10378_v28  ;;  %v10383_v8 = vmov %v10377_v2  ;;  %v8962_v55 = vmul.f32 %v6577_v63, %v8874_v45  ;;  %v8964_v25 = vmin.f32 %v1968_v60, 6.0  ;;  %v10385_v60 = vld [vmem:[#allocation66_spill] sm:$0xff]  ;;  %v10417_v52 = vld [vmem:[#allocation84_spill] sm:$0xff] }
 0x3f1   :  { %v8952_v26 = vsel %vm652_vm0, %v10381_v37, %v10380_v15  ;;  %v2293_v47 = vsel %vm717_vm1, %v10383_v8, %v10382_v22  ;;  %v3517_v38 = vadd.f32 %v3453_v46, %v3393_v51  ;;  %v3936_v43 = vadd.f32 %v3935_v14, %v3846_v6  ;;  %v10386_v14 = vld [vmem:[#allocation70_spill] sm:$0xff] }
 0x3f2   :  { %10384 = vst [vmem:[#allocation93_spill] sm:$0xff] %v8962_v55  ;;  %v3579_v17 = vmax.f32 %v3515_v31, 0.0  ;;  %v1970_v34 = vmax.f32 %v8820_v58, 0.0  ;;  %v8970_v54 = vsel %vm750_vm2, %v8938_v39, %v2165_v16  ;;  %v2478_v61 = vmul.f32 %v10053_v12, %v8544_v29  ;;  %v10387_v15 = vld [vmem:[#allocation90_spill] sm:$0xff] }
 0x3f3   :  { %v3581_v2 = vmax.f32 %v3517_v38, 0.0  ;;  %v8977_v28 = vsel %vm789_vm3, %v8952_v26, %v2293_v47  ;;  %v2602_v51 = vadd.f32 %v10385_v60, %v2476_v48  ;;  %v2799_v6 = vmul.f32 %v10061_v59, %v8766_v24  ;;  %v10388_v47 = vld [vmem:[#allocation94_spill] sm:$0xff] }
 0x3f4   :  { %v3643_v58 = vmin.f32 %v3579_v17, 6.0  ;;  %v2604_v46 = vadd.f32 %v10386_v14, %v2478_v61  ;;  %v2670_v16 = vmul.f32 %v10133_v40, %v8569_v27  ;;  %v2801_v29 = vmul.f32 %v10061_v59, %v8748_v50  ;;  %v9003_v14 = vpop.f32.mrf.mxu0 }
 0x3f5   :  { %v3645_v31 = vmin.f32 %v3581_v2, 6.0  ;;  %v2933_v37 = vadd.f32 %v10387_v15, %v2799_v6  ;;  %v3003_v22 = vmul.f32 %v10134_v41, %v8734_v20  ;;  %v3005_v48 = vmul.f32 %v10134_v41, %v8773_v10 }
 0x3f6   :  { %v2668_v8 = vmul.f32 %v10133_v40, %v8530_v11  ;;  %v2935_v38 = vadd.f32 %v10388_v47, %v2801_v29  ;;  %v3138_v27 = vmul.f32 %v10105_v32, %v8970_v54  ;;  %v3140_v17 = vmul.f32 %v10105_v32, %v8952_v26 }
 0x3f7   :  { %v3685_v61 = vpack.c.bf16 %v3645_v31, %v3643_v58  ;;  %v3067_v2 = vadd.f32 %v3003_v22, %v2933_v37  ;;  %v3204_v60 = vmul.f32 %v10069_v62, %v10374_v3  ;;  %v3206_v6 = vmul.f32 %v10069_v62, %v8760_v5 }
 0x3f8   :  { %v9005_v15 = vmin.f32 %v1971_v53, 6.0  ;;  %v2728_v11 = vadd.f32 %v2668_v8, %v2602_v51  ;;  %v3069_v29 = vadd.f32 %v3005_v48, %v2935_v38  ;;  %v3332_v47 = vmul.f32 %v6675_v44, %v8977_v28  ;;  %v9024_v38 = vpop.f32.mrf.mxu3 }
 0x3f9   :  { %3974 = vmatmul.bf16.gmra.mxu2 %v3685_v61  ;;  %v2730_v36 = vadd.f32 %v2670_v16, %v2604_v46  ;;  %v3264_v18 = vadd.f32 %v3204_v60, %v3138_v27  ;;  %v3266_v58 = vadd.f32 %v3206_v6, %v3140_v17  ;;  %v3330_v31 = vmul.f32 %v6675_v44, %v8938_v39  ;;  %v3848_v60 = vpop.f32.mrf.mxu1  ;;  %v3937_v6 = vpop.f32.mrf.mxu2 }
 0x3fa   :  { %4898 = vpow2.f32 %v4316_v13  ;;  %v4318_v5 = vmul.f32 1.442695, %v3936_v43  ;;  %v9012_v37 = vmin.f32 %v1970_v34, 6.0  ;;  %v3450_v51 = vadd.f32 %v3067_v2, %v2728_v11 }
 0x3fb   :  { %v3390_v53 = vadd.f32 %v3330_v31, %v3264_v18  ;;  %v3392_v22 = vadd.f32 %v3332_v47, %v3266_v58  ;;  %v3452_v48 = vadd.f32 %v3069_v29, %v2730_v36  ;;  %v9017_v46 = vmul.f32 %v6579_v19, %v8964_v25 }
 0x3fc   :  { %10389 = vst [vmem:[#allocation77_spill] sm:$0xff] %v9012_v37  ;;  %v9021_v16 = vmul.f32 %v6581_v4, %v8964_v25  ;;  %v9029_v18 = vmul.f32 %v6575_v30, %v9005_v15  ;;  %v9033_v27 = vmul.f32 %v6577_v63, %v9005_v15  ;;  %4900 = vpow2.f32 %v4318_v5  ;;  %v9076_v8 = vpop.f32.mrf.mxu0  ;;  %4280 = vmatmul.bf16.gmra.mxu0 %v3685_v61 }
 0x3fd   :  { %10390 = vst [vmem:[#allocation43_spill] sm:$0xff] %v9017_v46  ;;  %v3514_v36 = vadd.f32 %v3450_v51, %v3390_v53  ;;  %v3516_v34 = vadd.f32 %v3452_v48, %v3392_v22  ;;  %v1973_v2 = vmax.f32 %v8872_v0, 0.0  ;;  %v10394_v47 = vrot.slane %v8801_v57, 7  ;;  %v10414_v46 = vld [vmem:[#allocation67_spill] sm:$0xff] }
 0x3fe   :  { %10391 = vst [vmem:[#allocation92_spill] sm:$0xff] %v9021_v16  ;;  %v10395_v58 = vrot.slane %v8874_v45, 7  ;;  %v10396_v53 = vrot.slane %v8874_v45, 1  ;;  %v10397_v22 = vrot.slane %v8801_v57, 1  ;;  %v9056_v48 = vmul.f32 %v6579_v19, %v9012_v37 }
 0x3ff   :  { %10392 = vst [vmem:[#allocation81_spill] sm:$0xff] %v9029_v18  ;;  %v3578_v11 = vmax.f32 %v3514_v36, 0.0  ;;  %v3580_v29 = vmax.f32 %v3516_v34, 0.0  ;;  %v10401_v34 = vmov %v10394_v47  ;;  %v9074_v51 = vmul.f32 %v6581_v4, %v9012_v37  ;;  %v10411_v18 = vld [vmem:[#allocation74_spill] sm:$0xff]  ;;  %v10418_v37 = vld [vmem:[#allocation64_spill] sm:$0xff] }
 0x400   :  { %10393 = vst [vmem:[#allocation89_spill] sm:$0xff] %v9033_v27  ;;  %v2168_v31 = vsel %vm652_vm0, %v10395_v58, %v10394_v47  ;;  %v9049_v5 = vsel %vm717_vm1, %v10397_v22, %v10396_v53  ;;  %v9051_v0 = vpop.eup %4898  ;;  %v10400_v36 = vmov %v10395_v58  ;;  %v10403_v58 = vmov %v10397_v22 }
 0x401   :  { %10398 = vst [vmem:[#allocation66_spill] sm:$0xff] %v9051_v0  ;;  %v9064_v47 = vsel %vm652_vm0, %v10401_v34, %v10400_v36  ;;  %v2296_v22 = vsel %vm717_vm1, %v10396_v53, %v10403_v58  ;;  %v3642_v17 = vmin.f32 %v3578_v11, 6.0  ;;  %v3644_v43 = vmin.f32 %v3580_v29, 6.0 }
 0x402   :  { %10399 = vst [vmem:[#allocation70_spill] sm:$0xff] %v9056_v48  ;;  %v3938_v13 = vadd.f32 %v3937_v6, %v3848_v60  ;;  %v9078_v3 = vmin.f32 %v1973_v2, 6.0  ;;  %v9083_v36 = vsel %vm750_vm2, %v9049_v5, %v2168_v31  ;;  %v2481_v34 = vmul.f32 %v10039_v42, %v10360_v35  ;;  %v10406_v2 = vld [vmem:[#allocation101_spill] sm:$0xff]  ;;  %v10407_v6 = vld [vmem:[#allocation58_spill] sm:$0xff]  ;;  %v9098_v29 = vpop.eup %4900  ;;  %v10409_v31 = vld [vmem:[#allocation80_spill] sm:$0xff] }
 0x403   :  { %10402 = vst [vmem:[#allocation90_spill] sm:$0xff] %v9064_v47  ;;  %v2483_v58 = vmul.f32 %v10039_v42, %v10365_v21  ;;  %v3684_v53 = vpack.c.bf16 %v3644_v43, %v3642_v17  ;;  %v9092_v60 = vsel %vm789_vm3, %v9064_v47, %v2296_v22  ;;  %v2675_v61 = vmul.f32 %v10231_v49, %v8684_v7  ;;  %v10410_v35 = vld [vmem:[#allocation44_spill] sm:$0xff]  ;;  %v10412_v43 = vld [vmem:[#allocation59_spill] sm:$0xff]  ;;  %v10413_v22 = vld [vmem:[#allocation97_spill] sm:$0xff] }
 0x404   :  { %10404 = vst [vmem:[#allocation94_spill] sm:$0xff] %v9074_v51  ;;  %v2804_v11 = vmul.f32 %v10407_v6, %v10406_v2  ;;  %v2607_v0 = vadd.f32 %v10409_v31, %v2481_v34  ;;  %v2806_v21 = vmul.f32 %v10407_v6, %v10411_v18  ;;  %v3008_v17 = vmul.f32 %v10412_v43, %v8845_v56  ;;  %v10415_v31 = vld [vmem:[#allocation87_spill] sm:$0xff] }
 0x405   :  { %10405 = vst [vmem:[#allocation102_spill] sm:$0xff] %v9083_v36  ;;  %v2609_v48 = vadd.f32 %v10410_v35, %v2483_v58  ;;  %3885 = vmatmul.bf16.gmra.mxu1 %v3684_v53  ;;  %v3010_v7 = vmul.f32 %v10412_v43, %v8888_v1  ;;  %v3143_v27 = vmul.f32 %v10414_v46, %v9083_v36  ;;  %v1972_v58 = vmax.f32 %v10415_v31, 0.0  ;;  %v10416_v35 = vld [vmem:[#allocation83_spill] sm:$0xff]  ;;  %v10419_v36 = vld [vmem:[#allocation72_spill] sm:$0xff] }
 0x406   :  { %10408 = vst [vmem:[#allocation101_spill] sm:$0xff] %v9098_v29  ;;  %v2938_v51 = vadd.f32 %v10413_v22, %v2804_v11  ;;  %v3145_v34 = vmul.f32 %v10414_v46, %v9064_v47  ;;  %v2673_v29 = vmul.f32 %v10231_v49, %v10416_v35  ;;  %v2940_v16 = vadd.f32 %v10417_v52, %v2806_v21  ;;  %v9119_v11 = vpop.f32.mrf.mxu3 }
 0x407   :  { %v3209_v55 = vmul.f32 %v10418_v37, %v8801_v57  ;;  %4191 = vmatmul.bf16.gmra.mxu3 %v3684_v53  ;;  %v1975_v22 = vmax.f32 %v9003_v14, 0.0  ;;  %v3211_v56 = vmul.f32 %v10418_v37, %v8874_v45  ;;  %v3337_v31 = vmul.f32 %v6645_v33, %v9092_v60 }
 0x408   :  { %v3072_v43 = vadd.f32 %v3008_v17, %v2938_v51  ;;  %v2733_v46 = vadd.f32 %v2673_v29, %v2607_v0  ;;  %v3074_v47 = vadd.f32 %v3010_v7, %v2940_v16  ;;  %v3335_v52 = vmul.f32 %v6645_v33, %v9049_v5 }
 0x409   :  { %v3269_v35 = vadd.f32 %v3209_v55, %v3143_v27  ;;  %v2106_v57 = vrot.slane %v9078_v3, 7  ;;  %v4320_v21 = vmul.f32 1.442695, %v3938_v13  ;;  %v2735_v6 = vadd.f32 %v2675_v61, %v2609_v48 }
 0x40a   :  { %v3271_v53 = vadd.f32 %v3211_v56, %v3145_v34  ;;  %v3455_v17 = vadd.f32 %v3072_v43, %v2733_v46  ;;  %v10420_v45 = vrot.slane %v10419_v36, 7  ;;  %v10421_v49 = vrot.slane %v8964_v25, 7 }
 0x40b   :  { %v3395_v51 = vadd.f32 %v3335_v52, %v3269_v35  ;;  %v3457_v27 = vadd.f32 %v3074_v47, %v2735_v6  ;;  %v10422_v0 = vrot.slane %v8964_v25, 1  ;;  %v10423_v29 = vrot.slane %v10419_v36, 1 }
 0x40c   :  { %v2167_v16 = vsel %vm652_vm0, %v10421_v49, %v10420_v45  ;;  %v3397_v55 = vadd.f32 %v3337_v31, %v3271_v53  ;;  %v2480_v46 = vmul.f32 %v10053_v12, %v8766_v24  ;;  %v9148_v13 = vmul.f32 %v6575_v30, %v9078_v3 }
 0x40d   :  { %v9142_v56 = vsel %vm717_vm1, %v10423_v29, %v10422_v0  ;;  %v3519_v48 = vadd.f32 %v3455_v17, %v3395_v51  ;;  %v10425_v47 = vmov %v10420_v45  ;;  %v10426_v6 = vmov %v10423_v29 }
 0x40e   :  { %10424 = vst [vmem:[#allocation80_spill] sm:$0xff] %v9148_v13  ;;  %v9156_v61 = vsel %vm652_vm0, %v10425_v47, %v10421_v49  ;;  %v10427_v43 = vmov %v10422_v0  ;;  %v9166_v30 = vmul.f32 %v6577_v63, %v9078_v3  ;;  %v9168_v7 = vmin.f32 %v1972_v58, 6.0 }
 0x40f   :  { %v2295_v24 = vsel %vm717_vm1, %v10427_v43, %v10426_v6  ;;  %v9170_v34 = vmin.f32 %v1975_v22, 6.0  ;;  %v3521_v31 = vadd.f32 %v3457_v27, %v3397_v55  ;;  %v3583_v35 = vmax.f32 %v3519_v48, 0.0  ;;  %v10429_v22 = vld [vmem:[#allocation61_spill] sm:$0xff]  ;;  %v10430_v27 = vld [vmem:[#allocation71_spill] sm:$0xff]  ;;  %v10432_v43 = vld [vmem:[#allocation82_spill] sm:$0xff] }
 0x410   :  { %10428 = vst [vmem:[#allocation44_spill] sm:$0xff] %v9166_v30  ;;  %v1974_v52 = vmax.f32 %v9024_v38, 0.0  ;;  %v9176_v53 = vsel %vm750_vm2, %v9142_v56, %v2167_v16  ;;  %v2482_v51 = vmul.f32 %v10053_v12, %v8748_v50  ;;  %v9183_v58 = vsel %vm789_vm3, %v9156_v61, %v2295_v24  ;;  %v10431_v48 = vld [vmem:[#allocation75_spill] sm:$0xff] }
 0x411   :  { %v3585_v17 = vmax.f32 %v3521_v31, 0.0  ;;  %v2606_v45 = vadd.f32 %v10429_v22, %v2480_v46  ;;  %v2803_v55 = vmul.f32 %v10061_v59, %v8970_v54  ;;  %v3647_v38 = vmin.f32 %v3583_v35, 6.0 }
 0x412   :  { %v2608_v0 = vadd.f32 %v10430_v27, %v2482_v51  ;;  %v2674_v16 = vmul.f32 %v10133_v40, %v8773_v10  ;;  %v2805_v50 = vmul.f32 %v10061_v59, %v8952_v26  ;;  %v3007_v47 = vmul.f32 %v10134_v41, %v8938_v39 }
 0x413   :  { %v3649_v29 = vmin.f32 %v3585_v17, 6.0  ;;  %v2937_v49 = vadd.f32 %v10431_v48, %v2803_v55  ;;  %v3009_v46 = vmul.f32 %v10134_v41, %v8977_v28  ;;  %v2672_v6 = vmul.f32 %v10133_v40, %v8734_v20  ;;  %v9209_v55 = vpop.f32.mrf.mxu0 }
 0x414   :  { %v2939_v24 = vadd.f32 %v10432_v43, %v2805_v50  ;;  %v3142_v10 = vmul.f32 %v10105_v32, %v9176_v53  ;;  %v3144_v31 = vmul.f32 %v10105_v32, %v9156_v61  ;;  %v3208_v17 = vmul.f32 %v10069_v62, %v10419_v36  ;;  %v9216_v36 = vpop.f32.mrf.mxu3 }
 0x415   :  { %v3687_v35 = vpack.c.bf16 %v3649_v29, %v3647_v38  ;;  %v3071_v51 = vadd.f32 %v3007_v47, %v2937_v49  ;;  %v3210_v22 = vmul.f32 %v10069_v62, %v8964_v25  ;;  %v2732_v27 = vadd.f32 %v2672_v6, %v2606_v45  ;;  %v3851_v47 = vpop.f32.mrf.mxu1 }
 0x416   :  { %v3073_v20 = vadd.f32 %v3009_v46, %v2939_v24  ;;  %v3336_v50 = vmul.f32 %v6675_v44, %v9183_v58  ;;  %v1977_v48 = vmax.f32 %v9076_v8, 0.0  ;;  %v2734_v43 = vadd.f32 %v2674_v16, %v2608_v0  ;;  %v3940_v46 = vpop.f32.mrf.mxu2 }
 0x417   :  { %3979 = vmatmul.bf16.gmra.mxu2 %v3687_v35  ;;  %v3268_v14 = vadd.f32 %v3208_v17, %v3142_v10  ;;  %v3270_v38 = vadd.f32 %v3210_v22, %v3144_v31  ;;  %v3334_v29 = vmul.f32 %v6675_v44, %v9142_v56  ;;  %4902 = vpow2.f32 %v4320_v21 }
 0x418   :  { %v9220_v49 = vmin.f32 %v1974_v52, 6.0  ;;  %v3454_v24 = vadd.f32 %v3071_v51, %v2732_v27  ;;  %v3456_v0 = vadd.f32 %v3073_v20, %v2734_v43  ;;  %v9224_v16 = vmul.f32 %v6579_v19, %v9168_v7 }
 0x419   :  { %v3394_v6 = vadd.f32 %v3334_v29, %v3268_v14  ;;  %v3396_v8 = vadd.f32 %v3336_v50, %v3270_v38  ;;  %v9228_v10 = vmul.f32 %v6581_v4, %v9168_v7  ;;  %v9231_v31 = vmin.f32 %v1977_v48, 6.0 }
 0x41a   :  { %10433 = vst [vmem:[#allocation74_spill] sm:$0xff] %v9224_v16  ;;  %v9236_v14 = vmul.f32 %v6577_v63, %v9170_v34  ;;  %v9240_v19 = vmul.f32 %v10418_v37, %v9170_v34  ;;  %v9242_v22 = vadd.f32 %v3940_v46, %v3851_v47  ;;  %v1976_v20 = vmax.f32 %v9119_v11, 0.0  ;;  %v10453_v16 = vld [vmem:[#allocation91_spill] sm:$0xff] }
 0x41b   :  { %10434 = vst [vmem:[#allocation97_spill] sm:$0xff] %v9228_v10  ;;  %v3518_v51 = vadd.f32 %v3454_v24, %v3394_v6  ;;  %v3520_v17 = vadd.f32 %v3456_v0, %v3396_v8  ;;  %v10438_v43 = vrot.slane %v9005_v15, 7  ;;  %v10439_v29 = vrot.slane %v9078_v3, 1  ;;  %v9283_v52 = vpop.f32.mrf.mxu0  ;;  %4285 = vmatmul.bf16.gmra.mxu0 %v3687_v35  ;;  %v10449_v24 = vld [vmem:[#allocation102_spill] sm:$0xff] }
 0x41c   :  { %10435 = vst [vmem:[#allocation87_spill] sm:$0xff] %v9236_v14  ;;  %v10440_v6 = vrot.slane %v9005_v15, 1  ;;  %v9265_v8 = vmul.f32 %v10069_v62, %v9220_v49  ;;  %v9287_v45 = vmul.f32 %v6577_v63, %v9231_v31  ;;  %v2487_v35 = vmul.f32 %v10039_v42, %v10411_v18  ;;  %v10447_v63 = vld [vmem:[#allocation60_spill] sm:$0xff]  ;;  %v10454_v14 = vld [vmem:[#allocation59_spill] sm:$0xff] }
 0x41d   :  { %10436 = vst [vmem:[#allocation83_spill] sm:$0xff] %v9240_v19  ;;  %v3582_v50 = vmax.f32 %v3518_v51, 0.0  ;;  %v3584_v48 = vmax.f32 %v3520_v17, 0.0  ;;  %v2170_v38 = vsel %vm652_vm0, %v2106_v57, %v10438_v43  ;;  %v9260_v46 = vpop.eup %4902  ;;  %v10443_v0 = vmov %v10438_v43  ;;  %v10452_v18 = vld [vmem:[#allocation40_spill] sm:$0xff] }
 0x41e   :  { %10437 = vst [vmem:[#allocation84_spill] sm:$0xff] %v9242_v22  ;;  %v9258_v47 = vsel %vm717_vm1, %v10440_v6, %v10439_v29  ;;  %v9274_v51 = vsel %vm652_vm0, %v10443_v0, %v2106_v57  ;;  %v10444_v11 = vmov %v10439_v29  ;;  %v9291_v57 = vmul.f32 %v10418_v37, %v9231_v31  ;;  %v9306_v29 = vpop.f32.mrf.mxu3 }
 0x41f   :  { %10441 = vst [vmem:[#allocation64_spill] sm:$0xff] %v9260_v46  ;;  %v3646_v17 = vmin.f32 %v3582_v50, 6.0  ;;  %v3648_v43 = vmin.f32 %v3584_v48, 6.0  ;;  %v2298_v27 = vsel %vm717_vm1, %v10444_v11, %v10440_v6  ;;  %v9296_v50 = vsel %vm750_vm2, %v9258_v47, %v2170_v38  ;;  %v10448_v38 = vld [vmem:[#allocation57_spill] sm:$0xff] }
 0x420   :  { %10442 = vst [vmem:[#allocation72_spill] sm:$0xff] %v9265_v8  ;;  %v2485_v48 = vmul.f32 %v10039_v42, %v10406_v2  ;;  %v9300_v0 = vmin.f32 %v1976_v20, 6.0  ;;  %v2679_v6 = vmul.f32 %v10447_v63, %v8888_v1  ;;  %v9311_v25 = vsel %vm789_vm3, %v9274_v51, %v2298_v27  ;;  %v10450_v2 = vld [vmem:[#allocation58_spill] sm:$0xff]  ;;  %v10455_v27 = vld [vmem:[#allocation67_spill] sm:$0xff] }
 0x421   :  { %10445 = vst [vmem:[#allocation61_spill] sm:$0xff] %v9287_v45  ;;  %v3686_v11 = vpack.c.bf16 %v3648_v43, %v3646_v17  ;;  %v2808_v17 = vmul.f32 %v10450_v2, %v10449_v24  ;;  %v10451_v20 = vld [vmem:[#allocation90_spill] sm:$0xff]  ;;  %v2613_v46 = vadd.f32 %v10452_v18, %v2487_v35  ;;  %v2677_v1 = vmul.f32 %v10447_v63, %v10453_v16 }
 0x422   :  { %10446 = vst [vmem:[#allocation71_spill] sm:$0xff] %v9291_v57  ;;  %v2611_v21 = vadd.f32 %v10448_v38, %v2485_v48  ;;  %v2810_v43 = vmul.f32 %v10450_v2, %v10451_v20  ;;  %v3014_v13 = vmul.f32 %v10454_v14, %v9092_v60  ;;  %v3147_v4 = vmul.f32 %v10455_v27, %v9296_v50  ;;  %v10456_v45 = vld [vmem:[#allocation78_spill] sm:$0xff]  ;;  %v10457_v38 = vld [vmem:[#allocation93_spill] sm:$0xff] }
 0x423   :  { %3890 = vmatmul.bf16.gmra.mxu1 %v3686_v11  ;;  %v2942_v48 = vadd.f32 %v10456_v45, %v2808_v17  ;;  %v3012_v10 = vmul.f32 %v10454_v14, %v9049_v5  ;;  %v3149_v22 = vmul.f32 %v10455_v27, %v9274_v51  ;;  %4196 = vmatmul.bf16.gmra.mxu3 %v3686_v11  ;;  %v10459_v11 = vld [vmem:[#allocation73_spill] sm:$0xff] }
 0x424   :  { %v2944_v8 = vadd.f32 %v10457_v38, %v2810_v43  ;;  %v2737_v35 = vadd.f32 %v2677_v1, %v2611_v21  ;;  %v2739_v18 = vadd.f32 %v2679_v6, %v2613_v46  ;;  %v3213_v16 = vmul.f32 %v10418_v37, %v9005_v15  ;;  %v10458_v46 = vld [vmem:[#allocation45_spill] sm:$0xff] }
 0x425   :  { %v3215_v57 = vmul.f32 %v10418_v37, %v9078_v3  ;;  %v3076_v19 = vadd.f32 %v3012_v10, %v2942_v48  ;;  %v3339_v45 = vmul.f32 %v6645_v33, %v9258_v47  ;;  %v3341_v17 = vmul.f32 %v6645_v33, %v9311_v25 }
 0x426   :  { %v3078_v30 = vadd.f32 %v3014_v13, %v2944_v8  ;;  %v3273_v43 = vadd.f32 %v3213_v16, %v3147_v4  ;;  %v4227_v21 = vadd.f32 %v9209_v55, %v9216_v36  ;;  %v4370_v6 = vmul.f32 %v10459_v11, %v10458_v46  ;;  %v10463_v4 = vld [vmem:[#allocation77_spill] sm:$0xff]  ;;  %v9386_v46 = vpop.f32.mrf.mxu0 }
 0x427   :  { %v3275_v38 = vadd.f32 %v3215_v57, %v3149_v22  ;;  %v10460_v15 = vrot.slane %v9231_v31, 7  ;;  %v10461_v3 = vrot.slane %v9170_v34, 7  ;;  %v3459_v13 = vadd.f32 %v3076_v19, %v2737_v35 }
 0x428   :  { %v3461_v10 = vadd.f32 %v3078_v30, %v2739_v18  ;;  %v10462_v8 = vrot.slane %v9168_v7, 7  ;;  %v10464_v22 = vrot.slane %v10463_v4, 7  ;;  %v9359_v36 = vadd.f32 %v3339_v45, %v3273_v43 }
 0x429   :  { %v9349_v37 = vsel %vm652_vm0, %v10461_v3, %v10460_v15  ;;  %v9361_v57 = vadd.f32 %v3341_v17, %v3275_v38  ;;  %v4402_v1 = vadd.f32 %v4370_v6, %v4227_v21  ;;  %v2107_v19 = vrot.slane %v9300_v0, 7 }
 0x42a   :  { %v9357_v55 = vsel %vm652_vm0, %v10464_v22, %v10462_v8  ;;  %10465 = vst [vmem:[#allocation75_spill] sm:$0xff] %v9359_v36  ;;  %v10467_v48 = vmov %v10464_v22  ;;  %v10468_v16 = vmov %v10462_v8  ;;  %v10469_v35 = vrot.slane %v9168_v7, 1  ;;  %v9400_v8 = vpop.f32.mrf.mxu3  ;;  %v10473_v22 = vld [vmem:[#allocation86_spill] sm:$0xff] }
 0x42b   :  { %10466 = vst [vmem:[#allocation82_spill] sm:$0xff] %v9361_v57  ;;  %v2169_v30 = vsel %vm652_vm0, %v10468_v16, %v10467_v48  ;;  %v10470_v18 = vrot.slane %v10463_v4, 1  ;;  %v2484_v21 = vmul.f32 %v10053_v12, %v8970_v54  ;;  %v3523_v11 = vadd.f32 %v3459_v13, %v9359_v36  ;;  %v10477_v36 = vld [vmem:[#allocation92_spill] sm:$0xff] }
 0x42c   :  { %v10472_v43 = vmov %v10469_v35  ;;  %v3525_v6 = vadd.f32 %v3461_v10, %v9361_v57  ;;  %4434 = vst [vmem:[#allocation17] sm:$0xff] %v4402_v1  ;;  %v2486_v54 = vmul.f32 %v10053_v12, %v8952_v26  ;;  %v2676_v10 = vmul.f32 %v10133_v40, %v8938_v39 }
 0x42d   :  { %v9376_v45 = vsel %vm717_vm1, %v10470_v18, %v10469_v35  ;;  %v10471_v17 = vmov %v10470_v18  ;;  %v2610_v13 = vadd.f32 %v10473_v22, %v2484_v21  ;;  %v2678_v1 = vmul.f32 %v10133_v40, %v8977_v28  ;;  %v9413_v18 = vpop.f32.mrf.mxu2  ;;  %v9420_v28 = vpop.f32.mrf.mxu1 }
 0x42e   :  { %v2297_v38 = vsel %vm717_vm1, %v10472_v43, %v10471_v17  ;;  %v9393_v15 = vsel %vm750_vm2, %v9376_v45, %v2169_v30  ;;  %v3587_v48 = vmax.f32 %v3523_v11, 0.0  ;;  %v3589_v16 = vmax.f32 %v3525_v6, 0.0  ;;  %10474 = vst [vmem:[#allocation60_spill] sm:$0xff] %v9413_v18  ;;  %v10475_v17 = vld [vmem:[#allocation96_spill] sm:$0xff] }
 0x42f   :  { %v9398_v3 = vsel %vm789_vm3, %v9357_v55, %v2297_v38  ;;  %v2807_v30 = vmul.f32 %v10061_v59, %v9176_v53  ;;  %v2809_v35 = vmul.f32 %v10061_v59, %v9156_v61  ;;  %v2612_v26 = vadd.f32 %v10475_v17, %v2486_v54  ;;  %v10476_v6 = vld [vmem:[#allocation100_spill] sm:$0xff] }
 0x430   :  { %v2736_v43 = vadd.f32 %v2676_v10, %v2610_v13  ;;  %v3011_v38 = vmul.f32 %v10134_v41, %v9142_v56  ;;  %v3013_v39 = vmul.f32 %v10134_v41, %v9183_v58  ;;  %v3651_v21 = vmin.f32 %v3587_v48, 6.0 }
 0x431   :  { %v3653_v11 = vmin.f32 %v3589_v16, 6.0  ;;  %v2941_v22 = vadd.f32 %v10476_v6, %v2807_v30  ;;  %v2943_v57 = vadd.f32 %v10477_v36, %v2809_v35  ;;  %v2738_v59 = vadd.f32 %v2678_v1, %v2612_v26  ;;  %v10482_v6 = vld [vmem:[#allocation65_spill] sm:$0xff] }
 0x432   :  { %v3146_v18 = vmul.f32 %v10105_v32, %v9393_v15  ;;  %v3148_v54 = vmul.f32 %v10105_v32, %v9357_v55  ;;  %v3212_v13 = vmul.f32 %v10069_v62, %v10463_v4  ;;  %v3214_v48 = vmul.f32 %v10069_v62, %v9168_v7 }
 0x433   :  { %v3689_v10 = vpack.c.bf16 %v3653_v11, %v3651_v21  ;;  %v3075_v17 = vadd.f32 %v3011_v38, %v2941_v22  ;;  %v3077_v41 = vadd.f32 %v3013_v39, %v2943_v57  ;;  %v10478_v16 = vrot.slane %v9170_v34, 7  ;;  %v10481_v11 = vld [vmem:[#allocation46_spill] sm:$0xff] }
 0x434   :  { %v10479_v36 = vrot.slane %v9231_v31, 7  ;;  %v3272_v30 = vadd.f32 %v3212_v13, %v3146_v18  ;;  %v3338_v35 = vmul.f32 %v6675_v44, %v9376_v45  ;;  %v3340_v4 = vmul.f32 %v6675_v44, %v9398_v3 }
 0x435   :  { %3984 = vmatmul.bf16.gmra.mxu2 %v3689_v10  ;;  %v3274_v26 = vadd.f32 %v3214_v48, %v3148_v54  ;;  %v3458_v57 = vadd.f32 %v3075_v17, %v2736_v43  ;;  %v3460_v38 = vadd.f32 %v3077_v41, %v2738_v59  ;;  %v4229_v7 = vadd.f32 %v9283_v52, %v9306_v29  ;;  %v9457_v43 = vpop.f32.mrf.mxu0 }
 0x436   :  { %v2172_v1 = vsel %vm652_vm0, %v10479_v36, %v10478_v16  ;;  %v2235_v39 = vrot.slane %v9300_v0, 1  ;;  %v9445_v21 = vadd.f32 %v3338_v35, %v3272_v30  ;;  %v4371_v18 = vmul.f32 %v10482_v6, %v10481_v11  ;;  %4290 = vmatmul.bf16.gmra.mxu0 %v3689_v10  ;;  %v9475_v36 = vpop.f32.mrf.mxu3  ;;  %v10489_v11 = vld [vmem:[#allocation85_spill] sm:$0xff]  ;;  %v9496_v6 = vpop.f32.mrf.mxu2 }
 0x437   :  { %v10483_v22 = vrot.slane %v9231_v31, 1  ;;  %v10484_v13 = vrot.slane %v9170_v34, 1  ;;  %v10485_v59 = vrot.slane %v9220_v49, 7  ;;  %v9465_v52 = vadd.f32 %v3340_v4, %v3274_v26  ;;  %10490 = vst [vmem:[#allocation102_spill] sm:$0xff] %v9496_v6 }
 0x438   :  { %10480 = vst [vmem:[#allocation57_spill] sm:$0xff] %v9445_v21  ;;  %v2489_v48 = vmul.f32 %v10039_v42, %v10449_v24  ;;  %v3522_v35 = vadd.f32 %v3458_v57, %v9445_v21  ;;  %v4403_v4 = vadd.f32 %v4371_v18, %v4229_v7  ;;  %v2491_v26 = vmul.f32 %v10039_v42, %v10451_v20  ;;  %v9504_v18 = vpop.f32.mrf.mxu1 }
 0x439   :  { %v9455_v16 = vsel %vm717_vm1, %v10484_v13, %v10483_v22  ;;  %v9463_v41 = vsel %vm652_vm0, %v10485_v59, %v2107_v19  ;;  %v10486_v29 = vmov %v10484_v13  ;;  %v10487_v54 = vmov %v10483_v22  ;;  %10491 = vst [vmem:[#allocation58_spill] sm:$0xff] %v9504_v18  ;;  %v10492_v13 = vld [vmem:[#allocation95_spill] sm:$0xff] }
 0x43a   :  { %v2300_v17 = vsel %vm717_vm1, %v10487_v54, %v10486_v29  ;;  %v10488_v10 = vmov %v10485_v59  ;;  %v9485_v34 = vsel %vm750_vm2, %v9455_v16, %v2172_v1  ;;  %v3524_v31 = vadd.f32 %v3460_v38, %v9465_v52  ;;  %4435 = vst [vmem:[#allocation17 + $0x8] sm:$0xff] %v4403_v4  ;;  %v10496_v18 = vld [vmem:[#allocation71_spill] sm:$0xff] }
 0x43b   :  { %v2171_v30 = vsel %vm652_vm0, %v2107_v19, %v10488_v10  ;;  %v9491_v24 = vsel %vm789_vm3, %v9349_v37, %v2300_v17  ;;  %v2615_v19 = vadd.f32 %v10489_v11, %v2489_v48  ;;  %v3586_v57 = vmax.f32 %v3522_v35, 0.0  ;;  %v10493_v17 = vld [vmem:[#allocation89_spill] sm:$0xff]  ;;  %v10494_v48 = vld [vmem:[#allocation44_spill] sm:$0xff] }
 0x43c   :  { %v2683_v1 = vmul.f32 %v10447_v63, %v9092_v60  ;;  %v2812_v38 = vmul.f32 %v10450_v2, %v9296_v50  ;;  %v2814_v7 = vmul.f32 %v10450_v2, %v9274_v51  ;;  %v3588_v22 = vmax.f32 %v3524_v31, 0.0 }
 0x43d   :  { %v2617_v20 = vadd.f32 %v10492_v13, %v2491_v26  ;;  %v2681_v59 = vmul.f32 %v10447_v63, %v9049_v5  ;;  %v3016_v29 = vmul.f32 %v10454_v14, %v9258_v47  ;;  %v3650_v54 = vmin.f32 %v3586_v57, 6.0 }
 0x43e   :  { %v2946_v60 = vadd.f32 %v10493_v17, %v2812_v38  ;;  %v2948_v10 = vadd.f32 %v10494_v48, %v2814_v7  ;;  %v3018_v35 = vmul.f32 %v10454_v14, %v9311_v25  ;;  %v3652_v4 = vmin.f32 %v3588_v22, 6.0  ;;  %v9521_v38 = vpop.f32.mrf.mxu0  ;;  %v10495_v17 = vld [vmem:[#allocation83_spill] sm:$0xff] }
 0x43f   :  { %v2741_v11 = vadd.f32 %v2681_v59, %v2615_v19  ;;  %v3151_v31 = vmul.f32 %v10455_v27, %v9485_v34  ;;  %v3153_v26 = vmul.f32 %v10455_v27, %v9349_v37  ;;  %v2743_v5 = vadd.f32 %v2683_v1, %v2617_v20  ;;  %v10497_v1 = vld [vmem:[#allocation47_spill] sm:$0xff] }
 0x440   :  { %v3080_v13 = vadd.f32 %v3016_v29, %v2946_v60  ;;  %v3082_v6 = vadd.f32 %v3018_v35, %v2948_v10  ;;  %v3345_v57 = vmul.f32 %v6645_v33, %v9491_v24  ;;  %v3688_v7 = vpack.c.bf16 %v3652_v4, %v3650_v54  ;;  %v10498_v20 = vld [vmem:[#allocation99_spill] sm:$0xff]  ;;  %v9531_v60 = vpop.f32.mrf.mxu3  ;;  %v10499_v10 = vld [vmem:[#allocation84_spill] sm:$0xff] }
 0x441   :  { %v3277_v48 = vadd.f32 %v10495_v17, %v3151_v31  ;;  %v3279_v22 = vadd.f32 %v10496_v18, %v3153_v26  ;;  %v3343_v19 = vmul.f32 %v6645_v33, %v9455_v16  ;;  %v4232_v27 = vadd.f32 %v9386_v46, %v9400_v8  ;;  %v9567_v17 = vpop.f32.mrf.mxu1 }
 0x442   :  { %v3463_v59 = vadd.f32 %v3080_v13, %v2741_v11  ;;  %v3465_v21 = vadd.f32 %v3082_v6, %v2743_v5  ;;  %v4372_v29 = vmul.f32 %v10498_v20, %v10497_v1  ;;  %v4322_v35 = vmul.f32 1.442695, %v10499_v10  ;;  %3895 = vmatmul.bf16.gmra.mxu1 %v3688_v7  ;;  %4201 = vmatmul.bf16.gmra.mxu3 %v3688_v7  ;;  %v10502_v7 = vld [vmem:[#allocation68_spill] sm:$0xff] }
 0x443   :  { %v3403_v54 = vadd.f32 %v3343_v19, %v3277_v48  ;;  %v3405_v4 = vadd.f32 %v3345_v57, %v3279_v22  ;;  %v10500_v18 = vrot.slane %v9220_v49, 1  ;;  %v2818_v46 = vmul.f32 %v10450_v2, %v9349_v37  ;;  %v9555_v37 = vpop.f32.mrf.mxu2  ;;  %v10503_v48 = vld [vmem:[#allocation62_spill] sm:$0xff]  ;;  %v10504_v19 = vld [vmem:[#allocation43_spill] sm:$0xff] }
 0x444   :  { %v4404_v8 = vadd.f32 %v4372_v29, %v4232_v27  ;;  %v2488_v31 = vmul.f32 %v10053_v12, %v9176_v53  ;;  %v3218_v26 = vmul.f32 %v10069_v62, %v9300_v0  ;;  %v2490_v53 = vmul.f32 %v10053_v12, %v9156_v61  ;;  %v10505_v27 = vld [vmem:[#allocation63_spill] sm:$0xff] }
 0x445   :  { %v9538_v33 = vsel %vm717_vm1, %v10500_v18, %v2235_v39  ;;  %v10501_v6 = vmov %v10500_v18  ;;  %v3527_v5 = vadd.f32 %v3463_v59, %v3403_v54  ;;  %v3529_v13 = vadd.f32 %v3465_v21, %v3405_v4  ;;  %v10506_v54 = vld [vmem:[#allocation94_spill] sm:$0xff]  ;;  %v10507_v18 = vld [vmem:[#allocation97_spill] sm:$0xff] }
 0x446   :  { %v2299_v11 = vsel %vm717_vm1, %v2235_v39, %v10501_v6  ;;  %v9553_v57 = vsel %vm750_vm2, %v9538_v33, %v2171_v30  ;;  %4436 = vst [vmem:[#allocation17 + $0x10] sm:$0xff] %v4404_v8  ;;  %v2614_v62 = vadd.f32 %v10502_v7, %v2488_v31  ;;  %v2682_v21 = vmul.f32 %v10133_v40, %v9183_v58  ;;  %v9580_v20 = vpop.f32.mrf.mxu0 }
 0x447   :  { %v9560_v39 = vsel %vm789_vm3, %v9463_v41, %v2299_v11  ;;  %v3591_v9 = vmax.f32 %v3527_v5, 0.0  ;;  %v3593_v30 = vmax.f32 %v3529_v13, 0.0  ;;  %v2811_v22 = vmul.f32 %v10503_v48, %v9393_v15 }
 0x448   :  { %v2813_v23 = vmul.f32 %v10503_v48, %v9357_v55  ;;  %v2616_v59 = vadd.f32 %v10504_v19, %v2490_v53  ;;  %v2680_v61 = vmul.f32 %v10133_v40, %v9142_v56  ;;  %v3015_v1 = vmul.f32 %v10505_v27, %v9376_v45  ;;  %v9588_v5 = vpop.f32.mrf.mxu3 }
 0x449   :  { %v3017_v58 = vmul.f32 %v10505_v27, %v9398_v3  ;;  %v3655_v29 = vmin.f32 %v3591_v9, 6.0  ;;  %v3657_v10 = vmin.f32 %v3593_v30, 6.0  ;;  %v2945_v4 = vadd.f32 %v10506_v54, %v2811_v22  ;;  %v10508_v30 = vld [vmem:[#allocation72_spill] sm:$0xff] }
 0x44a   :  { %v2947_v8 = vadd.f32 %v10507_v18, %v2813_v23  ;;  %v2740_v6 = vadd.f32 %v2680_v61, %v2614_v62  ;;  %v2742_v11 = vadd.f32 %v2682_v21, %v2616_v59  ;;  %v3150_v31 = vmul.f32 %v10105_v32, %v9553_v57  ;;  %v10509_v59 = vld [vmem:[#allocation48_spill] sm:$0xff] }
 0x44b   :  { %v3152_v56 = vmul.f32 %v10105_v32, %v9463_v41  ;;  %v3691_v13 = vpack.c.bf16 %v3657_v10, %v3655_v29  ;;  %v3079_v53 = vadd.f32 %v3015_v1, %v2945_v4  ;;  %v3344_v9 = vmul.f32 %v6675_v44, %v9560_v39  ;;  %v10510_v61 = vld [vmem:[#allocation88_spill] sm:$0xff] }
 0x44c   :  { %v3081_v7 = vadd.f32 %v3017_v58, %v2947_v8  ;;  %v3276_v22 = vadd.f32 %v10508_v30, %v3150_v31  ;;  %v3342_v62 = vmul.f32 %v6675_v44, %v9538_v33  ;;  %v4234_v21 = vadd.f32 %v9457_v43, %v9475_v36  ;;  %v10511_v44 = vld [vmem:[#allocation61_spill] sm:$0xff]  ;;  %v10512_v43 = vld [vmem:[#allocation56_spill] sm:$0xff]  ;;  %v9608_v8 = vpop.f32.mrf.mxu2 }
 0x44d   :  { %v3278_v19 = vadd.f32 %v3218_v26, %v3152_v56  ;;  %3989 = vmatmul.bf16.gmra.mxu2 %v3691_v13  ;;  %v3462_v23 = vadd.f32 %v3079_v53, %v2740_v6  ;;  %v4373_v29 = vmul.f32 %v10510_v61, %v10509_v59  ;;  %v2493_v1 = vmul.f32 %v10039_v42, %v9296_v50  ;;  %v10514_v31 = vld [vmem:[#allocation80_spill] sm:$0xff] }
 0x44e   :  { %v3464_v32 = vadd.f32 %v3081_v7, %v2742_v11  ;;  %4904 = vpow2.f32 %v4322_v35  ;;  %v3402_v58 = vadd.f32 %v3342_v62, %v3276_v22  ;;  %v2495_v26 = vmul.f32 %v10039_v42, %v9274_v51  ;;  %4295 = vmatmul.bf16.gmra.mxu0 %v3691_v13  ;;  %v10513_v35 = vld [vmem:[#allocation81_spill] sm:$0xff]  ;;  %v4241_v53 = vpop.f32.mrf.mxu0  ;;  %v9614_v51 = vpop.f32.mrf.mxu1 }
 0x44f   :  { %v3404_v10 = vadd.f32 %v3344_v9, %v3278_v19  ;;  %v2952_v54 = vadd.f32 %v10511_v44, %v2818_v46  ;;  %v2887_v36 = vmul.f32 %v10512_v43, %v9300_v0  ;;  %v4405_v4 = vadd.f32 %v4373_v29, %v4234_v21  ;;  %v10519_v44 = vld [vmem:[#allocation82_spill] sm:$0xff] }
 0x450   :  { %v2687_v18 = vmul.f32 %v10447_v63, %v9311_v25  ;;  %v3526_v6 = vadd.f32 %v3462_v23, %v3402_v58  ;;  %v2619_v11 = vadd.f32 %v10513_v35, %v2493_v1  ;;  %v2621_v56 = vadd.f32 %v10514_v31, %v2495_v26  ;;  %v4152_v22 = vpop.f32.mrf.mxu3  ;;  %v10518_v58 = vld [vmem:[#allocation70_spill] sm:$0xff] }
 0x451   :  { %v3528_v50 = vadd.f32 %v3464_v32, %v3404_v10  ;;  %v2817_v42 = vmul.f32 %v10503_v48, %v9463_v41  ;;  %4437 = vst [vmem:[#allocation17 + $0x18] sm:$0xff] %v4405_v4  ;;  %v2685_v0 = vmul.f32 %v10447_v63, %v9258_v47  ;;  %v2816_v25 = vmul.f32 %v10450_v2, %v9485_v34  ;;  %v10515_v41 = vld [vmem:[#allocation87_spill] sm:$0xff]  ;;  %v10516_v47 = vld [vmem:[#allocation49_spill] sm:$0xff]  ;;  %v10517_v63 = vld [vmem:[#allocation98_spill] sm:$0xff] }
 0x452   :  { %v3022_v46 = vmul.f32 %v10454_v14, %v9491_v24  ;;  %v3590_v13 = vmax.f32 %v3526_v6, 0.0  ;;  %v2747_v9 = vadd.f32 %v2687_v18, %v2621_v56  ;;  %v3020_v30 = vmul.f32 %v10454_v14, %v9455_v16  ;;  %v10520_v4 = vld [vmem:[#allocation74_spill] sm:$0xff]  ;;  %v10521_v6 = vld [vmem:[#allocation60_spill] sm:$0xff] }
 0x453   :  { %v3592_v7 = vmax.f32 %v3528_v50, 0.0  ;;  %v2950_v19 = vadd.f32 %v10515_v41, %v2816_v25  ;;  %v4237_v21 = vadd.f32 %v9521_v38, %v9531_v60  ;;  %v4374_v23 = vmul.f32 %v10517_v63, %v10516_v47  ;;  %v10525_v41 = vld [vmem:[#allocation51_spill] sm:$0xff] }
 0x454   :  { %v3086_v62 = vadd.f32 %v3022_v46, %v2952_v54  ;;  %v9629_v2 = vpop.eup %4904  ;;  %v3654_v34 = vmin.f32 %v3590_v13, 6.0  ;;  %v2745_v32 = vadd.f32 %v2685_v0, %v2619_v11  ;;  %v2492_v59 = vmul.f32 %v10053_v12, %v9393_v15 }
 0x455   :  { %v3656_v24 = vmin.f32 %v3592_v7, 6.0  ;;  %v3084_v61 = vadd.f32 %v3020_v30, %v2950_v19  ;;  %v4406_v16 = vadd.f32 %v4374_v23, %v4237_v21  ;;  %v2494_v29 = vmul.f32 %v10053_v12, %v9357_v55  ;;  %v10526_v19 = vld [vmem:[#allocation101_spill] sm:$0xff] }
 0x456   :  { %v3469_v14 = vadd.f32 %v3086_v62, %v2747_v9  ;;  %v2885_v38 = vmul.f32 %v10512_v43, %v9220_v49  ;;  %v2951_v60 = vadd.f32 %v2887_v36, %v2817_v42  ;;  %v2618_v10 = vadd.f32 %v10518_v58, %v2492_v59  ;;  %v4243_v43 = vpop.f32.mrf.mxu0  ;;  %v10522_v36 = vld [vmem:[#allocation75_spill] sm:$0xff]  ;;  %v9659_v0 = vpop.f32.mrf.mxu1  ;;  %v10529_v59 = vld [vmem:[#allocation57_spill] sm:$0xff] }
 0x457   :  { %v3690_v1 = vpack.c.bf16 %v3656_v24, %v3654_v34  ;;  %v3467_v26 = vadd.f32 %v3084_v61, %v2745_v32  ;;  %4438 = vst [vmem:[#allocation17 + $0x20] sm:$0xff] %v4406_v16  ;;  %v2620_v18 = vadd.f32 %v10520_v4, %v2494_v29  ;;  %v2686_v15 = vmul.f32 %v10133_v40, %v9398_v3  ;;  %v10527_v34 = vld [vmem:[#allocation52_spill] sm:$0xff]  ;;  %v10531_v29 = vld [vmem:[#allocation102_spill] sm:$0xff] }
 0x458   :  { %v3533_v54 = vadd.f32 %v3469_v14, %v10519_v44  ;;  %v3943_v50 = vadd.f32 %v10521_v6, %v9420_v28  ;;  %v2684_v12 = vmul.f32 %v10133_v40, %v9376_v45  ;;  %v2815_v49 = vmul.f32 %v10503_v48, %v9553_v57  ;;  %v9653_v28 = vpop.f32.mrf.mxu2  ;;  %v10523_v45 = vld [vmem:[#allocation50_spill] sm:$0xff]  ;;  %v10528_v24 = vld [vmem:[#allocation64_spill] sm:$0xff] }
 0x459   :  { %3900 = vmatmul.bf16.gmra.mxu1 %v3690_v1  ;;  %v3021_v55 = vmul.f32 %v10505_v27, %v9560_v39  ;;  %v3531_v35 = vadd.f32 %v3467_v26, %v10522_v36  ;;  %v2746_v31 = vadd.f32 %v2686_v15, %v2620_v18  ;;  %v3019_v3 = vmul.f32 %v10505_v27, %v9538_v33  ;;  %v10524_v57 = vld [vmem:[#allocation66_spill] sm:$0xff]  ;;  %v4154_v39 = vpop.f32.mrf.mxu3 }
 0x45a   :  { %v3597_v11 = vmax.f32 %v3533_v54, 0.0  ;;  %4206 = vmatmul.bf16.gmra.mxu3 %v3690_v1  ;;  %v2949_v56 = vadd.f32 %v2885_v38, %v2815_v49  ;;  %v4239_v40 = vadd.f32 %v9580_v20, %v9588_v5  ;;  %v4375_v48 = vmul.f32 %v10524_v57, %v10523_v45  ;;  %v10533_v36 = vld [vmem:[#allocation54_spill] sm:$0xff] }
 0x45b   :  { %v3085_v42 = vadd.f32 %v3021_v55, %v2951_v60  ;;  %v3595_v25 = vmax.f32 %v3531_v35, 0.0  ;;  %v2744_v13 = vadd.f32 %v2684_v12, %v2618_v10  ;;  %v4242_v27 = vadd.f32 %v4241_v53, %v4152_v22  ;;  %v10530_v22 = vld [vmem:[#allocation58_spill] sm:$0xff]  ;;  %v10532_v10 = vld [vmem:[#allocation53_spill] sm:$0xff] }
 0x45c   :  { %v3661_v46 = vmin.f32 %v3597_v11, 6.0  ;;  %v3083_v7 = vadd.f32 %v3019_v3, %v2949_v56  ;;  %v4407_v33 = vadd.f32 %v4375_v48, %v4239_v40  ;;  %v4376_v62 = vmul.f32 %v10526_v19, %v10525_v41  ;;  %v10534_v48 = vld [vmem:[#allocation55_spill] sm:$0xff] }
 0x45d   :  { %v3468_v9 = vadd.f32 %v3085_v42, %v2746_v31  ;;  %v3659_v30 = vmin.f32 %v3595_v25, 6.0  ;;  %v4324_v21 = vmul.f32 1.442695, %v3943_v50  ;;  %v4244_v5 = vadd.f32 %v4243_v43, %v4154_v39 }
 0x45e   :  { %v3466_v47 = vadd.f32 %v3083_v7, %v2744_v13  ;;  %4439 = vst [vmem:[#allocation17 + $0x28] sm:$0xff] %v4407_v33  ;;  %v4408_v23 = vadd.f32 %v4376_v62, %v4242_v27  ;;  %v4377_v32 = vmul.f32 %v10528_v24, %v10527_v34  ;;  %v4246_v16 = vpop.f32.mrf.mxu0  ;;  %v3946_v38 = vadd.f32 %v10531_v29, %v10530_v22  ;;  %v3866_v4 = vpop.f32.mrf.mxu1 }
 0x45f   :  { %v3532_v20 = vadd.f32 %v3468_v9, %v9465_v52  ;;  %v3693_v63 = vpack.c.bf16 %v3661_v46, %v3659_v30  ;;  %4906 = vpow2.f32 %v4324_v21  ;;  %v4378_v26 = vmul.f32 %v9629_v2, %v10532_v10  ;;  %v10535_v30 = vld [vmem:[#allocation24_spill] sm:$0xff] }
 0x460   :  { %v3530_v61 = vadd.f32 %v3466_v47, %v10529_v59  ;;  %4440 = vst [vmem:[#allocation17 + $0x30] sm:$0xff] %v4408_v23  ;;  %v4409_v53 = vadd.f32 %v4377_v32, %v4244_v5  ;;  %v3955_v44 = vpop.f32.mrf.mxu2  ;;  %v4326_v15 = vmul.f32 1.442695, %v3946_v38  ;;  %v3948_v49 = vadd.f32 %v9555_v37, %v9567_v17  ;;  %v10536_v23 = vld [vmem:[#allocation25_spill] sm:$0xff] }
 0x461   :  { %v3596_v14 = vmax.f32 %v3532_v20, 0.0  ;;  %3994 = vmatmul.bf16.gmra.mxu2 %v3693_v63  ;;  %4300 = vmatmul.bf16.gmra.mxu0 %v3693_v63  ;;  %v4157_v1 = vpop.f32.mrf.mxu3  ;;  %v3951_v40 = vadd.f32 %v9608_v8, %v9614_v51  ;;  %v3953_v9 = vadd.f32 %v9653_v28, %v9659_v0  ;;  %v3956_v21 = vadd.f32 %v3955_v44, %v3866_v4 }
 0x462   :  { %v3594_v52 = vmax.f32 %v3530_v61, 0.0  ;;  %4441 = vst [vmem:[#allocation17 + $0x38] sm:$0xff] %v4409_v53  ;;  %v4247_v58 = vadd.f32 %v4246_v16, %v4157_v1  ;;  %4908 = vpow2.f32 %v4326_v15  ;;  %v4328_v11 = vmul.f32 1.442695, %v3948_v49  ;;  %v10537_v16 = vld [vmem:[#allocation26_spill] sm:$0xff] }
 0x463   :  { %v3660_v60 = vmin.f32 %v3596_v14, 6.0  ;;  %v4330_v17 = vmul.f32 1.442695, %v3951_v40  ;;  %v4332_v51 = vmul.f32 1.442695, %v3953_v9 }
 0x464   :  { %v3658_v54 = vmin.f32 %v3594_v52, 6.0  ;;  %v4410_v18 = vadd.f32 %v4378_v26, %v4247_v58  ;;  %4910 = vpow2.f32 %v4328_v11  ;;  %v4334_v32 = vmul.f32 1.442695, %v3956_v21  ;;  %v10538_v26 = vld [vmem:[#allocation27_spill] sm:$0xff] }
 0x465   :  { %v4907_v50 = vpop.eup %4906  ;;  %4912 = vpow2.f32 %v4330_v17 }
 0x466   :  { %v3692_v6 = vpack.c.bf16 %v3660_v60, %v3658_v54  ;;  %4442 = vst [vmem:[#allocation17 + $0x40] sm:$0xff] %v4410_v18  ;;  %v4248_v12 = vpop.f32.mrf.mxu0  ;;  %v4379_v35 = vmul.f32 %v4907_v50, %v10533_v36  ;;  %v3868_v3 = vpop.f32.mrf.mxu1  ;;  %4914 = vpow2.f32 %v4332_v51 }
 0x467   :  { %4916 = vpow2.f32 %v4334_v32 }
 0x468   :  { %v3957_v31 = vpop.f32.mrf.mxu2  ;;  %v4909_v56 = vpop.eup %4908 }
 0x469   :  { %3905 = vmatmul.bf16.gmra.mxu1 %v3692_v6  ;;  %v4159_v55 = vpop.f32.mrf.mxu3  ;;  %v4380_v39 = vmul.f32 %v4909_v56, %v10534_v48  ;;  %v3958_v59 = vadd.f32 %v3957_v31, %v3868_v3 }
 0x46a   :  { %4211 = vmatmul.bf16.gmra.mxu3 %v3692_v6  ;;  %v4249_v43 = vadd.f32 %v4248_v12, %v4159_v55  ;;  %v4911_v25 = vpop.eup %4910 }
 0x46b   :  { %v4381_v41 = vmul.f32 %v4911_v25, %v10535_v30  ;;  %v4913_v19 = vpop.eup %4912  ;;  %v4336_v52 = vmul.f32 1.442695, %v3958_v59 }
 0x46c   :  { %v4411_v2 = vadd.f32 %v4379_v35, %v4249_v43  ;;  %v4382_v34 = vmul.f32 %v4913_v19, %v10536_v23  ;;  %v4915_v28 = vpop.eup %4914  ;;  %v10539_v43 = vld [vmem:[#allocation28_spill] sm:$0xff]  ;;  %v10542_v23 = vld [vmem:[#allocation31_spill] sm:$0xff] }
 0x46d   :  { %v4383_v53 = vmul.f32 %v4915_v28, %v10537_v16  ;;  %v4917_v60 = vpop.eup %4916  ;;  %4918 = vpow2.f32 %v4336_v52 }
 0x46e   :  { %4443 = vst [vmem:[#allocation17 + $0x48] sm:$0xff] %v4411_v2  ;;  %v4251_v42 = vpop.f32.mrf.mxu0  ;;  %v3871_v7 = vpop.f32.mrf.mxu1  ;;  %v4384_v44 = vmul.f32 %v4917_v60, %v10538_v26 }
 0x470   :  { %v3960_v46 = vpop.f32.mrf.mxu2 }
 0x471   :  { %v4162_v45 = vpop.f32.mrf.mxu3  ;;  %v3961_v54 = vadd.f32 %v3960_v46, %v3871_v7 }
 0x472   :  { %v4252_v57 = vadd.f32 %v4251_v42, %v4162_v45 }
 0x473   :  { %v4919_v6 = vpop.eup %4918  ;;  %v4338_v12 = vmul.f32 1.442695, %v3961_v54 }
 0x474   :  { %v4412_v37 = vadd.f32 %v4380_v39, %v4252_v57  ;;  %v4385_v36 = vmul.f32 %v4919_v6, %v10539_v43  ;;  %v10540_v57 = vld [vmem:[#allocation29_spill] sm:$0xff] }
 0x475   :  { %4920 = vpow2.f32 %v4338_v12 }
 0x476   :  { %4444 = vst [vmem:[#allocation17 + $0x50] sm:$0xff] %v4412_v37  ;;  %v4253_v13 = vpop.f32.mrf.mxu0  ;;  %v3873_v5 = vpop.f32.mrf.mxu1 }
 0x478   :  { %v3962_v47 = vpop.f32.mrf.mxu2 }
 0x479   :  { %v4164_v33 = vpop.f32.mrf.mxu3  ;;  %v3963_v35 = vadd.f32 %v3962_v47, %v3873_v5 }
 0x47a   :  { %v4254_v27 = vadd.f32 %v4253_v13, %v4164_v33 }
 0x47b   :  { %v4340_v3 = vmul.f32 1.442695, %v3963_v35  ;;  %v4921_v42 = vpop.eup %4920 }
 0x47c   :  { %v4413_v8 = vadd.f32 %v4381_v41, %v4254_v27  ;;  %v4386_v48 = vmul.f32 %v4921_v42, %v10540_v57  ;;  %v10541_v27 = vld [vmem:[#allocation30_spill] sm:$0xff] }
 0x47d   :  { %4922 = vpow2.f32 %v4340_v3 }
 0x47e   :  { %4445 = vst [vmem:[#allocation17 + $0x58] sm:$0xff] %v4413_v8  ;;  %v4256_v62 = vpop.f32.mrf.mxu0  ;;  %v3876_v29 = vpop.f32.mrf.mxu1 }
 0x480   :  { %v3965_v22 = vpop.f32.mrf.mxu2 }
 0x481   :  { %v4167_v20 = vpop.f32.mrf.mxu3  ;;  %v3966_v17 = vadd.f32 %v3965_v22, %v3876_v29  ;;  %v10543_v22 = vld [vmem:[#allocation32_spill] sm:$0xff] }
 0x482   :  { %v4257_v63 = vadd.f32 %v4256_v62, %v4167_v20 }
 0x483   :  { %v4923_v46 = vpop.eup %4922  ;;  %v4342_v9 = vmul.f32 1.442695, %v3966_v17 }
 0x484   :  { %v4414_v24 = vadd.f32 %v4382_v34, %v4257_v63  ;;  %v4387_v30 = vmul.f32 %v4923_v46, %v10541_v27 }
 0x485   :  { %4924 = vpow2.f32 %v4342_v9 }
 0x486   :  { %4446 = vst [vmem:[#allocation17 + $0x60] sm:$0xff] %v4414_v24  ;;  %v4258_v0 = vpop.f32.mrf.mxu0  ;;  %v3878_v15 = vpop.f32.mrf.mxu1 }
 0x488   :  { %v3967_v18 = vpop.f32.mrf.mxu2 }
 0x489   :  { %v4169_v61 = vpop.f32.mrf.mxu3  ;;  %v3968_v51 = vadd.f32 %v3967_v18, %v3878_v15 }
 0x48a   :  { %v4259_v14 = vadd.f32 %v4258_v0, %v4169_v61 }
 0x48b   :  { %v4344_v21 = vmul.f32 1.442695, %v3968_v51  ;;  %v4925_v47 = vpop.eup %4924 }
 0x48c   :  { %v4415_v38 = vadd.f32 %v4383_v53, %v4259_v14  ;;  %v4388_v34 = vmul.f32 %v4925_v47, %v10542_v23  ;;  %v10548_v23 = vld [vmem:[#allocation37_spill] sm:$0xff] }
 0x48d   :  { %4926 = vpow2.f32 %v4344_v21 }
 0x48e   :  { %4447 = vst [vmem:[#allocation17 + $0x68] sm:$0xff] %v4415_v38  ;;  %v4261_v1 = vpop.f32.mrf.mxu0  ;;  %v3881_v56 = vpop.f32.mrf.mxu1 }
 0x490   :  { %v3970_v11 = vpop.f32.mrf.mxu2 }
 0x491   :  { %v4172_v58 = vpop.f32.mrf.mxu3  ;;  %v3971_v20 = vadd.f32 %v3970_v11, %v3881_v56 }
 0x492   :  { %v4262_v10 = vadd.f32 %v4261_v1, %v4172_v58 }
 0x493   :  { %v4346_v28 = vmul.f32 1.442695, %v3971_v20  ;;  %v4927_v61 = vpop.eup %4926 }
 0x494   :  { %v4416_v4 = vadd.f32 %v4384_v44, %v4262_v10  ;;  %v4389_v29 = vmul.f32 %v4927_v61, %v10543_v22  ;;  %v10549_v22 = vld [vmem:[#allocation38_spill] sm:$0xff] }
 0x495   :  { %4928 = vpow2.f32 %v4346_v28 }
 0x496   :  { %4448 = vst [vmem:[#allocation17 + $0x70] sm:$0xff] %v4416_v4  ;;  %v4263_v50 = vpop.f32.mrf.mxu0  ;;  %v3883_v13 = vpop.f32.mrf.mxu1  ;;  %v10544_v4 = vld [vmem:[#allocation33_spill] sm:$0xff] }
 0x498   :  { %v3972_v25 = vpop.f32.mrf.mxu2 }
 0x499   :  { %v4174_v49 = vpop.f32.mrf.mxu3  ;;  %v3973_v14 = vadd.f32 %v3972_v25, %v3883_v13 }
 0x49a   :  { %v4264_v55 = vadd.f32 %v4263_v50, %v4174_v49 }
 0x49b   :  { %v4348_v60 = vmul.f32 1.442695, %v3973_v14  ;;  %v4929_v1 = vpop.eup %4928 }
 0x49c   :  { %v4417_v2 = vadd.f32 %v4385_v36, %v4264_v55  ;;  %v4390_v18 = vmul.f32 %v4929_v1, %v10544_v4  ;;  %v10550_v4 = vld [vmem:[#allocation39_spill] sm:$0xff] }
 0x49d   :  { %4930 = vpow2.f32 %v4348_v60 }
 0x49e   :  { %4449 = vst [vmem:[#allocation17 + $0x78] sm:$0xff] %v4417_v2  ;;  %v4266_v31 = vpop.f32.mrf.mxu0  ;;  %v3886_v62 = vpop.f32.mrf.mxu1  ;;  %v10545_v2 = vld [vmem:[#allocation34_spill] sm:$0xff] }
 0x4a0   :  { %v3975_v19 = vpop.f32.mrf.mxu2 }
 0x4a1   :  { %v4177_v40 = vpop.f32.mrf.mxu3  ;;  %v3976_v26 = vadd.f32 %v3975_v19, %v3886_v62 }
 0x4a2   :  { %v4267_v45 = vadd.f32 %v4266_v31, %v4177_v40 }
 0x4a3   :  { %v4350_v50 = vmul.f32 1.442695, %v3976_v26  ;;  %v4931_v12 = vpop.eup %4930 }
 0x4a4   :  { %v4418_v39 = vadd.f32 %v4386_v48, %v4267_v45  ;;  %v4391_v11 = vmul.f32 %v4931_v12, %v10545_v2  ;;  %v10546_v48 = vld [vmem:[#allocation35_spill] sm:$0xff] }
 0x4a5   :  { %4932 = vpow2.f32 %v4350_v50 }
 0x4a6   :  { %v4268_v37 = vpop.f32.mrf.mxu0  ;;  %4450 = vst [vmem:[#allocation17 + $0x80] sm:$0xff] %v4418_v39  ;;  %v3888_v59 = vpop.f32.mrf.mxu1 }
 0x4a8   :  { %v3977_v0 = vpop.f32.mrf.mxu2 }
 0x4a9   :  { %v4179_v7 = vpop.f32.mrf.mxu3  ;;  %v3978_v49 = vadd.f32 %v3977_v0, %v3888_v59 }
 0x4aa   :  { %v4269_v33 = vadd.f32 %v4268_v37, %v4179_v7 }
 0x4ab   :  { %v4352_v56 = vmul.f32 1.442695, %v3978_v49  ;;  %v4933_v42 = vpop.eup %4932 }
 0x4ac   :  { %v4419_v41 = vadd.f32 %v4387_v30, %v4269_v33  ;;  %v4392_v39 = vmul.f32 %v4933_v42, %v10546_v48  ;;  %v10547_v30 = vld [vmem:[#allocation36_spill] sm:$0xff]  ;;  %v10552_v48 = vld [vmem:[#allocation41_spill] sm:$0xff] }
 0x4ad   :  { %4934 = vpow2.f32 %v4352_v56 }
 0x4ae   :  { %v4271_v8 = vpop.f32.mrf.mxu0  ;;  %4451 = vst [vmem:[#allocation17 + $0x88] sm:$0xff] %v4419_v41  ;;  %v3891_v10 = vpop.f32.mrf.mxu1 }
 0x4b0   :  { %v3980_v58 = vpop.f32.mrf.mxu2 }
 0x4b1   :  { %v4182_v5 = vpop.f32.mrf.mxu3  ;;  %v3981_v40 = vadd.f32 %v3980_v58, %v3891_v10 }
 0x4b2   :  { %v4272_v63 = vadd.f32 %v4271_v8, %v4182_v5 }
 0x4b3   :  { %v4354_v13 = vmul.f32 1.442695, %v3981_v40  ;;  %v4935_v7 = vpop.eup %4934 }
 0x4b4   :  { %v4420_v32 = vadd.f32 %v4388_v34, %v4272_v63  ;;  %v4393_v41 = vmul.f32 %v4935_v7, %v10547_v30  ;;  %v10553_v30 = vld [vmem:[#allocation42_spill] sm:$0xff] }
 0x4b5   :  { %4936 = vpow2.f32 %v4354_v13 }
 0x4b6   :  { %v4273_v24 = vpop.f32.mrf.mxu0  ;;  %4452 = vst [vmem:[#allocation17 + $0x90] sm:$0xff] %v4420_v32  ;;  %v3893_v36 = vpop.f32.mrf.mxu1 }
 0x4b8   :  { %v3982_v55 = vpop.f32.mrf.mxu2 }
 0x4b9   :  { %v4184_v16 = vpop.f32.mrf.mxu3  ;;  %v3983_v9 = vadd.f32 %v3982_v55, %v3893_v36  ;;  %v10551_v36 = vld [vmem:[#allocation69_spill] sm:$0xff] }
 0x4ba   :  { %v4274_v53 = vadd.f32 %v4273_v24, %v4184_v16 }
 0x4bb   :  { %v4356_v19 = vmul.f32 1.442695, %v3983_v9  ;;  %v4937_v47 = vpop.eup %4936 }
 0x4bc   :  { %v4421_v52 = vadd.f32 %v4389_v29, %v4274_v53  ;;  %v4394_v34 = vmul.f32 %v4937_v47, %v10548_v23 }
 0x4bd   :  { %4938 = vpow2.f32 %v4356_v19 }
 0x4be   :  { %v4276_v38 = vpop.f32.mrf.mxu0  ;;  %4453 = vst [vmem:[#allocation17 + $0x98] sm:$0xff] %v4421_v52 }
 0x4bf   :  { %v3896_v25 = vpop.f32.mrf.mxu1 }
 0x4c0   :  { %v3985_v17 = vpop.f32.mrf.mxu2 }
 0x4c1   :  { %v4187_v44 = vpop.f32.mrf.mxu3  ;;  %v3986_v20 = vadd.f32 %v3985_v17, %v3896_v25 }
 0x4c2   :  { %v4277_v54 = vadd.f32 %v4276_v38, %v4187_v44 }
 0x4c3   :  { %v4358_v28 = vmul.f32 1.442695, %v3986_v20  ;;  %v4939_v0 = vpop.eup %4938  ;;  %v10554_v20 = vld [vmem:[#allocation79_spill] sm:$0xff] }
 0x4c4   :  { %v4422_v6 = vadd.f32 %v4390_v18, %v4277_v54  ;;  %v4395_v29 = vmul.f32 %v4939_v0, %v10549_v22 }
 0x4c5   :  { %4940 = vpow2.f32 %v4358_v28  ;;  %v10555_v28 = vld [vmem:[#allocation76_spill] sm:$0xff] }
 0x4c6   :  { %v4278_v15 = vpop.f32.mrf.mxu0  ;;  %4454 = vst [vmem:[#allocation17 + $0xa0] sm:$0xff] %v4422_v6 }
 0x4c7   :  { %v3898_v21 = vpop.f32.mrf.mxu1 }
 0x4c8   :  { %v3987_v62 = vpop.f32.mrf.mxu2 }
 0x4c9   :  { %v4189_v43 = vpop.f32.mrf.mxu3  ;;  %v3988_v14 = vadd.f32 %v3987_v62, %v3898_v21 }
 0x4ca   :  { %v4279_v35 = vadd.f32 %v4278_v15, %v4189_v43 }
 0x4cb   :  { %v4360_v60 = vmul.f32 1.442695, %v3988_v14  ;;  %v4941_v1 = vpop.eup %4940 }
 0x4cc   :  { %v4423_v3 = vadd.f32 %v4391_v11, %v4279_v35  ;;  %v4396_v18 = vmul.f32 %v4941_v1, %v10550_v4 }
 0x4cd   :  { %4942 = vpow2.f32 %v4360_v60 }
 0x4ce   :  { %v4281_v31 = vpop.f32.mrf.mxu0  ;;  %4455 = vst [vmem:[#allocation17 + $0xa8] sm:$0xff] %v4423_v3 }
 0x4d0   :  { %v3990_v59 = vpop.f32.mrf.mxu2 }
 0x4d1   :  { %v4192_v45 = vpop.f32.mrf.mxu3 }
 0x4d2   :  { %v4282_v57 = vadd.f32 %v4281_v31, %v4192_v45 }
 0x4d3   :  { %v4943_v12 = vpop.eup %4942 }
 0x4d4   :  { %v4424_v46 = vadd.f32 %v4392_v39, %v4282_v57  ;;  %v4397_v35 = vmul.f32 %v4943_v12, %v10551_v36 }
 0x4d6   :  { %v4283_v37 = vpop.f32.mrf.mxu0  ;;  %4456 = vst [vmem:[#allocation17 + $0xb0] sm:$0xff] %v4424_v46  ;;  %v3901_v61 = vpop.f32.mrf.mxu1 }
 0x4d7   :  { %v3991_v58 = vadd.f32 %v3990_v59, %v3901_v61 }
 0x4d8   :  { %v3992_v10 = vpop.f32.mrf.mxu2 }
 0x4d9   :  { %v4194_v33 = vpop.f32.mrf.mxu3  ;;  %v4362_v50 = vmul.f32 1.442695, %v3991_v58 }
 0x4da   :  { %v4284_v27 = vadd.f32 %v4283_v37, %v4194_v33 }
 0x4db   :  { %4944 = vpow2.f32 %v4362_v50 }
 0x4dc   :  { %v4425_v51 = vadd.f32 %v4393_v41, %v4284_v27 }
 0x4de   :  { %v4286_v8 = vpop.f32.mrf.mxu0  ;;  %4457 = vst [vmem:[#allocation17 + $0xb8] sm:$0xff] %v4425_v51  ;;  %v3903_v44 = vpop.f32.mrf.mxu1 }
 0x4df   :  { %v3993_v49 = vadd.f32 %v3992_v10, %v3903_v44 }
 0x4e1   :  { %v4197_v5 = vpop.f32.mrf.mxu3  ;;  %v4364_v56 = vmul.f32 1.442695, %v3993_v49  ;;  %v4945_v42 = vpop.eup %4944 }
 0x4e2   :  { %v4287_v63 = vadd.f32 %v4286_v8, %v4197_v5  ;;  %v4398_v39 = vmul.f32 %v4945_v42, %v10552_v48 }
 0x4e3   :  { %4946 = vpow2.f32 %v4364_v56 }
 0x4e4   :  { %v4426_v32 = vadd.f32 %v4394_v34, %v4287_v63  ;;  %v3995_v31 = vpop.f32.mrf.mxu2 }
 0x4e6   :  { %v4288_v24 = vpop.f32.mrf.mxu0  ;;  %4458 = vst [vmem:[#allocation17 + $0xc0] sm:$0xff] %v4426_v32  ;;  %v3906_v11 = vpop.f32.mrf.mxu1 }
 0x4e7   :  { %v3996_v40 = vadd.f32 %v3995_v31, %v3906_v11 }
 0x4e9   :  { %v4199_v16 = vpop.f32.mrf.mxu3  ;;  %v4366_v17 = vmul.f32 1.442695, %v3996_v40  ;;  %v4947_v7 = vpop.eup %4946 }
 0x4ea   :  { %v4289_v53 = vadd.f32 %v4288_v24, %v4199_v16  ;;  %v4399_v41 = vmul.f32 %v4947_v7, %v10553_v30 }
 0x4eb   :  { %4948 = vpow2.f32 %v4366_v17 }
 0x4ec   :  { %v4427_v52 = vadd.f32 %v4395_v29, %v4289_v53  ;;  %v3997_v13 = vpop.f32.mrf.mxu2 }
 0x4ee   :  { %v4291_v38 = vpop.f32.mrf.mxu0  ;;  %4459 = vst [vmem:[#allocation17 + $0xc8] sm:$0xff] %v4427_v52  ;;  %v3908_v46 = vpop.f32.mrf.mxu1 }
 0x4ef   :  { %v3998_v9 = vadd.f32 %v3997_v13, %v3908_v46 }
 0x4f1   :  { %v4202_v26 = vpop.f32.mrf.mxu3  ;;  %v4368_v51 = vmul.f32 1.442695, %v3998_v9  ;;  %v4949_v19 = vpop.eup %4948 }
 0x4f2   :  { %v4292_v54 = vadd.f32 %v4291_v38, %v4202_v26  ;;  %v4400_v5 = vmul.f32 %v4949_v19, %v10554_v20 }
 0x4f3   :  { %4950 = vpow2.f32 %v4368_v51 }
 0x4f4   :  { %v4428_v6 = vadd.f32 %v4396_v18, %v4292_v54 }
 0x4f6   :  { %v4293_v15 = vpop.f32.mrf.mxu0  ;;  %4460 = vst [vmem:[#allocation17 + $0xd0] sm:$0xff] %v4428_v6 }
 0x4f9   :  { %v4204_v55 = vpop.f32.mrf.mxu3  ;;  %v4951_v23 = vpop.eup %4950 }
 0x4fa   :  { %v4294_v43 = vadd.f32 %v4293_v15, %v4204_v55  ;;  %v4401_v0 = vmul.f32 %v4951_v23, %v10555_v28 }
 0x4fc   :  { %v4429_v3 = vadd.f32 %v4397_v35, %v4294_v43 }
 0x4fe   :  { %v4296_v2 = vpop.f32.mrf.mxu0  ;;  %4461 = vst [vmem:[#allocation17 + $0xd8] sm:$0xff] %v4429_v3 }
 0x501   :  { %v4207_v45 = vpop.f32.mrf.mxu3 }
 0x502   :  { %v4297_v57 = vadd.f32 %v4296_v2, %v4207_v45 }
 0x504   :  { %v4430_v37 = vadd.f32 %v4398_v39, %v4297_v57 }
 0x506   :  { %v4298_v25 = vpop.f32.mrf.mxu0  ;;  %4462 = vst [vmem:[#allocation17 + $0xe0] sm:$0xff] %v4430_v37 }
 0x509   :  { %v4209_v33 = vpop.f32.mrf.mxu3 }
 0x50a   :  { %v4299_v27 = vadd.f32 %v4298_v25, %v4209_v33 }
 0x50c   :  { %v4431_v8 = vadd.f32 %v4399_v41, %v4299_v27 }
 0x50e   :  { %4463 = vst [vmem:[#allocation17 + $0xe8] sm:$0xff] %v4431_v8  ;;  %v4301_v62 = vpop.f32.mrf.mxu0 }
 0x511   :  { %v4212_v21 = vpop.f32.mrf.mxu3 }
 0x512   :  { %v4302_v47 = vadd.f32 %v4301_v62, %v4212_v21 }
 0x514   :  { %v4432_v63 = vadd.f32 %v4400_v5, %v4302_v47 }
 0x516   :  { %4464 = vst [vmem:[#allocation17 + $0xf0] sm:$0xff] %v4432_v63  ;;  %v4303_v34 = vpop.f32.mrf.mxu0 }
 0x519   :  { %v4214_v24 = vpop.f32.mrf.mxu3 }
 0x51a   :  { %v4304_v32 = vadd.f32 %v4303_v34, %v4214_v24 }
 0x51c   :  { %v4433_v59 = vadd.f32 %v4401_v0, %v4304_v32 }
 0x51e   :  { %4465 = vst [vmem:[#allocation17 + $0xf8] sm:$0xff] %v4433_v59 }
 0x51f   :  { %4478 = dma.vmem_to_hbm [thread:$0]  %s4471_s22, 4096, %s4473_s8, [#allocation4], %s5209_s11, %s5209_s11, %s5210_s12  }
 0x520   :  { %5202 = dma.done.wait [#allocation4], 4096  }
 0x521   :  { %5203 = vsyncadd [#allocation4], 4294963200 }
 0x522   :  { %4483 = vsyncpa [#allocation3], 1 }
 0x523   :  { %4484 = vsyncpa [#allocation6], 1 }
 0x524   :  { %4485 = vsyncpa [#allocation9], 1 }
 0x525   :  { %4486 = vsyncpa [#allocation12], 1 }
 0x526   :  { %4487 = vsyncpa [#allocation15], 1 }
 0x527   :  { %4488 = vsyncpa [#allocation4], 1 }

</bundles_post_ra>
